<compile_context>
chip_gen: v7x
topology: tpu7x:2x2x1
jax: 0.10.0
libtpu: 0.0.40
codegen_flags: <defaults>
</compile_context>

<pallas_src>
import math

import jax
import jax.numpy as jnp
import numpy as np
from jax.experimental import pallas as pl
from jax.experimental.pallas import tpu as pltpu


def bilstm_kernel(x_ref, len_ref,
                  wi0_ref, b0_ref, whf0_ref, whb0_ref,
                  wi1_ref, b1_ref, whf1_ref, whb1_ref,
                  out_ref,
                  gx_ref, outs0_ref):
    """2-layer bidirectional LSTM with masked (packed-sequence) state updates.

    x_ref     : (L*Np, D)     bf16  time-major, batch padded to Np
    len_ref   : (Np, 1)       int32
    wi0_ref   : (D, 8*Hp)     bf16  [fwd gates | bwd gates], gate order (i,f,g,o)
    b0_ref    : (1, 8*Hp)     f32
    wh*_ref   : (Hp, 4*Hp)    bf16
    wi1_ref   : (2*Hp, 8*Hp)  bf16  rows = [fwd half | bwd half] of layer-0 output
    b1_ref    : (1, 8*Hp)     f32
    out_ref   : (Np, 2*Hp)    f32   [h_fwd(last valid t) | h_bwd(t=0)] of layer 1
    gx_ref    : (L*Np, 8*Hp)  f32   scratch: hoisted x-gate pre-activations (reused)
    outs0_ref : (L*Np, 2*Hp)  f32   scratch: layer-0 outputs, both directions
    """
    Np = len_ref.shape[0]
    Hp = whf0_ref.shape[0]
    L = x_ref.shape[0] // Np
    G = 4 * Hp

    f32 = jnp.float32
    bf16 = jnp.bfloat16

    # Hoisted once: lengths broadcast used by all per-step validity masks.
    len_b = jnp.broadcast_to(len_ref[...], (Np, Hp))        # (Np, Hp) int32

    def lstm_cell(gates, c):
        # Each gate slice is a lane-tile-aligned whole-vreg view (Hp % 128 == 0).
        i_g = jax.nn.sigmoid(gates[:, 0 * Hp:1 * Hp])
        f_g = jax.nn.sigmoid(gates[:, 1 * Hp:2 * Hp])
        g_g = jnp.tanh(gates[:, 2 * Hp:3 * Hp])
        o_g = jax.nn.sigmoid(gates[:, 3 * Hp:4 * Hp])
        c_new = f_g * c + i_g * g_g
        h_new = o_g * jnp.tanh(c_new)
        return h_new, c_new

    def run_layer(wh_f_ref, wh_b_ref, store_outs):
        # Fused fwd+bwd recurrence, fully statically unrolled (L is small).
        h_f = jnp.zeros((Np, Hp), f32)
        c_f = jnp.zeros((Np, Hp), f32)
        h_b = jnp.zeros((Np, Hp), f32)
        c_b = jnp.zeros((Np, Hp), f32)
        for s in range(L):
            tf = s
            tb = L - 1 - s
            # Only the recurrent h @ Wh matmuls remain on the serial chain.
            gates_f = (gx_ref[tf * Np:(tf + 1) * Np, 0:G]
                       + jnp.dot(h_f.astype(bf16), wh_f_ref[...],
                                 preferred_element_type=f32))
            gates_b = (gx_ref[tb * Np:(tb + 1) * Np, G:2 * G]
                       + jnp.dot(h_b.astype(bf16), wh_b_ref[...],
                                 preferred_element_type=f32))
            hf_new, cf_new = lstm_cell(gates_f, c_f)
            hb_new, cb_new = lstm_cell(gates_b, c_b)
            # pack_padded_sequence semantics: update only while t < length.
            vf = tf < len_b
            vb = tb < len_b
            h_f = jnp.where(vf, hf_new, h_f)
            c_f = jnp.where(vf, cf_new, c_f)
            h_b = jnp.where(vb, hb_new, h_b)
            c_b = jnp.where(vb, cb_new, c_b)
            if store_outs:
                # Lane-aligned stores into the shared layer-0 output slab.
                outs0_ref[tf * Np:(tf + 1) * Np, 0:Hp] = h_f
                outs0_ref[tb * Np:(tb + 1) * Np, Hp:2 * Hp] = h_b
        return h_f, h_b

    # ---- layer 0: hoisted input projection (both directions, bias folded) ----
    gx_ref[...] = (jnp.dot(x_ref[...], wi0_ref[...], preferred_element_type=f32)
                   + b0_ref[...])
    run_layer(whf0_ref, whb0_ref, store_outs=True)

    # ---- layer 1: hoisted input projection from the layer-0 output slab ----
    gx_ref[...] = (jnp.dot(outs0_ref[...].astype(bf16), wi1_ref[...],
                           preferred_element_type=f32)
                   + b1_ref[...])
    h_f1, h_b1 = run_layer(whf1_ref, whb1_ref, store_outs=False)

    # Masked updates guarantee:
    #   h_f1 == forward output at t = lengths-1, h_b1 == backward output at t = 0.
    # Two lane-aligned whole-vreg stores (no in-kernel concatenate).
    out_ref[:, 0:Hp] = h_f1
    out_ref[:, Hp:2 * Hp] = h_b1


# ----------------------------- wrapper ----------------------------------------------


def _round_up(v, m):
    return ((v + m - 1) // m) * m


def _pad_gate_cols(w, H, Hp):
    """(..., 4*H) -> (..., 4*Hp): each gate block (i,f,g,o) re-based at k*Hp."""
    lead = w.shape[:-1]
    w = w.reshape(lead + (4, H))
    w = jnp.pad(w, [(0, 0)] * len(lead) + [(0, 0), (0, Hp - H)])
    return w.reshape(lead + (4 * Hp,))


def _pad_row_blocks(w, nblk, H, Hp):
    """(nblk*H, C) -> (nblk*Hp, C): zero-pad each row block of size H to Hp."""
    C = w.shape[-1]
    w = w.reshape(nblk, H, C)
    w = jnp.pad(w, [(0, 0), (0, Hp - H), (0, 0)])
    return w.reshape(nblk * Hp, C)


def bilstm_last_outputs(x, lengths, params):
    """x: (N, L, D) f32 batch_first (like PyTorch), lengths: (N,).
    Returns (N, 2*H) == BasicLSTM.forward(x, lengths) at inference."""
    N, L, D = x.shape
    H = params["wh_f0"].shape[0]
    Hp = _round_up(H, 128)     # lane-tile aligned gate width
    Np = _round_up(N, 8)       # sublane aligned batch
    bf16 = jnp.bfloat16

    def gc(name):
        return _pad_gate_cols(params[name].astype(jnp.float32), H, Hp)

    # Layer 0: both directions fused along the gate axis, bf16 MXU operands.
    wi0 = jnp.concatenate([gc("wi_f0"), gc("wi_b0")], axis=1).astype(bf16)    # (D, 8Hp)
    b0 = jnp.concatenate([gc("b_f0"), gc("b_b0")], axis=1)                    # (1, 8Hp) f32
    whf0 = _pad_row_blocks(gc("wh_f0"), 1, H, Hp).astype(bf16)                # (Hp, 4Hp)
    whb0 = _pad_row_blocks(gc("wh_b0"), 1, H, Hp).astype(bf16)

    # Layer 1: input rows laid out as [fwd half | bwd half] of the layer-0 slab.
    wi1 = jnp.concatenate([_pad_row_blocks(gc("wi_f1"), 2, H, Hp),
                           _pad_row_blocks(gc("wi_b1"), 2, H, Hp)],
                          axis=1).astype(bf16)                                # (2Hp, 8Hp)
    b1 = jnp.concatenate([gc("b_f1"), gc("b_b1")], axis=1)                    # (1, 8Hp) f32
    whf1 = _pad_row_blocks(gc("wh_f1"), 1, H, Hp).astype(bf16)
    whb1 = _pad_row_blocks(gc("wh_b1"), 1, H, Hp).astype(bf16)

    # Inputs: time-major, batch padded to Np, flattened to (L*Np, D) for the hoisted
    # projection matmul.
    x_tm = jnp.transpose(x, (1, 0, 2)).astype(jnp.float32)       # (L, N, D)
    x_tm = jnp.pad(x_tm, [(0, 0), (0, Np - N), (0, 0)])
    x_flat = x_tm.reshape(L * Np, D).astype(bf16)
    len_p = jnp.pad(lengths.astype(jnp.int32), (0, Np - N)).reshape(Np, 1)

    vmem = pl.BlockSpec(memory_space=pltpu.MemorySpace.VMEM)
    args = (x_flat, len_p, wi0, b0, whf0, whb0, wi1, b1, whf1, whb1)
    out_full = pl.pallas_call(
        bilstm_kernel,
        out_shape=jax.ShapeDtypeStruct((Np, 2 * Hp), jnp.float32),
        in_specs=[vmem] * len(args),
        out_specs=vmem,
        scratch_shapes=[
            pltpu.VMEM((L * Np, 8 * Hp), jnp.float32),   # hoisted gate slab (reused per layer)
            pltpu.VMEM((L * Np, 2 * Hp), jnp.float32),   # layer-0 outputs [fwd | bwd]
        ],
        compiler_params=pltpu.CompilerParams(vmem_limit_bytes=64 << 20),
    )(*args)

    # Strip the H / batch padding; result layout is [forward | backward].
    return jnp.concatenate([out_full[:N, 0:H], out_full[:N, Hp:Hp + H]], axis=-1)


# ----------------------------- params & reference ------------------------------------


def init_params(key, input_dim, rnn_size):
    """Deterministic synthetic init matching nn.LSTM's U(-1/sqrt(H), 1/sqrt(H)).
    (b_ih + b_hh combined into a single bias per direction/layer.)"""
    H = rnn_size
    bound = 1.0 / math.sqrt(H)
    shapes = {
        "wi_f0": (input_dim, 4 * H), "wh_f0": (H, 4 * H), "b_f0": (1, 4 * H),
        "wi_b0": (input_dim, 4 * H), "wh_b0": (H, 4 * H), "b_b0": (1, 4 * H),
        "wi_f1": (2 * H, 4 * H),     "wh_f1": (H, 4 * H), "b_f1": (1, 4 * H),
        "wi_b1": (2 * H, 4 * H),     "wh_b1": (H, 4 * H), "b_b1": (1, 4 * H),
    }
    keys = jax.random.split(key, len(shapes))
    return {name: jax.random.uniform(k, shp, jnp.float32, -bound, bound)
            for k, (name, shp) in zip(keys, shapes.items())}


def reference(x, lengths, params):
    """Pure-JAX f32 reference of the same masked bidirectional 2-layer LSTM."""
    N, L, D = x.shape
    H = params["wh_f0"].shape[0]
    lengths = lengths.astype(jnp.int32)

    def cell(x_t, h, c, wi, wh, b):
        gates = x_t @ wi + h @ wh + b
        i, f, g, o = jnp.split(gates, 4, axis=-1)
        c_new = jax.nn.sigmoid(f) * c + jax.nn.sigmoid(i) * jnp.tanh(g)
        h_new = jax.nn.sigmoid(o) * jnp.tanh(c_new)
        return h_new, c_new

    def run_dir(inputs, wi, wh, b, reverse):
        h = jnp.zeros((N, H), jnp.float32)
        c = jnp.zeros((N, H), jnp.float32)
        outs = [None] * L
        order = range(L - 1, -1, -1) if reverse else range(L)
        for t in order:
            h_new, c_new = cell(inputs[t], h, c, wi, wh, b)
            valid = (t < lengths)[:, None]
            h = jnp.where(valid, h_new, h)
            c = jnp.where(valid, c_new, c)
            outs[t] = h
        return jnp.stack(outs, 0), h

    x_tm = jnp.transpose(x, (1, 0, 2))
    of0, _ = run_dir(x_tm, params["wi_f0"], params["wh_f0"], params["b_f0"], False)
    ob0, _ = run_dir(x_tm, params["wi_b0"], params["wh_b0"], params["b_b0"], True)
    l1_in = jnp.concatenate([of0, ob0], axis=-1)
    _, hf1 = run_dir(l1_in, params["wi_f1"], params["wh_f1"], params["b_f1"], False)
    _, hb1 = run_dir(l1_in, params["wi_b1"], params["wh_b1"], params["b_b1"], True)
    return jnp.concatenate([hf1, hb1], axis=-1)


if __name__ == "__main__":
    N, L, D, H = 4, 8, 64, 64   # batch, seq, input_dim, rnn_size (spec: rnn_size=64)

    key = jax.random.PRNGKey(0)
    k_x, k_p = jax.random.split(key)
    x = jax.random.normal(k_x, (N, L, D), jnp.float32)
    lengths = jnp.array([8, 5, 3, 6], dtype=jnp.int32)
    params = init_params(k_p, D, H)

    # Snap weights/inputs to bf16-representable f32 values so the bf16-MXU kernel and
    # the f32 reference see identical operands; remaining deviation comes only from
    # rounding of intermediate activations (small).
    snap = lambda a: a.astype(jnp.bfloat16).astype(jnp.float32)
    x = snap(x)
    params = jax.tree_util.tree_map(snap, params)

    out = bilstm_last_outputs(x, lengths, params)
    out = jax.block_until_ready(out)

    ref = reference(x, lengths, params)
    assert out.shape == (N, 2 * H), out.shape
    np.testing.assert_allclose(np.asarray(out), np.asarray(ref), atol=2e-2, rtol=2e-2)

    print("KERNEL_OK")
</pallas_src>

<mosaic_0001>
module attributes {stable_mosaic.version = 11 : i64} {
  func.func @bilstm_kernel(%arg0: memref<64x64xbf16, #tpu.memory_space<vmem>>, %arg1: memref<8x1xi32, #tpu.memory_space<vmem>>, %arg2: memref<64x1024xbf16, #tpu.memory_space<vmem>>, %arg3: memref<1x1024xf32, #tpu.memory_space<vmem>>, %arg4: memref<128x512xbf16, #tpu.memory_space<vmem>>, %arg5: memref<128x512xbf16, #tpu.memory_space<vmem>>, %arg6: memref<256x1024xbf16, #tpu.memory_space<vmem>>, %arg7: memref<1x1024xf32, #tpu.memory_space<vmem>>, %arg8: memref<128x512xbf16, #tpu.memory_space<vmem>>, %arg9: memref<128x512xbf16, #tpu.memory_space<vmem>>, %arg10: memref<8x256xf32, #tpu.memory_space<vmem>>, %arg11: memref<64x1024xf32, #tpu.memory_space<vmem>>, %arg12: memref<64x256xf32, #tpu.memory_space<vmem>>) attributes {dimension_semantics = [], scalar_prefetch = 0 : i64, scratch_operands = 2 : i64, tpu.core_type = #tpu.core_type<tc>} {
    %c0 = arith.constant 0 : index
    %c0_0 = arith.constant 0 : index
    %0 = vector.load %arg1[%c0, %c0_0] : memref<8x1xi32, #tpu.memory_space<vmem>>, vector<8x1xi32>
    %1 = vector.shape_cast %0 : vector<8x1xi32> to vector<8x1xi32>
    %2 = vector.broadcast %1 : vector<8x1xi32> to vector<8x128xi32>
    %c0_1 = arith.constant 0 : index
    %c0_2 = arith.constant 0 : index
    %3 = vector.load %arg0[%c0_1, %c0_2] : memref<64x64xbf16, #tpu.memory_space<vmem>>, vector<64x64xbf16>
    %c0_3 = arith.constant 0 : index
    %c0_4 = arith.constant 0 : index
    %4 = vector.load %arg2[%c0_3, %c0_4] : memref<64x1024xbf16, #tpu.memory_space<vmem>>, vector<64x1024xbf16>
    %cst = arith.constant dense<0.000000e+00> : vector<64x1024xf32>
    %5 = tpu.matmul %3, %4, %cst {dimension_numbers = #tpu.dot_dimension_numbers<[1], [0], [0], [1], [0, 0, 1, 1], [], []>} : vector<64x64xbf16>, vector<64x1024xbf16>, vector<64x1024xf32> -> vector<64x1024xf32>
    %c0_5 = arith.constant 0 : index
    %c0_6 = arith.constant 0 : index
    %6 = vector.load %arg3[%c0_5, %c0_6] : memref<1x1024xf32, #tpu.memory_space<vmem>>, vector<1x1024xf32>
    %7 = vector.broadcast %6 : vector<1x1024xf32> to vector<64x1024xf32>
    %8 = arith.addf %5, %7 : vector<64x1024xf32>
    %c0_7 = arith.constant 0 : index
    %c0_8 = arith.constant 0 : index
    %9 = vector.load %arg11[%c0_7, %c0_8] : memref<64x1024xf32, #tpu.memory_space<vmem>>, vector<64x1024xf32>
    tpu.vector_store %arg11[%c0_7, %c0_8], %8 {strides = array<i32>} : memref<64x1024xf32, #tpu.memory_space<vmem>>, vector<64x1024xf32>,
    %cst_9 = arith.constant 0.000000e+00 : f32
    %10 = vector.broadcast %cst_9 : f32 to vector<8x128xf32>
    %cst_10 = arith.constant 0.000000e+00 : f32
    %11 = vector.broadcast %cst_10 : f32 to vector<8x128xf32>
    %cst_11 = arith.constant 0.000000e+00 : f32
    %12 = vector.broadcast %cst_11 : f32 to vector<8x128xf32>
    %cst_12 = arith.constant 0.000000e+00 : f32
    %13 = vector.broadcast %cst_12 : f32 to vector<8x128xf32>
    %c0_13 = arith.constant 0 : index
    %c0_14 = arith.constant 0 : index
    %14 = vector.load %arg11[%c0_13, %c0_14] : memref<64x1024xf32, #tpu.memory_space<vmem>>, vector<8x512xf32>
    %15 = arith.truncf %10 : vector<8x128xf32> to vector<8x128xbf16>
    %c0_15 = arith.constant 0 : index
    %c0_16 = arith.constant 0 : index
    %16 = vector.load %arg4[%c0_15, %c0_16] : memref<128x512xbf16, #tpu.memory_space<vmem>>, vector<128x512xbf16>
    %cst_17 = arith.constant dense<0.000000e+00> : vector<8x512xf32>
    %17 = tpu.matmul %15, %16, %cst_17 {dimension_numbers = #tpu.dot_dimension_numbers<[1], [0], [0], [1], [0, 0, 1, 1], [], []>} : vector<8x128xbf16>, vector<128x512xbf16>, vector<8x512xf32> -> vector<8x512xf32>
    %18 = arith.addf %14, %17 : vector<8x512xf32>
    %c56 = arith.constant 56 : index
    %c512 = arith.constant 512 : index
    %19 = vector.load %arg11[%c56, %c512] : memref<64x1024xf32, #tpu.memory_space<vmem>>, vector<8x512xf32>
    %20 = arith.truncf %12 : vector<8x128xf32> to vector<8x128xbf16>
    %c0_18 = arith.constant 0 : index
    %c0_19 = arith.constant 0 : index
    %21 = vector.load %arg5[%c0_18, %c0_19] : memref<128x512xbf16, #tpu.memory_space<vmem>>, vector<128x512xbf16>
    %cst_20 = arith.constant dense<0.000000e+00> : vector<8x512xf32>
    %22 = tpu.matmul %20, %21, %cst_20 {dimension_numbers = #tpu.dot_dimension_numbers<[1], [0], [0], [1], [0, 0, 1, 1], [], []>} : vector<8x128xbf16>, vector<128x512xbf16>, vector<8x512xf32> -> vector<8x512xf32>
    %23 = arith.addf %19, %22 : vector<8x512xf32>
    %24 = vector.extract_strided_slice %18 {offsets = [0, 0], sizes = [8, 128], strides = [1, 1]} : vector<8x512xf32> to vector<8x128xf32>
    %25 = arith.negf %24 : vector<8x128xf32>
    %26 = math.exp %25 : vector<8x128xf32>
    %cst_21 = arith.constant 1.000000e+00 : f32
    %27 = vector.broadcast %cst_21 : f32 to vector<8x128xf32>
    %28 = arith.addf %27, %26 : vector<8x128xf32>
    %29 = arith.divf %27, %28 : vector<8x128xf32>
    %30 = vector.extract_strided_slice %18 {offsets = [0, 128], sizes = [8, 128], strides = [1, 1]} : vector<8x512xf32> to vector<8x128xf32>
    %31 = arith.negf %30 : vector<8x128xf32>
    %32 = math.exp %31 : vector<8x128xf32>
    %cst_22 = arith.constant 1.000000e+00 : f32
    %33 = vector.broadcast %cst_22 : f32 to vector<8x128xf32>
    %34 = arith.addf %33, %32 : vector<8x128xf32>
    %35 = arith.divf %33, %34 : vector<8x128xf32>
    %36 = vector.extract_strided_slice %18 {offsets = [0, 256], sizes = [8, 128], strides = [1, 1]} : vector<8x512xf32> to vector<8x128xf32>
    %37 = math.tanh %36 : vector<8x128xf32>
    %38 = vector.extract_strided_slice %18 {offsets = [0, 384], sizes = [8, 128], strides = [1, 1]} : vector<8x512xf32> to vector<8x128xf32>
    %39 = arith.negf %38 : vector<8x128xf32>
    %40 = math.exp %39 : vector<8x128xf32>
    %cst_23 = arith.constant 1.000000e+00 : f32
    %41 = vector.broadcast %cst_23 : f32 to vector<8x128xf32>
    %42 = arith.addf %41, %40 : vector<8x128xf32>
    %43 = arith.divf %41, %42 : vector<8x128xf32>
    %44 = arith.mulf %35, %11 : vector<8x128xf32>
    %45 = arith.mulf %29, %37 : vector<8x128xf32>
    %46 = arith.addf %44, %45 : vector<8x128xf32>
    %47 = math.tanh %46 : vector<8x128xf32>
    %48 = arith.mulf %43, %47 : vector<8x128xf32>
    %49 = vector.extract_strided_slice %23 {offsets = [0, 0], sizes = [8, 128], strides = [1, 1]} : vector<8x512xf32> to vector<8x128xf32>
    %50 = arith.negf %49 : vector<8x128xf32>
    %51 = math.exp %50 : vector<8x128xf32>
    %cst_24 = arith.constant 1.000000e+00 : f32
    %52 = vector.broadcast %cst_24 : f32 to vector<8x128xf32>
    %53 = arith.addf %52, %51 : vector<8x128xf32>
    %54 = arith.divf %52, %53 : vector<8x128xf32>
    %55 = vector.extract_strided_slice %23 {offsets = [0, 128], sizes = [8, 128], strides = [1, 1]} : vector<8x512xf32> to vector<8x128xf32>
    %56 = arith.negf %55 : vector<8x128xf32>
    %57 = math.exp %56 : vector<8x128xf32>
    %cst_25 = arith.constant 1.000000e+00 : f32
    %58 = vector.broadcast %cst_25 : f32 to vector<8x128xf32>
    %59 = arith.addf %58, %57 : vector<8x128xf32>
    %60 = arith.divf %58, %59 : vector<8x128xf32>
    %61 = vector.extract_strided_slice %23 {offsets = [0, 256], sizes = [8, 128], strides = [1, 1]} : vector<8x512xf32> to vector<8x128xf32>
    %62 = math.tanh %61 : vector<8x128xf32>
    %63 = vector.extract_strided_slice %23 {offsets = [0, 384], sizes = [8, 128], strides = [1, 1]} : vector<8x512xf32> to vector<8x128xf32>
    %64 = arith.negf %63 : vector<8x128xf32>
    %65 = math.exp %64 : vector<8x128xf32>
    %cst_26 = arith.constant 1.000000e+00 : f32
    %66 = vector.broadcast %cst_26 : f32 to vector<8x128xf32>
    %67 = arith.addf %66, %65 : vector<8x128xf32>
    %68 = arith.divf %66, %67 : vector<8x128xf32>
    %69 = arith.mulf %60, %13 : vector<8x128xf32>
    %70 = arith.mulf %54, %62 : vector<8x128xf32>
    %71 = arith.addf %69, %70 : vector<8x128xf32>
    %72 = math.tanh %71 : vector<8x128xf32>
    %73 = arith.mulf %68, %72 : vector<8x128xf32>
    %c0_i32 = arith.constant 0 : i32
    %74 = vector.broadcast %c0_i32 : i32 to vector<8x128xi32>
    %75 = arith.cmpi sgt, %2, %74 : vector<8x128xi32>
    %c7_i32 = arith.constant 7 : i32
    %76 = vector.broadcast %c7_i32 : i32 to vector<8x128xi32>
    %77 = arith.cmpi sgt, %2, %76 : vector<8x128xi32>
    %78 = arith.select %75, %48, %10 : vector<8x128xi1>, vector<8x128xf32>
    %79 = arith.select %75, %46, %11 : vector<8x128xi1>, vector<8x128xf32>
    %80 = arith.select %77, %73, %12 : vector<8x128xi1>, vector<8x128xf32>
    %81 = arith.select %77, %71, %13 : vector<8x128xi1>, vector<8x128xf32>
    %c0_27 = arith.constant 0 : index
    %c0_28 = arith.constant 0 : index
    %82 = vector.load %arg12[%c0_27, %c0_28] : memref<64x256xf32, #tpu.memory_space<vmem>>, vector<8x128xf32>
    tpu.vector_store %arg12[%c0_27, %c0_28], %78 {strides = array<i32>} : memref<64x256xf32, #tpu.memory_space<vmem>>, vector<8x128xf32>,
    %c56_29 = arith.constant 56 : index
    %c128 = arith.constant 128 : index
    %83 = vector.load %arg12[%c56_29, %c128] : memref<64x256xf32, #tpu.memory_space<vmem>>, vector<8x128xf32>
    tpu.vector_store %arg12[%c56_29, %c128], %80 {strides = array<i32>} : memref<64x256xf32, #tpu.memory_space<vmem>>, vector<8x128xf32>,
    %c8 = arith.constant 8 : index
    %c0_30 = arith.constant 0 : index
    %84 = vector.load %arg11[%c8, %c0_30] : memref<64x1024xf32, #tpu.memory_space<vmem>>, vector<8x512xf32>
    %85 = arith.truncf %78 : vector<8x128xf32> to vector<8x128xbf16>
    %c0_31 = arith.constant 0 : index
    %c0_32 = arith.constant 0 : index
    %86 = vector.load %arg4[%c0_31, %c0_32] : memref<128x512xbf16, #tpu.memory_space<vmem>>, vector<128x512xbf16>
    %cst_33 = arith.constant dense<0.000000e+00> : vector<8x512xf32>
    %87 = tpu.matmul %85, %86, %cst_33 {dimension_numbers = #tpu.dot_dimension_numbers<[1], [0], [0], [1], [0, 0, 1, 1], [], []>} : vector<8x128xbf16>, vector<128x512xbf16>, vector<8x512xf32> -> vector<8x512xf32>
    %88 = arith.addf %84, %87 : vector<8x512xf32>
    %c48 = arith.constant 48 : index
    %c512_34 = arith.constant 512 : index
    %89 = vector.load %arg11[%c48, %c512_34] : memref<64x1024xf32, #tpu.memory_space<vmem>>, vector<8x512xf32>
    %90 = arith.truncf %80 : vector<8x128xf32> to vector<8x128xbf16>
    %c0_35 = arith.constant 0 : index
    %c0_36 = arith.constant 0 : index
    %91 = vector.load %arg5[%c0_35, %c0_36] : memref<128x512xbf16, #tpu.memory_space<vmem>>, vector<128x512xbf16>
    %cst_37 = arith.constant dense<0.000000e+00> : vector<8x512xf32>
    %92 = tpu.matmul %90, %91, %cst_37 {dimension_numbers = #tpu.dot_dimension_numbers<[1], [0], [0], [1], [0, 0, 1, 1], [], []>} : vector<8x128xbf16>, vector<128x512xbf16>, vector<8x512xf32> -> vector<8x512xf32>
    %93 = arith.addf %89, %92 : vector<8x512xf32>
    %94 = vector.extract_strided_slice %88 {offsets = [0, 0], sizes = [8, 128], strides = [1, 1]} : vector<8x512xf32> to vector<8x128xf32>
    %95 = arith.negf %94 : vector<8x128xf32>
    %96 = math.exp %95 : vector<8x128xf32>
    %cst_38 = arith.constant 1.000000e+00 : f32
    %97 = vector.broadcast %cst_38 : f32 to vector<8x128xf32>
    %98 = arith.addf %97, %96 : vector<8x128xf32>
    %99 = arith.divf %97, %98 : vector<8x128xf32>
    %100 = vector.extract_strided_slice %88 {offsets = [0, 128], sizes = [8, 128], strides = [1, 1]} : vector<8x512xf32> to vector<8x128xf32>
    %101 = arith.negf %100 : vector<8x128xf32>
    %102 = math.exp %101 : vector<8x128xf32>
    %cst_39 = arith.constant 1.000000e+00 : f32
    %103 = vector.broadcast %cst_39 : f32 to vector<8x128xf32>
    %104 = arith.addf %103, %102 : vector<8x128xf32>
    %105 = arith.divf %103, %104 : vector<8x128xf32>
    %106 = vector.extract_strided_slice %88 {offsets = [0, 256], sizes = [8, 128], strides = [1, 1]} : vector<8x512xf32> to vector<8x128xf32>
    %107 = math.tanh %106 : vector<8x128xf32>
    %108 = vector.extract_strided_slice %88 {offsets = [0, 384], sizes = [8, 128], strides = [1, 1]} : vector<8x512xf32> to vector<8x128xf32>
    %109 = arith.negf %108 : vector<8x128xf32>
    %110 = math.exp %109 : vector<8x128xf32>
    %cst_40 = arith.constant 1.000000e+00 : f32
    %111 = vector.broadcast %cst_40 : f32 to vector<8x128xf32>
    %112 = arith.addf %111, %110 : vector<8x128xf32>
    %113 = arith.divf %111, %112 : vector<8x128xf32>
    %114 = arith.mulf %105, %79 : vector<8x128xf32>
    %115 = arith.mulf %99, %107 : vector<8x128xf32>
    %116 = arith.addf %114, %115 : vector<8x128xf32>
    %117 = math.tanh %116 : vector<8x128xf32>
    %118 = arith.mulf %113, %117 : vector<8x128xf32>
    %119 = vector.extract_strided_slice %93 {offsets = [0, 0], sizes = [8, 128], strides = [1, 1]} : vector<8x512xf32> to vector<8x128xf32>
    %120 = arith.negf %119 : vector<8x128xf32>
    %121 = math.exp %120 : vector<8x128xf32>
    %cst_41 = arith.constant 1.000000e+00 : f32
    %122 = vector.broadcast %cst_41 : f32 to vector<8x128xf32>
    %123 = arith.addf %122, %121 : vector<8x128xf32>
    %124 = arith.divf %122, %123 : vector<8x128xf32>
    %125 = vector.extract_strided_slice %93 {offsets = [0, 128], sizes = [8, 128], strides = [1, 1]} : vector<8x512xf32> to vector<8x128xf32>
    %126 = arith.negf %125 : vector<8x128xf32>
    %127 = math.exp %126 : vector<8x128xf32>
    %cst_42 = arith.constant 1.000000e+00 : f32
    %128 = vector.broadcast %cst_42 : f32 to vector<8x128xf32>
    %129 = arith.addf %128, %127 : vector<8x128xf32>
    %130 = arith.divf %128, %129 : vector<8x128xf32>
    %131 = vector.extract_strided_slice %93 {offsets = [0, 256], sizes = [8, 128], strides = [1, 1]} : vector<8x512xf32> to vector<8x128xf32>
    %132 = math.tanh %131 : vector<8x128xf32>
    %133 = vector.extract_strided_slice %93 {offsets = [0, 384], sizes = [8, 128], strides = [1, 1]} : vector<8x512xf32> to vector<8x128xf32>
    %134 = arith.negf %133 : vector<8x128xf32>
    %135 = math.exp %134 : vector<8x128xf32>
    %cst_43 = arith.constant 1.000000e+00 : f32
    %136 = vector.broadcast %cst_43 : f32 to vector<8x128xf32>
    %137 = arith.addf %136, %135 : vector<8x128xf32>
    %138 = arith.divf %136, %137 : vector<8x128xf32>
    %139 = arith.mulf %130, %81 : vector<8x128xf32>
    %140 = arith.mulf %124, %132 : vector<8x128xf32>
    %141 = arith.addf %139, %140 : vector<8x128xf32>
    %142 = math.tanh %141 : vector<8x128xf32>
    %143 = arith.mulf %138, %142 : vector<8x128xf32>
    %c1_i32 = arith.constant 1 : i32
    %144 = vector.broadcast %c1_i32 : i32 to vector<8x128xi32>
    %145 = arith.cmpi sgt, %2, %144 : vector<8x128xi32>
    %c6_i32 = arith.constant 6 : i32
    %146 = vector.broadcast %c6_i32 : i32 to vector<8x128xi32>
    %147 = arith.cmpi sgt, %2, %146 : vector<8x128xi32>
    %148 = arith.select %145, %118, %78 : vector<8x128xi1>, vector<8x128xf32>
    %149 = arith.select %145, %116, %79 : vector<8x128xi1>, vector<8x128xf32>
    %150 = arith.select %147, %143, %80 : vector<8x128xi1>, vector<8x128xf32>
    %151 = arith.select %147, %141, %81 : vector<8x128xi1>, vector<8x128xf32>
    %c8_44 = arith.constant 8 : index
    %c0_45 = arith.constant 0 : index
    %152 = vector.load %arg12[%c8_44, %c0_45] : memref<64x256xf32, #tpu.memory_space<vmem>>, vector<8x128xf32>
    tpu.vector_store %arg12[%c8_44, %c0_45], %148 {strides = array<i32>} : memref<64x256xf32, #tpu.memory_space<vmem>>, vector<8x128xf32>,
    %c48_46 = arith.constant 48 : index
    %c128_47 = arith.constant 128 : index
    %153 = vector.load %arg12[%c48_46, %c128_47] : memref<64x256xf32, #tpu.memory_space<vmem>>, vector<8x128xf32>
    tpu.vector_store %arg12[%c48_46, %c128_47], %150 {strides = array<i32>} : memref<64x256xf32, #tpu.memory_space<vmem>>, vector<8x128xf32>,
    %c16 = arith.constant 16 : index
    %c0_48 = arith.constant 0 : index
    %154 = vector.load %arg11[%c16, %c0_48] : memref<64x1024xf32, #tpu.memory_space<vmem>>, vector<8x512xf32>
    %155 = arith.truncf %148 : vector<8x128xf32> to vector<8x128xbf16>
    %c0_49 = arith.constant 0 : index
    %c0_50 = arith.constant 0 : index
    %156 = vector.load %arg4[%c0_49, %c0_50] : memref<128x512xbf16, #tpu.memory_space<vmem>>, vector<128x512xbf16>
    %cst_51 = arith.constant dense<0.000000e+00> : vector<8x512xf32>
    %157 = tpu.matmul %155, %156, %cst_51 {dimension_numbers = #tpu.dot_dimension_numbers<[1], [0], [0], [1], [0, 0, 1, 1], [], []>} : vector<8x128xbf16>, vector<128x512xbf16>, vector<8x512xf32> -> vector<8x512xf32>
    %158 = arith.addf %154, %157 : vector<8x512xf32>
    %c40 = arith.constant 40 : index
    %c512_52 = arith.constant 512 : index
    %159 = vector.load %arg11[%c40, %c512_52] : memref<64x1024xf32, #tpu.memory_space<vmem>>, vector<8x512xf32>
    %160 = arith.truncf %150 : vector<8x128xf32> to vector<8x128xbf16>
    %c0_53 = arith.constant 0 : index
    %c0_54 = arith.constant 0 : index
    %161 = vector.load %arg5[%c0_53, %c0_54] : memref<128x512xbf16, #tpu.memory_space<vmem>>, vector<128x512xbf16>
    %cst_55 = arith.constant dense<0.000000e+00> : vector<8x512xf32>
    %162 = tpu.matmul %160, %161, %cst_55 {dimension_numbers = #tpu.dot_dimension_numbers<[1], [0], [0], [1], [0, 0, 1, 1], [], []>} : vector<8x128xbf16>, vector<128x512xbf16>, vector<8x512xf32> -> vector<8x512xf32>
    %163 = arith.addf %159, %162 : vector<8x512xf32>
    %164 = vector.extract_strided_slice %158 {offsets = [0, 0], sizes = [8, 128], strides = [1, 1]} : vector<8x512xf32> to vector<8x128xf32>
    %165 = arith.negf %164 : vector<8x128xf32>
    %166 = math.exp %165 : vector<8x128xf32>
    %cst_56 = arith.constant 1.000000e+00 : f32
    %167 = vector.broadcast %cst_56 : f32 to vector<8x128xf32>
    %168 = arith.addf %167, %166 : vector<8x128xf32>
    %169 = arith.divf %167, %168 : vector<8x128xf32>
    %170 = vector.extract_strided_slice %158 {offsets = [0, 128], sizes = [8, 128], strides = [1, 1]} : vector<8x512xf32> to vector<8x128xf32>
    %171 = arith.negf %170 : vector<8x128xf32>
    %172 = math.exp %171 : vector<8x128xf32>
    %cst_57 = arith.constant 1.000000e+00 : f32
    %173 = vector.broadcast %cst_57 : f32 to vector<8x128xf32>
    %174 = arith.addf %173, %172 : vector<8x128xf32>
    %175 = arith.divf %173, %174 : vector<8x128xf32>
    %176 = vector.extract_strided_slice %158 {offsets = [0, 256], sizes = [8, 128], strides = [1, 1]} : vector<8x512xf32> to vector<8x128xf32>
    %177 = math.tanh %176 : vector<8x128xf32>
    %178 = vector.extract_strided_slice %158 {offsets = [0, 384], sizes = [8, 128], strides = [1, 1]} : vector<8x512xf32> to vector<8x128xf32>
    %179 = arith.negf %178 : vector<8x128xf32>
    %180 = math.exp %179 : vector<8x128xf32>
    %cst_58 = arith.constant 1.000000e+00 : f32
    %181 = vector.broadcast %cst_58 : f32 to vector<8x128xf32>
    %182 = arith.addf %181, %180 : vector<8x128xf32>
    %183 = arith.divf %181, %182 : vector<8x128xf32>
    %184 = arith.mulf %175, %149 : vector<8x128xf32>
    %185 = arith.mulf %169, %177 : vector<8x128xf32>
    %186 = arith.addf %184, %185 : vector<8x128xf32>
    %187 = math.tanh %186 : vector<8x128xf32>
    %188 = arith.mulf %183, %187 : vector<8x128xf32>
    %189 = vector.extract_strided_slice %163 {offsets = [0, 0], sizes = [8, 128], strides = [1, 1]} : vector<8x512xf32> to vector<8x128xf32>
    %190 = arith.negf %189 : vector<8x128xf32>
    %191 = math.exp %190 : vector<8x128xf32>
    %cst_59 = arith.constant 1.000000e+00 : f32
    %192 = vector.broadcast %cst_59 : f32 to vector<8x128xf32>
    %193 = arith.addf %192, %191 : vector<8x128xf32>
    %194 = arith.divf %192, %193 : vector<8x128xf32>
    %195 = vector.extract_strided_slice %163 {offsets = [0, 128], sizes = [8, 128], strides = [1, 1]} : vector<8x512xf32> to vector<8x128xf32>
    %196 = arith.negf %195 : vector<8x128xf32>
    %197 = math.exp %196 : vector<8x128xf32>
    %cst_60 = arith.constant 1.000000e+00 : f32
    %198 = vector.broadcast %cst_60 : f32 to vector<8x128xf32>
    %199 = arith.addf %198, %197 : vector<8x128xf32>
    %200 = arith.divf %198, %199 : vector<8x128xf32>
    %201 = vector.extract_strided_slice %163 {offsets = [0, 256], sizes = [8, 128], strides = [1, 1]} : vector<8x512xf32> to vector<8x128xf32>
    %202 = math.tanh %201 : vector<8x128xf32>
    %203 = vector.extract_strided_slice %163 {offsets = [0, 384], sizes = [8, 128], strides = [1, 1]} : vector<8x512xf32> to vector<8x128xf32>
    %204 = arith.negf %203 : vector<8x128xf32>
    %205 = math.exp %204 : vector<8x128xf32>
    %cst_61 = arith.constant 1.000000e+00 : f32
    %206 = vector.broadcast %cst_61 : f32 to vector<8x128xf32>
    %207 = arith.addf %206, %205 : vector<8x128xf32>
    %208 = arith.divf %206, %207 : vector<8x128xf32>
    %209 = arith.mulf %200, %151 : vector<8x128xf32>
    %210 = arith.mulf %194, %202 : vector<8x128xf32>
    %211 = arith.addf %209, %210 : vector<8x128xf32>
    %212 = math.tanh %211 : vector<8x128xf32>
    %213 = arith.mulf %208, %212 : vector<8x128xf32>
    %c2_i32 = arith.constant 2 : i32
    %214 = vector.broadcast %c2_i32 : i32 to vector<8x128xi32>
    %215 = arith.cmpi sgt, %2, %214 : vector<8x128xi32>
    %c5_i32 = arith.constant 5 : i32
    %216 = vector.broadcast %c5_i32 : i32 to vector<8x128xi32>
    %217 = arith.cmpi sgt, %2, %216 : vector<8x128xi32>
    %218 = arith.select %215, %188, %148 : vector<8x128xi1>, vector<8x128xf32>
    %219 = arith.select %215, %186, %149 : vector<8x128xi1>, vector<8x128xf32>
    %220 = arith.select %217, %213, %150 : vector<8x128xi1>, vector<8x128xf32>
    %221 = arith.select %217, %211, %151 : vector<8x128xi1>, vector<8x128xf32>
    %c16_62 = arith.constant 16 : index
    %c0_63 = arith.constant 0 : index
    %222 = vector.load %arg12[%c16_62, %c0_63] : memref<64x256xf32, #tpu.memory_space<vmem>>, vector<8x128xf32>
    tpu.vector_store %arg12[%c16_62, %c0_63], %218 {strides = array<i32>} : memref<64x256xf32, #tpu.memory_space<vmem>>, vector<8x128xf32>,
    %c40_64 = arith.constant 40 : index
    %c128_65 = arith.constant 128 : index
    %223 = vector.load %arg12[%c40_64, %c128_65] : memref<64x256xf32, #tpu.memory_space<vmem>>, vector<8x128xf32>
    tpu.vector_store %arg12[%c40_64, %c128_65], %220 {strides = array<i32>} : memref<64x256xf32, #tpu.memory_space<vmem>>, vector<8x128xf32>,
    %c24 = arith.constant 24 : index
    %c0_66 = arith.constant 0 : index
    %224 = vector.load %arg11[%c24, %c0_66] : memref<64x1024xf32, #tpu.memory_space<vmem>>, vector<8x512xf32>
    %225 = arith.truncf %218 : vector<8x128xf32> to vector<8x128xbf16>
    %c0_67 = arith.constant 0 : index
    %c0_68 = arith.constant 0 : index
    %226 = vector.load %arg4[%c0_67, %c0_68] : memref<128x512xbf16, #tpu.memory_space<vmem>>, vector<128x512xbf16>
    %cst_69 = arith.constant dense<0.000000e+00> : vector<8x512xf32>
    %227 = tpu.matmul %225, %226, %cst_69 {dimension_numbers = #tpu.dot_dimension_numbers<[1], [0], [0], [1], [0, 0, 1, 1], [], []>} : vector<8x128xbf16>, vector<128x512xbf16>, vector<8x512xf32> -> vector<8x512xf32>
    %228 = arith.addf %224, %227 : vector<8x512xf32>
    %c32 = arith.constant 32 : index
    %c512_70 = arith.constant 512 : index
    %229 = vector.load %arg11[%c32, %c512_70] : memref<64x1024xf32, #tpu.memory_space<vmem>>, vector<8x512xf32>
    %230 = arith.truncf %220 : vector<8x128xf32> to vector<8x128xbf16>
    %c0_71 = arith.constant 0 : index
    %c0_72 = arith.constant 0 : index
    %231 = vector.load %arg5[%c0_71, %c0_72] : memref<128x512xbf16, #tpu.memory_space<vmem>>, vector<128x512xbf16>
    %cst_73 = arith.constant dense<0.000000e+00> : vector<8x512xf32>
    %232 = tpu.matmul %230, %231, %cst_73 {dimension_numbers = #tpu.dot_dimension_numbers<[1], [0], [0], [1], [0, 0, 1, 1], [], []>} : vector<8x128xbf16>, vector<128x512xbf16>, vector<8x512xf32> -> vector<8x512xf32>
    %233 = arith.addf %229, %232 : vector<8x512xf32>
    %234 = vector.extract_strided_slice %228 {offsets = [0, 0], sizes = [8, 128], strides = [1, 1]} : vector<8x512xf32> to vector<8x128xf32>
    %235 = arith.negf %234 : vector<8x128xf32>
    %236 = math.exp %235 : vector<8x128xf32>
    %cst_74 = arith.constant 1.000000e+00 : f32
    %237 = vector.broadcast %cst_74 : f32 to vector<8x128xf32>
    %238 = arith.addf %237, %236 : vector<8x128xf32>
    %239 = arith.divf %237, %238 : vector<8x128xf32>
    %240 = vector.extract_strided_slice %228 {offsets = [0, 128], sizes = [8, 128], strides = [1, 1]} : vector<8x512xf32> to vector<8x128xf32>
    %241 = arith.negf %240 : vector<8x128xf32>
    %242 = math.exp %241 : vector<8x128xf32>
    %cst_75 = arith.constant 1.000000e+00 : f32
    %243 = vector.broadcast %cst_75 : f32 to vector<8x128xf32>
    %244 = arith.addf %243, %242 : vector<8x128xf32>
    %245 = arith.divf %243, %244 : vector<8x128xf32>
    %246 = vector.extract_strided_slice %228 {offsets = [0, 256], sizes = [8, 128], strides = [1, 1]} : vector<8x512xf32> to vector<8x128xf32>
    %247 = math.tanh %246 : vector<8x128xf32>
    %248 = vector.extract_strided_slice %228 {offsets = [0, 384], sizes = [8, 128], strides = [1, 1]} : vector<8x512xf32> to vector<8x128xf32>
    %249 = arith.negf %248 : vector<8x128xf32>
    %250 = math.exp %249 : vector<8x128xf32>
    %cst_76 = arith.constant 1.000000e+00 : f32
    %251 = vector.broadcast %cst_76 : f32 to vector<8x128xf32>
    %252 = arith.addf %251, %250 : vector<8x128xf32>
    %253 = arith.divf %251, %252 : vector<8x128xf32>
    %254 = arith.mulf %245, %219 : vector<8x128xf32>
    %255 = arith.mulf %239, %247 : vector<8x128xf32>
    %256 = arith.addf %254, %255 : vector<8x128xf32>
    %257 = math.tanh %256 : vector<8x128xf32>
    %258 = arith.mulf %253, %257 : vector<8x128xf32>
    %259 = vector.extract_strided_slice %233 {offsets = [0, 0], sizes = [8, 128], strides = [1, 1]} : vector<8x512xf32> to vector<8x128xf32>
    %260 = arith.negf %259 : vector<8x128xf32>
    %261 = math.exp %260 : vector<8x128xf32>
    %cst_77 = arith.constant 1.000000e+00 : f32
    %262 = vector.broadcast %cst_77 : f32 to vector<8x128xf32>
    %263 = arith.addf %262, %261 : vector<8x128xf32>
    %264 = arith.divf %262, %263 : vector<8x128xf32>
    %265 = vector.extract_strided_slice %233 {offsets = [0, 128], sizes = [8, 128], strides = [1, 1]} : vector<8x512xf32> to vector<8x128xf32>
    %266 = arith.negf %265 : vector<8x128xf32>
    %267 = math.exp %266 : vector<8x128xf32>
    %cst_78 = arith.constant 1.000000e+00 : f32
    %268 = vector.broadcast %cst_78 : f32 to vector<8x128xf32>
    %269 = arith.addf %268, %267 : vector<8x128xf32>
    %270 = arith.divf %268, %269 : vector<8x128xf32>
    %271 = vector.extract_strided_slice %233 {offsets = [0, 256], sizes = [8, 128], strides = [1, 1]} : vector<8x512xf32> to vector<8x128xf32>
    %272 = math.tanh %271 : vector<8x128xf32>
    %273 = vector.extract_strided_slice %233 {offsets = [0, 384], sizes = [8, 128], strides = [1, 1]} : vector<8x512xf32> to vector<8x128xf32>
    %274 = arith.negf %273 : vector<8x128xf32>
    %275 = math.exp %274 : vector<8x128xf32>
    %cst_79 = arith.constant 1.000000e+00 : f32
    %276 = vector.broadcast %cst_79 : f32 to vector<8x128xf32>
    %277 = arith.addf %276, %275 : vector<8x128xf32>
    %278 = arith.divf %276, %277 : vector<8x128xf32>
    %279 = arith.mulf %270, %221 : vector<8x128xf32>
    %280 = arith.mulf %264, %272 : vector<8x128xf32>
    %281 = arith.addf %279, %280 : vector<8x128xf32>
    %282 = math.tanh %281 : vector<8x128xf32>
    %283 = arith.mulf %278, %282 : vector<8x128xf32>
    %c3_i32 = arith.constant 3 : i32
    %284 = vector.broadcast %c3_i32 : i32 to vector<8x128xi32>
    %285 = arith.cmpi sgt, %2, %284 : vector<8x128xi32>
    %c4_i32 = arith.constant 4 : i32
    %286 = vector.broadcast %c4_i32 : i32 to vector<8x128xi32>
    %287 = arith.cmpi sgt, %2, %286 : vector<8x128xi32>
    %288 = arith.select %285, %258, %218 : vector<8x128xi1>, vector<8x128xf32>
    %289 = arith.select %285, %256, %219 : vector<8x128xi1>, vector<8x128xf32>
    %290 = arith.select %287, %283, %220 : vector<8x128xi1>, vector<8x128xf32>
    %291 = arith.select %287, %281, %221 : vector<8x128xi1>, vector<8x128xf32>
    %c24_80 = arith.constant 24 : index
    %c0_81 = arith.constant 0 : index
    %292 = vector.load %arg12[%c24_80, %c0_81] : memref<64x256xf32, #tpu.memory_space<vmem>>, vector<8x128xf32>
    tpu.vector_store %arg12[%c24_80, %c0_81], %288 {strides = array<i32>} : memref<64x256xf32, #tpu.memory_space<vmem>>, vector<8x128xf32>,
    %c32_82 = arith.constant 32 : index
    %c128_83 = arith.constant 128 : index
    %293 = vector.load %arg12[%c32_82, %c128_83] : memref<64x256xf32, #tpu.memory_space<vmem>>, vector<8x128xf32>
    tpu.vector_store %arg12[%c32_82, %c128_83], %290 {strides = array<i32>} : memref<64x256xf32, #tpu.memory_space<vmem>>, vector<8x128xf32>,
    %c32_84 = arith.constant 32 : index
    %c0_85 = arith.constant 0 : index
    %294 = vector.load %arg11[%c32_84, %c0_85] : memref<64x1024xf32, #tpu.memory_space<vmem>>, vector<8x512xf32>
    %295 = arith.truncf %288 : vector<8x128xf32> to vector<8x128xbf16>
    %c0_86 = arith.constant 0 : index
    %c0_87 = arith.constant 0 : index
    %296 = vector.load %arg4[%c0_86, %c0_87] : memref<128x512xbf16, #tpu.memory_space<vmem>>, vector<128x512xbf16>
    %cst_88 = arith.constant dense<0.000000e+00> : vector<8x512xf32>
    %297 = tpu.matmul %295, %296, %cst_88 {dimension_numbers = #tpu.dot_dimension_numbers<[1], [0], [0], [1], [0, 0, 1, 1], [], []>} : vector<8x128xbf16>, vector<128x512xbf16>, vector<8x512xf32> -> vector<8x512xf32>
    %298 = arith.addf %294, %297 : vector<8x512xf32>
    %c24_89 = arith.constant 24 : index
    %c512_90 = arith.constant 512 : index
    %299 = vector.load %arg11[%c24_89, %c512_90] : memref<64x1024xf32, #tpu.memory_space<vmem>>, vector<8x512xf32>
    %300 = arith.truncf %290 : vector<8x128xf32> to vector<8x128xbf16>
    %c0_91 = arith.constant 0 : index
    %c0_92 = arith.constant 0 : index
    %301 = vector.load %arg5[%c0_91, %c0_92] : memref<128x512xbf16, #tpu.memory_space<vmem>>, vector<128x512xbf16>
    %cst_93 = arith.constant dense<0.000000e+00> : vector<8x512xf32>
    %302 = tpu.matmul %300, %301, %cst_93 {dimension_numbers = #tpu.dot_dimension_numbers<[1], [0], [0], [1], [0, 0, 1, 1], [], []>} : vector<8x128xbf16>, vector<128x512xbf16>, vector<8x512xf32> -> vector<8x512xf32>
    %303 = arith.addf %299, %302 : vector<8x512xf32>
    %304 = vector.extract_strided_slice %298 {offsets = [0, 0], sizes = [8, 128], strides = [1, 1]} : vector<8x512xf32> to vector<8x128xf32>
    %305 = arith.negf %304 : vector<8x128xf32>
    %306 = math.exp %305 : vector<8x128xf32>
    %cst_94 = arith.constant 1.000000e+00 : f32
    %307 = vector.broadcast %cst_94 : f32 to vector<8x128xf32>
    %308 = arith.addf %307, %306 : vector<8x128xf32>
    %309 = arith.divf %307, %308 : vector<8x128xf32>
    %310 = vector.extract_strided_slice %298 {offsets = [0, 128], sizes = [8, 128], strides = [1, 1]} : vector<8x512xf32> to vector<8x128xf32>
    %311 = arith.negf %310 : vector<8x128xf32>
    %312 = math.exp %311 : vector<8x128xf32>
    %cst_95 = arith.constant 1.000000e+00 : f32
    %313 = vector.broadcast %cst_95 : f32 to vector<8x128xf32>
    %314 = arith.addf %313, %312 : vector<8x128xf32>
    %315 = arith.divf %313, %314 : vector<8x128xf32>
    %316 = vector.extract_strided_slice %298 {offsets = [0, 256], sizes = [8, 128], strides = [1, 1]} : vector<8x512xf32> to vector<8x128xf32>
    %317 = math.tanh %316 : vector<8x128xf32>
    %318 = vector.extract_strided_slice %298 {offsets = [0, 384], sizes = [8, 128], strides = [1, 1]} : vector<8x512xf32> to vector<8x128xf32>
    %319 = arith.negf %318 : vector<8x128xf32>
    %320 = math.exp %319 : vector<8x128xf32>
    %cst_96 = arith.constant 1.000000e+00 : f32
    %321 = vector.broadcast %cst_96 : f32 to vector<8x128xf32>
    %322 = arith.addf %321, %320 : vector<8x128xf32>
    %323 = arith.divf %321, %322 : vector<8x128xf32>
    %324 = arith.mulf %315, %289 : vector<8x128xf32>
    %325 = arith.mulf %309, %317 : vector<8x128xf32>
    %326 = arith.addf %324, %325 : vector<8x128xf32>
    %327 = math.tanh %326 : vector<8x128xf32>
    %328 = arith.mulf %323, %327 : vector<8x128xf32>
    %329 = vector.extract_strided_slice %303 {offsets = [0, 0], sizes = [8, 128], strides = [1, 1]} : vector<8x512xf32> to vector<8x128xf32>
    %330 = arith.negf %329 : vector<8x128xf32>
    %331 = math.exp %330 : vector<8x128xf32>
    %cst_97 = arith.constant 1.000000e+00 : f32
    %332 = vector.broadcast %cst_97 : f32 to vector<8x128xf32>
    %333 = arith.addf %332, %331 : vector<8x128xf32>
    %334 = arith.divf %332, %333 : vector<8x128xf32>
    %335 = vector.extract_strided_slice %303 {offsets = [0, 128], sizes = [8, 128], strides = [1, 1]} : vector<8x512xf32> to vector<8x128xf32>
    %336 = arith.negf %335 : vector<8x128xf32>
    %337 = math.exp %336 : vector<8x128xf32>
    %cst_98 = arith.constant 1.000000e+00 : f32
    %338 = vector.broadcast %cst_98 : f32 to vector<8x128xf32>
    %339 = arith.addf %338, %337 : vector<8x128xf32>
    %340 = arith.divf %338, %339 : vector<8x128xf32>
    %341 = vector.extract_strided_slice %303 {offsets = [0, 256], sizes = [8, 128], strides = [1, 1]} : vector<8x512xf32> to vector<8x128xf32>
    %342 = math.tanh %341 : vector<8x128xf32>
    %343 = vector.extract_strided_slice %303 {offsets = [0, 384], sizes = [8, 128], strides = [1, 1]} : vector<8x512xf32> to vector<8x128xf32>
    %344 = arith.negf %343 : vector<8x128xf32>
    %345 = math.exp %344 : vector<8x128xf32>
    %cst_99 = arith.constant 1.000000e+00 : f32
    %346 = vector.broadcast %cst_99 : f32 to vector<8x128xf32>
    %347 = arith.addf %346, %345 : vector<8x128xf32>
    %348 = arith.divf %346, %347 : vector<8x128xf32>
    %349 = arith.mulf %340, %291 : vector<8x128xf32>
    %350 = arith.mulf %334, %342 : vector<8x128xf32>
    %351 = arith.addf %349, %350 : vector<8x128xf32>
    %352 = math.tanh %351 : vector<8x128xf32>
    %353 = arith.mulf %348, %352 : vector<8x128xf32>
    %c4_i32_100 = arith.constant 4 : i32
    %354 = vector.broadcast %c4_i32_100 : i32 to vector<8x128xi32>
    %355 = arith.cmpi sgt, %2, %354 : vector<8x128xi32>
    %c3_i32_101 = arith.constant 3 : i32
    %356 = vector.broadcast %c3_i32_101 : i32 to vector<8x128xi32>
    %357 = arith.cmpi sgt, %2, %356 : vector<8x128xi32>
    %358 = arith.select %355, %328, %288 : vector<8x128xi1>, vector<8x128xf32>
    %359 = arith.select %355, %326, %289 : vector<8x128xi1>, vector<8x128xf32>
    %360 = arith.select %357, %353, %290 : vector<8x128xi1>, vector<8x128xf32>
    %361 = arith.select %357, %351, %291 : vector<8x128xi1>, vector<8x128xf32>
    %c32_102 = arith.constant 32 : index
    %c0_103 = arith.constant 0 : index
    %362 = vector.load %arg12[%c32_102, %c0_103] : memref<64x256xf32, #tpu.memory_space<vmem>>, vector<8x128xf32>
    tpu.vector_store %arg12[%c32_102, %c0_103], %358 {strides = array<i32>} : memref<64x256xf32, #tpu.memory_space<vmem>>, vector<8x128xf32>,
    %c24_104 = arith.constant 24 : index
    %c128_105 = arith.constant 128 : index
    %363 = vector.load %arg12[%c24_104, %c128_105] : memref<64x256xf32, #tpu.memory_space<vmem>>, vector<8x128xf32>
    tpu.vector_store %arg12[%c24_104, %c128_105], %360 {strides = array<i32>} : memref<64x256xf32, #tpu.memory_space<vmem>>, vector<8x128xf32>,
    %c40_106 = arith.constant 40 : index
    %c0_107 = arith.constant 0 : index
    %364 = vector.load %arg11[%c40_106, %c0_107] : memref<64x1024xf32, #tpu.memory_space<vmem>>, vector<8x512xf32>
    %365 = arith.truncf %358 : vector<8x128xf32> to vector<8x128xbf16>
    %c0_108 = arith.constant 0 : index
    %c0_109 = arith.constant 0 : index
    %366 = vector.load %arg4[%c0_108, %c0_109] : memref<128x512xbf16, #tpu.memory_space<vmem>>, vector<128x512xbf16>
    %cst_110 = arith.constant dense<0.000000e+00> : vector<8x512xf32>
    %367 = tpu.matmul %365, %366, %cst_110 {dimension_numbers = #tpu.dot_dimension_numbers<[1], [0], [0], [1], [0, 0, 1, 1], [], []>} : vector<8x128xbf16>, vector<128x512xbf16>, vector<8x512xf32> -> vector<8x512xf32>
    %368 = arith.addf %364, %367 : vector<8x512xf32>
    %c16_111 = arith.constant 16 : index
    %c512_112 = arith.constant 512 : index
    %369 = vector.load %arg11[%c16_111, %c512_112] : memref<64x1024xf32, #tpu.memory_space<vmem>>, vector<8x512xf32>
    %370 = arith.truncf %360 : vector<8x128xf32> to vector<8x128xbf16>
    %c0_113 = arith.constant 0 : index
    %c0_114 = arith.constant 0 : index
    %371 = vector.load %arg5[%c0_113, %c0_114] : memref<128x512xbf16, #tpu.memory_space<vmem>>, vector<128x512xbf16>
    %cst_115 = arith.constant dense<0.000000e+00> : vector<8x512xf32>
    %372 = tpu.matmul %370, %371, %cst_115 {dimension_numbers = #tpu.dot_dimension_numbers<[1], [0], [0], [1], [0, 0, 1, 1], [], []>} : vector<8x128xbf16>, vector<128x512xbf16>, vector<8x512xf32> -> vector<8x512xf32>
    %373 = arith.addf %369, %372 : vector<8x512xf32>
    %374 = vector.extract_strided_slice %368 {offsets = [0, 0], sizes = [8, 128], strides = [1, 1]} : vector<8x512xf32> to vector<8x128xf32>
    %375 = arith.negf %374 : vector<8x128xf32>
    %376 = math.exp %375 : vector<8x128xf32>
    %cst_116 = arith.constant 1.000000e+00 : f32
    %377 = vector.broadcast %cst_116 : f32 to vector<8x128xf32>
    %378 = arith.addf %377, %376 : vector<8x128xf32>
    %379 = arith.divf %377, %378 : vector<8x128xf32>
    %380 = vector.extract_strided_slice %368 {offsets = [0, 128], sizes = [8, 128], strides = [1, 1]} : vector<8x512xf32> to vector<8x128xf32>
    %381 = arith.negf %380 : vector<8x128xf32>
    %382 = math.exp %381 : vector<8x128xf32>
    %cst_117 = arith.constant 1.000000e+00 : f32
    %383 = vector.broadcast %cst_117 : f32 to vector<8x128xf32>
    %384 = arith.addf %383, %382 : vector<8x128xf32>
    %385 = arith.divf %383, %384 : vector<8x128xf32>
    %386 = vector.extract_strided_slice %368 {offsets = [0, 256], sizes = [8, 128], strides = [1, 1]} : vector<8x512xf32> to vector<8x128xf32>
    %387 = math.tanh %386 : vector<8x128xf32>
    %388 = vector.extract_strided_slice %368 {offsets = [0, 384], sizes = [8, 128], strides = [1, 1]} : vector<8x512xf32> to vector<8x128xf32>
    %389 = arith.negf %388 : vector<8x128xf32>
    %390 = math.exp %389 : vector<8x128xf32>
    %cst_118 = arith.constant 1.000000e+00 : f32
    %391 = vector.broadcast %cst_118 : f32 to vector<8x128xf32>
    %392 = arith.addf %391, %390 : vector<8x128xf32>
    %393 = arith.divf %391, %392 : vector<8x128xf32>
    %394 = arith.mulf %385, %359 : vector<8x128xf32>
    %395 = arith.mulf %379, %387 : vector<8x128xf32>
    %396 = arith.addf %394, %395 : vector<8x128xf32>
    %397 = math.tanh %396 : vector<8x128xf32>
    %398 = arith.mulf %393, %397 : vector<8x128xf32>
    %399 = vector.extract_strided_slice %373 {offsets = [0, 0], sizes = [8, 128], strides = [1, 1]} : vector<8x512xf32> to vector<8x128xf32>
    %400 = arith.negf %399 : vector<8x128xf32>
    %401 = math.exp %400 : vector<8x128xf32>
    %cst_119 = arith.constant 1.000000e+00 : f32
    %402 = vector.broadcast %cst_119 : f32 to vector<8x128xf32>
    %403 = arith.addf %402, %401 : vector<8x128xf32>
    %404 = arith.divf %402, %403 : vector<8x128xf32>
    %405 = vector.extract_strided_slice %373 {offsets = [0, 128], sizes = [8, 128], strides = [1, 1]} : vector<8x512xf32> to vector<8x128xf32>
    %406 = arith.negf %405 : vector<8x128xf32>
    %407 = math.exp %406 : vector<8x128xf32>
    %cst_120 = arith.constant 1.000000e+00 : f32
    %408 = vector.broadcast %cst_120 : f32 to vector<8x128xf32>
    %409 = arith.addf %408, %407 : vector<8x128xf32>
    %410 = arith.divf %408, %409 : vector<8x128xf32>
    %411 = vector.extract_strided_slice %373 {offsets = [0, 256], sizes = [8, 128], strides = [1, 1]} : vector<8x512xf32> to vector<8x128xf32>
    %412 = math.tanh %411 : vector<8x128xf32>
    %413 = vector.extract_strided_slice %373 {offsets = [0, 384], sizes = [8, 128], strides = [1, 1]} : vector<8x512xf32> to vector<8x128xf32>
    %414 = arith.negf %413 : vector<8x128xf32>
    %415 = math.exp %414 : vector<8x128xf32>
    %cst_121 = arith.constant 1.000000e+00 : f32
    %416 = vector.broadcast %cst_121 : f32 to vector<8x128xf32>
    %417 = arith.addf %416, %415 : vector<8x128xf32>
    %418 = arith.divf %416, %417 : vector<8x128xf32>
    %419 = arith.mulf %410, %361 : vector<8x128xf32>
    %420 = arith.mulf %404, %412 : vector<8x128xf32>
    %421 = arith.addf %419, %420 : vector<8x128xf32>
    %422 = math.tanh %421 : vector<8x128xf32>
    %423 = arith.mulf %418, %422 : vector<8x128xf32>
    %c5_i32_122 = arith.constant 5 : i32
    %424 = vector.broadcast %c5_i32_122 : i32 to vector<8x128xi32>
    %425 = arith.cmpi sgt, %2, %424 : vector<8x128xi32>
    %c2_i32_123 = arith.constant 2 : i32
    %426 = vector.broadcast %c2_i32_123 : i32 to vector<8x128xi32>
    %427 = arith.cmpi sgt, %2, %426 : vector<8x128xi32>
    %428 = arith.select %425, %398, %358 : vector<8x128xi1>, vector<8x128xf32>
    %429 = arith.select %425, %396, %359 : vector<8x128xi1>, vector<8x128xf32>
    %430 = arith.select %427, %423, %360 : vector<8x128xi1>, vector<8x128xf32>
    %431 = arith.select %427, %421, %361 : vector<8x128xi1>, vector<8x128xf32>
    %c40_124 = arith.constant 40 : index
    %c0_125 = arith.constant 0 : index
    %432 = vector.load %arg12[%c40_124, %c0_125] : memref<64x256xf32, #tpu.memory_space<vmem>>, vector<8x128xf32>
    tpu.vector_store %arg12[%c40_124, %c0_125], %428 {strides = array<i32>} : memref<64x256xf32, #tpu.memory_space<vmem>>, vector<8x128xf32>,
    %c16_126 = arith.constant 16 : index
    %c128_127 = arith.constant 128 : index
    %433 = vector.load %arg12[%c16_126, %c128_127] : memref<64x256xf32, #tpu.memory_space<vmem>>, vector<8x128xf32>
    tpu.vector_store %arg12[%c16_126, %c128_127], %430 {strides = array<i32>} : memref<64x256xf32, #tpu.memory_space<vmem>>, vector<8x128xf32>,
    %c48_128 = arith.constant 48 : index
    %c0_129 = arith.constant 0 : index
    %434 = vector.load %arg11[%c48_128, %c0_129] : memref<64x1024xf32, #tpu.memory_space<vmem>>, vector<8x512xf32>
    %435 = arith.truncf %428 : vector<8x128xf32> to vector<8x128xbf16>
    %c0_130 = arith.constant 0 : index
    %c0_131 = arith.constant 0 : index
    %436 = vector.load %arg4[%c0_130, %c0_131] : memref<128x512xbf16, #tpu.memory_space<vmem>>, vector<128x512xbf16>
    %cst_132 = arith.constant dense<0.000000e+00> : vector<8x512xf32>
    %437 = tpu.matmul %435, %436, %cst_132 {dimension_numbers = #tpu.dot_dimension_numbers<[1], [0], [0], [1], [0, 0, 1, 1], [], []>} : vector<8x128xbf16>, vector<128x512xbf16>, vector<8x512xf32> -> vector<8x512xf32>
    %438 = arith.addf %434, %437 : vector<8x512xf32>
    %c8_133 = arith.constant 8 : index
    %c512_134 = arith.constant 512 : index
    %439 = vector.load %arg11[%c8_133, %c512_134] : memref<64x1024xf32, #tpu.memory_space<vmem>>, vector<8x512xf32>
    %440 = arith.truncf %430 : vector<8x128xf32> to vector<8x128xbf16>
    %c0_135 = arith.constant 0 : index
    %c0_136 = arith.constant 0 : index
    %441 = vector.load %arg5[%c0_135, %c0_136] : memref<128x512xbf16, #tpu.memory_space<vmem>>, vector<128x512xbf16>
    %cst_137 = arith.constant dense<0.000000e+00> : vector<8x512xf32>
    %442 = tpu.matmul %440, %441, %cst_137 {dimension_numbers = #tpu.dot_dimension_numbers<[1], [0], [0], [1], [0, 0, 1, 1], [], []>} : vector<8x128xbf16>, vector<128x512xbf16>, vector<8x512xf32> -> vector<8x512xf32>
    %443 = arith.addf %439, %442 : vector<8x512xf32>
    %444 = vector.extract_strided_slice %438 {offsets = [0, 0], sizes = [8, 128], strides = [1, 1]} : vector<8x512xf32> to vector<8x128xf32>
    %445 = arith.negf %444 : vector<8x128xf32>
    %446 = math.exp %445 : vector<8x128xf32>
    %cst_138 = arith.constant 1.000000e+00 : f32
    %447 = vector.broadcast %cst_138 : f32 to vector<8x128xf32>
    %448 = arith.addf %447, %446 : vector<8x128xf32>
    %449 = arith.divf %447, %448 : vector<8x128xf32>
    %450 = vector.extract_strided_slice %438 {offsets = [0, 128], sizes = [8, 128], strides = [1, 1]} : vector<8x512xf32> to vector<8x128xf32>
    %451 = arith.negf %450 : vector<8x128xf32>
    %452 = math.exp %451 : vector<8x128xf32>
    %cst_139 = arith.constant 1.000000e+00 : f32
    %453 = vector.broadcast %cst_139 : f32 to vector<8x128xf32>
    %454 = arith.addf %453, %452 : vector<8x128xf32>
    %455 = arith.divf %453, %454 : vector<8x128xf32>
    %456 = vector.extract_strided_slice %438 {offsets = [0, 256], sizes = [8, 128], strides = [1, 1]} : vector<8x512xf32> to vector<8x128xf32>
    %457 = math.tanh %456 : vector<8x128xf32>
    %458 = vector.extract_strided_slice %438 {offsets = [0, 384], sizes = [8, 128], strides = [1, 1]} : vector<8x512xf32> to vector<8x128xf32>
    %459 = arith.negf %458 : vector<8x128xf32>
    %460 = math.exp %459 : vector<8x128xf32>
    %cst_140 = arith.constant 1.000000e+00 : f32
    %461 = vector.broadcast %cst_140 : f32 to vector<8x128xf32>
    %462 = arith.addf %461, %460 : vector<8x128xf32>
    %463 = arith.divf %461, %462 : vector<8x128xf32>
    %464 = arith.mulf %455, %429 : vector<8x128xf32>
    %465 = arith.mulf %449, %457 : vector<8x128xf32>
    %466 = arith.addf %464, %465 : vector<8x128xf32>
    %467 = math.tanh %466 : vector<8x128xf32>
    %468 = arith.mulf %463, %467 : vector<8x128xf32>
    %469 = vector.extract_strided_slice %443 {offsets = [0, 0], sizes = [8, 128], strides = [1, 1]} : vector<8x512xf32> to vector<8x128xf32>
    %470 = arith.negf %469 : vector<8x128xf32>
    %471 = math.exp %470 : vector<8x128xf32>
    %cst_141 = arith.constant 1.000000e+00 : f32
    %472 = vector.broadcast %cst_141 : f32 to vector<8x128xf32>
    %473 = arith.addf %472, %471 : vector<8x128xf32>
    %474 = arith.divf %472, %473 : vector<8x128xf32>
    %475 = vector.extract_strided_slice %443 {offsets = [0, 128], sizes = [8, 128], strides = [1, 1]} : vector<8x512xf32> to vector<8x128xf32>
    %476 = arith.negf %475 : vector<8x128xf32>
    %477 = math.exp %476 : vector<8x128xf32>
    %cst_142 = arith.constant 1.000000e+00 : f32
    %478 = vector.broadcast %cst_142 : f32 to vector<8x128xf32>
    %479 = arith.addf %478, %477 : vector<8x128xf32>
    %480 = arith.divf %478, %479 : vector<8x128xf32>
    %481 = vector.extract_strided_slice %443 {offsets = [0, 256], sizes = [8, 128], strides = [1, 1]} : vector<8x512xf32> to vector<8x128xf32>
    %482 = math.tanh %481 : vector<8x128xf32>
    %483 = vector.extract_strided_slice %443 {offsets = [0, 384], sizes = [8, 128], strides = [1, 1]} : vector<8x512xf32> to vector<8x128xf32>
    %484 = arith.negf %483 : vector<8x128xf32>
    %485 = math.exp %484 : vector<8x128xf32>
    %cst_143 = arith.constant 1.000000e+00 : f32
    %486 = vector.broadcast %cst_143 : f32 to vector<8x128xf32>
    %487 = arith.addf %486, %485 : vector<8x128xf32>
    %488 = arith.divf %486, %487 : vector<8x128xf32>
    %489 = arith.mulf %480, %431 : vector<8x128xf32>
    %490 = arith.mulf %474, %482 : vector<8x128xf32>
    %491 = arith.addf %489, %490 : vector<8x128xf32>
    %492 = math.tanh %491 : vector<8x128xf32>
    %493 = arith.mulf %488, %492 : vector<8x128xf32>
    %c6_i32_144 = arith.constant 6 : i32
    %494 = vector.broadcast %c6_i32_144 : i32 to vector<8x128xi32>
    %495 = arith.cmpi sgt, %2, %494 : vector<8x128xi32>
    %c1_i32_145 = arith.constant 1 : i32
    %496 = vector.broadcast %c1_i32_145 : i32 to vector<8x128xi32>
    %497 = arith.cmpi sgt, %2, %496 : vector<8x128xi32>
    %498 = arith.select %495, %468, %428 : vector<8x128xi1>, vector<8x128xf32>
    %499 = arith.select %495, %466, %429 : vector<8x128xi1>, vector<8x128xf32>
    %500 = arith.select %497, %493, %430 : vector<8x128xi1>, vector<8x128xf32>
    %501 = arith.select %497, %491, %431 : vector<8x128xi1>, vector<8x128xf32>
    %c48_146 = arith.constant 48 : index
    %c0_147 = arith.constant 0 : index
    %502 = vector.load %arg12[%c48_146, %c0_147] : memref<64x256xf32, #tpu.memory_space<vmem>>, vector<8x128xf32>
    tpu.vector_store %arg12[%c48_146, %c0_147], %498 {strides = array<i32>} : memref<64x256xf32, #tpu.memory_space<vmem>>, vector<8x128xf32>,
    %c8_148 = arith.constant 8 : index
    %c128_149 = arith.constant 128 : index
    %503 = vector.load %arg12[%c8_148, %c128_149] : memref<64x256xf32, #tpu.memory_space<vmem>>, vector<8x128xf32>
    tpu.vector_store %arg12[%c8_148, %c128_149], %500 {strides = array<i32>} : memref<64x256xf32, #tpu.memory_space<vmem>>, vector<8x128xf32>,
    %c56_150 = arith.constant 56 : index
    %c0_151 = arith.constant 0 : index
    %504 = vector.load %arg11[%c56_150, %c0_151] : memref<64x1024xf32, #tpu.memory_space<vmem>>, vector<8x512xf32>
    %505 = arith.truncf %498 : vector<8x128xf32> to vector<8x128xbf16>
    %c0_152 = arith.constant 0 : index
    %c0_153 = arith.constant 0 : index
    %506 = vector.load %arg4[%c0_152, %c0_153] : memref<128x512xbf16, #tpu.memory_space<vmem>>, vector<128x512xbf16>
    %cst_154 = arith.constant dense<0.000000e+00> : vector<8x512xf32>
    %507 = tpu.matmul %505, %506, %cst_154 {dimension_numbers = #tpu.dot_dimension_numbers<[1], [0], [0], [1], [0, 0, 1, 1], [], []>} : vector<8x128xbf16>, vector<128x512xbf16>, vector<8x512xf32> -> vector<8x512xf32>
    %508 = arith.addf %504, %507 : vector<8x512xf32>
    %c0_155 = arith.constant 0 : index
    %c512_156 = arith.constant 512 : index
    %509 = vector.load %arg11[%c0_155, %c512_156] : memref<64x1024xf32, #tpu.memory_space<vmem>>, vector<8x512xf32>
    %510 = arith.truncf %500 : vector<8x128xf32> to vector<8x128xbf16>
    %c0_157 = arith.constant 0 : index
    %c0_158 = arith.constant 0 : index
    %511 = vector.load %arg5[%c0_157, %c0_158] : memref<128x512xbf16, #tpu.memory_space<vmem>>, vector<128x512xbf16>
    %cst_159 = arith.constant dense<0.000000e+00> : vector<8x512xf32>
    %512 = tpu.matmul %510, %511, %cst_159 {dimension_numbers = #tpu.dot_dimension_numbers<[1], [0], [0], [1], [0, 0, 1, 1], [], []>} : vector<8x128xbf16>, vector<128x512xbf16>, vector<8x512xf32> -> vector<8x512xf32>
    %513 = arith.addf %509, %512 : vector<8x512xf32>
    %514 = vector.extract_strided_slice %508 {offsets = [0, 0], sizes = [8, 128], strides = [1, 1]} : vector<8x512xf32> to vector<8x128xf32>
    %515 = arith.negf %514 : vector<8x128xf32>
    %516 = math.exp %515 : vector<8x128xf32>
    %cst_160 = arith.constant 1.000000e+00 : f32
    %517 = vector.broadcast %cst_160 : f32 to vector<8x128xf32>
    %518 = arith.addf %517, %516 : vector<8x128xf32>
    %519 = arith.divf %517, %518 : vector<8x128xf32>
    %520 = vector.extract_strided_slice %508 {offsets = [0, 128], sizes = [8, 128], strides = [1, 1]} : vector<8x512xf32> to vector<8x128xf32>
    %521 = arith.negf %520 : vector<8x128xf32>
    %522 = math.exp %521 : vector<8x128xf32>
    %cst_161 = arith.constant 1.000000e+00 : f32
    %523 = vector.broadcast %cst_161 : f32 to vector<8x128xf32>
    %524 = arith.addf %523, %522 : vector<8x128xf32>
    %525 = arith.divf %523, %524 : vector<8x128xf32>
    %526 = vector.extract_strided_slice %508 {offsets = [0, 256], sizes = [8, 128], strides = [1, 1]} : vector<8x512xf32> to vector<8x128xf32>
    %527 = math.tanh %526 : vector<8x128xf32>
    %528 = vector.extract_strided_slice %508 {offsets = [0, 384], sizes = [8, 128], strides = [1, 1]} : vector<8x512xf32> to vector<8x128xf32>
    %529 = arith.negf %528 : vector<8x128xf32>
    %530 = math.exp %529 : vector<8x128xf32>
    %cst_162 = arith.constant 1.000000e+00 : f32
    %531 = vector.broadcast %cst_162 : f32 to vector<8x128xf32>
    %532 = arith.addf %531, %530 : vector<8x128xf32>
    %533 = arith.divf %531, %532 : vector<8x128xf32>
    %534 = arith.mulf %525, %499 : vector<8x128xf32>
    %535 = arith.mulf %519, %527 : vector<8x128xf32>
    %536 = arith.addf %534, %535 : vector<8x128xf32>
    %537 = math.tanh %536 : vector<8x128xf32>
    %538 = arith.mulf %533, %537 : vector<8x128xf32>
    %539 = vector.extract_strided_slice %513 {offsets = [0, 0], sizes = [8, 128], strides = [1, 1]} : vector<8x512xf32> to vector<8x128xf32>
    %540 = arith.negf %539 : vector<8x128xf32>
    %541 = math.exp %540 : vector<8x128xf32>
    %cst_163 = arith.constant 1.000000e+00 : f32
    %542 = vector.broadcast %cst_163 : f32 to vector<8x128xf32>
    %543 = arith.addf %542, %541 : vector<8x128xf32>
    %544 = arith.divf %542, %543 : vector<8x128xf32>
    %545 = vector.extract_strided_slice %513 {offsets = [0, 128], sizes = [8, 128], strides = [1, 1]} : vector<8x512xf32> to vector<8x128xf32>
    %546 = arith.negf %545 : vector<8x128xf32>
    %547 = math.exp %546 : vector<8x128xf32>
    %cst_164 = arith.constant 1.000000e+00 : f32
    %548 = vector.broadcast %cst_164 : f32 to vector<8x128xf32>
    %549 = arith.addf %548, %547 : vector<8x128xf32>
    %550 = arith.divf %548, %549 : vector<8x128xf32>
    %551 = vector.extract_strided_slice %513 {offsets = [0, 256], sizes = [8, 128], strides = [1, 1]} : vector<8x512xf32> to vector<8x128xf32>
    %552 = math.tanh %551 : vector<8x128xf32>
    %553 = vector.extract_strided_slice %513 {offsets = [0, 384], sizes = [8, 128], strides = [1, 1]} : vector<8x512xf32> to vector<8x128xf32>
    %554 = arith.negf %553 : vector<8x128xf32>
    %555 = math.exp %554 : vector<8x128xf32>
    %cst_165 = arith.constant 1.000000e+00 : f32
    %556 = vector.broadcast %cst_165 : f32 to vector<8x128xf32>
    %557 = arith.addf %556, %555 : vector<8x128xf32>
    %558 = arith.divf %556, %557 : vector<8x128xf32>
    %559 = arith.mulf %550, %501 : vector<8x128xf32>
    %560 = arith.mulf %544, %552 : vector<8x128xf32>
    %561 = arith.addf %559, %560 : vector<8x128xf32>
    %562 = math.tanh %561 : vector<8x128xf32>
    %563 = arith.mulf %558, %562 : vector<8x128xf32>
    %c7_i32_166 = arith.constant 7 : i32
    %564 = vector.broadcast %c7_i32_166 : i32 to vector<8x128xi32>
    %565 = arith.cmpi sgt, %2, %564 : vector<8x128xi32>
    %c0_i32_167 = arith.constant 0 : i32
    %566 = vector.broadcast %c0_i32_167 : i32 to vector<8x128xi32>
    %567 = arith.cmpi sgt, %2, %566 : vector<8x128xi32>
    %568 = arith.select %565, %538, %498 : vector<8x128xi1>, vector<8x128xf32>
    %569 = arith.select %567, %563, %500 : vector<8x128xi1>, vector<8x128xf32>
    %c56_168 = arith.constant 56 : index
    %c0_169 = arith.constant 0 : index
    %570 = vector.load %arg12[%c56_168, %c0_169] : memref<64x256xf32, #tpu.memory_space<vmem>>, vector<8x128xf32>
    tpu.vector_store %arg12[%c56_168, %c0_169], %568 {strides = array<i32>} : memref<64x256xf32, #tpu.memory_space<vmem>>, vector<8x128xf32>,
    %c0_170 = arith.constant 0 : index
    %c128_171 = arith.constant 128 : index
    %571 = vector.load %arg12[%c0_170, %c128_171] : memref<64x256xf32, #tpu.memory_space<vmem>>, vector<8x128xf32>
    tpu.vector_store %arg12[%c0_170, %c128_171], %569 {strides = array<i32>} : memref<64x256xf32, #tpu.memory_space<vmem>>, vector<8x128xf32>,
    %c0_172 = arith.constant 0 : index
    %c0_173 = arith.constant 0 : index
    %572 = vector.load %arg12[%c0_172, %c0_173] : memref<64x256xf32, #tpu.memory_space<vmem>>, vector<64x256xf32>
    %573 = arith.truncf %572 : vector<64x256xf32> to vector<64x256xbf16>
    %c0_174 = arith.constant 0 : index
    %c0_175 = arith.constant 0 : index
    %574 = vector.load %arg6[%c0_174, %c0_175] : memref<256x1024xbf16, #tpu.memory_space<vmem>>, vector<256x1024xbf16>
    %cst_176 = arith.constant dense<0.000000e+00> : vector<64x1024xf32>
    %575 = tpu.matmul %573, %574, %cst_176 {dimension_numbers = #tpu.dot_dimension_numbers<[1], [0], [0], [1], [0, 0, 1, 1], [], []>} : vector<64x256xbf16>, vector<256x1024xbf16>, vector<64x1024xf32> -> vector<64x1024xf32>
    %c0_177 = arith.constant 0 : index
    %c0_178 = arith.constant 0 : index
    %576 = vector.load %arg7[%c0_177, %c0_178] : memref<1x1024xf32, #tpu.memory_space<vmem>>, vector<1x1024xf32>
    %577 = vector.broadcast %576 : vector<1x1024xf32> to vector<64x1024xf32>
    %578 = arith.addf %575, %577 : vector<64x1024xf32>
    %c0_179 = arith.constant 0 : index
    %c0_180 = arith.constant 0 : index
    %579 = vector.load %arg11[%c0_179, %c0_180] : memref<64x1024xf32, #tpu.memory_space<vmem>>, vector<64x1024xf32>
    tpu.vector_store %arg11[%c0_179, %c0_180], %578 {strides = array<i32>} : memref<64x1024xf32, #tpu.memory_space<vmem>>, vector<64x1024xf32>,
    %cst_181 = arith.constant 0.000000e+00 : f32
    %580 = vector.broadcast %cst_181 : f32 to vector<8x128xf32>
    %cst_182 = arith.constant 0.000000e+00 : f32
    %581 = vector.broadcast %cst_182 : f32 to vector<8x128xf32>
    %cst_183 = arith.constant 0.000000e+00 : f32
    %582 = vector.broadcast %cst_183 : f32 to vector<8x128xf32>
    %cst_184 = arith.constant 0.000000e+00 : f32
    %583 = vector.broadcast %cst_184 : f32 to vector<8x128xf32>
    %c0_185 = arith.constant 0 : index
    %c0_186 = arith.constant 0 : index
    %584 = vector.load %arg11[%c0_185, %c0_186] : memref<64x1024xf32, #tpu.memory_space<vmem>>, vector<8x512xf32>
    %585 = arith.truncf %580 : vector<8x128xf32> to vector<8x128xbf16>
    %c0_187 = arith.constant 0 : index
    %c0_188 = arith.constant 0 : index
    %586 = vector.load %arg8[%c0_187, %c0_188] : memref<128x512xbf16, #tpu.memory_space<vmem>>, vector<128x512xbf16>
    %cst_189 = arith.constant dense<0.000000e+00> : vector<8x512xf32>
    %587 = tpu.matmul %585, %586, %cst_189 {dimension_numbers = #tpu.dot_dimension_numbers<[1], [0], [0], [1], [0, 0, 1, 1], [], []>} : vector<8x128xbf16>, vector<128x512xbf16>, vector<8x512xf32> -> vector<8x512xf32>
    %588 = arith.addf %584, %587 : vector<8x512xf32>
    %c56_190 = arith.constant 56 : index
    %c512_191 = arith.constant 512 : index
    %589 = vector.load %arg11[%c56_190, %c512_191] : memref<64x1024xf32, #tpu.memory_space<vmem>>, vector<8x512xf32>
    %590 = arith.truncf %582 : vector<8x128xf32> to vector<8x128xbf16>
    %c0_192 = arith.constant 0 : index
    %c0_193 = arith.constant 0 : index
    %591 = vector.load %arg9[%c0_192, %c0_193] : memref<128x512xbf16, #tpu.memory_space<vmem>>, vector<128x512xbf16>
    %cst_194 = arith.constant dense<0.000000e+00> : vector<8x512xf32>
    %592 = tpu.matmul %590, %591, %cst_194 {dimension_numbers = #tpu.dot_dimension_numbers<[1], [0], [0], [1], [0, 0, 1, 1], [], []>} : vector<8x128xbf16>, vector<128x512xbf16>, vector<8x512xf32> -> vector<8x512xf32>
    %593 = arith.addf %589, %592 : vector<8x512xf32>
    %594 = vector.extract_strided_slice %588 {offsets = [0, 0], sizes = [8, 128], strides = [1, 1]} : vector<8x512xf32> to vector<8x128xf32>
    %595 = arith.negf %594 : vector<8x128xf32>
    %596 = math.exp %595 : vector<8x128xf32>
    %cst_195 = arith.constant 1.000000e+00 : f32
    %597 = vector.broadcast %cst_195 : f32 to vector<8x128xf32>
    %598 = arith.addf %597, %596 : vector<8x128xf32>
    %599 = arith.divf %597, %598 : vector<8x128xf32>
    %600 = vector.extract_strided_slice %588 {offsets = [0, 128], sizes = [8, 128], strides = [1, 1]} : vector<8x512xf32> to vector<8x128xf32>
    %601 = arith.negf %600 : vector<8x128xf32>
    %602 = math.exp %601 : vector<8x128xf32>
    %cst_196 = arith.constant 1.000000e+00 : f32
    %603 = vector.broadcast %cst_196 : f32 to vector<8x128xf32>
    %604 = arith.addf %603, %602 : vector<8x128xf32>
    %605 = arith.divf %603, %604 : vector<8x128xf32>
    %606 = vector.extract_strided_slice %588 {offsets = [0, 256], sizes = [8, 128], strides = [1, 1]} : vector<8x512xf32> to vector<8x128xf32>
    %607 = math.tanh %606 : vector<8x128xf32>
    %608 = vector.extract_strided_slice %588 {offsets = [0, 384], sizes = [8, 128], strides = [1, 1]} : vector<8x512xf32> to vector<8x128xf32>
    %609 = arith.negf %608 : vector<8x128xf32>
    %610 = math.exp %609 : vector<8x128xf32>
    %cst_197 = arith.constant 1.000000e+00 : f32
    %611 = vector.broadcast %cst_197 : f32 to vector<8x128xf32>
    %612 = arith.addf %611, %610 : vector<8x128xf32>
    %613 = arith.divf %611, %612 : vector<8x128xf32>
    %614 = arith.mulf %605, %581 : vector<8x128xf32>
    %615 = arith.mulf %599, %607 : vector<8x128xf32>
    %616 = arith.addf %614, %615 : vector<8x128xf32>
    %617 = math.tanh %616 : vector<8x128xf32>
    %618 = arith.mulf %613, %617 : vector<8x128xf32>
    %619 = vector.extract_strided_slice %593 {offsets = [0, 0], sizes = [8, 128], strides = [1, 1]} : vector<8x512xf32> to vector<8x128xf32>
    %620 = arith.negf %619 : vector<8x128xf32>
    %621 = math.exp %620 : vector<8x128xf32>
    %cst_198 = arith.constant 1.000000e+00 : f32
    %622 = vector.broadcast %cst_198 : f32 to vector<8x128xf32>
    %623 = arith.addf %622, %621 : vector<8x128xf32>
    %624 = arith.divf %622, %623 : vector<8x128xf32>
    %625 = vector.extract_strided_slice %593 {offsets = [0, 128], sizes = [8, 128], strides = [1, 1]} : vector<8x512xf32> to vector<8x128xf32>
    %626 = arith.negf %625 : vector<8x128xf32>
    %627 = math.exp %626 : vector<8x128xf32>
    %cst_199 = arith.constant 1.000000e+00 : f32
    %628 = vector.broadcast %cst_199 : f32 to vector<8x128xf32>
    %629 = arith.addf %628, %627 : vector<8x128xf32>
    %630 = arith.divf %628, %629 : vector<8x128xf32>
    %631 = vector.extract_strided_slice %593 {offsets = [0, 256], sizes = [8, 128], strides = [1, 1]} : vector<8x512xf32> to vector<8x128xf32>
    %632 = math.tanh %631 : vector<8x128xf32>
    %633 = vector.extract_strided_slice %593 {offsets = [0, 384], sizes = [8, 128], strides = [1, 1]} : vector<8x512xf32> to vector<8x128xf32>
    %634 = arith.negf %633 : vector<8x128xf32>
    %635 = math.exp %634 : vector<8x128xf32>
    %cst_200 = arith.constant 1.000000e+00 : f32
    %636 = vector.broadcast %cst_200 : f32 to vector<8x128xf32>
    %637 = arith.addf %636, %635 : vector<8x128xf32>
    %638 = arith.divf %636, %637 : vector<8x128xf32>
    %639 = arith.mulf %630, %583 : vector<8x128xf32>
    %640 = arith.mulf %624, %632 : vector<8x128xf32>
    %641 = arith.addf %639, %640 : vector<8x128xf32>
    %642 = math.tanh %641 : vector<8x128xf32>
    %643 = arith.mulf %638, %642 : vector<8x128xf32>
    %c0_i32_201 = arith.constant 0 : i32
    %644 = vector.broadcast %c0_i32_201 : i32 to vector<8x128xi32>
    %645 = arith.cmpi sgt, %2, %644 : vector<8x128xi32>
    %c7_i32_202 = arith.constant 7 : i32
    %646 = vector.broadcast %c7_i32_202 : i32 to vector<8x128xi32>
    %647 = arith.cmpi sgt, %2, %646 : vector<8x128xi32>
    %648 = arith.select %645, %618, %580 : vector<8x128xi1>, vector<8x128xf32>
    %649 = arith.select %645, %616, %581 : vector<8x128xi1>, vector<8x128xf32>
    %650 = arith.select %647, %643, %582 : vector<8x128xi1>, vector<8x128xf32>
    %651 = arith.select %647, %641, %583 : vector<8x128xi1>, vector<8x128xf32>
    %c8_203 = arith.constant 8 : index
    %c0_204 = arith.constant 0 : index
    %652 = vector.load %arg11[%c8_203, %c0_204] : memref<64x1024xf32, #tpu.memory_space<vmem>>, vector<8x512xf32>
    %653 = arith.truncf %648 : vector<8x128xf32> to vector<8x128xbf16>
    %c0_205 = arith.constant 0 : index
    %c0_206 = arith.constant 0 : index
    %654 = vector.load %arg8[%c0_205, %c0_206] : memref<128x512xbf16, #tpu.memory_space<vmem>>, vector<128x512xbf16>
    %cst_207 = arith.constant dense<0.000000e+00> : vector<8x512xf32>
    %655 = tpu.matmul %653, %654, %cst_207 {dimension_numbers = #tpu.dot_dimension_numbers<[1], [0], [0], [1], [0, 0, 1, 1], [], []>} : vector<8x128xbf16>, vector<128x512xbf16>, vector<8x512xf32> -> vector<8x512xf32>
    %656 = arith.addf %652, %655 : vector<8x512xf32>
    %c48_208 = arith.constant 48 : index
    %c512_209 = arith.constant 512 : index
    %657 = vector.load %arg11[%c48_208, %c512_209] : memref<64x1024xf32, #tpu.memory_space<vmem>>, vector<8x512xf32>
    %658 = arith.truncf %650 : vector<8x128xf32> to vector<8x128xbf16>
    %c0_210 = arith.constant 0 : index
    %c0_211 = arith.constant 0 : index
    %659 = vector.load %arg9[%c0_210, %c0_211] : memref<128x512xbf16, #tpu.memory_space<vmem>>, vector<128x512xbf16>
    %cst_212 = arith.constant dense<0.000000e+00> : vector<8x512xf32>
    %660 = tpu.matmul %658, %659, %cst_212 {dimension_numbers = #tpu.dot_dimension_numbers<[1], [0], [0], [1], [0, 0, 1, 1], [], []>} : vector<8x128xbf16>, vector<128x512xbf16>, vector<8x512xf32> -> vector<8x512xf32>
    %661 = arith.addf %657, %660 : vector<8x512xf32>
    %662 = vector.extract_strided_slice %656 {offsets = [0, 0], sizes = [8, 128], strides = [1, 1]} : vector<8x512xf32> to vector<8x128xf32>
    %663 = arith.negf %662 : vector<8x128xf32>
    %664 = math.exp %663 : vector<8x128xf32>
    %cst_213 = arith.constant 1.000000e+00 : f32
    %665 = vector.broadcast %cst_213 : f32 to vector<8x128xf32>
    %666 = arith.addf %665, %664 : vector<8x128xf32>
    %667 = arith.divf %665, %666 : vector<8x128xf32>
    %668 = vector.extract_strided_slice %656 {offsets = [0, 128], sizes = [8, 128], strides = [1, 1]} : vector<8x512xf32> to vector<8x128xf32>
    %669 = arith.negf %668 : vector<8x128xf32>
    %670 = math.exp %669 : vector<8x128xf32>
    %cst_214 = arith.constant 1.000000e+00 : f32
    %671 = vector.broadcast %cst_214 : f32 to vector<8x128xf32>
    %672 = arith.addf %671, %670 : vector<8x128xf32>
    %673 = arith.divf %671, %672 : vector<8x128xf32>
    %674 = vector.extract_strided_slice %656 {offsets = [0, 256], sizes = [8, 128], strides = [1, 1]} : vector<8x512xf32> to vector<8x128xf32>
    %675 = math.tanh %674 : vector<8x128xf32>
    %676 = vector.extract_strided_slice %656 {offsets = [0, 384], sizes = [8, 128], strides = [1, 1]} : vector<8x512xf32> to vector<8x128xf32>
    %677 = arith.negf %676 : vector<8x128xf32>
    %678 = math.exp %677 : vector<8x128xf32>
    %cst_215 = arith.constant 1.000000e+00 : f32
    %679 = vector.broadcast %cst_215 : f32 to vector<8x128xf32>
    %680 = arith.addf %679, %678 : vector<8x128xf32>
    %681 = arith.divf %679, %680 : vector<8x128xf32>
    %682 = arith.mulf %673, %649 : vector<8x128xf32>
    %683 = arith.mulf %667, %675 : vector<8x128xf32>
    %684 = arith.addf %682, %683 : vector<8x128xf32>
    %685 = math.tanh %684 : vector<8x128xf32>
    %686 = arith.mulf %681, %685 : vector<8x128xf32>
    %687 = vector.extract_strided_slice %661 {offsets = [0, 0], sizes = [8, 128], strides = [1, 1]} : vector<8x512xf32> to vector<8x128xf32>
    %688 = arith.negf %687 : vector<8x128xf32>
    %689 = math.exp %688 : vector<8x128xf32>
    %cst_216 = arith.constant 1.000000e+00 : f32
    %690 = vector.broadcast %cst_216 : f32 to vector<8x128xf32>
    %691 = arith.addf %690, %689 : vector<8x128xf32>
    %692 = arith.divf %690, %691 : vector<8x128xf32>
    %693 = vector.extract_strided_slice %661 {offsets = [0, 128], sizes = [8, 128], strides = [1, 1]} : vector<8x512xf32> to vector<8x128xf32>
    %694 = arith.negf %693 : vector<8x128xf32>
    %695 = math.exp %694 : vector<8x128xf32>
    %cst_217 = arith.constant 1.000000e+00 : f32
    %696 = vector.broadcast %cst_217 : f32 to vector<8x128xf32>
    %697 = arith.addf %696, %695 : vector<8x128xf32>
    %698 = arith.divf %696, %697 : vector<8x128xf32>
    %699 = vector.extract_strided_slice %661 {offsets = [0, 256], sizes = [8, 128], strides = [1, 1]} : vector<8x512xf32> to vector<8x128xf32>
    %700 = math.tanh %699 : vector<8x128xf32>
    %701 = vector.extract_strided_slice %661 {offsets = [0, 384], sizes = [8, 128], strides = [1, 1]} : vector<8x512xf32> to vector<8x128xf32>
    %702 = arith.negf %701 : vector<8x128xf32>
    %703 = math.exp %702 : vector<8x128xf32>
    %cst_218 = arith.constant 1.000000e+00 : f32
    %704 = vector.broadcast %cst_218 : f32 to vector<8x128xf32>
    %705 = arith.addf %704, %703 : vector<8x128xf32>
    %706 = arith.divf %704, %705 : vector<8x128xf32>
    %707 = arith.mulf %698, %651 : vector<8x128xf32>
    %708 = arith.mulf %692, %700 : vector<8x128xf32>
    %709 = arith.addf %707, %708 : vector<8x128xf32>
    %710 = math.tanh %709 : vector<8x128xf32>
    %711 = arith.mulf %706, %710 : vector<8x128xf32>
    %c1_i32_219 = arith.constant 1 : i32
    %712 = vector.broadcast %c1_i32_219 : i32 to vector<8x128xi32>
    %713 = arith.cmpi sgt, %2, %712 : vector<8x128xi32>
    %c6_i32_220 = arith.constant 6 : i32
    %714 = vector.broadcast %c6_i32_220 : i32 to vector<8x128xi32>
    %715 = arith.cmpi sgt, %2, %714 : vector<8x128xi32>
    %716 = arith.select %713, %686, %648 : vector<8x128xi1>, vector<8x128xf32>
    %717 = arith.select %713, %684, %649 : vector<8x128xi1>, vector<8x128xf32>
    %718 = arith.select %715, %711, %650 : vector<8x128xi1>, vector<8x128xf32>
    %719 = arith.select %715, %709, %651 : vector<8x128xi1>, vector<8x128xf32>
    %c16_221 = arith.constant 16 : index
    %c0_222 = arith.constant 0 : index
    %720 = vector.load %arg11[%c16_221, %c0_222] : memref<64x1024xf32, #tpu.memory_space<vmem>>, vector<8x512xf32>
    %721 = arith.truncf %716 : vector<8x128xf32> to vector<8x128xbf16>
    %c0_223 = arith.constant 0 : index
    %c0_224 = arith.constant 0 : index
    %722 = vector.load %arg8[%c0_223, %c0_224] : memref<128x512xbf16, #tpu.memory_space<vmem>>, vector<128x512xbf16>
    %cst_225 = arith.constant dense<0.000000e+00> : vector<8x512xf32>
    %723 = tpu.matmul %721, %722, %cst_225 {dimension_numbers = #tpu.dot_dimension_numbers<[1], [0], [0], [1], [0, 0, 1, 1], [], []>} : vector<8x128xbf16>, vector<128x512xbf16>, vector<8x512xf32> -> vector<8x512xf32>
    %724 = arith.addf %720, %723 : vector<8x512xf32>
    %c40_226 = arith.constant 40 : index
    %c512_227 = arith.constant 512 : index
    %725 = vector.load %arg11[%c40_226, %c512_227] : memref<64x1024xf32, #tpu.memory_space<vmem>>, vector<8x512xf32>
    %726 = arith.truncf %718 : vector<8x128xf32> to vector<8x128xbf16>
    %c0_228 = arith.constant 0 : index
    %c0_229 = arith.constant 0 : index
    %727 = vector.load %arg9[%c0_228, %c0_229] : memref<128x512xbf16, #tpu.memory_space<vmem>>, vector<128x512xbf16>
    %cst_230 = arith.constant dense<0.000000e+00> : vector<8x512xf32>
    %728 = tpu.matmul %726, %727, %cst_230 {dimension_numbers = #tpu.dot_dimension_numbers<[1], [0], [0], [1], [0, 0, 1, 1], [], []>} : vector<8x128xbf16>, vector<128x512xbf16>, vector<8x512xf32> -> vector<8x512xf32>
    %729 = arith.addf %725, %728 : vector<8x512xf32>
    %730 = vector.extract_strided_slice %724 {offsets = [0, 0], sizes = [8, 128], strides = [1, 1]} : vector<8x512xf32> to vector<8x128xf32>
    %731 = arith.negf %730 : vector<8x128xf32>
    %732 = math.exp %731 : vector<8x128xf32>
    %cst_231 = arith.constant 1.000000e+00 : f32
    %733 = vector.broadcast %cst_231 : f32 to vector<8x128xf32>
    %734 = arith.addf %733, %732 : vector<8x128xf32>
    %735 = arith.divf %733, %734 : vector<8x128xf32>
    %736 = vector.extract_strided_slice %724 {offsets = [0, 128], sizes = [8, 128], strides = [1, 1]} : vector<8x512xf32> to vector<8x128xf32>
    %737 = arith.negf %736 : vector<8x128xf32>
    %738 = math.exp %737 : vector<8x128xf32>
    %cst_232 = arith.constant 1.000000e+00 : f32
    %739 = vector.broadcast %cst_232 : f32 to vector<8x128xf32>
    %740 = arith.addf %739, %738 : vector<8x128xf32>
    %741 = arith.divf %739, %740 : vector<8x128xf32>
    %742 = vector.extract_strided_slice %724 {offsets = [0, 256], sizes = [8, 128], strides = [1, 1]} : vector<8x512xf32> to vector<8x128xf32>
    %743 = math.tanh %742 : vector<8x128xf32>
    %744 = vector.extract_strided_slice %724 {offsets = [0, 384], sizes = [8, 128], strides = [1, 1]} : vector<8x512xf32> to vector<8x128xf32>
    %745 = arith.negf %744 : vector<8x128xf32>
    %746 = math.exp %745 : vector<8x128xf32>
    %cst_233 = arith.constant 1.000000e+00 : f32
    %747 = vector.broadcast %cst_233 : f32 to vector<8x128xf32>
    %748 = arith.addf %747, %746 : vector<8x128xf32>
    %749 = arith.divf %747, %748 : vector<8x128xf32>
    %750 = arith.mulf %741, %717 : vector<8x128xf32>
    %751 = arith.mulf %735, %743 : vector<8x128xf32>
    %752 = arith.addf %750, %751 : vector<8x128xf32>
    %753 = math.tanh %752 : vector<8x128xf32>
    %754 = arith.mulf %749, %753 : vector<8x128xf32>
    %755 = vector.extract_strided_slice %729 {offsets = [0, 0], sizes = [8, 128], strides = [1, 1]} : vector<8x512xf32> to vector<8x128xf32>
    %756 = arith.negf %755 : vector<8x128xf32>
    %757 = math.exp %756 : vector<8x128xf32>
    %cst_234 = arith.constant 1.000000e+00 : f32
    %758 = vector.broadcast %cst_234 : f32 to vector<8x128xf32>
    %759 = arith.addf %758, %757 : vector<8x128xf32>
    %760 = arith.divf %758, %759 : vector<8x128xf32>
    %761 = vector.extract_strided_slice %729 {offsets = [0, 128], sizes = [8, 128], strides = [1, 1]} : vector<8x512xf32> to vector<8x128xf32>
    %762 = arith.negf %761 : vector<8x128xf32>
    %763 = math.exp %762 : vector<8x128xf32>
    %cst_235 = arith.constant 1.000000e+00 : f32
    %764 = vector.broadcast %cst_235 : f32 to vector<8x128xf32>
    %765 = arith.addf %764, %763 : vector<8x128xf32>
    %766 = arith.divf %764, %765 : vector<8x128xf32>
    %767 = vector.extract_strided_slice %729 {offsets = [0, 256], sizes = [8, 128], strides = [1, 1]} : vector<8x512xf32> to vector<8x128xf32>
    %768 = math.tanh %767 : vector<8x128xf32>
    %769 = vector.extract_strided_slice %729 {offsets = [0, 384], sizes = [8, 128], strides = [1, 1]} : vector<8x512xf32> to vector<8x128xf32>
    %770 = arith.negf %769 : vector<8x128xf32>
    %771 = math.exp %770 : vector<8x128xf32>
    %cst_236 = arith.constant 1.000000e+00 : f32
    %772 = vector.broadcast %cst_236 : f32 to vector<8x128xf32>
    %773 = arith.addf %772, %771 : vector<8x128xf32>
    %774 = arith.divf %772, %773 : vector<8x128xf32>
    %775 = arith.mulf %766, %719 : vector<8x128xf32>
    %776 = arith.mulf %760, %768 : vector<8x128xf32>
    %777 = arith.addf %775, %776 : vector<8x128xf32>
    %778 = math.tanh %777 : vector<8x128xf32>
    %779 = arith.mulf %774, %778 : vector<8x128xf32>
    %c2_i32_237 = arith.constant 2 : i32
    %780 = vector.broadcast %c2_i32_237 : i32 to vector<8x128xi32>
    %781 = arith.cmpi sgt, %2, %780 : vector<8x128xi32>
    %c5_i32_238 = arith.constant 5 : i32
    %782 = vector.broadcast %c5_i32_238 : i32 to vector<8x128xi32>
    %783 = arith.cmpi sgt, %2, %782 : vector<8x128xi32>
    %784 = arith.select %781, %754, %716 : vector<8x128xi1>, vector<8x128xf32>
    %785 = arith.select %781, %752, %717 : vector<8x128xi1>, vector<8x128xf32>
    %786 = arith.select %783, %779, %718 : vector<8x128xi1>, vector<8x128xf32>
    %787 = arith.select %783, %777, %719 : vector<8x128xi1>, vector<8x128xf32>
    %c24_239 = arith.constant 24 : index
    %c0_240 = arith.constant 0 : index
    %788 = vector.load %arg11[%c24_239, %c0_240] : memref<64x1024xf32, #tpu.memory_space<vmem>>, vector<8x512xf32>
    %789 = arith.truncf %784 : vector<8x128xf32> to vector<8x128xbf16>
    %c0_241 = arith.constant 0 : index
    %c0_242 = arith.constant 0 : index
    %790 = vector.load %arg8[%c0_241, %c0_242] : memref<128x512xbf16, #tpu.memory_space<vmem>>, vector<128x512xbf16>
    %cst_243 = arith.constant dense<0.000000e+00> : vector<8x512xf32>
    %791 = tpu.matmul %789, %790, %cst_243 {dimension_numbers = #tpu.dot_dimension_numbers<[1], [0], [0], [1], [0, 0, 1, 1], [], []>} : vector<8x128xbf16>, vector<128x512xbf16>, vector<8x512xf32> -> vector<8x512xf32>
    %792 = arith.addf %788, %791 : vector<8x512xf32>
    %c32_244 = arith.constant 32 : index
    %c512_245 = arith.constant 512 : index
    %793 = vector.load %arg11[%c32_244, %c512_245] : memref<64x1024xf32, #tpu.memory_space<vmem>>, vector<8x512xf32>
    %794 = arith.truncf %786 : vector<8x128xf32> to vector<8x128xbf16>
    %c0_246 = arith.constant 0 : index
    %c0_247 = arith.constant 0 : index
    %795 = vector.load %arg9[%c0_246, %c0_247] : memref<128x512xbf16, #tpu.memory_space<vmem>>, vector<128x512xbf16>
    %cst_248 = arith.constant dense<0.000000e+00> : vector<8x512xf32>
    %796 = tpu.matmul %794, %795, %cst_248 {dimension_numbers = #tpu.dot_dimension_numbers<[1], [0], [0], [1], [0, 0, 1, 1], [], []>} : vector<8x128xbf16>, vector<128x512xbf16>, vector<8x512xf32> -> vector<8x512xf32>
    %797 = arith.addf %793, %796 : vector<8x512xf32>
    %798 = vector.extract_strided_slice %792 {offsets = [0, 0], sizes = [8, 128], strides = [1, 1]} : vector<8x512xf32> to vector<8x128xf32>
    %799 = arith.negf %798 : vector<8x128xf32>
    %800 = math.exp %799 : vector<8x128xf32>
    %cst_249 = arith.constant 1.000000e+00 : f32
    %801 = vector.broadcast %cst_249 : f32 to vector<8x128xf32>
    %802 = arith.addf %801, %800 : vector<8x128xf32>
    %803 = arith.divf %801, %802 : vector<8x128xf32>
    %804 = vector.extract_strided_slice %792 {offsets = [0, 128], sizes = [8, 128], strides = [1, 1]} : vector<8x512xf32> to vector<8x128xf32>
    %805 = arith.negf %804 : vector<8x128xf32>
    %806 = math.exp %805 : vector<8x128xf32>
    %cst_250 = arith.constant 1.000000e+00 : f32
    %807 = vector.broadcast %cst_250 : f32 to vector<8x128xf32>
    %808 = arith.addf %807, %806 : vector<8x128xf32>
    %809 = arith.divf %807, %808 : vector<8x128xf32>
    %810 = vector.extract_strided_slice %792 {offsets = [0, 256], sizes = [8, 128], strides = [1, 1]} : vector<8x512xf32> to vector<8x128xf32>
    %811 = math.tanh %810 : vector<8x128xf32>
    %812 = vector.extract_strided_slice %792 {offsets = [0, 384], sizes = [8, 128], strides = [1, 1]} : vector<8x512xf32> to vector<8x128xf32>
    %813 = arith.negf %812 : vector<8x128xf32>
    %814 = math.exp %813 : vector<8x128xf32>
    %cst_251 = arith.constant 1.000000e+00 : f32
    %815 = vector.broadcast %cst_251 : f32 to vector<8x128xf32>
    %816 = arith.addf %815, %814 : vector<8x128xf32>
    %817 = arith.divf %815, %816 : vector<8x128xf32>
    %818 = arith.mulf %809, %785 : vector<8x128xf32>
    %819 = arith.mulf %803, %811 : vector<8x128xf32>
    %820 = arith.addf %818, %819 : vector<8x128xf32>
    %821 = math.tanh %820 : vector<8x128xf32>
    %822 = arith.mulf %817, %821 : vector<8x128xf32>
    %823 = vector.extract_strided_slice %797 {offsets = [0, 0], sizes = [8, 128], strides = [1, 1]} : vector<8x512xf32> to vector<8x128xf32>
    %824 = arith.negf %823 : vector<8x128xf32>
    %825 = math.exp %824 : vector<8x128xf32>
    %cst_252 = arith.constant 1.000000e+00 : f32
    %826 = vector.broadcast %cst_252 : f32 to vector<8x128xf32>
    %827 = arith.addf %826, %825 : vector<8x128xf32>
    %828 = arith.divf %826, %827 : vector<8x128xf32>
    %829 = vector.extract_strided_slice %797 {offsets = [0, 128], sizes = [8, 128], strides = [1, 1]} : vector<8x512xf32> to vector<8x128xf32>
    %830 = arith.negf %829 : vector<8x128xf32>
    %831 = math.exp %830 : vector<8x128xf32>
    %cst_253 = arith.constant 1.000000e+00 : f32
    %832 = vector.broadcast %cst_253 : f32 to vector<8x128xf32>
    %833 = arith.addf %832, %831 : vector<8x128xf32>
    %834 = arith.divf %832, %833 : vector<8x128xf32>
    %835 = vector.extract_strided_slice %797 {offsets = [0, 256], sizes = [8, 128], strides = [1, 1]} : vector<8x512xf32> to vector<8x128xf32>
    %836 = math.tanh %835 : vector<8x128xf32>
    %837 = vector.extract_strided_slice %797 {offsets = [0, 384], sizes = [8, 128], strides = [1, 1]} : vector<8x512xf32> to vector<8x128xf32>
    %838 = arith.negf %837 : vector<8x128xf32>
    %839 = math.exp %838 : vector<8x128xf32>
    %cst_254 = arith.constant 1.000000e+00 : f32
    %840 = vector.broadcast %cst_254 : f32 to vector<8x128xf32>
    %841 = arith.addf %840, %839 : vector<8x128xf32>
    %842 = arith.divf %840, %841 : vector<8x128xf32>
    %843 = arith.mulf %834, %787 : vector<8x128xf32>
    %844 = arith.mulf %828, %836 : vector<8x128xf32>
    %845 = arith.addf %843, %844 : vector<8x128xf32>
    %846 = math.tanh %845 : vector<8x128xf32>
    %847 = arith.mulf %842, %846 : vector<8x128xf32>
    %c3_i32_255 = arith.constant 3 : i32
    %848 = vector.broadcast %c3_i32_255 : i32 to vector<8x128xi32>
    %849 = arith.cmpi sgt, %2, %848 : vector<8x128xi32>
    %c4_i32_256 = arith.constant 4 : i32
    %850 = vector.broadcast %c4_i32_256 : i32 to vector<8x128xi32>
    %851 = arith.cmpi sgt, %2, %850 : vector<8x128xi32>
    %852 = arith.select %849, %822, %784 : vector<8x128xi1>, vector<8x128xf32>
    %853 = arith.select %849, %820, %785 : vector<8x128xi1>, vector<8x128xf32>
    %854 = arith.select %851, %847, %786 : vector<8x128xi1>, vector<8x128xf32>
    %855 = arith.select %851, %845, %787 : vector<8x128xi1>, vector<8x128xf32>
    %c32_257 = arith.constant 32 : index
    %c0_258 = arith.constant 0 : index
    %856 = vector.load %arg11[%c32_257, %c0_258] : memref<64x1024xf32, #tpu.memory_space<vmem>>, vector<8x512xf32>
    %857 = arith.truncf %852 : vector<8x128xf32> to vector<8x128xbf16>
    %c0_259 = arith.constant 0 : index
    %c0_260 = arith.constant 0 : index
    %858 = vector.load %arg8[%c0_259, %c0_260] : memref<128x512xbf16, #tpu.memory_space<vmem>>, vector<128x512xbf16>
    %cst_261 = arith.constant dense<0.000000e+00> : vector<8x512xf32>
    %859 = tpu.matmul %857, %858, %cst_261 {dimension_numbers = #tpu.dot_dimension_numbers<[1], [0], [0], [1], [0, 0, 1, 1], [], []>} : vector<8x128xbf16>, vector<128x512xbf16>, vector<8x512xf32> -> vector<8x512xf32>
    %860 = arith.addf %856, %859 : vector<8x512xf32>
    %c24_262 = arith.constant 24 : index
    %c512_263 = arith.constant 512 : index
    %861 = vector.load %arg11[%c24_262, %c512_263] : memref<64x1024xf32, #tpu.memory_space<vmem>>, vector<8x512xf32>
    %862 = arith.truncf %854 : vector<8x128xf32> to vector<8x128xbf16>
    %c0_264 = arith.constant 0 : index
    %c0_265 = arith.constant 0 : index
    %863 = vector.load %arg9[%c0_264, %c0_265] : memref<128x512xbf16, #tpu.memory_space<vmem>>, vector<128x512xbf16>
    %cst_266 = arith.constant dense<0.000000e+00> : vector<8x512xf32>
    %864 = tpu.matmul %862, %863, %cst_266 {dimension_numbers = #tpu.dot_dimension_numbers<[1], [0], [0], [1], [0, 0, 1, 1], [], []>} : vector<8x128xbf16>, vector<128x512xbf16>, vector<8x512xf32> -> vector<8x512xf32>
    %865 = arith.addf %861, %864 : vector<8x512xf32>
    %866 = vector.extract_strided_slice %860 {offsets = [0, 0], sizes = [8, 128], strides = [1, 1]} : vector<8x512xf32> to vector<8x128xf32>
    %867 = arith.negf %866 : vector<8x128xf32>
    %868 = math.exp %867 : vector<8x128xf32>
    %cst_267 = arith.constant 1.000000e+00 : f32
    %869 = vector.broadcast %cst_267 : f32 to vector<8x128xf32>
    %870 = arith.addf %869, %868 : vector<8x128xf32>
    %871 = arith.divf %869, %870 : vector<8x128xf32>
    %872 = vector.extract_strided_slice %860 {offsets = [0, 128], sizes = [8, 128], strides = [1, 1]} : vector<8x512xf32> to vector<8x128xf32>
    %873 = arith.negf %872 : vector<8x128xf32>
    %874 = math.exp %873 : vector<8x128xf32>
    %cst_268 = arith.constant 1.000000e+00 : f32
    %875 = vector.broadcast %cst_268 : f32 to vector<8x128xf32>
    %876 = arith.addf %875, %874 : vector<8x128xf32>
    %877 = arith.divf %875, %876 : vector<8x128xf32>
    %878 = vector.extract_strided_slice %860 {offsets = [0, 256], sizes = [8, 128], strides = [1, 1]} : vector<8x512xf32> to vector<8x128xf32>
    %879 = math.tanh %878 : vector<8x128xf32>
    %880 = vector.extract_strided_slice %860 {offsets = [0, 384], sizes = [8, 128], strides = [1, 1]} : vector<8x512xf32> to vector<8x128xf32>
    %881 = arith.negf %880 : vector<8x128xf32>
    %882 = math.exp %881 : vector<8x128xf32>
    %cst_269 = arith.constant 1.000000e+00 : f32
    %883 = vector.broadcast %cst_269 : f32 to vector<8x128xf32>
    %884 = arith.addf %883, %882 : vector<8x128xf32>
    %885 = arith.divf %883, %884 : vector<8x128xf32>
    %886 = arith.mulf %877, %853 : vector<8x128xf32>
    %887 = arith.mulf %871, %879 : vector<8x128xf32>
    %888 = arith.addf %886, %887 : vector<8x128xf32>
    %889 = math.tanh %888 : vector<8x128xf32>
    %890 = arith.mulf %885, %889 : vector<8x128xf32>
    %891 = vector.extract_strided_slice %865 {offsets = [0, 0], sizes = [8, 128], strides = [1, 1]} : vector<8x512xf32> to vector<8x128xf32>
    %892 = arith.negf %891 : vector<8x128xf32>
    %893 = math.exp %892 : vector<8x128xf32>
    %cst_270 = arith.constant 1.000000e+00 : f32
    %894 = vector.broadcast %cst_270 : f32 to vector<8x128xf32>
    %895 = arith.addf %894, %893 : vector<8x128xf32>
    %896 = arith.divf %894, %895 : vector<8x128xf32>
    %897 = vector.extract_strided_slice %865 {offsets = [0, 128], sizes = [8, 128], strides = [1, 1]} : vector<8x512xf32> to vector<8x128xf32>
    %898 = arith.negf %897 : vector<8x128xf32>
    %899 = math.exp %898 : vector<8x128xf32>
    %cst_271 = arith.constant 1.000000e+00 : f32
    %900 = vector.broadcast %cst_271 : f32 to vector<8x128xf32>
    %901 = arith.addf %900, %899 : vector<8x128xf32>
    %902 = arith.divf %900, %901 : vector<8x128xf32>
    %903 = vector.extract_strided_slice %865 {offsets = [0, 256], sizes = [8, 128], strides = [1, 1]} : vector<8x512xf32> to vector<8x128xf32>
    %904 = math.tanh %903 : vector<8x128xf32>
    %905 = vector.extract_strided_slice %865 {offsets = [0, 384], sizes = [8, 128], strides = [1, 1]} : vector<8x512xf32> to vector<8x128xf32>
    %906 = arith.negf %905 : vector<8x128xf32>
    %907 = math.exp %906 : vector<8x128xf32>
    %cst_272 = arith.constant 1.000000e+00 : f32
    %908 = vector.broadcast %cst_272 : f32 to vector<8x128xf32>
    %909 = arith.addf %908, %907 : vector<8x128xf32>
    %910 = arith.divf %908, %909 : vector<8x128xf32>
    %911 = arith.mulf %902, %855 : vector<8x128xf32>
    %912 = arith.mulf %896, %904 : vector<8x128xf32>
    %913 = arith.addf %911, %912 : vector<8x128xf32>
    %914 = math.tanh %913 : vector<8x128xf32>
    %915 = arith.mulf %910, %914 : vector<8x128xf32>
    %c4_i32_273 = arith.constant 4 : i32
    %916 = vector.broadcast %c4_i32_273 : i32 to vector<8x128xi32>
    %917 = arith.cmpi sgt, %2, %916 : vector<8x128xi32>
    %c3_i32_274 = arith.constant 3 : i32
    %918 = vector.broadcast %c3_i32_274 : i32 to vector<8x128xi32>
    %919 = arith.cmpi sgt, %2, %918 : vector<8x128xi32>
    %920 = arith.select %917, %890, %852 : vector<8x128xi1>, vector<8x128xf32>
    %921 = arith.select %917, %888, %853 : vector<8x128xi1>, vector<8x128xf32>
    %922 = arith.select %919, %915, %854 : vector<8x128xi1>, vector<8x128xf32>
    %923 = arith.select %919, %913, %855 : vector<8x128xi1>, vector<8x128xf32>
    %c40_275 = arith.constant 40 : index
    %c0_276 = arith.constant 0 : index
    %924 = vector.load %arg11[%c40_275, %c0_276] : memref<64x1024xf32, #tpu.memory_space<vmem>>, vector<8x512xf32>
    %925 = arith.truncf %920 : vector<8x128xf32> to vector<8x128xbf16>
    %c0_277 = arith.constant 0 : index
    %c0_278 = arith.constant 0 : index
    %926 = vector.load %arg8[%c0_277, %c0_278] : memref<128x512xbf16, #tpu.memory_space<vmem>>, vector<128x512xbf16>
    %cst_279 = arith.constant dense<0.000000e+00> : vector<8x512xf32>
    %927 = tpu.matmul %925, %926, %cst_279 {dimension_numbers = #tpu.dot_dimension_numbers<[1], [0], [0], [1], [0, 0, 1, 1], [], []>} : vector<8x128xbf16>, vector<128x512xbf16>, vector<8x512xf32> -> vector<8x512xf32>
    %928 = arith.addf %924, %927 : vector<8x512xf32>
    %c16_280 = arith.constant 16 : index
    %c512_281 = arith.constant 512 : index
    %929 = vector.load %arg11[%c16_280, %c512_281] : memref<64x1024xf32, #tpu.memory_space<vmem>>, vector<8x512xf32>
    %930 = arith.truncf %922 : vector<8x128xf32> to vector<8x128xbf16>
    %c0_282 = arith.constant 0 : index
    %c0_283 = arith.constant 0 : index
    %931 = vector.load %arg9[%c0_282, %c0_283] : memref<128x512xbf16, #tpu.memory_space<vmem>>, vector<128x512xbf16>
    %cst_284 = arith.constant dense<0.000000e+00> : vector<8x512xf32>
    %932 = tpu.matmul %930, %931, %cst_284 {dimension_numbers = #tpu.dot_dimension_numbers<[1], [0], [0], [1], [0, 0, 1, 1], [], []>} : vector<8x128xbf16>, vector<128x512xbf16>, vector<8x512xf32> -> vector<8x512xf32>
    %933 = arith.addf %929, %932 : vector<8x512xf32>
    %934 = vector.extract_strided_slice %928 {offsets = [0, 0], sizes = [8, 128], strides = [1, 1]} : vector<8x512xf32> to vector<8x128xf32>
    %935 = arith.negf %934 : vector<8x128xf32>
    %936 = math.exp %935 : vector<8x128xf32>
    %cst_285 = arith.constant 1.000000e+00 : f32
    %937 = vector.broadcast %cst_285 : f32 to vector<8x128xf32>
    %938 = arith.addf %937, %936 : vector<8x128xf32>
    %939 = arith.divf %937, %938 : vector<8x128xf32>
    %940 = vector.extract_strided_slice %928 {offsets = [0, 128], sizes = [8, 128], strides = [1, 1]} : vector<8x512xf32> to vector<8x128xf32>
    %941 = arith.negf %940 : vector<8x128xf32>
    %942 = math.exp %941 : vector<8x128xf32>
    %cst_286 = arith.constant 1.000000e+00 : f32
    %943 = vector.broadcast %cst_286 : f32 to vector<8x128xf32>
    %944 = arith.addf %943, %942 : vector<8x128xf32>
    %945 = arith.divf %943, %944 : vector<8x128xf32>
    %946 = vector.extract_strided_slice %928 {offsets = [0, 256], sizes = [8, 128], strides = [1, 1]} : vector<8x512xf32> to vector<8x128xf32>
    %947 = math.tanh %946 : vector<8x128xf32>
    %948 = vector.extract_strided_slice %928 {offsets = [0, 384], sizes = [8, 128], strides = [1, 1]} : vector<8x512xf32> to vector<8x128xf32>
    %949 = arith.negf %948 : vector<8x128xf32>
    %950 = math.exp %949 : vector<8x128xf32>
    %cst_287 = arith.constant 1.000000e+00 : f32
    %951 = vector.broadcast %cst_287 : f32 to vector<8x128xf32>
    %952 = arith.addf %951, %950 : vector<8x128xf32>
    %953 = arith.divf %951, %952 : vector<8x128xf32>
    %954 = arith.mulf %945, %921 : vector<8x128xf32>
    %955 = arith.mulf %939, %947 : vector<8x128xf32>
    %956 = arith.addf %954, %955 : vector<8x128xf32>
    %957 = math.tanh %956 : vector<8x128xf32>
    %958 = arith.mulf %953, %957 : vector<8x128xf32>
    %959 = vector.extract_strided_slice %933 {offsets = [0, 0], sizes = [8, 128], strides = [1, 1]} : vector<8x512xf32> to vector<8x128xf32>
    %960 = arith.negf %959 : vector<8x128xf32>
    %961 = math.exp %960 : vector<8x128xf32>
    %cst_288 = arith.constant 1.000000e+00 : f32
    %962 = vector.broadcast %cst_288 : f32 to vector<8x128xf32>
    %963 = arith.addf %962, %961 : vector<8x128xf32>
    %964 = arith.divf %962, %963 : vector<8x128xf32>
    %965 = vector.extract_strided_slice %933 {offsets = [0, 128], sizes = [8, 128], strides = [1, 1]} : vector<8x512xf32> to vector<8x128xf32>
    %966 = arith.negf %965 : vector<8x128xf32>
    %967 = math.exp %966 : vector<8x128xf32>
    %cst_289 = arith.constant 1.000000e+00 : f32
    %968 = vector.broadcast %cst_289 : f32 to vector<8x128xf32>
    %969 = arith.addf %968, %967 : vector<8x128xf32>
    %970 = arith.divf %968, %969 : vector<8x128xf32>
    %971 = vector.extract_strided_slice %933 {offsets = [0, 256], sizes = [8, 128], strides = [1, 1]} : vector<8x512xf32> to vector<8x128xf32>
    %972 = math.tanh %971 : vector<8x128xf32>
    %973 = vector.extract_strided_slice %933 {offsets = [0, 384], sizes = [8, 128], strides = [1, 1]} : vector<8x512xf32> to vector<8x128xf32>
    %974 = arith.negf %973 : vector<8x128xf32>
    %975 = math.exp %974 : vector<8x128xf32>
    %cst_290 = arith.constant 1.000000e+00 : f32
    %976 = vector.broadcast %cst_290 : f32 to vector<8x128xf32>
    %977 = arith.addf %976, %975 : vector<8x128xf32>
    %978 = arith.divf %976, %977 : vector<8x128xf32>
    %979 = arith.mulf %970, %923 : vector<8x128xf32>
    %980 = arith.mulf %964, %972 : vector<8x128xf32>
    %981 = arith.addf %979, %980 : vector<8x128xf32>
    %982 = math.tanh %981 : vector<8x128xf32>
    %983 = arith.mulf %978, %982 : vector<8x128xf32>
    %c5_i32_291 = arith.constant 5 : i32
    %984 = vector.broadcast %c5_i32_291 : i32 to vector<8x128xi32>
    %985 = arith.cmpi sgt, %2, %984 : vector<8x128xi32>
    %c2_i32_292 = arith.constant 2 : i32
    %986 = vector.broadcast %c2_i32_292 : i32 to vector<8x128xi32>
    %987 = arith.cmpi sgt, %2, %986 : vector<8x128xi32>
    %988 = arith.select %985, %958, %920 : vector<8x128xi1>, vector<8x128xf32>
    %989 = arith.select %985, %956, %921 : vector<8x128xi1>, vector<8x128xf32>
    %990 = arith.select %987, %983, %922 : vector<8x128xi1>, vector<8x128xf32>
    %991 = arith.select %987, %981, %923 : vector<8x128xi1>, vector<8x128xf32>
    %c48_293 = arith.constant 48 : index
    %c0_294 = arith.constant 0 : index
    %992 = vector.load %arg11[%c48_293, %c0_294] : memref<64x1024xf32, #tpu.memory_space<vmem>>, vector<8x512xf32>
    %993 = arith.truncf %988 : vector<8x128xf32> to vector<8x128xbf16>
    %c0_295 = arith.constant 0 : index
    %c0_296 = arith.constant 0 : index
    %994 = vector.load %arg8[%c0_295, %c0_296] : memref<128x512xbf16, #tpu.memory_space<vmem>>, vector<128x512xbf16>
    %cst_297 = arith.constant dense<0.000000e+00> : vector<8x512xf32>
    %995 = tpu.matmul %993, %994, %cst_297 {dimension_numbers = #tpu.dot_dimension_numbers<[1], [0], [0], [1], [0, 0, 1, 1], [], []>} : vector<8x128xbf16>, vector<128x512xbf16>, vector<8x512xf32> -> vector<8x512xf32>
    %996 = arith.addf %992, %995 : vector<8x512xf32>
    %c8_298 = arith.constant 8 : index
    %c512_299 = arith.constant 512 : index
    %997 = vector.load %arg11[%c8_298, %c512_299] : memref<64x1024xf32, #tpu.memory_space<vmem>>, vector<8x512xf32>
    %998 = arith.truncf %990 : vector<8x128xf32> to vector<8x128xbf16>
    %c0_300 = arith.constant 0 : index
    %c0_301 = arith.constant 0 : index
    %999 = vector.load %arg9[%c0_300, %c0_301] : memref<128x512xbf16, #tpu.memory_space<vmem>>, vector<128x512xbf16>
    %cst_302 = arith.constant dense<0.000000e+00> : vector<8x512xf32>
    %1000 = tpu.matmul %998, %999, %cst_302 {dimension_numbers = #tpu.dot_dimension_numbers<[1], [0], [0], [1], [0, 0, 1, 1], [], []>} : vector<8x128xbf16>, vector<128x512xbf16>, vector<8x512xf32> -> vector<8x512xf32>
    %1001 = arith.addf %997, %1000 : vector<8x512xf32>
    %1002 = vector.extract_strided_slice %996 {offsets = [0, 0], sizes = [8, 128], strides = [1, 1]} : vector<8x512xf32> to vector<8x128xf32>
    %1003 = arith.negf %1002 : vector<8x128xf32>
    %1004 = math.exp %1003 : vector<8x128xf32>
    %cst_303 = arith.constant 1.000000e+00 : f32
    %1005 = vector.broadcast %cst_303 : f32 to vector<8x128xf32>
    %1006 = arith.addf %1005, %1004 : vector<8x128xf32>
    %1007 = arith.divf %1005, %1006 : vector<8x128xf32>
    %1008 = vector.extract_strided_slice %996 {offsets = [0, 128], sizes = [8, 128], strides = [1, 1]} : vector<8x512xf32> to vector<8x128xf32>
    %1009 = arith.negf %1008 : vector<8x128xf32>
    %1010 = math.exp %1009 : vector<8x128xf32>
    %cst_304 = arith.constant 1.000000e+00 : f32
    %1011 = vector.broadcast %cst_304 : f32 to vector<8x128xf32>
    %1012 = arith.addf %1011, %1010 : vector<8x128xf32>
    %1013 = arith.divf %1011, %1012 : vector<8x128xf32>
    %1014 = vector.extract_strided_slice %996 {offsets = [0, 256], sizes = [8, 128], strides = [1, 1]} : vector<8x512xf32> to vector<8x128xf32>
    %1015 = math.tanh %1014 : vector<8x128xf32>
    %1016 = vector.extract_strided_slice %996 {offsets = [0, 384], sizes = [8, 128], strides = [1, 1]} : vector<8x512xf32> to vector<8x128xf32>
    %1017 = arith.negf %1016 : vector<8x128xf32>
    %1018 = math.exp %1017 : vector<8x128xf32>
    %cst_305 = arith.constant 1.000000e+00 : f32
    %1019 = vector.broadcast %cst_305 : f32 to vector<8x128xf32>
    %1020 = arith.addf %1019, %1018 : vector<8x128xf32>
    %1021 = arith.divf %1019, %1020 : vector<8x128xf32>
    %1022 = arith.mulf %1013, %989 : vector<8x128xf32>
    %1023 = arith.mulf %1007, %1015 : vector<8x128xf32>
    %1024 = arith.addf %1022, %1023 : vector<8x128xf32>
    %1025 = math.tanh %1024 : vector<8x128xf32>
    %1026 = arith.mulf %1021, %1025 : vector<8x128xf32>
    %1027 = vector.extract_strided_slice %1001 {offsets = [0, 0], sizes = [8, 128], strides = [1, 1]} : vector<8x512xf32> to vector<8x128xf32>
    %1028 = arith.negf %1027 : vector<8x128xf32>
    %1029 = math.exp %1028 : vector<8x128xf32>
    %cst_306 = arith.constant 1.000000e+00 : f32
    %1030 = vector.broadcast %cst_306 : f32 to vector<8x128xf32>
    %1031 = arith.addf %1030, %1029 : vector<8x128xf32>
    %1032 = arith.divf %1030, %1031 : vector<8x128xf32>
    %1033 = vector.extract_strided_slice %1001 {offsets = [0, 128], sizes = [8, 128], strides = [1, 1]} : vector<8x512xf32> to vector<8x128xf32>
    %1034 = arith.negf %1033 : vector<8x128xf32>
    %1035 = math.exp %1034 : vector<8x128xf32>
    %cst_307 = arith.constant 1.000000e+00 : f32
    %1036 = vector.broadcast %cst_307 : f32 to vector<8x128xf32>
    %1037 = arith.addf %1036, %1035 : vector<8x128xf32>
    %1038 = arith.divf %1036, %1037 : vector<8x128xf32>
    %1039 = vector.extract_strided_slice %1001 {offsets = [0, 256], sizes = [8, 128], strides = [1, 1]} : vector<8x512xf32> to vector<8x128xf32>
    %1040 = math.tanh %1039 : vector<8x128xf32>
    %1041 = vector.extract_strided_slice %1001 {offsets = [0, 384], sizes = [8, 128], strides = [1, 1]} : vector<8x512xf32> to vector<8x128xf32>
    %1042 = arith.negf %1041 : vector<8x128xf32>
    %1043 = math.exp %1042 : vector<8x128xf32>
    %cst_308 = arith.constant 1.000000e+00 : f32
    %1044 = vector.broadcast %cst_308 : f32 to vector<8x128xf32>
    %1045 = arith.addf %1044, %1043 : vector<8x128xf32>
    %1046 = arith.divf %1044, %1045 : vector<8x128xf32>
    %1047 = arith.mulf %1038, %991 : vector<8x128xf32>
    %1048 = arith.mulf %1032, %1040 : vector<8x128xf32>
    %1049 = arith.addf %1047, %1048 : vector<8x128xf32>
    %1050 = math.tanh %1049 : vector<8x128xf32>
    %1051 = arith.mulf %1046, %1050 : vector<8x128xf32>
    %c6_i32_309 = arith.constant 6 : i32
    %1052 = vector.broadcast %c6_i32_309 : i32 to vector<8x128xi32>
    %1053 = arith.cmpi sgt, %2, %1052 : vector<8x128xi32>
    %c1_i32_310 = arith.constant 1 : i32
    %1054 = vector.broadcast %c1_i32_310 : i32 to vector<8x128xi32>
    %1055 = arith.cmpi sgt, %2, %1054 : vector<8x128xi32>
    %1056 = arith.select %1053, %1026, %988 : vector<8x128xi1>, vector<8x128xf32>
    %1057 = arith.select %1053, %1024, %989 : vector<8x128xi1>, vector<8x128xf32>
    %1058 = arith.select %1055, %1051, %990 : vector<8x128xi1>, vector<8x128xf32>
    %1059 = arith.select %1055, %1049, %991 : vector<8x128xi1>, vector<8x128xf32>
    %c56_311 = arith.constant 56 : index
    %c0_312 = arith.constant 0 : index
    %1060 = vector.load %arg11[%c56_311, %c0_312] : memref<64x1024xf32, #tpu.memory_space<vmem>>, vector<8x512xf32>
    %1061 = arith.truncf %1056 : vector<8x128xf32> to vector<8x128xbf16>
    %c0_313 = arith.constant 0 : index
    %c0_314 = arith.constant 0 : index
    %1062 = vector.load %arg8[%c0_313, %c0_314] : memref<128x512xbf16, #tpu.memory_space<vmem>>, vector<128x512xbf16>
    %cst_315 = arith.constant dense<0.000000e+00> : vector<8x512xf32>
    %1063 = tpu.matmul %1061, %1062, %cst_315 {dimension_numbers = #tpu.dot_dimension_numbers<[1], [0], [0], [1], [0, 0, 1, 1], [], []>} : vector<8x128xbf16>, vector<128x512xbf16>, vector<8x512xf32> -> vector<8x512xf32>
    %1064 = arith.addf %1060, %1063 : vector<8x512xf32>
    %c0_316 = arith.constant 0 : index
    %c512_317 = arith.constant 512 : index
    %1065 = vector.load %arg11[%c0_316, %c512_317] : memref<64x1024xf32, #tpu.memory_space<vmem>>, vector<8x512xf32>
    %1066 = arith.truncf %1058 : vector<8x128xf32> to vector<8x128xbf16>
    %c0_318 = arith.constant 0 : index
    %c0_319 = arith.constant 0 : index
    %1067 = vector.load %arg9[%c0_318, %c0_319] : memref<128x512xbf16, #tpu.memory_space<vmem>>, vector<128x512xbf16>
    %cst_320 = arith.constant dense<0.000000e+00> : vector<8x512xf32>
    %1068 = tpu.matmul %1066, %1067, %cst_320 {dimension_numbers = #tpu.dot_dimension_numbers<[1], [0], [0], [1], [0, 0, 1, 1], [], []>} : vector<8x128xbf16>, vector<128x512xbf16>, vector<8x512xf32> -> vector<8x512xf32>
    %1069 = arith.addf %1065, %1068 : vector<8x512xf32>
    %1070 = vector.extract_strided_slice %1064 {offsets = [0, 0], sizes = [8, 128], strides = [1, 1]} : vector<8x512xf32> to vector<8x128xf32>
    %1071 = arith.negf %1070 : vector<8x128xf32>
    %1072 = math.exp %1071 : vector<8x128xf32>
    %cst_321 = arith.constant 1.000000e+00 : f32
    %1073 = vector.broadcast %cst_321 : f32 to vector<8x128xf32>
    %1074 = arith.addf %1073, %1072 : vector<8x128xf32>
    %1075 = arith.divf %1073, %1074 : vector<8x128xf32>
    %1076 = vector.extract_strided_slice %1064 {offsets = [0, 128], sizes = [8, 128], strides = [1, 1]} : vector<8x512xf32> to vector<8x128xf32>
    %1077 = arith.negf %1076 : vector<8x128xf32>
    %1078 = math.exp %1077 : vector<8x128xf32>
    %cst_322 = arith.constant 1.000000e+00 : f32
    %1079 = vector.broadcast %cst_322 : f32 to vector<8x128xf32>
    %1080 = arith.addf %1079, %1078 : vector<8x128xf32>
    %1081 = arith.divf %1079, %1080 : vector<8x128xf32>
    %1082 = vector.extract_strided_slice %1064 {offsets = [0, 256], sizes = [8, 128], strides = [1, 1]} : vector<8x512xf32> to vector<8x128xf32>
    %1083 = math.tanh %1082 : vector<8x128xf32>
    %1084 = vector.extract_strided_slice %1064 {offsets = [0, 384], sizes = [8, 128], strides = [1, 1]} : vector<8x512xf32> to vector<8x128xf32>
    %1085 = arith.negf %1084 : vector<8x128xf32>
    %1086 = math.exp %1085 : vector<8x128xf32>
    %cst_323 = arith.constant 1.000000e+00 : f32
    %1087 = vector.broadcast %cst_323 : f32 to vector<8x128xf32>
    %1088 = arith.addf %1087, %1086 : vector<8x128xf32>
    %1089 = arith.divf %1087, %1088 : vector<8x128xf32>
    %1090 = arith.mulf %1081, %1057 : vector<8x128xf32>
    %1091 = arith.mulf %1075, %1083 : vector<8x128xf32>
    %1092 = arith.addf %1090, %1091 : vector<8x128xf32>
    %1093 = math.tanh %1092 : vector<8x128xf32>
    %1094 = arith.mulf %1089, %1093 : vector<8x128xf32>
    %1095 = vector.extract_strided_slice %1069 {offsets = [0, 0], sizes = [8, 128], strides = [1, 1]} : vector<8x512xf32> to vector<8x128xf32>
    %1096 = arith.negf %1095 : vector<8x128xf32>
    %1097 = math.exp %1096 : vector<8x128xf32>
    %cst_324 = arith.constant 1.000000e+00 : f32
    %1098 = vector.broadcast %cst_324 : f32 to vector<8x128xf32>
    %1099 = arith.addf %1098, %1097 : vector<8x128xf32>
    %1100 = arith.divf %1098, %1099 : vector<8x128xf32>
    %1101 = vector.extract_strided_slice %1069 {offsets = [0, 128], sizes = [8, 128], strides = [1, 1]} : vector<8x512xf32> to vector<8x128xf32>
    %1102 = arith.negf %1101 : vector<8x128xf32>
    %1103 = math.exp %1102 : vector<8x128xf32>
    %cst_325 = arith.constant 1.000000e+00 : f32
    %1104 = vector.broadcast %cst_325 : f32 to vector<8x128xf32>
    %1105 = arith.addf %1104, %1103 : vector<8x128xf32>
    %1106 = arith.divf %1104, %1105 : vector<8x128xf32>
    %1107 = vector.extract_strided_slice %1069 {offsets = [0, 256], sizes = [8, 128], strides = [1, 1]} : vector<8x512xf32> to vector<8x128xf32>
    %1108 = math.tanh %1107 : vector<8x128xf32>
    %1109 = vector.extract_strided_slice %1069 {offsets = [0, 384], sizes = [8, 128], strides = [1, 1]} : vector<8x512xf32> to vector<8x128xf32>
    %1110 = arith.negf %1109 : vector<8x128xf32>
    %1111 = math.exp %1110 : vector<8x128xf32>
    %cst_326 = arith.constant 1.000000e+00 : f32
    %1112 = vector.broadcast %cst_326 : f32 to vector<8x128xf32>
    %1113 = arith.addf %1112, %1111 : vector<8x128xf32>
    %1114 = arith.divf %1112, %1113 : vector<8x128xf32>
    %1115 = arith.mulf %1106, %1059 : vector<8x128xf32>
    %1116 = arith.mulf %1100, %1108 : vector<8x128xf32>
    %1117 = arith.addf %1115, %1116 : vector<8x128xf32>
    %1118 = math.tanh %1117 : vector<8x128xf32>
    %1119 = arith.mulf %1114, %1118 : vector<8x128xf32>
    %c7_i32_327 = arith.constant 7 : i32
    %1120 = vector.broadcast %c7_i32_327 : i32 to vector<8x128xi32>
    %1121 = arith.cmpi sgt, %2, %1120 : vector<8x128xi32>
    %c0_i32_328 = arith.constant 0 : i32
    %1122 = vector.broadcast %c0_i32_328 : i32 to vector<8x128xi32>
    %1123 = arith.cmpi sgt, %2, %1122 : vector<8x128xi32>
    %1124 = arith.select %1121, %1094, %1056 : vector<8x128xi1>, vector<8x128xf32>
    %1125 = arith.select %1123, %1119, %1058 : vector<8x128xi1>, vector<8x128xf32>
    %c0_329 = arith.constant 0 : index
    %c0_330 = arith.constant 0 : index
    %1126 = vector.load %arg10[%c0_329, %c0_330] : memref<8x256xf32, #tpu.memory_space<vmem>>, vector<8x128xf32>
    tpu.vector_store %arg10[%c0_329, %c0_330], %1124 {strides = array<i32>} : memref<8x256xf32, #tpu.memory_space<vmem>>, vector<8x128xf32>,
    %c0_331 = arith.constant 0 : index
    %c128_332 = arith.constant 128 : index
    %1127 = vector.load %arg10[%c0_331, %c128_332] : memref<8x256xf32, #tpu.memory_space<vmem>>, vector<8x128xf32>
    tpu.vector_store %arg10[%c0_331, %c128_332], %1125 {strides = array<i32>} : memref<8x256xf32, #tpu.memory_space<vmem>>, vector<8x128xf32>,
    return
  }
}

</mosaic_0001>

<bundles_post_ra>
// kernel: tpu_custom_call.1
= control target key start
LH: loop header
LB: loop body
LE: loop exit
PB: predicated region body
PF: predicated region fallthrough
CT: control target
= control target key end

     0   :  { %15 = vsyncpa [#allocation5], 0  ;;  %s14723_s0 = inlined_call_operand.hbm [shape: bf16[64,64], index: 0, kind: input, shape index: {}]   ;;  %s14724_s1 = inlined_call_operand.hbm [shape: s32[8,1], index: 1, kind: input, shape index: {}]   ;;  %s14725_s2 = inlined_call_operand.hbm [shape: bf16[64,1024], index: 2, kind: input, shape index: {}]   ;;  %s14726_s3 = inlined_call_operand.hbm [shape: f32[1,1024], index: 3, kind: input, shape index: {}]   ;;  %s14727_s4 = inlined_call_operand.hbm [shape: bf16[128,512], index: 4, kind: input, shape index: {}]   ;;  %s14728_s5 = inlined_call_operand.hbm [shape: bf16[128,512], index: 5, kind: input, shape index: {}]   ;;  %s14729_s6 = inlined_call_operand.hbm [shape: bf16[256,1024], index: 6, kind: input, shape index: {}]   ;;  %s14730_s7 = inlined_call_operand.hbm [shape: f32[1,1024], index: 7, kind: input, shape index: {}]   ;;  %s14731_s8 = inlined_call_operand.hbm [shape: bf16[128,512], index: 8, kind: input, shape index: {}]   ;;  %s14732_s9 = inlined_call_operand.hbm [shape: bf16[128,512], index: 9, kind: input, shape index: {}]   ;;  %s14733_s10 = inlined_call_operand.hbm [shape: f32[8,256], index: 10, kind: output, shape index: {}]  }
   0x1   :  { %16 = vsyncpa [#allocation8], 0 }
   0x2   :  { %17 = vsyncpa [#allocation11], 0 }
   0x3   :  { %18 = vsyncpa [#allocation14], 0 }
   0x4   :  { %19 = vsyncpa [#allocation17], 0 }
   0x5   :  { %20 = vsyncpa [#allocation20], 0 }
   0x6   :  { %21 = vsyncpa [#allocation6], 0  ;;  %s11533_s13 = smov [#allocation7]   ;;  %s11534_s15 = smov [#allocation10]  }
   0x7   :  { %s40_s14 = sshll.u32 %s11533_s13, 4  ;;  %s62_s16 = sshll.u32 %s11534_s15, 4  ;;  %s41_s14 = int_to_ptr.vmem [resolvable:$true] %s40_s14  ;;  %s63_s16 = int_to_ptr.vmem [resolvable:$true] %s62_s16 }
   0x8   :  { %s11277_s19 = scalar_lea.hbm %s14724_s1, 128 }
   0x9   :  { %p11278_p0 = scmp.ne.s32.totalorder %s14724_s1, %s11277_s19  ;;  %p11281_p1 = scmp.lt.u32.totalorder %s11277_s19, %s14724_s1 }
   0xb   :  { %p11283_p2 = pnand %p11281_p1, %p11278_p0 }
   0xd   :  { %11286 = shalt.err (!%p11283_p2)
}
   0xe   :  { %s11287_s24 = scalar_lea.vmem %s41_s14, 128  ;;  %p11292_p4 = scmp.lt.s32.totalorder %s41_s14, %s41_s14 }
   0xf   :  { %p11288_p3 = scmp.ne.s32.totalorder %s41_s14, %s11287_s24  ;;  %p11293_p5 = scmp.lt.s32.totalorder %s11287_s24, %s11287_s24 }
  0x11   :  { %p11294_p6 = por %p11293_p5, %p11292_p4 }
  0x13   :  { %p11295_p7 = pnand %p11294_p6, %p11288_p3 }
  0x15   :  { %11298 = shalt.err (!%p11295_p7)
}
  0x16   :  { %43 = dma.hbm_to_vmem [thread:$0]  %s14724_s1, 128, %s41_s14, [#allocation8]  }
  0x17   :  { %s11299_s29 = scalar_lea.hbm %s14726_s3, 128 }
  0x18   :  { %p11300_p8 = scmp.ne.s32.totalorder %s14726_s3, %s11299_s29  ;;  %p11303_p9 = scmp.lt.u32.totalorder %s11299_s29, %s14726_s3 }
  0x1a   :  { %p11305_p10 = pnand %p11303_p9, %p11300_p8 }
  0x1c   :  { %11308 = shalt.err (!%p11305_p10)
}
  0x1d   :  { %s11309_s15 = scalar_lea.vmem %s63_s16, 128  ;;  %p11314_p12 = scmp.lt.s32.totalorder %s63_s16, %s63_s16 }
  0x1e   :  { %p11310_p11 = scmp.ne.s32.totalorder %s63_s16, %s11309_s15  ;;  %p11315_p13 = scmp.lt.s32.totalorder %s11309_s15, %s11309_s15 }
  0x20   :  { %p11316_p0 = por %p11315_p13, %p11314_p12 }
  0x22   :  { %p11317_p1 = pnand %p11316_p0, %p11310_p11 }
  0x24   :  { %11320 = shalt.err (!%p11317_p1)
}
  0x25   :  { %65 = dma.hbm_to_vmem [thread:$0]  %s14726_s3, 128, %s63_s16, [#allocation11]  }
  0x26   :  { %s11535_s17 = smov [#allocation13]   ;;  %s11536_s19 = smov [#allocation16]  }
  0x27   :  { %s83_s18 = sshll.u32 %s11535_s17, 4  ;;  %s108_s20 = sshll.u32 %s11536_s19, 4  ;;  %s84_s18 = int_to_ptr.vmem [resolvable:$true] %s83_s18  ;;  %s109_s20 = int_to_ptr.vmem [resolvable:$true] %s108_s20 }
  0x28   :  { %s11321_s23 = scalar_lea.hbm %s14728_s5, 4096 }
  0x29   :  { %p11322_p2 = scmp.ne.s32.totalorder %s14728_s5, %s11321_s23  ;;  %p11325_p3 = scmp.lt.u32.totalorder %s11321_s23, %s14728_s5 }
  0x2b   :  { %p11327_p4 = pnand %p11325_p3, %p11322_p2 }
  0x2d   :  { %11330 = shalt.err (!%p11327_p4)
}
  0x2e   :  { %s11331_s3 = scalar_lea.vmem %s84_s18, 4096  ;;  %p11336_p6 = scmp.lt.s32.totalorder %s84_s18, %s84_s18 }
  0x2f   :  { %p11332_p5 = scmp.ne.s32.totalorder %s84_s18, %s11331_s3  ;;  %p11337_p7 = scmp.lt.s32.totalorder %s11331_s3, %s11331_s3 }
  0x31   :  { %p11338_p8 = por %p11337_p7, %p11336_p6 }
  0x33   :  { %p11339_p9 = pnand %p11338_p8, %p11332_p5 }
  0x35   :  { %11342 = shalt.err (!%p11339_p9)
}
  0x36   :  { %s11537_s16 = smov 256   ;;  %s11538_s28 = smov 16  }
  0x37   :  { %89 = dma.hbm_to_vmem [thread:$0]  %s14728_s5, 4096, %s84_s18, [#allocation14], %s11537_s16, %s11537_s16, %s11538_s28  }
  0x38   :  { %s11343_s13 = scalar_lea.hbm %s14730_s7, 128 }
  0x39   :  { %p11344_p10 = scmp.ne.s32.totalorder %s14730_s7, %s11343_s13  ;;  %p11347_p11 = scmp.lt.u32.totalorder %s11343_s13, %s14730_s7 }
  0x3b   :  { %p11349_p12 = pnand %p11347_p11, %p11344_p10 }
  0x3d   :  { %11352 = shalt.err (!%p11349_p12)
}
  0x3e   :  { %s11353_s19 = scalar_lea.vmem %s109_s20, 128  ;;  %p11358_p0 = scmp.lt.s32.totalorder %s109_s20, %s109_s20 }
  0x3f   :  { %p11354_p13 = scmp.ne.s32.totalorder %s109_s20, %s11353_s19  ;;  %p11359_p1 = scmp.lt.s32.totalorder %s11353_s19, %s11353_s19 }
  0x41   :  { %p11360_p2 = por %p11359_p1, %p11358_p0 }
  0x43   :  { %p11361_p3 = pnand %p11360_p2, %p11354_p13 }
  0x45   :  { %11364 = shalt.err (!%p11361_p3)
}
  0x46   :  { %111 = dma.hbm_to_vmem [thread:$0]  %s14730_s7, 128, %s109_s20, [#allocation17]  }
  0x47   :  { %s11539_s21 = smov [#allocation4]   ;;  %s11365_s25 = scalar_lea.hbm %s14723_s0, 512 }
  0x48   :  { %s27_s22 = sshll.u32 %s11539_s21, 4  ;;  %p11366_p4 = scmp.ne.s32.totalorder %s14723_s0, %s11365_s25  ;;  %s28_s22 = int_to_ptr.vmem [resolvable:$true] %s27_s22 }
  0x49   :  { %p11369_p5 = scmp.lt.u32.totalorder %s11365_s25, %s14723_s0 }
  0x4b   :  { %p11371_p6 = pnand %p11369_p5, %p11366_p4 }
  0x4d   :  { %11374 = shalt.err (!%p11371_p6)
}
  0x4e   :  { %s11375_s30 = scalar_lea.vmem %s28_s22, 512  ;;  %p11380_p8 = scmp.lt.s32.totalorder %s28_s22, %s28_s22 }
  0x4f   :  { %p11376_p7 = scmp.ne.s32.totalorder %s28_s22, %s11375_s30  ;;  %p11381_p9 = scmp.lt.s32.totalorder %s11375_s30, %s11375_s30 }
  0x51   :  { %p11382_p10 = por %p11381_p9, %p11380_p8 }
  0x53   :  { %p11383_p11 = pnand %p11382_p10, %p11376_p7 }
  0x55   :  { %11386 = shalt.err (!%p11383_p11)
}
  0x56   :  { %s11540_s7 = smov 64   ;;  %s11541_s20 = smov 4  }
  0x57   :  { %33 = dma.hbm_to_vmem [thread:$0]  %s14723_s0, 512, %s28_s22, [#allocation5], %s11540_s7, %s11540_s7, %s11541_s20  }
  0x58   :  { %s11542_s13 = smov [#allocation9]   ;;  %s11387_s17 = scalar_lea.hbm %s14725_s2, 4096 }
  0x59   :  { %s49_s15 = sshll.u32 %s11542_s13, 4  ;;  %p11388_p12 = scmp.ne.s32.totalorder %s14725_s2, %s11387_s17  ;;  %s50_s15 = int_to_ptr.vmem [resolvable:$true] %s49_s15 }
  0x5a   :  { %p11391_p13 = scmp.lt.u32.totalorder %s11387_s17, %s14725_s2 }
  0x5c   :  { %p11393_p0 = pnand %p11391_p13, %p11388_p12 }
  0x5e   :  { %11396 = shalt.err (!%p11393_p0)
}
  0x5f   :  { %s11397_s23 = scalar_lea.vmem %s50_s15, 4096  ;;  %p11402_p2 = scmp.lt.s32.totalorder %s50_s15, %s50_s15 }
  0x60   :  { %p11398_p1 = scmp.ne.s32.totalorder %s50_s15, %s11397_s23  ;;  %p11403_p3 = scmp.lt.s32.totalorder %s11397_s23, %s11397_s23 }
  0x62   :  { %p11404_p4 = por %p11403_p3, %p11402_p2 }
  0x64   :  { %p11405_p5 = pnand %p11404_p4, %p11398_p1 }
  0x66   :  { %11408 = shalt.err (!%p11405_p5)
}
  0x67   :  { %s11543_s0 = smov 512   ;;  %s11544_s22 = smov 32  }
  0x68   :  { %55 = dma.hbm_to_vmem [thread:$0]  %s14725_s2, 4096, %s50_s15, [#allocation8], %s11543_s0, %s11543_s0, %s11544_s22  }
  0x69   :  { %s11545_s26 = smov [#allocation12]   ;;  %s11546_s3 = smov [#allocation15]  }
  0x6a   :  { %s71_s27 = sshll.u32 %s11545_s26, 4  ;;  %s95_s29 = sshll.u32 %s11546_s3, 4  ;;  %s72_s27 = int_to_ptr.vmem [resolvable:$true] %s71_s27  ;;  %s11685_s29 = int_to_ptr.vmem [resolvable:$true] %s95_s29 }
  0x6b   :  { %s11409_s20 = scalar_lea.hbm %s14727_s4, 4096 }
  0x6c   :  { %p11410_p6 = scmp.ne.s32.totalorder %s14727_s4, %s11409_s20  ;;  %p11413_p7 = scmp.lt.u32.totalorder %s11409_s20, %s14727_s4 }
  0x6e   :  { %p11415_p8 = pnand %p11413_p7, %p11410_p6 }
  0x70   :  { %11418 = shalt.err (!%p11415_p8)
}
  0x71   :  { %s11419_s2 = scalar_lea.vmem %s72_s27, 4096  ;;  %p11424_p10 = scmp.lt.s32.totalorder %s72_s27, %s72_s27 }
  0x72   :  { %p11420_p9 = scmp.ne.s32.totalorder %s72_s27, %s11419_s2  ;;  %p11425_p11 = scmp.lt.s32.totalorder %s11419_s2, %s11419_s2 }
  0x74   :  { %p11426_p12 = por %p11425_p11, %p11424_p10 }
  0x76   :  { %p11427_p13 = pnand %p11426_p12, %p11420_p9 }
  0x78   :  { %11430 = shalt.err (!%p11427_p13)
}
  0x79   :  { %77 = dma.hbm_to_vmem [thread:$0]  %s14727_s4, 4096, %s72_s27, [#allocation11], %s11537_s16, %s11537_s16, %s11538_s28  }
  0x7a   :  { %s11431_s5 = scalar_lea.hbm %s14729_s6, 16384 }
  0x7b   :  { %p11432_p0 = scmp.ne.s32.totalorder %s14729_s6, %s11431_s5  ;;  %p11435_p1 = scmp.lt.u32.totalorder %s11431_s5, %s14729_s6 }
  0x7d   :  { %p11437_p2 = pnand %p11435_p1, %p11432_p0 }
  0x7f   :  { %11440 = shalt.err (!%p11437_p2)
}
  0x80   :  { %s11441_s25 = scalar_lea.vmem %s11685_s29, 16384  ;;  %p11446_p4 = scmp.lt.s32.totalorder %s11685_s29, %s11685_s29 }
  0x81   :  { %p11442_p3 = scmp.ne.s32.totalorder %s11685_s29, %s11441_s25  ;;  %p11447_p5 = scmp.lt.s32.totalorder %s11441_s25, %s11441_s25 }
  0x83   :  { %p11448_p6 = por %p11447_p5, %p11446_p4 }
  0x85   :  { %p11449_p7 = pnand %p11448_p6, %p11442_p3 }
  0x87   :  { %11452 = shalt.err (!%p11449_p7)
}
  0x88   :  { %101 = dma.hbm_to_vmem [thread:$0]  %s14729_s6, 16384, %s11685_s29, [#allocation14], %s11543_s0, %s11543_s0, %s11544_s22  }
  0x89   :  { %s11547_s27 = smov [#allocation18]   ;;  %s11548_s30 = smov [#allocation19]  }
  0x8a   :  { %s117_s3 = sshll.u32 %s11547_s27, 4  ;;  %s129_s7 = sshll.u32 %s11548_s30, 4  ;;  %s118_s3 = int_to_ptr.vmem [resolvable:$true] %s117_s3  ;;  %s11722_s7 = int_to_ptr.vmem [resolvable:$true] %s129_s7 }
  0x8b   :  { %s11453_s12 = scalar_lea.hbm %s14731_s8, 4096 }
  0x8c   :  { %p11454_p8 = scmp.ne.s32.totalorder %s14731_s8, %s11453_s12  ;;  %p11457_p9 = scmp.lt.u32.totalorder %s11453_s12, %s14731_s8 }
  0x8e   :  { %p11459_p10 = pnand %p11457_p9, %p11454_p8 }
  0x90   :  { %11462 = shalt.err (!%p11459_p10)
}
  0x91   :  { %s11463_s6 = scalar_lea.vmem %s118_s3, 4096  ;;  %p11468_p12 = scmp.lt.s32.totalorder %s118_s3, %s118_s3 }
  0x92   :  { %p11464_p11 = scmp.ne.s32.totalorder %s118_s3, %s11463_s6  ;;  %p11469_p13 = scmp.lt.s32.totalorder %s11463_s6, %s11463_s6 }
  0x94   :  { %p11470_p0 = por %p11469_p13, %p11468_p12 }
  0x96   :  { %p11471_p1 = pnand %p11470_p0, %p11464_p11 }
  0x98   :  { %11474 = shalt.err (!%p11471_p1)
}
  0x99   :  { %123 = dma.hbm_to_vmem [thread:$0]  %s14731_s8, 4096, %s118_s3, [#allocation17], %s11537_s16, %s11537_s16, %s11538_s28  }
  0x9a   :  { %s11475_s17 = scalar_lea.hbm %s14732_s9, 4096 }
  0x9b   :  { %p11476_p2 = scmp.ne.s32.totalorder %s14732_s9, %s11475_s17  ;;  %p11479_p3 = scmp.lt.u32.totalorder %s11475_s17, %s14732_s9 }
  0x9d   :  { %p11481_p4 = pnand %p11479_p3, %p11476_p2 }
  0x9f   :  { %11484 = shalt.err (!%p11481_p4)
}
  0xa0   :  { %s11485_s23 = scalar_lea.vmem %s11722_s7, 4096  ;;  %p11490_p6 = scmp.lt.s32.totalorder %s11722_s7, %s11722_s7 }
  0xa1   :  { %p11486_p5 = scmp.ne.s32.totalorder %s11722_s7, %s11485_s23  ;;  %p11491_p7 = scmp.lt.s32.totalorder %s11485_s23, %s11485_s23 }
  0xa3   :  { %p11492_p8 = por %p11491_p7, %p11490_p6 }
  0xa5   :  { %p11493_p9 = pnand %p11492_p8, %p11486_p5 }
  0xa7   :  { %11496 = shalt.err (!%p11493_p9)
}
  0xa8   :  { %135 = dma.hbm_to_vmem [thread:$0]  %s14732_s9, 4096, %s11722_s7, [#allocation20], %s11537_s16, %s11537_s16, %s11538_s28  }
  0xa9   :  { %11519 = dma.done.wait [#allocation5], 512  }
  0xaa   :  { %11520 = vsyncadd [#allocation5], 4294966784 }
  0xab   :  { %11521 = dma.done.wait [#allocation8], 4224  }
  0xac   :  { %11522 = vsyncadd [#allocation8], 4294963072 }
  0xad   :  { %11523 = dma.done.wait [#allocation11], 4224  }
  0xae   :  { %11524 = vsyncadd [#allocation11], 4294963072 }
  0xaf   :  { %11525 = dma.done.wait [#allocation14], 20480  }
  0xb0   :  { %11526 = vsyncadd [#allocation14], 4294946816 }
  0xb1   :  { %11527 = dma.done.wait [#allocation17], 4224  }
  0xb2   :  { %11528 = vsyncadd [#allocation17], 4294963072 }
  0xb3   :  { %11529 = dma.done.wait [#allocation20], 4096  }
  0xb4   :  { %11530 = vsyncadd [#allocation20], 4294963200  ;;  %v14738_v0 = vmov 0   ;;  %v179_v1 = vld [vmem:[#allocation9] sm:$0xff]  ;;  %v180_v3 = vld [vmem:[#allocation9 + $0x8] sm:$0xff]  ;;  %vm433_vm0 = vcmask 523264  }
  0xb5   :  { %478 = vmatprep.mubr.bf16.mxu0 %v14738_v0  ;;  %551 = vmatprep.mubr.bf16.mxu1 %v14738_v0  ;;  %v183_v2 = vld [vmem:[#allocation9 + $0x20] sm:$0xff]  ;;  %v184_v5 = vld [vmem:[#allocation9 + $0x28] sm:$0xff]  ;;  %v181_v31 = vld [vmem:[#allocation9 + $0x10] sm:$0xff]  ;;  %vm11550_vm11 = vmmov 1   ;;  %s11551_s9 = smov [#allocation21]  }
  0xb6   :  { %10149 = vset.pattern.permute.xlu0 %v14738_v0  ;;  %v9235_v4 = vcombine.high %v179_v1, %v183_v2  ;;  %v9234_v6 = vcombine.low %v179_v1, %v183_v2  ;;  %v187_v7 = vld [vmem:[#allocation9 + $0x40] sm:$0xff]  ;;  %v9237_v9 = vcombine.high %v180_v3, %v184_v5  ;;  %v9236_v10 = vcombine.low %v180_v3, %v184_v5  ;;  %v188_v12 = vld [vmem:[#allocation9 + $0x48] sm:$0xff]  ;;  %v185_v32 = vld [vmem:[#allocation9 + $0x30] sm:$0xff]  ;;  %s9216_s16 = sshll.u32 %s11551_s9, 4  ;;  %s9217_s16 = int_to_ptr.vmem [resolvable:$true] %s9216_s16 }
  0xb7   :  { %v191_v8 = vld [vmem:[#allocation9 + $0x60] sm:$0xff]  ;;  %v192_v13 = vld [vmem:[#allocation9 + $0x68] sm:$0xff]  ;;  %v182_v33 = vld [vmem:[#allocation9 + $0x18] sm:$0xff]  ;;  %v9239_v37 = vcombine.high %v181_v31, %v185_v32  ;;  %v9238_v43 = vcombine.low %v181_v31, %v185_v32  ;;  %s11497_s28 = scalar_lea.vmem %s9217_s16, 256  ;;  %p11502_p11 = scmp.lt.s32.totalorder %s9217_s16, %s9217_s16 }
  0xb8   :  { %v9243_v11 = vcombine.high %v187_v7, %v191_v8  ;;  %v195_v14 = vld [vmem:[#allocation9 + $0x80] sm:$0xff]  ;;  %446 = vmatprep.subr.bf16.mxu0 %v9235_v4  ;;  %v9245_v15 = vcombine.high %v188_v12, %v192_v13  ;;  %v196_v17 = vld [vmem:[#allocation9 + $0x88] sm:$0xff]  ;;  %519 = vmatprep.subr.bf16.mxu1 %v9237_v9  ;;  %v9242_v19 = vcombine.low %v187_v7, %v191_v8  ;;  %v186_v34 = vld [vmem:[#allocation9 + $0x38] sm:$0xff]  ;;  %p11498_p10 = scmp.ne.s32.totalorder %s9217_s16, %s11497_s28  ;;  %p11503_p12 = scmp.lt.s32.totalorder %s11497_s28, %s11497_s28 }
  0xb9   :  { %v199_v16 = vld [vmem:[#allocation9 + $0xa0] sm:$0xff]  ;;  %v200_v18 = vld [vmem:[#allocation9 + $0xa8] sm:$0xff]  ;;  %447 = vmatpush1.bf16.msra.mxu0 %v9234_v6  ;;  %520 = vmatpush1.bf16.msra.mxu1 %v9236_v10  ;;  %v9244_v20 = vcombine.low %v188_v12, %v192_v13  ;;  %v11762_v38 = vld [vmem:[#allocation4] sm:$0xff]   ;;  %v9241_v40 = vcombine.high %v182_v33, %v186_v34  ;;  %v9240_v46 = vcombine.low %v182_v33, %v186_v34 }
  0xba   :  { %448 = vmatprep.subr.bf16.mxu0 %v9243_v11  ;;  %v9251_v21 = vcombine.high %v195_v14, %v199_v16  ;;  %521 = vmatprep.subr.bf16.mxu1 %v9245_v15  ;;  %v9253_v22 = vcombine.high %v196_v17, %v200_v18  ;;  %v203_v23 = vld [vmem:[#allocation9 + $0xc0] sm:$0xff]  ;;  %v204_v25 = vld [vmem:[#allocation9 + $0xc8] sm:$0xff]  ;;  %v9250_v27 = vcombine.low %v195_v14, %v199_v16  ;;  %v189_v39 = vld [vmem:[#allocation9 + $0x50] sm:$0xff]  ;;  %p11504_p13 = por %p11503_p12, %p11502_p11 }
  0xbb   :  { %v207_v24 = vld [vmem:[#allocation9 + $0xe0] sm:$0xff]  ;;  %v208_v26 = vld [vmem:[#allocation9 + $0xe8] sm:$0xff]  ;;  %v9252_v28 = vcombine.low %v196_v17, %v200_v18  ;;  %v193_v41 = vld [vmem:[#allocation9 + $0x70] sm:$0xff] }
  0xbc   :  { %v9259_v29 = vcombine.high %v203_v23, %v207_v24  ;;  %v9261_v30 = vcombine.high %v204_v25, %v208_v26  ;;  %v9258_v35 = vcombine.low %v203_v23, %v207_v24  ;;  %v9260_v36 = vcombine.low %v204_v25, %v208_v26  ;;  %v190_v42 = vld [vmem:[#allocation9 + $0x58] sm:$0xff]  ;;  %v197_v47 = vld [vmem:[#allocation9 + $0x90] sm:$0xff]  ;;  %v11770_v54 = vld [vmem:[#allocation4 + $0x8] sm:$0xff]   ;;  %p11505_p0 = pnand %p11504_p13, %p11498_p10 }
  0xbd   :  { %449 = vmatpush1.bf16.msra.mxu0 %v9242_v19  ;;  %522 = vmatpush1.bf16.msra.mxu1 %v9244_v20  ;;  %v194_v44 = vld [vmem:[#allocation9 + $0x78] sm:$0xff]  ;;  %v9247_v45 = vcombine.high %v189_v39, %v193_v41  ;;  %v201_v48 = vld [vmem:[#allocation9 + $0xb0] sm:$0xff]  ;;  %v9246_v51 = vcombine.low %v189_v39, %v193_v41  ;;  %v11780_v5 = vld [vmem:[#allocation4 + $0x10] sm:$0xff]  }
  0xbe   :  { %450 = vmatprep.subr.bf16.mxu0 %v9251_v21  ;;  %523 = vmatprep.subr.bf16.mxu1 %v9253_v22  ;;  %v9249_v49 = vcombine.high %v190_v42, %v194_v44  ;;  %v198_v50 = vld [vmem:[#allocation9 + $0x98] sm:$0xff]  ;;  %v9255_v53 = vcombine.high %v197_v47, %v201_v48  ;;  %v9248_v55 = vcombine.low %v190_v42, %v194_v44  ;;  %v205_v56 = vld [vmem:[#allocation9 + $0xd0] sm:$0xff] }
  0xbf   :  { %v202_v52 = vld [vmem:[#allocation9 + $0xb8] sm:$0xff]  ;;  %v209_v58 = vld [vmem:[#allocation9 + $0xf0] sm:$0xff]  ;;  %v9254_v61 = vcombine.low %v197_v47, %v201_v48 }
  0xc0   :  { %v9257_v57 = vcombine.high %v198_v50, %v202_v52  ;;  %v206_v59 = vld [vmem:[#allocation9 + $0xd8] sm:$0xff]  ;;  %v9256_v62 = vcombine.low %v198_v50, %v202_v52  ;;  %v9263_v63 = vcombine.high %v205_v56, %v209_v58  ;;  %v9262_v2 = vcombine.low %v205_v56, %v209_v58  ;;  %v11782_v6 = vld [vmem:[#allocation12 + $0xc] ss:$16 sps:$4 sm:$0xff]   ;;  %v11802_v9 = vld [vmem:[#allocation12 + $0x8] ss:$16 sps:$4 sm:$0xff]  }
  0xc1   :  { %451 = vmatpush1.bf16.msra.mxu0 %v9250_v27  ;;  %524 = vmatpush1.bf16.msra.mxu1 %v9252_v28  ;;  %v210_v60 = vld [vmem:[#allocation9 + $0xf8] sm:$0xff]  ;;  %v11792_v7 = vld [vmem:[#allocation4 + $0x18] sm:$0xff]  }
  0xc2   :  { %452 = vmatprep.subr.bf16.mxu0 %v9259_v29  ;;  %525 = vmatprep.subr.bf16.mxu1 %v9261_v30  ;;  %v9265_v1 = vcombine.high %v206_v59, %v210_v60  ;;  %v9264_v3 = vcombine.low %v206_v59, %v210_v60  ;;  %v11778_v4 = vld [vmem:[#allocation12 + $0x4] ss:$16 sps:$4 sm:$0xff]   ;;  %v11800_v8 = vld [vmem:[#allocation12] ss:$16 sps:$4 sm:$0xff]   ;;  %v11806_v11 = vld [vmem:[#allocation12 + $0x2c] ss:$16 sps:$4 sm:$0xff]  }
  0xc3   :  { %v11804_v10 = vld [vmem:[#allocation12 + $0x24] ss:$16 sps:$4 sm:$0xff]   ;;  %v11810_v12 = vld [vmem:[#allocation12 + $0x20] ss:$16 sps:$4 sm:$0xff]   ;;  %v11815_v13 = vld [vmem:[#allocation12 + $0x28] ss:$16 sps:$4 sm:$0xff]  }
  0xc4   :  { %v11819_v14 = vld [vmem:[#allocation12 + $0x44] ss:$16 sps:$4 sm:$0xff]   ;;  %v11823_v15 = vld [vmem:[#allocation12 + $0x4c] ss:$16 sps:$4 sm:$0xff]   ;;  %v11826_v16 = vld [vmem:[#allocation12 + $0x40] ss:$16 sps:$4 sm:$0xff]  }
  0xc5   :  { %453 = vmatpush1.bf16.msra.mxu0 %v9258_v35  ;;  %526 = vmatpush1.bf16.msra.mxu1 %v9260_v36  ;;  %v11829_v17 = vld [vmem:[#allocation12 + $0x48] ss:$16 sps:$4 sm:$0xff]   ;;  %v11833_v18 = vld [vmem:[#allocation12 + $0x64] ss:$16 sps:$4 sm:$0xff]   ;;  %v11835_v19 = vld [vmem:[#allocation12 + $0x6c] ss:$16 sps:$4 sm:$0xff]  }
  0xc6   :  { %592 = vmatprep.subr.bf16.mxu0 %v9239_v37  ;;  %665 = vmatprep.subr.bf16.mxu1 %v9241_v40  ;;  %v167_v20 = vld [vmem:[#allocation7] sm:$0xff]  ;;  %v11842_v22 = vld [vmem:[#allocation12 + $0x68] ss:$16 sps:$4 sm:$0xff]   ;;  %v11849_v24 = vld [vmem:[#allocation12 + $0x8c] ss:$16 sps:$4 sm:$0xff]  }
  0xc7   :  { %v11838_v21 = vld [vmem:[#allocation12 + $0x60] ss:$16 sps:$4 sm:$0xff]   ;;  %169 = vperm.xlu0 %10149, %v167_v20   ;;  %v11844_v23 = vld [vmem:[#allocation12 + $0x84] ss:$16 sps:$4 sm:$0xff]   ;;  %v11858_v26 = vld [vmem:[#allocation12 + $0x88] ss:$16 sps:$4 sm:$0xff]  }
  0xc8   :  { %9266 = vmatmul.mubr.msk.bf16.vlgmr.msra.gmra.mrb[0].mxu0 %vm433_vm0, %v11762_v38  ;;  %9270 = vmatmul.mubr.msk.bf16.vlgmr.msra.gmra.mrb[0].mxu1 %vm433_vm0, %v11762_v38  ;;  %v11855_v25 = vld [vmem:[#allocation12 + $0x80] ss:$16 sps:$4 sm:$0xff]   ;;  %v11860_v27 = vld [vmem:[#allocation12 + $0xa4] ss:$16 sps:$4 sm:$0xff]   ;;  %v11863_v28 = vld [vmem:[#allocation12 + $0xac] ss:$16 sps:$4 sm:$0xff]  }
  0xc9   :  { %593 = vmatpush1.bf16.msra.mxu0 %v9238_v43  ;;  %488 = vmatprep.mubr.bf16.mxu0 %v14738_v0  ;;  %v11868_v29 = vld [vmem:[#allocation12 + $0xa0] ss:$16 sps:$4 sm:$0xff]   ;;  %v11872_v30 = vld [vmem:[#allocation12 + $0xa8] ss:$16 sps:$4 sm:$0xff]   ;;  %v11874_v31 = vld [vmem:[#allocation12 + $0xc4] ss:$16 sps:$4 sm:$0xff]  }
  0xca   :  { %561 = vmatprep.mubr.bf16.mxu1 %v14738_v0  ;;  %594 = vmatprep.subr.bf16.mxu0 %v9247_v45  ;;  %v11879_v32 = vld [vmem:[#allocation12 + $0xcc] ss:$16 sps:$4 sm:$0xff]   ;;  %v11885_v33 = vld [vmem:[#allocation12 + $0xc0] ss:$16 sps:$4 sm:$0xff]   ;;  %v11888_v34 = vld [vmem:[#allocation12 + $0xc8] ss:$16 sps:$4 sm:$0xff]  }
  0xcb   :  { %666 = vmatpush1.bf16.msra.mxu1 %v9240_v46  ;;  %v11890_v35 = vld [vmem:[#allocation12 + $0xe4] ss:$16 sps:$4 sm:$0xff]   ;;  %v11893_v36 = vld [vmem:[#allocation12 + $0xec] ss:$16 sps:$4 sm:$0xff]   ;;  %v11898_v37 = vld [vmem:[#allocation12 + $0xe0] ss:$16 sps:$4 sm:$0xff]  }
  0xcc   :  { %667 = vmatprep.subr.bf16.mxu1 %v9249_v49  ;;  %v11904_v39 = vld [vmem:[#allocation13 + $0x4] ss:$16 sps:$4 sm:$0xff]   ;;  %v11909_v40 = vld [vmem:[#allocation13 + $0xc] ss:$16 sps:$4 sm:$0xff]   ;;  %v10202_v41 = vld [vmem:[#allocation13] ss:$16 sps:$4 sm:$0xff]  }
  0xcd   :  { %595 = vmatpush1.bf16.msra.mxu0 %v9246_v51  ;;  %v10205_v42 = vld [vmem:[#allocation13 + $0x8] ss:$16 sps:$4 sm:$0xff]   ;;  %v10210_v43 = vld [vmem:[#allocation13 + $0x24] ss:$16 sps:$4 sm:$0xff]   ;;  %v11917_v44 = vld [vmem:[#allocation13 + $0x2c] ss:$16 sps:$4 sm:$0xff]  }
  0xce   :  { %596 = vmatprep.subr.bf16.mxu0 %v9255_v53  ;;  %v11922_v45 = vld [vmem:[#allocation13 + $0x20] ss:$16 sps:$4 sm:$0xff]   ;;  %v11925_v46 = vld [vmem:[#allocation13 + $0x28] ss:$16 sps:$4 sm:$0xff]   ;;  %v11927_v47 = vld [vmem:[#allocation13 + $0x44] ss:$16 sps:$4 sm:$0xff]  }
  0xcf   :  { %668 = vmatpush1.bf16.msra.mxu1 %v9248_v55  ;;  %v11930_v48 = vld [vmem:[#allocation13 + $0x4c] ss:$16 sps:$4 sm:$0xff]   ;;  %v11933_v49 = vld [vmem:[#allocation13 + $0x40] ss:$16 sps:$4 sm:$0xff]   ;;  %v11936_v50 = vld [vmem:[#allocation13 + $0x48] ss:$16 sps:$4 sm:$0xff]  }
  0xd0   :  { %9267 = vmatmul.mubr.msk.bf16.gmra.mrb[4].mxu0 %vm433_vm0, %v11770_v54  ;;  %669 = vmatprep.subr.bf16.mxu1 %v9257_v57  ;;  %v11938_v51 = vld [vmem:[#allocation13 + $0x64] ss:$16 sps:$4 sm:$0xff]   ;;  %v11942_v52 = vld [vmem:[#allocation13 + $0x6c] ss:$16 sps:$4 sm:$0xff]   ;;  %v11947_v53 = vld [vmem:[#allocation13 + $0x60] ss:$16 sps:$4 sm:$0xff]  }
  0xd1   :  { %9271 = vmatmul.mubr.msk.bf16.gmra.mrb[4].mxu1 %vm433_vm0, %v11770_v54  ;;  %498 = vmatprep.mubr.bf16.mxu0 %v14738_v0  ;;  %v11951_v55 = vld [vmem:[#allocation13 + $0x84] ss:$16 sps:$4 sm:$0xff]   ;;  %v11954_v56 = vld [vmem:[#allocation13 + $0x8c] ss:$16 sps:$4 sm:$0xff]   ;;  %v11959_v57 = vld [vmem:[#allocation13 + $0x80] ss:$16 sps:$4 sm:$0xff]  }
  0xd2   :  { %571 = vmatprep.mubr.bf16.mxu1 %v14738_v0  ;;  %597 = vmatpush1.bf16.msra.mxu0 %v9254_v61  ;;  %v11961_v58 = vld [vmem:[#allocation13 + $0x88] ss:$16 sps:$4 sm:$0xff]   ;;  %v11963_v59 = vld [vmem:[#allocation13 + $0xa4] ss:$16 sps:$4 sm:$0xff]   ;;  %v11966_v60 = vld [vmem:[#allocation13 + $0xac] ss:$16 sps:$4 sm:$0xff]  }
  0xd3   :  { %598 = vmatprep.subr.bf16.mxu0 %v9263_v63  ;;  %670 = vmatpush1.bf16.msra.mxu1 %v9256_v62  ;;  %v11971_v61 = vld [vmem:[#allocation13 + $0xa0] ss:$16 sps:$4 sm:$0xff]   ;;  %v11973_v62 = vld [vmem:[#allocation13 + $0xa8] ss:$16 sps:$4 sm:$0xff]   ;;  %v11975_v63 = vld [vmem:[#allocation13 + $0xc4] ss:$16 sps:$4 sm:$0xff]  }
  0xd4   :  { %671 = vmatprep.subr.bf16.mxu1 %v9265_v1  ;;  %v11978_v1 = vld [vmem:[#allocation13 + $0xcc] ss:$16 sps:$4 sm:$0xff]   ;;  %v11995_v20 = vld [vmem:[#allocation13 + $0xe0] ss:$16 sps:$4 sm:$0xff]  }
  0xd6   :  { %599 = vmatpush1.bf16.msra.mxu0 %v9262_v2  ;;  %v11983_v2 = vld [vmem:[#allocation13 + $0xc0] ss:$16 sps:$4 sm:$0xff]  }
  0xd7   :  { %672 = vmatpush1.bf16.msra.mxu1 %v9264_v3  ;;  %998 = vmatprep.subr.bf16.mxu0 %v11778_v4  ;;  %v11985_v3 = vld [vmem:[#allocation13 + $0xc8] ss:$16 sps:$4 sm:$0xff]  }
  0xd8   :  { %9268 = vmatmul.mubr.msk.bf16.gmra.mrb[8].mxu0 %vm433_vm0, %v11780_v5  ;;  %1039 = vmatprep.subr.bf16.mxu1 %v11782_v6 }
  0xd9   :  { %9272 = vmatmul.mubr.msk.bf16.gmra.mrb[8].mxu1 %vm433_vm0, %v11780_v5  ;;  %508 = vmatprep.mubr.bf16.mxu0 %v14738_v0 }
  0xda   :  { %581 = vmatprep.mubr.bf16.mxu1 %v14738_v0 }
  0xe0   :  { %9269 = vmatmul.mubr.msk.bf16.gmra.mrb[12].mxu0 %vm433_vm0, %v11792_v7 }
  0xe1   :  { %9273 = vmatmul.mubr.msk.bf16.gmra.mrb[12].mxu1 %vm433_vm0, %v11792_v7  ;;  %624 = vmatprep.mubr.bf16.mxu0 %v14738_v0 }
  0xe2   :  { %697 = vmatprep.mubr.bf16.mxu1 %v14738_v0 }
  0xe8   :  { %9274 = vmatmul.mubr.msk.bf16.vlgmr.msra.gmra.mrb[16].mxu0 %vm433_vm0, %v11762_v38 }
  0xe9   :  { %9278 = vmatmul.mubr.msk.bf16.vlgmr.msra.gmra.mrb[16].mxu1 %vm433_vm0, %v11762_v38  ;;  %999 = vmatpush1.bf16.msra.mxu0 %v11800_v8  ;;  %v11902_v38 = vld [vmem:[#allocation12 + $0xe8] ss:$16 sps:$4 sm:$0xff]  }
  0xea   :  { %1040 = vmatpush1.bf16.msra.mxu1 %v11802_v9  ;;  %1000 = vmatprep.subr.bf16.mxu0 %v11804_v10 }
  0xeb   :  { %1041 = vmatprep.subr.bf16.mxu1 %v11806_v11  ;;  %634 = vmatprep.mubr.bf16.mxu0 %v14738_v0 }
  0xec   :  { %707 = vmatprep.mubr.bf16.mxu1 %v14738_v0 }
  0xed   :  { %1001 = vmatpush1.bf16.msra.mxu0 %v11810_v12 }
  0xee   :  { %1042 = vmatpush1.bf16.msra.mxu1 %v11815_v13  ;;  %1002 = vmatprep.subr.bf16.mxu0 %v11819_v14 }
  0xef   :  { %1043 = vmatprep.subr.bf16.mxu1 %v11823_v15 }
  0xf0   :  { %9275 = vmatmul.mubr.msk.bf16.gmra.mrb[20].mxu0 %vm433_vm0, %v11770_v54 }
  0xf1   :  { %9279 = vmatmul.mubr.msk.bf16.gmra.mrb[20].mxu1 %vm433_vm0, %v11770_v54  ;;  %1003 = vmatpush1.bf16.msra.mxu0 %v11826_v16  ;;  %v11949_v54 = vld [vmem:[#allocation13 + $0x68] ss:$16 sps:$4 sm:$0xff]  }
  0xf2   :  { %1044 = vmatpush1.bf16.msra.mxu1 %v11829_v17  ;;  %1004 = vmatprep.subr.bf16.mxu0 %v11833_v18 }
  0xf3   :  { %1045 = vmatprep.subr.bf16.mxu1 %v11835_v19  ;;  %644 = vmatprep.mubr.bf16.mxu0 %v14738_v0 }
  0xf4   :  { %717 = vmatprep.mubr.bf16.mxu1 %v14738_v0 }
  0xf5   :  { %1005 = vmatpush1.bf16.msra.mxu0 %v11838_v21 }
  0xf6   :  { %1046 = vmatpush1.bf16.msra.mxu1 %v11842_v22  ;;  %1006 = vmatprep.subr.bf16.mxu0 %v11844_v23 }
  0xf7   :  { %1047 = vmatprep.subr.bf16.mxu1 %v11849_v24 }
  0xf8   :  { %9276 = vmatmul.mubr.msk.bf16.gmra.mrb[24].mxu0 %vm433_vm0, %v11780_v5 }
  0xf9   :  { %9280 = vmatmul.mubr.msk.bf16.gmra.mrb[24].mxu1 %vm433_vm0, %v11780_v5  ;;  %1007 = vmatpush1.bf16.msra.mxu0 %v11855_v25  ;;  %v11987_v5 = vld [vmem:[#allocation13 + $0xe4] ss:$16 sps:$4 sm:$0xff]  }
  0xfa   :  { %1048 = vmatpush1.bf16.msra.mxu1 %v11858_v26  ;;  %1008 = vmatprep.subr.bf16.mxu0 %v11860_v27 }
  0xfb   :  { %1049 = vmatprep.subr.bf16.mxu1 %v11863_v28  ;;  %654 = vmatprep.mubr.bf16.mxu0 %v14738_v0 }
  0xfc   :  { %727 = vmatprep.mubr.bf16.mxu1 %v14738_v0 }
  0xfd   :  { %1009 = vmatpush1.bf16.msra.mxu0 %v11868_v29 }
  0xfe   :  { %1050 = vmatpush1.bf16.msra.mxu1 %v11872_v30  ;;  %1010 = vmatprep.subr.bf16.mxu0 %v11874_v31 }
  0xff   :  { %1051 = vmatprep.subr.bf16.mxu1 %v11879_v32 }
 0x100   :  { %9277 = vmatmul.mubr.msk.bf16.gmra.mrb[28].mxu0 %vm433_vm0, %v11792_v7 }
 0x101   :  { %9281 = vmatmul.mubr.msk.bf16.gmra.mrb[28].mxu1 %vm433_vm0, %v11792_v7  ;;  %1011 = vmatpush1.bf16.msra.mxu0 %v11885_v33  ;;  %v11990_v7 = vld [vmem:[#allocation13 + $0xec] ss:$16 sps:$4 sm:$0xff]  }
 0x102   :  { %1052 = vmatpush1.bf16.msra.mxu1 %v11888_v34  ;;  %1012 = vmatprep.subr.bf16.mxu0 %v11890_v35 }
 0x103   :  { %1053 = vmatprep.subr.bf16.mxu1 %v11893_v36  ;;  %1030 = vmatprep.mubr.bf16.mxu0 %v14738_v0 }
 0x104   :  { %1071 = vmatprep.mubr.bf16.mxu1 %v14738_v0 }
 0x105   :  { %1013 = vmatpush1.bf16.msra.mxu0 %v11898_v37 }
 0x106   :  { %1054 = vmatpush1.bf16.msra.mxu1 %v11902_v38  ;;  %1280 = vmatprep.subr.bf16.mxu0 %v11904_v39 }
 0x107   :  { %1321 = vmatprep.subr.bf16.mxu1 %v11909_v40 }
 0x108   :  { %1031 = vmatmul.mubr.bf16.vlgmr.msra.gmra.mrb[32].mxu0 %v14738_v0 }
 0x109   :  { %1072 = vmatmul.mubr.bf16.vlgmr.msra.gmra.mrb[32].mxu1 %v14738_v0  ;;  %1281 = vmatpush1.bf16.msra.mxu0 %v10202_v41  ;;  %v11997_v41 = vld [vmem:[#allocation13 + $0xe8] ss:$16 sps:$4 sm:$0xff]  }
 0x10a   :  { %1322 = vmatpush1.bf16.msra.mxu1 %v10205_v42  ;;  %1282 = vmatprep.subr.bf16.mxu0 %v10210_v43 }
 0x10b   :  { %1323 = vmatprep.subr.bf16.mxu1 %v11917_v44  ;;  %1312 = vmatprep.mubr.bf16.mxu0 %v14738_v0 }
 0x10c   :  { %1353 = vmatprep.mubr.bf16.mxu1 %v14738_v0 }
 0x10d   :  { %1283 = vmatpush1.bf16.msra.mxu0 %v11922_v45 }
 0x10e   :  { %1324 = vmatpush1.bf16.msra.mxu1 %v11925_v46  ;;  %1284 = vmatprep.subr.bf16.mxu0 %v11927_v47 }
 0x10f   :  { %1325 = vmatprep.subr.bf16.mxu1 %v11930_v48 }
 0x111   :  { %1285 = vmatpush1.bf16.msra.mxu0 %v11933_v49 }
 0x112   :  { %1326 = vmatpush1.bf16.msra.mxu1 %v11936_v50  ;;  %1286 = vmatprep.subr.bf16.mxu0 %v11938_v51 }
 0x113   :  { %1327 = vmatprep.subr.bf16.mxu1 %v11942_v52 }
 0x115   :  { %1287 = vmatpush1.bf16.msra.mxu0 %v11947_v53 }
 0x116   :  { %1328 = vmatpush1.bf16.msra.mxu1 %v11949_v54  ;;  %1288 = vmatprep.subr.bf16.mxu0 %v11951_v55 }
 0x117   :  { %1329 = vmatprep.subr.bf16.mxu1 %v11954_v56 }
 0x119   :  { %1289 = vmatpush1.bf16.msra.mxu0 %v11959_v57 }
 0x11a   :  { %1330 = vmatpush1.bf16.msra.mxu1 %v11961_v58  ;;  %1290 = vmatprep.subr.bf16.mxu0 %v11963_v59 }
 0x11b   :  { %1331 = vmatprep.subr.bf16.mxu1 %v11966_v60 }
 0x11d   :  { %1291 = vmatpush1.bf16.msra.mxu0 %v11971_v61 }
 0x11e   :  { %1332 = vmatpush1.bf16.msra.mxu1 %v11973_v62  ;;  %1292 = vmatprep.subr.bf16.mxu0 %v11975_v63 }
 0x11f   :  { %1333 = vmatprep.subr.bf16.mxu1 %v11978_v1 }
 0x121   :  { %1293 = vmatpush1.bf16.msra.mxu0 %v11983_v2 }
 0x122   :  { %1334 = vmatpush1.bf16.msra.mxu1 %v11985_v3  ;;  %1294 = vmatprep.subr.bf16.mxu0 %v11987_v5 }
 0x123   :  { %1335 = vmatprep.subr.bf16.mxu1 %v11990_v7 }
 0x125   :  { %1295 = vmatpush1.bf16.msra.mxu0 %v11995_v20 }
 0x126   :  { %1336 = vmatpush1.bf16.msra.mxu1 %v11997_v41  ;;  %1619 = vmatprep.subr.bf16.mxu0 %v11778_v4  ;;  %v213_v4 = vlaneseq }
 0x127   :  { %1660 = vmatprep.subr.bf16.mxu1 %v11782_v6 }
 0x128   :  { %1313 = vmatmul.mubr.bf16.vlgmr.msra.gmra.mrb[36].mxu0 %v14738_v0  ;;  %v12043_v6 = vshrl.u32 %v213_v4, 7 }
 0x129   :  { %1354 = vmatmul.mubr.bf16.vlgmr.msra.gmra.mrb[36].mxu1 %v14738_v0  ;;  %1620 = vmatpush1.bf16.msra.mxu0 %v11800_v8 }
 0x12a   :  { %1661 = vmatpush1.bf16.msra.mxu1 %v11802_v9  ;;  %1621 = vmatprep.subr.bf16.mxu0 %v11804_v10  ;;  %14889 = vst [vmem:[#allocation29_spill] sm:$0xff] %v12043_v6  ;;  %v14736_v8 = vsub.s32 2, %v12043_v6  ;;  %v14737_v9 = vsub.s32 0, %v12043_v6  ;;  %v14734_v10 = vsub.s32 3, %v12043_v6 }
 0x12b   :  { %1662 = vmatprep.subr.bf16.mxu1 %v11806_v11  ;;  %1651 = vmatprep.mubr.bf16.mxu0 %v14738_v0  ;;  %v12048_v11 = vld [vmem:[#allocation10] sm:$0xff] }
 0x12c   :  { %1692 = vmatprep.mubr.bf16.mxu1 %v14738_v0 }
 0x12d   :  { %1622 = vmatpush1.bf16.msra.mxu0 %v11810_v12  ;;  %v14735_v12 = vsub.s32 1, %v12043_v6 }
 0x12e   :  { %1663 = vmatpush1.bf16.msra.mxu1 %v11815_v13  ;;  %1623 = vmatprep.subr.bf16.mxu0 %v11819_v14  ;;  %v12056_v14 = vrot.slane %v12048_v11, %v14736_v8 }
 0x12f   :  { %1664 = vmatprep.subr.bf16.mxu1 %v11823_v15  ;;  %v12061_v15 = vrot.slane %v12048_v11, %v14737_v9 }
 0x131   :  { %1624 = vmatpush1.bf16.msra.mxu0 %v11826_v16 }
 0x132   :  { %1665 = vmatpush1.bf16.msra.mxu1 %v11829_v17  ;;  %1625 = vmatprep.subr.bf16.mxu0 %v11833_v18  ;;  %v12070_v18 = vrot.slane %v12048_v11, %v14734_v10 }
 0x133   :  { %1666 = vmatprep.subr.bf16.mxu1 %v11835_v19  ;;  %v12075_v19 = vrot.slane %v12048_v11, %v14735_v12 }
 0x135   :  { %1626 = vmatpush1.bf16.msra.mxu0 %v11838_v21 }
 0x136   :  { %1667 = vmatpush1.bf16.msra.mxu1 %v11842_v22  ;;  %1627 = vmatprep.subr.bf16.mxu0 %v11844_v23 }
 0x137   :  { %1668 = vmatprep.subr.bf16.mxu1 %v11849_v24 }
 0x139   :  { %1628 = vmatpush1.bf16.msra.mxu0 %v11855_v25 }
 0x13a   :  { %1669 = vmatpush1.bf16.msra.mxu1 %v11858_v26  ;;  %1629 = vmatprep.subr.bf16.mxu0 %v11860_v27 }
 0x13b   :  { %1670 = vmatprep.subr.bf16.mxu1 %v11863_v28 }
 0x13d   :  { %1630 = vmatpush1.bf16.msra.mxu0 %v11868_v29 }
 0x13e   :  { %1671 = vmatpush1.bf16.msra.mxu1 %v11872_v30  ;;  %1631 = vmatprep.subr.bf16.mxu0 %v11874_v31 }
 0x13f   :  { %1672 = vmatprep.subr.bf16.mxu1 %v11879_v32 }
 0x141   :  { %1632 = vmatpush1.bf16.msra.mxu0 %v11885_v33 }
 0x142   :  { %1673 = vmatpush1.bf16.msra.mxu1 %v11888_v34  ;;  %1633 = vmatprep.subr.bf16.mxu0 %v11890_v35 }
 0x143   :  { %1674 = vmatprep.subr.bf16.mxu1 %v11893_v36 }
 0x145   :  { %1634 = vmatpush1.bf16.msra.mxu0 %v11898_v37 }
 0x146   :  { %1675 = vmatpush1.bf16.msra.mxu1 %v11902_v38  ;;  %1902 = vmatprep.subr.bf16.mxu0 %v11904_v39 }
 0x147   :  { %1943 = vmatprep.subr.bf16.mxu1 %v11909_v40 }
 0x19b   :  { %v12051_v13 = vpop.f32.mrb[0].mxu0  ;;  %v12065_v17 = vpop.f32.mrb[0].mxu1 }
 0x19c   :  { %v12063_v16 = vpop.f32.mrb[1].mxu0  ;;  %v12077_v22 = vpop.f32.mrb[1].mxu1 }
 0x19d   :  { %v484_v21 = vpop.f32.mrb[2].mxu0  ;;  %v557_v25 = vpop.f32.mrb[2].mxu1 }
 0x19e   :  { %v12080_v23 = vadd.f32 %v484_v21, %v12061_v15  ;;  %v486_v24 = vpop.f32.mrb[3].mxu0  ;;  %v12086_v27 = vadd.f32 %v557_v25, %v12056_v14  ;;  %v559_v28 = vpop.f32.mrb[3].mxu1 }
 0x19f   :  { %v12083_v26 = vadd.f32 %v486_v24, %v12075_v19  ;;  %v12089_v29 = vadd.f32 %v559_v28, %v12070_v18 }
 0x1a3   :  { %v490_v30 = vpop.f32.mrb[4].mxu0 }
 0x1a4   :  { %v12092_v31 = vadd.f32 %v490_v30, %v12061_v15  ;;  %v492_v32 = vpop.f32.mrb[5].mxu0  ;;  %v563_v33 = vpop.f32.mrb[4].mxu1 }
 0x1a5   :  { %v12095_v34 = vadd.f32 %v492_v32, %v12075_v19  ;;  %v494_v35 = vpop.f32.mrb[6].mxu0  ;;  %v12098_v36 = vadd.f32 %v563_v33, %v12056_v14  ;;  %v565_v37 = vpop.f32.mrb[5].mxu1 }
 0x1a6   :  { %14890 = vst [vmem:[#allocation30_spill] sm:$0xff] %v12092_v31  ;;  %v12101_v38 = vadd.f32 %v494_v35, %v12061_v15  ;;  %v496_v39 = vpop.f32.mrb[7].mxu0  ;;  %v12104_v40 = vadd.f32 %v565_v37, %v12070_v18  ;;  %v567_v42 = vpop.f32.mrb[6].mxu1 }
 0x1a7   :  { %14891 = vst [vmem:[#allocation31_spill] sm:$0xff] %v12095_v34  ;;  %14892 = vst [vmem:[#allocation32_spill] sm:$0xff] %v12098_v36  ;;  %v12107_v43 = vadd.f32 %v496_v39, %v12075_v19  ;;  %v12110_v4 = vadd.f32 %v567_v42, %v12056_v14  ;;  %v569_v21 = vpop.f32.mrb[7].mxu1 }
 0x1a8   :  { %14893 = vst [vmem:[#allocation33_spill] sm:$0xff] %v12101_v38  ;;  %14894 = vst [vmem:[#allocation34_spill] sm:$0xff] %v12104_v40  ;;  %v12113_v24 = vadd.f32 %v569_v21, %v12070_v18  ;;  %v483_v38 = vadd.f32 %v12063_v16, %v12075_v19 }
 0x1a9   :  { %14895 = vst [vmem:[#allocation35_spill] sm:$0xff] %v12107_v43  ;;  %14896 = vst [vmem:[#allocation36_spill] sm:$0xff] %v12110_v4 }
 0x1aa   :  { %14897 = vst [vmem:[#allocation37_spill] sm:$0xff] %v12113_v24 }
 0x1ab   :  { %v500_v25 = vpop.f32.mrb[8].mxu0 }
 0x1ac   :  { %v12116_v28 = vadd.f32 %v500_v25, %v12061_v15  ;;  %v502_v30 = vpop.f32.mrb[9].mxu0  ;;  %v573_v32 = vpop.f32.mrb[8].mxu1 }
 0x1ad   :  { %v12119_v33 = vadd.f32 %v502_v30, %v12075_v19  ;;  %v504_v35 = vpop.f32.mrb[10].mxu0  ;;  %v12122_v37 = vadd.f32 %v573_v32, %v12056_v14  ;;  %v575_v39 = vpop.f32.mrb[9].mxu1 }
 0x1ae   :  { %14898 = vst [vmem:[#allocation38_spill] sm:$0xff] %v12116_v28  ;;  %v12125_v42 = vadd.f32 %v504_v35, %v12061_v15  ;;  %v506_v10 = vpop.f32.mrb[11].mxu0  ;;  %v12128_v21 = vadd.f32 %v575_v39, %v12070_v18  ;;  %v577_v12 = vpop.f32.mrb[10].mxu1 }
 0x1af   :  { %14899 = vst [vmem:[#allocation39_spill] sm:$0xff] %v12119_v33  ;;  %14900 = vst [vmem:[#allocation40_spill] sm:$0xff] %v12122_v37  ;;  %v12131_v25 = vadd.f32 %v506_v10, %v12075_v19  ;;  %v12134_v8 = vadd.f32 %v577_v12, %v12056_v14  ;;  %v579_v30 = vpop.f32.mrb[11].mxu1 }
 0x1b0   :  { %14901 = vst [vmem:[#allocation41_spill] sm:$0xff] %v12125_v42  ;;  %14902 = vst [vmem:[#allocation42_spill] sm:$0xff] %v12128_v21  ;;  %v12137_v9 = vadd.f32 %v579_v30, %v12070_v18 }
 0x1b1   :  { %14903 = vst [vmem:[#allocation43_spill] sm:$0xff] %v12131_v25  ;;  %14904 = vst [vmem:[#allocation44_spill] sm:$0xff] %v12134_v8 }
 0x1b2   :  { %14905 = vst [vmem:[#allocation45_spill] sm:$0xff] %v12137_v9 }
 0x1b3   :  { %v510_v32 = vpop.f32.mrb[12].mxu0 }
 0x1b4   :  { %v12140_v0 = vadd.f32 %v510_v32, %v12061_v15  ;;  %v512_v35 = vpop.f32.mrb[13].mxu0  ;;  %v583_v39 = vpop.f32.mrb[12].mxu1 }
 0x1b5   :  { %v12144_v21 = vadd.f32 %v512_v35, %v12075_v19  ;;  %v514_v10 = vpop.f32.mrb[14].mxu0  ;;  %v12148_v12 = vadd.f32 %v583_v39, %v12056_v14  ;;  %v585_v8 = vpop.f32.mrb[13].mxu1 }
 0x1b6   :  { %14906 = vst [vmem:[#allocation46_spill] sm:$0xff] %v12140_v0  ;;  %v12152_v9 = vadd.f32 %v514_v10, %v12061_v15  ;;  %v516_v32 = vpop.f32.mrb[15].mxu0  ;;  %v12155_v0 = vadd.f32 %v585_v8, %v12070_v18  ;;  %v587_v42 = vpop.f32.mrb[14].mxu1  ;;  %v14915_v8 = vsub.s32 5, %v12043_v6 }
 0x1b7   :  { %14907 = vst [vmem:[#allocation47_spill] sm:$0xff] %v12144_v21  ;;  %14908 = vst [vmem:[#allocation48_spill] sm:$0xff] %v12148_v12  ;;  %v12159_v21 = vadd.f32 %v516_v32, %v12075_v19  ;;  %v12162_v25 = vadd.f32 %v587_v42, %v12056_v14  ;;  %v589_v39 = vpop.f32.mrb[15].mxu1  ;;  %v14913_v12 = vsub.s32 4, %v12043_v6  ;;  %v14916_v32 = vsub.s32 6, %v12043_v6 }
 0x1b8   :  { %14909 = vst [vmem:[#allocation49_spill] sm:$0xff] %v12152_v9  ;;  %14910 = vst [vmem:[#allocation50_spill] sm:$0xff] %v12155_v0  ;;  %v12170_v10 = vadd.f32 %v589_v39, %v12070_v18  ;;  %v12175_v9 = vrot.slane %v12048_v11, %v14915_v8  ;;  %v14917_v42 = vsub.s32 7, %v12043_v6 }
 0x1b9   :  { %14911 = vst [vmem:[#allocation51_spill] sm:$0xff] %v12159_v21  ;;  %14912 = vst [vmem:[#allocation52_spill] sm:$0xff] %v12162_v25  ;;  %v12167_v30 = vrot.slane %v12048_v11, %v14913_v12  ;;  %v12180_v35 = vrot.slane %v12048_v11, %v14916_v32 }
 0x1ba   :  { %14914 = vst [vmem:[#allocation53_spill] sm:$0xff] %v12170_v10  ;;  %v12185_v21 = vrot.slane %v12048_v11, %v14917_v42 }
 0x1bb   :  { %v626_v12 = vpop.f32.mrb[16].mxu0 }
 0x1bc   :  { %v12188_v25 = vadd.f32 %v626_v12, %v12167_v30  ;;  %v628_v39 = vpop.f32.mrb[17].mxu0  ;;  %v699_v10 = vpop.f32.mrb[16].mxu1 }
 0x1bd   :  { %v12191_v0 = vadd.f32 %v628_v39, %v12175_v9  ;;  %v630_v8 = vpop.f32.mrb[18].mxu0  ;;  %v12194_v33 = vadd.f32 %v699_v10, %v12180_v35  ;;  %v701_v32 = vpop.f32.mrb[17].mxu1 }
 0x1be   :  { %14918 = vst [vmem:[#allocation54_spill] sm:$0xff] %v12188_v25  ;;  %v12197_v37 = vadd.f32 %v630_v8, %v12167_v30  ;;  %v632_v6 = vpop.f32.mrb[19].mxu0  ;;  %v12200_v11 = vadd.f32 %v701_v32, %v12185_v21  ;;  %v703_v42 = vpop.f32.mrb[18].mxu1 }
 0x1bf   :  { %14919 = vst [vmem:[#allocation55_spill] sm:$0xff] %v12191_v0  ;;  %14920 = vst [vmem:[#allocation56_spill] sm:$0xff] %v12194_v33  ;;  %v12203_v12 = vadd.f32 %v632_v6, %v12175_v9  ;;  %v12206_v25 = vadd.f32 %v703_v42, %v12180_v35  ;;  %v705_v39 = vpop.f32.mrb[19].mxu1 }
 0x1c0   :  { %14921 = vst [vmem:[#allocation57_spill] sm:$0xff] %v12197_v37  ;;  %14922 = vst [vmem:[#allocation58_spill] sm:$0xff] %v12200_v11  ;;  %v12209_v0 = vadd.f32 %v705_v39, %v12185_v21 }
 0x1c1   :  { %14923 = vst [vmem:[#allocation59_spill] sm:$0xff] %v12203_v12  ;;  %14924 = vst [vmem:[#allocation60_spill] sm:$0xff] %v12206_v25 }
 0x1c2   :  { %14925 = vst [vmem:[#allocation61_spill] sm:$0xff] %v12209_v0 }
 0x1c3   :  { %v636_v10 = vpop.f32.mrb[20].mxu0 }
 0x1c4   :  { %v12212_v33 = vadd.f32 %v636_v10, %v12167_v30  ;;  %v638_v8 = vpop.f32.mrb[21].mxu0  ;;  %v709_v37 = vpop.f32.mrb[20].mxu1 }
 0x1c5   :  { %v12215_v32 = vadd.f32 %v638_v8, %v12175_v9  ;;  %v640_v11 = vpop.f32.mrb[22].mxu0  ;;  %v12218_v6 = vadd.f32 %v709_v37, %v12180_v35  ;;  %v711_v12 = vpop.f32.mrb[21].mxu1 }
 0x1c6   :  { %14926 = vst [vmem:[#allocation62_spill] sm:$0xff] %v12212_v33  ;;  %v12221_v42 = vadd.f32 %v640_v11, %v12167_v30  ;;  %v642_v25 = vpop.f32.mrb[23].mxu0  ;;  %v12224_v39 = vadd.f32 %v711_v12, %v12185_v21  ;;  %v713_v0 = vpop.f32.mrb[22].mxu1 }
 0x1c7   :  { %14927 = vst [vmem:[#allocation63_spill] sm:$0xff] %v12215_v32  ;;  %14928 = vst [vmem:[#allocation64_spill] sm:$0xff] %v12218_v6  ;;  %v12227_v10 = vadd.f32 %v642_v25, %v12175_v9  ;;  %v12230_v33 = vadd.f32 %v713_v0, %v12180_v35  ;;  %v715_v8 = vpop.f32.mrb[23].mxu1 }
 0x1c8   :  { %14929 = vst [vmem:[#allocation65_spill] sm:$0xff] %v12221_v42  ;;  %14930 = vst [vmem:[#allocation66_spill] sm:$0xff] %v12224_v39  ;;  %v12233_v32 = vadd.f32 %v715_v8, %v12185_v21 }
 0x1c9   :  { %14931 = vst [vmem:[#allocation67_spill] sm:$0xff] %v12227_v10  ;;  %14932 = vst [vmem:[#allocation68_spill] sm:$0xff] %v12230_v33 }
 0x1ca   :  { %14933 = vst [vmem:[#allocation69_spill] sm:$0xff] %v12233_v32 }
 0x1cb   :  { %v646_v37 = vpop.f32.mrb[24].mxu0 }
 0x1cc   :  { %v12236_v6 = vadd.f32 %v646_v37, %v12167_v30  ;;  %v648_v11 = vpop.f32.mrb[25].mxu0  ;;  %v719_v42 = vpop.f32.mrb[24].mxu1 }
 0x1cd   :  { %v12239_v12 = vadd.f32 %v648_v11, %v12175_v9  ;;  %v650_v39 = vpop.f32.mrb[26].mxu0  ;;  %v12242_v25 = vadd.f32 %v719_v42, %v12180_v35  ;;  %v721_v10 = vpop.f32.mrb[25].mxu1 }
 0x1ce   :  { %14934 = vst [vmem:[#allocation70_spill] sm:$0xff] %v12236_v6  ;;  %v12245_v0 = vadd.f32 %v650_v39, %v12167_v30  ;;  %v652_v33 = vpop.f32.mrb[27].mxu0  ;;  %v12248_v8 = vadd.f32 %v721_v10, %v12185_v21  ;;  %v723_v32 = vpop.f32.mrb[26].mxu1 }
 0x1cf   :  { %14935 = vst [vmem:[#allocation71_spill] sm:$0xff] %v12239_v12  ;;  %14936 = vst [vmem:[#allocation72_spill] sm:$0xff] %v12242_v25  ;;  %v12251_v37 = vadd.f32 %v652_v33, %v12175_v9  ;;  %v12254_v28 = vadd.f32 %v723_v32, %v12180_v35  ;;  %v725_v11 = vpop.f32.mrb[27].mxu1 }
 0x1d0   :  { %14937 = vst [vmem:[#allocation73_spill] sm:$0xff] %v12245_v0  ;;  %14938 = vst [vmem:[#allocation74_spill] sm:$0xff] %v12248_v8  ;;  %v12257_v12 = vadd.f32 %v725_v11, %v12185_v21 }
 0x1d1   :  { %14939 = vst [vmem:[#allocation75_spill] sm:$0xff] %v12251_v37  ;;  %14940 = vst [vmem:[#allocation76_spill] sm:$0xff] %v12254_v28 }
 0x1d2   :  { %14941 = vst [vmem:[#allocation77_spill] sm:$0xff] %v12257_v12 }
 0x1d3   :  { %v656_v42 = vpop.f32.mrb[28].mxu0 }
 0x1d4   :  { %v12260_v25 = vadd.f32 %v656_v42, %v12167_v30  ;;  %v658_v39 = vpop.f32.mrb[29].mxu0  ;;  %v729_v6 = vpop.f32.mrb[28].mxu1  ;;  %v481_v42 = vadd.f32 %v12051_v13, %v12061_v15 }
 0x1d5   :  { %v12263_v10 = vadd.f32 %v658_v39, %v12175_v9  ;;  %v660_v8 = vpop.f32.mrb[30].mxu0  ;;  %v12266_v33 = vadd.f32 %v729_v6, %v12180_v35  ;;  %v731_v24 = vpop.f32.mrb[29].mxu1  ;;  %v554_v39 = vadd.f32 %v12065_v17, %v12056_v14  ;;  %v556_v6 = vadd.f32 %v12077_v22, %v12070_v18 }
 0x1d6   :  { %v662_v32 = vpop.f32.mrb[31].mxu0  ;;  %v12269_v43 = vadd.f32 %v731_v24, %v12185_v21  ;;  %v733_v11 = vpop.f32.mrb[30].mxu1 }
 0x1d7   :  { %14942 = vst [vmem:[#allocation78_spill] sm:$0xff] %v12263_v10  ;;  %14943 = vst [vmem:[#allocation79_spill] sm:$0xff] %v12266_v33  ;;  %v735_v4 = vpop.f32.mrb[31].mxu1 }
 0x1d8   :  { %14944 = vst [vmem:[#allocation80_spill] sm:$0xff] %v12269_v43 }
 0x1db   :  { %v1032_v12 = vpop.f32.mrb[32].mxu0 }
 0x1dc   :  { %v1080_v37 = vadd.f32 %v1032_v12, %v481_v42  ;;  %v1073_v28 = vpop.f32.mrb[32].mxu1  ;;  %v1034_v0 = vpop.f32.mrb[33].mxu0  ;;  %v736_v42 = vadd.f32 %v735_v4, %v12185_v21 }
 0x1dd   :  { %v1082_v24 = vadd.f32 %v1073_v28, %v554_v39  ;;  %v1081_v40 = vadd.f32 %v1034_v0, %v483_v38  ;;  %v1075_v34 = vpop.f32.mrb[33].mxu1  ;;  %v1036_v36 = vpop.f32.mrb[34].mxu0 }
 0x1de   :  { %v9346_v31 = vmul.f32 -1.442695, %v1080_v37  ;;  %v1083_v43 = vadd.f32 %v1075_v34, %v556_v6  ;;  %v1037_v13 = vpop.f32.mrb[35].mxu0  ;;  %v1077_v15 = vpop.f32.mrb[34].mxu1 }
 0x1df   :  { %v9347_v10 = vmul.f32 -1.442695, %v1081_v40  ;;  %v1078_v16 = vpop.f32.mrb[35].mxu1  ;;  %v661_v40 = vadd.f32 %v660_v8, %v12167_v30 }
 0x1e0   :  { %10634 = vpow2.f32 %v9346_v31  ;;  %v9348_v14 = vmul.f32 -1.442695, %v1083_v43  ;;  %v663_v31 = vadd.f32 %v662_v32, %v12175_v9  ;;  %v734_v43 = vadd.f32 %v733_v11, %v12180_v35 }
 0x1e1   :  { %10636 = vpow2.f32 %v9347_v10 }
 0x1e2   :  { %10638 = vpow2.f32 %v9348_v14  ;;  %v12286_v14 = vpop.permute.xlu0 %169 }
 0x1e3   :  { %10640 = vtanh.f32 %v1082_v24  ;;  %14945 = vst [vmem:[#allocation81_spill] sm:$0xff] %v12286_v14  ;;  %vm1414_vm1 = vcmp.gt.s32.totalorder %v12286_v14, 0  ;;  %vm1415_vm3 = vcmp.gt.s32.totalorder %v12286_v14, 7  ;;  %vm2036_vm5 = vcmp.gt.s32.totalorder %v12286_v14, 1 }
 0x1e4   :  { %vm12294_vm2 = vmpackc.low %vm1414_vm1, %vm1414_vm1  ;;  %vm2037_vm6 = vcmp.gt.s32.totalorder %v12286_v14, 6  ;;  %vm2658_vm7 = vcmp.gt.s32.totalorder %v12286_v14, 2  ;;  %vm2659_vm8 = vcmp.gt.s32.totalorder %v12286_v14, 5  ;;  %vm3280_vm9 = vcmp.gt.s32.totalorder %v12286_v14, 3 }
 0x1e5   :  { %vm12344_vm4 = vmpackc.low %vm1415_vm3, %vm1415_vm3  ;;  %vm3281_vm10 = vcmp.gt.s32.totalorder %v12286_v14, 4  ;;  %v13683_v14 = vld [vmem:[#allocation19 + $0xe0] ss:$16 sps:$4 sm:$0xff]  }
 0x1e6   :  { %vm13397_vm12 = vmpackc.low %vm11550_vm11, %vm1414_vm1 }
 0x1e7   :  { %vm13450_vm13 = vmpackc.low %vm1415_vm3, %vm11550_vm11 }
 0x1ea   :  { %v10635_v17 = vpop.eup %10634 }
 0x1eb   :  { %v10637_v19 = vpop.eup %10636  ;;  %v1369_v33 = vadd.f32 1.0, %v10635_v17 }
 0x1ec   :  { %v1375_v18 = vadd.f32 1.0, %v10637_v19  ;;  %v10639_v22 = vpop.eup %10638 }
 0x1ed   :  { %10642 = vrcp.f32 %v1369_v33  ;;  %v10641_v38 = vpop.eup %10640  ;;  %v1382_v12 = vadd.f32 1.0, %v10639_v22 }
 0x1ee   :  { %10644 = vrcp.f32 %v1375_v18  ;;  %v14947_v18 = vmov 0 }
 0x1ef   :  { %10646 = vrcp.f32 %v1382_v12  ;;  %v14948_v18 = vsel %vm12294_vm2, 4294967295, %v14947_v18  ;;  %v11146_v12 = vld [vmem:[#allocation13] ss:$16 sps:$4 sm:$0xff]  }
 0x1f0   :  { %14949 = vst [vmem:[#allocation83_spill] sm:$0xff] %v14948_v18 }
 0x1f7   :  { %v10643_v36 = vpop.eup %10642 }
 0x1f8   :  { %v10645_v28 = vpop.eup %10644  ;;  %v1386_v34 = vmul.f32 %v10643_v36, %v10641_v38 }
 0x1f9   :  { %v1385_v0 = vmul.f32 0.0, %v10645_v28  ;;  %v10647_v4 = vpop.eup %10646 }
 0x1fb   :  { %v12282_v37 = vadd.f32 %v1386_v34, %v1385_v0  ;;  %v1314_v10 = vpop.f32.mrb[36].mxu0  ;;  %v11147_v0 = vld [vmem:[#allocation13 + $0x8] ss:$16 sps:$4 sm:$0xff]  }
 0x1fc   :  { %v1362_v33 = vadd.f32 %v1314_v10, %v661_v40  ;;  %v1355_v39 = vpop.f32.mrb[36].mxu1  ;;  %v1316_v6 = vpop.f32.mrb[37].mxu0  ;;  %v11148_v40 = vld [vmem:[#allocation13 + $0x24] ss:$16 sps:$4 sm:$0xff]  }
 0x1fd   :  { %10648 = vtanh.f32 %v12282_v37  ;;  %v1364_v24 = vadd.f32 %v1355_v39, %v734_v43  ;;  %v1363_v13 = vadd.f32 %v1316_v6, %v663_v31  ;;  %v1357_v15 = vpop.f32.mrb[37].mxu1  ;;  %v1318_v16 = vpop.f32.mrb[38].mxu0  ;;  %v14950_v31 = vmov 0   ;;  %v12408_v6 = vld [vmem:[#allocation12 + $0x88] ss:$16 sps:$4 sm:$0xff]  }
 0x1fe   :  { %v9349_v30 = vmul.f32 -1.442695, %v1362_v33  ;;  %v1365_v8 = vadd.f32 %v1357_v15, %v736_v42  ;;  %v1319_v9 = vpop.f32.mrb[39].mxu0  ;;  %v1359_v32 = vpop.f32.mrb[38].mxu1  ;;  %v12418_v15 = vld [vmem:[#allocation12 + $0xa0] ss:$16 sps:$4 sm:$0xff]  }
 0x1ff   :  { %v9350_v35 = vmul.f32 -1.442695, %v1363_v13  ;;  %v1360_v11 = vpop.f32.mrb[39].mxu1  ;;  %v12416_v13 = vld [vmem:[#allocation12 + $0xac] ss:$16 sps:$4 sm:$0xff]  }
 0x200   :  { %10650 = vpow2.f32 %v9349_v30  ;;  %v9351_v17 = vmul.f32 -1.442695, %v1365_v8  ;;  %v12420_v16 = vld [vmem:[#allocation12 + $0xa8] ss:$16 sps:$4 sm:$0xff]   ;;  %v12426_v30 = vld [vmem:[#allocation12 + $0xc4] ss:$16 sps:$4 sm:$0xff]  }
 0x201   :  { %10652 = vpow2.f32 %v9350_v35  ;;  %v12428_v8 = vld [vmem:[#allocation12 + $0xcc] ss:$16 sps:$4 sm:$0xff]   ;;  %v12430_v9 = vld [vmem:[#allocation12 + $0xc0] ss:$16 sps:$4 sm:$0xff]   ;;  %v12432_v32 = vld [vmem:[#allocation12 + $0xc8] ss:$16 sps:$4 sm:$0xff]  }
 0x202   :  { %10654 = vpow2.f32 %v9351_v17  ;;  %v12438_v35 = vld [vmem:[#allocation12 + $0xe4] ss:$16 sps:$4 sm:$0xff]   ;;  %v12440_v11 = vld [vmem:[#allocation12 + $0xec] ss:$16 sps:$4 sm:$0xff]  }
 0x203   :  { %10656 = vtanh.f32 %v1364_v24  ;;  %v12414_v24 = vld [vmem:[#allocation12 + $0xa4] ss:$16 sps:$4 sm:$0xff]  }
 0x204   :  { %v12450_v17 = vld [vmem:[#allocation13 + $0x4] ss:$16 sps:$4 sm:$0xff]  }
 0x207   :  { %v10649_v21 = vpop.eup %10648 }
 0x208   :  { %v12288_v19 = vmul.f32 %v10649_v21, %v10647_v4  ;;  %v12442_v4 = vld [vmem:[#allocation12 + $0xe0] ss:$16 sps:$4 sm:$0xff]   ;;  %v12444_v21 = vld [vmem:[#allocation12 + $0xe8] ss:$16 sps:$4 sm:$0xff]  }
 0x20a   :  { %14946 = vst [vmem:[#allocation82_spill] sm:$0xff] %v12288_v19  ;;  %v10651_v22 = vpop.eup %10650  ;;  %v9385_v38 = vpack.c.bf16 %v12288_v19, %v12288_v19 }
 0x20b   :  { %v10653_v36 = vpop.eup %10652  ;;  %v1393_v28 = vadd.f32 1.0, %v10651_v22  ;;  %v12452_v22 = vld [vmem:[#allocation13 + $0xc] ss:$16 sps:$4 sm:$0xff]  }
 0x20c   :  { %v1399_v34 = vadd.f32 1.0, %v10653_v36  ;;  %9386 = vmatmul.mubr.msk.bf16.vlgmr.msra.gmra.mrb[40].mxu0 %vm12294_vm2, %v9385_v38  ;;  %9389 = vmatmul.mubr.msk.bf16.vlgmr.msra.gmra.mrb[40].mxu1 %vm12294_vm2, %v9385_v38  ;;  %v10655_v43 = vpop.eup %10654 }
 0x20d   :  { %10658 = vrcp.f32 %v1393_v28  ;;  %1903 = vmatpush1.bf16.msra.mxu0 %v11146_v12  ;;  %1944 = vmatpush1.bf16.msra.mxu1 %v11147_v0  ;;  %v10657_v10 = vpop.eup %10656 }
 0x20e   :  { %10660 = vrcp.f32 %v1399_v34  ;;  %1904 = vmatprep.subr.bf16.mxu0 %v11148_v40  ;;  %1945 = vmatprep.subr.bf16.mxu1 %v11917_v44 }
 0x20f   :  { %1934 = vmatprep.mubr.bf16.mxu0 %v14950_v31  ;;  %1975 = vmatprep.mubr.bf16.mxu1 %v14950_v31 }
 0x211   :  { %1905 = vmatpush1.bf16.msra.mxu0 %v11922_v45  ;;  %1946 = vmatpush1.bf16.msra.mxu1 %v11925_v46  ;;  %v1406_v45 = vadd.f32 1.0, %v10655_v43 }
 0x212   :  { %1906 = vmatprep.subr.bf16.mxu0 %v11927_v47  ;;  %1947 = vmatprep.subr.bf16.mxu1 %v11930_v48 }
 0x213   :  { %10662 = vrcp.f32 %v1406_v45 }
 0x215   :  { %1907 = vmatpush1.bf16.msra.mxu0 %v11933_v49  ;;  %1948 = vmatpush1.bf16.msra.mxu1 %v11936_v50 }
 0x216   :  { %1908 = vmatprep.subr.bf16.mxu0 %v11938_v51  ;;  %1949 = vmatprep.subr.bf16.mxu1 %v11942_v52  ;;  %v14952_v51 = vmov 0  ;;  %v12354_v52 = vld [vmem:[#allocation12 + $0x4] ss:$16 sps:$4 sm:$0xff]  }
 0x217   :  { %v10659_v44 = vpop.eup %10658  ;;  %v14953_v51 = vsel %vm12344_vm4, 4294967295, %v14952_v51 }
 0x218   :  { %v10661_v42 = vpop.eup %10660  ;;  %v1410_v33 = vmul.f32 %v10659_v44, %v10657_v10  ;;  %14954 = vst [vmem:[#allocation85_spill] sm:$0xff] %v14953_v51 }
 0x219   :  { %v1409_v39 = vmul.f32 0.0, %v10661_v42  ;;  %1909 = vmatpush1.bf16.msra.mxu0 %v11947_v53  ;;  %1950 = vmatpush1.bf16.msra.mxu1 %v11949_v54  ;;  %v12356_v53 = vld [vmem:[#allocation12 + $0xc] ss:$16 sps:$4 sm:$0xff]   ;;  %v12358_v54 = vld [vmem:[#allocation12] ss:$16 sps:$4 sm:$0xff]  }
 0x21a   :  { %1910 = vmatprep.subr.bf16.mxu0 %v11951_v55  ;;  %1951 = vmatprep.subr.bf16.mxu1 %v11954_v56  ;;  %v12360_v55 = vld [vmem:[#allocation12 + $0x8] ss:$16 sps:$4 sm:$0xff]   ;;  %v12366_v56 = vld [vmem:[#allocation12 + $0x24] ss:$16 sps:$4 sm:$0xff]  }
 0x21b   :  { %v12319_v46 = vadd.f32 %v1410_v33, %v1409_v39 }
 0x21d   :  { %10664 = vtanh.f32 %v12319_v46  ;;  %1911 = vmatpush1.bf16.msra.mxu0 %v11959_v57  ;;  %1952 = vmatpush1.bf16.msra.mxu1 %v11961_v58  ;;  %v10663_v47 = vpop.eup %10662  ;;  %v12368_v57 = vld [vmem:[#allocation12 + $0x2c] ss:$16 sps:$4 sm:$0xff]   ;;  %v12370_v58 = vld [vmem:[#allocation12 + $0x20] ss:$16 sps:$4 sm:$0xff]   ;;  %v1419_v51 = vsel %vm1415_vm3, %v12319_v46, 0.0 }
 0x21e   :  { %1912 = vmatprep.subr.bf16.mxu0 %v11963_v59  ;;  %1953 = vmatprep.subr.bf16.mxu1 %v11966_v60  ;;  %v12372_v59 = vld [vmem:[#allocation12 + $0x28] ss:$16 sps:$4 sm:$0xff]   ;;  %v12378_v60 = vld [vmem:[#allocation12 + $0x44] ss:$16 sps:$4 sm:$0xff]  }
 0x221   :  { %1913 = vmatpush1.bf16.msra.mxu0 %v11971_v61  ;;  %1954 = vmatpush1.bf16.msra.mxu1 %v11973_v62  ;;  %v12380_v61 = vld [vmem:[#allocation12 + $0x4c] ss:$16 sps:$4 sm:$0xff]   ;;  %v12382_v62 = vld [vmem:[#allocation12 + $0x40] ss:$16 sps:$4 sm:$0xff]  }
 0x222   :  { %1914 = vmatprep.subr.bf16.mxu0 %v11975_v63  ;;  %1955 = vmatprep.subr.bf16.mxu1 %v11978_v1  ;;  %v12384_v63 = vld [vmem:[#allocation12 + $0x48] ss:$16 sps:$4 sm:$0xff]   ;;  %v12390_v1 = vld [vmem:[#allocation12 + $0x64] ss:$16 sps:$4 sm:$0xff]  }
 0x225   :  { %1915 = vmatpush1.bf16.msra.mxu0 %v11983_v2  ;;  %1956 = vmatpush1.bf16.msra.mxu1 %v11985_v3  ;;  %v12392_v2 = vld [vmem:[#allocation12 + $0x6c] ss:$16 sps:$4 sm:$0xff]   ;;  %v12394_v3 = vld [vmem:[#allocation12 + $0x60] ss:$16 sps:$4 sm:$0xff]  }
 0x226   :  { %1916 = vmatprep.subr.bf16.mxu0 %v11987_v5  ;;  %1957 = vmatprep.subr.bf16.mxu1 %v11990_v7  ;;  %v12396_v5 = vld [vmem:[#allocation12 + $0x68] ss:$16 sps:$4 sm:$0xff]   ;;  %v12402_v7 = vld [vmem:[#allocation12 + $0x84] ss:$16 sps:$4 sm:$0xff]  }
 0x227   :  { %v10665_v48 = vpop.eup %10664 }
 0x228   :  { %v12334_v49 = vmul.f32 %v10665_v48, %v10663_v47 }
 0x229   :  { %1917 = vmatpush1.bf16.msra.mxu0 %v11995_v20  ;;  %1958 = vmatpush1.bf16.msra.mxu1 %v11997_v41  ;;  %v12404_v20 = vld [vmem:[#allocation12 + $0x8c] ss:$16 sps:$4 sm:$0xff]   ;;  %v12406_v41 = vld [vmem:[#allocation12 + $0x80] ss:$16 sps:$4 sm:$0xff]  }
 0x22a   :  { %14951 = vst [vmem:[#allocation84_spill] sm:$0xff] %v12334_v49  ;;  %v9423_v50 = vpack.c.bf16 %v12334_v49, %v12334_v49  ;;  %2241 = vmatprep.subr.bf16.mxu0 %v12354_v52  ;;  %2282 = vmatprep.subr.bf16.mxu1 %v12356_v53 }
 0x22c   :  { %9424 = vmatmul.mubr.msk.bf16.vlgmr.msra.gmra.mrb[44].mxu0 %vm12344_vm4, %v9423_v50  ;;  %9427 = vmatmul.mubr.msk.bf16.vlgmr.msra.gmra.mrb[44].mxu1 %vm12344_vm4, %v9423_v50 }
 0x22d   :  { %2273 = vmatprep.mubr.bf16.mxu0 %v14950_v31  ;;  %2314 = vmatprep.mubr.bf16.mxu1 %v14950_v31 }
 0x22e   :  { %2242 = vmatpush1.bf16.msra.mxu0 %v12358_v54  ;;  %2283 = vmatpush1.bf16.msra.mxu1 %v12360_v55 }
 0x22f   :  { %2243 = vmatprep.subr.bf16.mxu0 %v12366_v56  ;;  %2284 = vmatprep.subr.bf16.mxu1 %v12368_v57 }
 0x232   :  { %2244 = vmatpush1.bf16.msra.mxu0 %v12370_v58  ;;  %2285 = vmatpush1.bf16.msra.mxu1 %v12372_v59 }
 0x233   :  { %2245 = vmatprep.subr.bf16.mxu0 %v12378_v60  ;;  %2286 = vmatprep.subr.bf16.mxu1 %v12380_v61 }
 0x236   :  { %2246 = vmatpush1.bf16.msra.mxu0 %v12382_v62  ;;  %2287 = vmatpush1.bf16.msra.mxu1 %v12384_v63 }
 0x237   :  { %2247 = vmatprep.subr.bf16.mxu0 %v12390_v1  ;;  %2288 = vmatprep.subr.bf16.mxu1 %v12392_v2 }
 0x23a   :  { %2248 = vmatpush1.bf16.msra.mxu0 %v12394_v3  ;;  %2289 = vmatpush1.bf16.msra.mxu1 %v12396_v5 }
 0x23b   :  { %2249 = vmatprep.subr.bf16.mxu0 %v12402_v7  ;;  %2290 = vmatprep.subr.bf16.mxu1 %v12404_v20 }
 0x23e   :  { %2250 = vmatpush1.bf16.msra.mxu0 %v12406_v41  ;;  %2291 = vmatpush1.bf16.msra.mxu1 %v12408_v6 }
 0x23f   :  { %2251 = vmatprep.subr.bf16.mxu0 %v12414_v24  ;;  %2292 = vmatprep.subr.bf16.mxu1 %v12416_v13 }
 0x242   :  { %2252 = vmatpush1.bf16.msra.mxu0 %v12418_v15  ;;  %2293 = vmatpush1.bf16.msra.mxu1 %v12420_v16 }
 0x243   :  { %2253 = vmatprep.subr.bf16.mxu0 %v12426_v30  ;;  %2294 = vmatprep.subr.bf16.mxu1 %v12428_v8 }
 0x246   :  { %2254 = vmatpush1.bf16.msra.mxu0 %v12430_v9  ;;  %2295 = vmatpush1.bf16.msra.mxu1 %v12432_v32 }
 0x247   :  { %2255 = vmatprep.subr.bf16.mxu0 %v12438_v35  ;;  %2296 = vmatprep.subr.bf16.mxu1 %v12440_v11 }
 0x24a   :  { %2256 = vmatpush1.bf16.msra.mxu0 %v12442_v4  ;;  %2297 = vmatpush1.bf16.msra.mxu1 %v12444_v21 }
 0x24b   :  { %2524 = vmatprep.subr.bf16.mxu0 %v12450_v17  ;;  %2565 = vmatprep.subr.bf16.mxu1 %v12452_v22 }
 0x2df   :  { %v1653_v38 = vpop.f32.mrb[40].mxu0  ;;  %v1694_v36 = vpop.f32.mrb[40].mxu1 }
 0x2e0   :  { %v1701_v28 = vadd.f32 %v1653_v38, %v12080_v23  ;;  %v1703_v34 = vadd.f32 %v1694_v36, %v12086_v27  ;;  %v1655_v12 = vpop.f32.mrb[41].mxu0  ;;  %v1696_v0 = vpop.f32.mrb[41].mxu1 }
 0x2e1   :  { %v1702_v40 = vadd.f32 %v1655_v12, %v12083_v26  ;;  %v1704_v43 = vadd.f32 %v1696_v0, %v12089_v29  ;;  %v1657_v10 = vpop.f32.mrb[42].mxu0  ;;  %v1698_v44 = vpop.f32.mrb[42].mxu1 }
 0x2e2   :  { %v9428_v42 = vmul.f32 -1.442695, %v1701_v28  ;;  %v1658_v33 = vpop.f32.mrb[43].mxu0  ;;  %v1699_v45 = vpop.f32.mrb[43].mxu1  ;;  %v1417_v28 = vsel %vm1414_vm1, %v12282_v37, 0.0 }
 0x2e3   :  { %v9429_v39 = vmul.f32 -1.442695, %v1702_v40  ;;  %v9430_v47 = vmul.f32 -1.442695, %v1704_v43 }
 0x2e4   :  { %10666 = vpow2.f32 %v9428_v42  ;;  %v14955_v42 = vld [vmem:[#allocation79_spill] sm:$0xff] }
 0x2e5   :  { %10668 = vpow2.f32 %v9429_v39 }
 0x2e6   :  { %10670 = vpow2.f32 %v9430_v47  ;;  %v14956_v47 = vld [vmem:[#allocation78_spill] sm:$0xff] }
 0x2e7   :  { %10672 = vtanh.f32 %v1703_v34 }
 0x2ee   :  { %v10667_v48 = vpop.eup %10666 }
 0x2ef   :  { %v10669_v50 = vpop.eup %10668  ;;  %v1991_v23 = vadd.f32 1.0, %v10667_v48 }
 0x2f0   :  { %v1997_v27 = vadd.f32 1.0, %v10669_v50  ;;  %v10671_v26 = vpop.eup %10670  ;;  %v14957_v50 = vld [vmem:[#allocation80_spill] sm:$0xff] }
 0x2f1   :  { %10674 = vrcp.f32 %v1991_v23  ;;  %v10673_v38 = vpop.eup %10672  ;;  %v2004_v0 = vadd.f32 1.0, %v10671_v26 }
 0x2f2   :  { %10676 = vrcp.f32 %v1997_v27 }
 0x2f3   :  { %10678 = vrcp.f32 %v2004_v0 }
 0x2fb   :  { %v10675_v29 = vpop.eup %10674 }
 0x2fc   :  { %v10677_v36 = vpop.eup %10676  ;;  %v2008_v12 = vmul.f32 %v10675_v29, %v10673_v38 }
 0x2fd   :  { %v2007_v40 = vmul.f32 %v10677_v36, %v1417_v28 }
 0x2ff   :  { %v2009_v43 = vadd.f32 %v2008_v12, %v2007_v40  ;;  %v1936_v10 = vpop.f32.mrb[44].mxu0  ;;  %v1977_v44 = vpop.f32.mrb[44].mxu1 }
 0x300   :  { %v1984_v34 = vadd.f32 %v1936_v10, %v12260_v25  ;;  %v1986_v33 = vadd.f32 %v1977_v44, %v14955_v42  ;;  %v1938_v45 = vpop.f32.mrb[45].mxu0  ;;  %v1979_v39 = vpop.f32.mrb[45].mxu1  ;;  %v1416_v44 = vsel %vm1414_vm1, %v12288_v19, 0.0 }
 0x301   :  { %10680 = vtanh.f32 %v2009_v43  ;;  %v1985_v48 = vadd.f32 %v1938_v45, %v14956_v47  ;;  %v1987_v23 = vadd.f32 %v1979_v39, %v14957_v50  ;;  %v1940_v37 = vpop.f32.mrb[46].mxu0  ;;  %v1981_v27 = vpop.f32.mrb[46].mxu1  ;;  %v12470_v26 = vsel %vm2036_vm5, %v2009_v43, %v1417_v28  ;;  %v12475_v45 = vld [vmem:[#allocation13] ss:$16 sps:$4 sm:$0xff]   ;;  %v12477_v39 = vld [vmem:[#allocation13 + $0x8] ss:$16 sps:$4 sm:$0xff]  }
 0x302   :  { %v9431_v38 = vmul.f32 -1.442695, %v1984_v34  ;;  %v1941_v29 = vpop.f32.mrb[47].mxu0  ;;  %v1982_v36 = vpop.f32.mrb[47].mxu1  ;;  %v12487_v50 = vld [vmem:[#allocation13 + $0x2c] ss:$16 sps:$4 sm:$0xff]  }
 0x303   :  { %v9432_v12 = vmul.f32 -1.442695, %v1985_v48  ;;  %v10679_v25 = vpop.eup %10678  ;;  %v9433_v40 = vmul.f32 -1.442695, %v1987_v23  ;;  %v12485_v48 = vld [vmem:[#allocation13 + $0x24] ss:$16 sps:$4 sm:$0xff]  }
 0x304   :  { %10682 = vpow2.f32 %v9431_v38  ;;  %v12491_v37 = vld [vmem:[#allocation13 + $0x20] ss:$16 sps:$4 sm:$0xff]   ;;  %v12493_v27 = vld [vmem:[#allocation13 + $0x28] ss:$16 sps:$4 sm:$0xff]   ;;  %v12497_v38 = vld [vmem:[#allocation13 + $0x44] ss:$16 sps:$4 sm:$0xff]  }
 0x305   :  { %10684 = vpow2.f32 %v9432_v12  ;;  %v12505_v29 = vld [vmem:[#allocation13 + $0x40] ss:$16 sps:$4 sm:$0xff]   ;;  %v12507_v36 = vld [vmem:[#allocation13 + $0x48] ss:$16 sps:$4 sm:$0xff]   ;;  %v12511_v12 = vld [vmem:[#allocation13 + $0x64] ss:$16 sps:$4 sm:$0xff]  }
 0x306   :  { %10686 = vpow2.f32 %v9433_v40  ;;  %14959 = vst [vmem:[#allocation78_spill] sm:$0xff] %v12507_v36  ;;  %14960 = vst [vmem:[#allocation80_spill] sm:$0xff] %v12511_v12 }
 0x307   :  { %10688 = vtanh.f32 %v1986_v33  ;;  %v12499_v33 = vld [vmem:[#allocation13 + $0x4c] ss:$16 sps:$4 sm:$0xff]  }
 0x30b   :  { %v10681_v0 = vpop.eup %10680 }
 0x30c   :  { %v2011_v10 = vmul.f32 %v10681_v0, %v10679_v25  ;;  %v12513_v25 = vld [vmem:[#allocation13 + $0x6c] ss:$16 sps:$4 sm:$0xff]  }
 0x30d   :  { %14961 = vst [vmem:[#allocation86_spill] sm:$0xff] %v12513_v25 }
 0x30e   :  { %v10683_v42 = vpop.eup %10682  ;;  %v12481_v28 = vsel %vm2036_vm5, %v2011_v10, %v1416_v44  ;;  %v12517_v10 = vld [vmem:[#allocation13 + $0x60] ss:$16 sps:$4 sm:$0xff]   ;;  %v12519_v44 = vld [vmem:[#allocation13 + $0x68] ss:$16 sps:$4 sm:$0xff]  }
 0x30f   :  { %14958 = vst [vmem:[#allocation79_spill] sm:$0xff] %v12481_v28  ;;  %v10685_v43 = vpop.eup %10684  ;;  %v2015_v34 = vadd.f32 1.0, %v10683_v42  ;;  %v2048_v47 = vpack.c.bf16 %v12481_v28, %v12481_v28 }
 0x310   :  { %v2021_v23 = vadd.f32 1.0, %v10685_v43  ;;  %v10687_v0 = vpop.eup %10686  ;;  %v12523_v43 = vld [vmem:[#allocation13 + $0x84] ss:$16 sps:$4 sm:$0xff]  }
 0x311   :  { %10690 = vrcp.f32 %v2015_v34  ;;  %2274 = vmatmul.mubr.bf16.vlgmr.msra.gmra.mrb[48].mxu0 %v2048_v47  ;;  %2315 = vmatmul.mubr.bf16.vlgmr.msra.gmra.mrb[48].mxu1 %v2048_v47  ;;  %v10689_v40 = vpop.eup %10688  ;;  %v12525_v34 = vld [vmem:[#allocation13 + $0x8c] ss:$16 sps:$4 sm:$0xff]   ;;  %v2028_v18 = vadd.f32 1.0, %v10687_v0  ;;  %v12551_v0 = vld [vmem:[#allocation13 + $0xa8] ss:$16 sps:$4 sm:$0xff]  }
 0x312   :  { %10692 = vrcp.f32 %v2021_v23  ;;  %2525 = vmatpush1.bf16.msra.mxu0 %v12475_v45  ;;  %2566 = vmatpush1.bf16.msra.mxu1 %v12477_v39  ;;  %14966 = vst [vmem:[#allocation91_spill] sm:$0xff] %v12551_v0 }
 0x313   :  { %2526 = vmatprep.subr.bf16.mxu0 %v12485_v48  ;;  %2567 = vmatprep.subr.bf16.mxu1 %v12487_v50  ;;  %10694 = vrcp.f32 %v2028_v18  ;;  %v12557_v18 = vld [vmem:[#allocation13 + $0xcc] ss:$16 sps:$4 sm:$0xff]  }
 0x314   :  { %2556 = vmatprep.mubr.bf16.mxu0 %v14950_v31  ;;  %2597 = vmatprep.mubr.bf16.mxu1 %v14950_v31  ;;  %14968 = vst [vmem:[#allocation93_spill] sm:$0xff] %v12557_v18 }
 0x316   :  { %2527 = vmatpush1.bf16.msra.mxu0 %v12491_v37  ;;  %2568 = vmatpush1.bf16.msra.mxu1 %v12493_v27 }
 0x317   :  { %2528 = vmatprep.subr.bf16.mxu0 %v12497_v38  ;;  %2569 = vmatprep.subr.bf16.mxu1 %v12499_v33 }
 0x31a   :  { %2529 = vmatpush1.bf16.msra.mxu0 %v12505_v29  ;;  %2570 = vmatpush1.bf16.msra.mxu1 %v12507_v36  ;;  %v12532_v36 = vld [vmem:[#allocation13 + $0x80] ss:$16 sps:$4 sm:$0xff]  }
 0x31b   :  { %v10691_v42 = vpop.eup %10690  ;;  %2530 = vmatprep.subr.bf16.mxu0 %v12511_v12  ;;  %2571 = vmatprep.subr.bf16.mxu1 %v12513_v25  ;;  %v12534_v12 = vld [vmem:[#allocation13 + $0x88] ss:$16 sps:$4 sm:$0xff]  }
 0x31c   :  { %v10693_v47 = vpop.eup %10692  ;;  %v2032_v23 = vmul.f32 %v10691_v42, %v10689_v40  ;;  %14962 = vst [vmem:[#allocation87_spill] sm:$0xff] %v12534_v12  ;;  %v12538_v40 = vld [vmem:[#allocation13 + $0xa4] ss:$16 sps:$4 sm:$0xff]   ;;  %v12540_v42 = vld [vmem:[#allocation13 + $0xac] ss:$16 sps:$4 sm:$0xff]  }
 0x31d   :  { %v2031_v19 = vmul.f32 %v10693_v47, %v1419_v51  ;;  %14963 = vst [vmem:[#allocation88_spill] sm:$0xff] %v12538_v40  ;;  %14964 = vst [vmem:[#allocation89_spill] sm:$0xff] %v12540_v42  ;;  %v12555_v47 = vld [vmem:[#allocation13 + $0xc4] ss:$16 sps:$4 sm:$0xff]  }
 0x31e   :  { %2531 = vmatpush1.bf16.msra.mxu0 %v12517_v10  ;;  %2572 = vmatpush1.bf16.msra.mxu1 %v12519_v44  ;;  %14967 = vst [vmem:[#allocation92_spill] sm:$0xff] %v12555_v47 }
 0x31f   :  { %v2033_v25 = vadd.f32 %v2032_v23, %v2031_v19  ;;  %2532 = vmatprep.subr.bf16.mxu0 %v12523_v43  ;;  %2573 = vmatprep.subr.bf16.mxu1 %v12525_v34  ;;  %v12549_v19 = vld [vmem:[#allocation13 + $0xa0] ss:$16 sps:$4 sm:$0xff]   ;;  %v12567_v23 = vld [vmem:[#allocation13 + $0xe4] ss:$16 sps:$4 sm:$0xff]  }
 0x320   :  { %14965 = vst [vmem:[#allocation90_spill] sm:$0xff] %v12549_v19 }
 0x321   :  { %10696 = vtanh.f32 %v2033_v25  ;;  %v12545_v46 = vsel %vm2037_vm6, %v2033_v25, %v1419_v51  ;;  %v12561_v51 = vld [vmem:[#allocation13 + $0xc0] ss:$16 sps:$4 sm:$0xff]   ;;  %v12563_v25 = vld [vmem:[#allocation13 + $0xc8] ss:$16 sps:$4 sm:$0xff]  }
 0x322   :  { %2533 = vmatpush1.bf16.msra.mxu0 %v12532_v36  ;;  %2574 = vmatpush1.bf16.msra.mxu1 %v12534_v12  ;;  %14969 = vst [vmem:[#allocation94_spill] sm:$0xff] %v12561_v51  ;;  %14970 = vst [vmem:[#allocation95_spill] sm:$0xff] %v12563_v25 }
 0x323   :  { %2534 = vmatprep.subr.bf16.mxu0 %v12538_v40  ;;  %2575 = vmatprep.subr.bf16.mxu1 %v12540_v42  ;;  %v12569_v40 = vld [vmem:[#allocation13 + $0xec] ss:$16 sps:$4 sm:$0xff]   ;;  %v10695_v42 = vpop.eup %10694 }
 0x326   :  { %2535 = vmatpush1.bf16.msra.mxu0 %v12549_v19  ;;  %2576 = vmatpush1.bf16.msra.mxu1 %v12551_v0  ;;  %v12573_v19 = vld [vmem:[#allocation13 + $0xe0] ss:$16 sps:$4 sm:$0xff]   ;;  %v12575_v0 = vld [vmem:[#allocation13 + $0xe8] ss:$16 sps:$4 sm:$0xff]  }
 0x327   :  { %2536 = vmatprep.subr.bf16.mxu0 %v12555_v47  ;;  %2577 = vmatprep.subr.bf16.mxu1 %v12557_v18  ;;  %v1418_v18 = vsel %vm1415_vm3, %v12334_v49, 0.0 }
 0x32a   :  { %2537 = vmatpush1.bf16.msra.mxu0 %v12561_v51  ;;  %2578 = vmatpush1.bf16.msra.mxu1 %v12563_v25 }
 0x32b   :  { %v10697_v12 = vpop.eup %10696  ;;  %2538 = vmatprep.subr.bf16.mxu0 %v12567_v23  ;;  %2579 = vmatprep.subr.bf16.mxu1 %v12569_v40 }
 0x32c   :  { %v2035_v47 = vmul.f32 %v10697_v12, %v10695_v42  ;;  %v14977_v42 = vld [vmem:[#allocation76_spill] sm:$0xff] }
 0x32e   :  { %2539 = vmatpush1.bf16.msra.mxu0 %v12573_v19  ;;  %2580 = vmatpush1.bf16.msra.mxu1 %v12575_v0  ;;  %v12586_v25 = vsel %vm2037_vm6, %v2035_v47, %v1418_v18 }
 0x32f   :  { %14971 = vst [vmem:[#allocation96_spill] sm:$0xff] %v12586_v25  ;;  %v2331_v51 = vpack.c.bf16 %v12586_v25, %v12586_v25  ;;  %2863 = vmatprep.subr.bf16.mxu0 %v12354_v52  ;;  %2904 = vmatprep.subr.bf16.mxu1 %v12356_v53 }
 0x331   :  { %2557 = vmatmul.mubr.bf16.vlgmr.msra.gmra.mrb[52].mxu0 %v2331_v51  ;;  %2598 = vmatmul.mubr.bf16.vlgmr.msra.gmra.mrb[52].mxu1 %v2331_v51 }
 0x332   :  { %2864 = vmatpush1.bf16.msra.mxu0 %v12358_v54  ;;  %2905 = vmatpush1.bf16.msra.mxu1 %v12360_v55  ;;  %v14972_v54 = vld [vmem:[#allocation30_spill] sm:$0xff] }
 0x333   :  { %2865 = vmatprep.subr.bf16.mxu0 %v12366_v56  ;;  %2906 = vmatprep.subr.bf16.mxu1 %v12368_v57  ;;  %v14973_v56 = vld [vmem:[#allocation32_spill] sm:$0xff] }
 0x334   :  { %2895 = vmatprep.mubr.bf16.mxu0 %v14950_v31  ;;  %2936 = vmatprep.mubr.bf16.mxu1 %v14950_v31 }
 0x336   :  { %2866 = vmatpush1.bf16.msra.mxu0 %v12370_v58  ;;  %2907 = vmatpush1.bf16.msra.mxu1 %v12372_v59 }
 0x337   :  { %2867 = vmatprep.subr.bf16.mxu0 %v12378_v60  ;;  %2908 = vmatprep.subr.bf16.mxu1 %v12380_v61  ;;  %v14974_v60 = vld [vmem:[#allocation31_spill] sm:$0xff] }
 0x33a   :  { %2868 = vmatpush1.bf16.msra.mxu0 %v12382_v62  ;;  %2909 = vmatpush1.bf16.msra.mxu1 %v12384_v63  ;;  %v14975_v62 = vld [vmem:[#allocation34_spill] sm:$0xff] }
 0x33b   :  { %2869 = vmatprep.subr.bf16.mxu0 %v12390_v1  ;;  %2910 = vmatprep.subr.bf16.mxu1 %v12392_v2 }
 0x33e   :  { %2870 = vmatpush1.bf16.msra.mxu0 %v12394_v3  ;;  %2911 = vmatpush1.bf16.msra.mxu1 %v12396_v5 }
 0x33f   :  { %2871 = vmatprep.subr.bf16.mxu0 %v12402_v7  ;;  %2912 = vmatprep.subr.bf16.mxu1 %v12404_v20 }
 0x342   :  { %2872 = vmatpush1.bf16.msra.mxu0 %v12406_v41  ;;  %2913 = vmatpush1.bf16.msra.mxu1 %v12408_v6 }
 0x343   :  { %2873 = vmatprep.subr.bf16.mxu0 %v12414_v24  ;;  %2914 = vmatprep.subr.bf16.mxu1 %v12416_v13 }
 0x346   :  { %2874 = vmatpush1.bf16.msra.mxu0 %v12418_v15  ;;  %2915 = vmatpush1.bf16.msra.mxu1 %v12420_v16 }
 0x347   :  { %2875 = vmatprep.subr.bf16.mxu0 %v12426_v30  ;;  %2916 = vmatprep.subr.bf16.mxu1 %v12428_v8 }
 0x34a   :  { %2876 = vmatpush1.bf16.msra.mxu0 %v12430_v9  ;;  %2917 = vmatpush1.bf16.msra.mxu1 %v12432_v32 }
 0x34b   :  { %2877 = vmatprep.subr.bf16.mxu0 %v12438_v35  ;;  %2918 = vmatprep.subr.bf16.mxu1 %v12440_v11 }
 0x34e   :  { %2878 = vmatpush1.bf16.msra.mxu0 %v12442_v4  ;;  %2919 = vmatpush1.bf16.msra.mxu1 %v12444_v21 }
 0x34f   :  { %3146 = vmatprep.subr.bf16.mxu0 %v12450_v17  ;;  %3187 = vmatprep.subr.bf16.mxu1 %v12452_v22  ;;  %v14976_v22 = vld [vmem:[#allocation73_spill] sm:$0xff] }
 0x3e4   :  { %v2275_v52 = vpop.f32.mrb[48].mxu0  ;;  %v2316_v53 = vpop.f32.mrb[48].mxu1 }
 0x3e5   :  { %v2323_v55 = vadd.f32 %v2275_v52, %v14972_v54  ;;  %v2325_v57 = vadd.f32 %v2316_v53, %v14973_v56  ;;  %v2277_v58 = vpop.f32.mrb[49].mxu0  ;;  %v2318_v59 = vpop.f32.mrb[49].mxu1  ;;  %v14978_v52 = vld [vmem:[#allocation75_spill] sm:$0xff]  ;;  %v14979_v54 = vld [vmem:[#allocation77_spill] sm:$0xff] }
 0x3e6   :  { %v2324_v61 = vadd.f32 %v2277_v58, %v14974_v60  ;;  %v2326_v63 = vadd.f32 %v2318_v59, %v14975_v62  ;;  %v2279_v1 = vpop.f32.mrb[50].mxu0  ;;  %v2320_v2 = vpop.f32.mrb[50].mxu1 }
 0x3e7   :  { %v9498_v3 = vmul.f32 -1.442695, %v2323_v55  ;;  %v2280_v5 = vpop.f32.mrb[51].mxu0  ;;  %v2321_v7 = vpop.f32.mrb[51].mxu1 }
 0x3e8   :  { %v9499_v20 = vmul.f32 -1.442695, %v2324_v61  ;;  %v9500_v41 = vmul.f32 -1.442695, %v2326_v63 }
 0x3e9   :  { %10698 = vpow2.f32 %v9498_v3 }
 0x3ea   :  { %10700 = vpow2.f32 %v9499_v20 }
 0x3eb   :  { %10702 = vpow2.f32 %v9500_v41 }
 0x3ec   :  { %10704 = vtanh.f32 %v2325_v57 }
 0x3f3   :  { %v10699_v6 = vpop.eup %10698 }
 0x3f4   :  { %v10701_v24 = vpop.eup %10700  ;;  %v2613_v13 = vadd.f32 1.0, %v10699_v6 }
 0x3f5   :  { %v2619_v15 = vadd.f32 1.0, %v10701_v24  ;;  %v10703_v16 = vpop.eup %10702 }
 0x3f6   :  { %10706 = vrcp.f32 %v2613_v13  ;;  %v10705_v30 = vpop.eup %10704  ;;  %v2626_v35 = vadd.f32 1.0, %v10703_v16  ;;  %v14983_v13 = vld [vmem:[#allocation86_spill] sm:$0xff] }
 0x3f7   :  { %10708 = vrcp.f32 %v2619_v15 }
 0x3f8   :  { %10710 = vrcp.f32 %v2626_v35 }
 0x400   :  { %v10707_v8 = vpop.eup %10706 }
 0x401   :  { %v10709_v9 = vpop.eup %10708  ;;  %v2630_v32 = vmul.f32 %v10707_v8, %v10705_v30  ;;  %v14989_v30 = vld [vmem:[#allocation92_spill] sm:$0xff]  ;;  %v14990_v8 = vld [vmem:[#allocation93_spill] sm:$0xff] }
 0x402   :  { %v2629_v11 = vmul.f32 %v10709_v9, %v12470_v26  ;;  %v10711_v63 = vpop.eup %10710 }
 0x404   :  { %v2631_v4 = vadd.f32 %v2630_v32, %v2629_v11  ;;  %v2558_v21 = vpop.f32.mrb[52].mxu0  ;;  %v2599_v17 = vpop.f32.mrb[52].mxu1  ;;  %v14991_v32 = vld [vmem:[#allocation94_spill] sm:$0xff] }
 0x405   :  { %v2606_v12 = vadd.f32 %v2558_v21, %v14976_v22  ;;  %v2608_v47 = vadd.f32 %v2599_v17, %v14977_v42  ;;  %v2560_v18 = vpop.f32.mrb[53].mxu0  ;;  %v2601_v51 = vpop.f32.mrb[53].mxu1  ;;  %v12708_v21 = vld [vmem:[#allocation12 + $0x24] ss:$16 sps:$4 sm:$0xff]   ;;  %v12710_v17 = vld [vmem:[#allocation12 + $0x2c] ss:$16 sps:$4 sm:$0xff]  }
 0x406   :  { %10712 = vtanh.f32 %v2631_v4  ;;  %v2607_v53 = vadd.f32 %v2560_v18, %v14978_v52  ;;  %v2609_v55 = vadd.f32 %v2601_v51, %v14979_v54  ;;  %v2562_v56 = vpop.f32.mrb[54].mxu0  ;;  %v2603_v57 = vpop.f32.mrb[54].mxu1  ;;  %v12639_v58 = vsel %vm2658_vm7, %v2631_v4, %v12470_v26  ;;  %v12712_v22 = vld [vmem:[#allocation12 + $0x20] ss:$16 sps:$4 sm:$0xff]   ;;  %v12720_v42 = vld [vmem:[#allocation12 + $0x44] ss:$16 sps:$4 sm:$0xff]  }
 0x407   :  { %v9501_v59 = vmul.f32 -1.442695, %v2606_v12  ;;  %v2563_v60 = vpop.f32.mrb[55].mxu0  ;;  %v2604_v61 = vpop.f32.mrb[55].mxu1  ;;  %v12714_v12 = vld [vmem:[#allocation12 + $0x28] ss:$16 sps:$4 sm:$0xff]  }
 0x408   :  { %v9502_v62 = vmul.f32 -1.442695, %v2607_v53  ;;  %v9503_v2 = vmul.f32 -1.442695, %v2609_v55  ;;  %v12724_v18 = vld [vmem:[#allocation12 + $0x40] ss:$16 sps:$4 sm:$0xff]  }
 0x409   :  { %10714 = vpow2.f32 %v9501_v59  ;;  %v12726_v51 = vld [vmem:[#allocation12 + $0x48] ss:$16 sps:$4 sm:$0xff]   ;;  %v12732_v52 = vld [vmem:[#allocation12 + $0x64] ss:$16 sps:$4 sm:$0xff]   ;;  %v12734_v53 = vld [vmem:[#allocation12 + $0x6c] ss:$16 sps:$4 sm:$0xff]  }
 0x40a   :  { %10716 = vpow2.f32 %v9502_v62  ;;  %v12736_v54 = vld [vmem:[#allocation12 + $0x60] ss:$16 sps:$4 sm:$0xff]   ;;  %v12738_v55 = vld [vmem:[#allocation12 + $0x68] ss:$16 sps:$4 sm:$0xff]   ;;  %v12744_v56 = vld [vmem:[#allocation12 + $0x84] ss:$16 sps:$4 sm:$0xff]  }
 0x40b   :  { %10718 = vpow2.f32 %v9503_v2  ;;  %v12746_v57 = vld [vmem:[#allocation12 + $0x8c] ss:$16 sps:$4 sm:$0xff]   ;;  %v12748_v59 = vld [vmem:[#allocation12 + $0x80] ss:$16 sps:$4 sm:$0xff]   ;;  %v12750_v60 = vld [vmem:[#allocation12 + $0x88] ss:$16 sps:$4 sm:$0xff]  }
 0x40c   :  { %10720 = vtanh.f32 %v2608_v47  ;;  %v12722_v47 = vld [vmem:[#allocation12 + $0x4c] ss:$16 sps:$4 sm:$0xff]   ;;  %v12756_v61 = vld [vmem:[#allocation12 + $0xa4] ss:$16 sps:$4 sm:$0xff]  }
 0x40d   :  { %v12758_v62 = vld [vmem:[#allocation12 + $0xac] ss:$16 sps:$4 sm:$0xff]   ;;  %v12768_v2 = vld [vmem:[#allocation12 + $0xc4] ss:$16 sps:$4 sm:$0xff]  }
 0x410   :  { %v10713_v1 = vpop.eup %10712 }
 0x411   :  { %v2633_v3 = vmul.f32 %v10713_v1, %v10711_v63  ;;  %v12760_v63 = vld [vmem:[#allocation12 + $0xa0] ss:$16 sps:$4 sm:$0xff]   ;;  %v12762_v1 = vld [vmem:[#allocation12 + $0xa8] ss:$16 sps:$4 sm:$0xff]  }
 0x413   :  { %v10715_v5 = vpop.eup %10714  ;;  %v12644_v7 = vsel %vm2658_vm7, %v2633_v3, %v12481_v28  ;;  %v12770_v3 = vld [vmem:[#allocation12 + $0xcc] ss:$16 sps:$4 sm:$0xff]   ;;  %v12869_v28 = vld [vmem:[#allocation13 + $0x80] ss:$16 sps:$4 sm:$0xff]  }
 0x414   :  { %14980 = vst [vmem:[#allocation30_spill] sm:$0xff] %v12644_v7  ;;  %v10717_v20 = vpop.eup %10716  ;;  %v2637_v41 = vadd.f32 1.0, %v10715_v5  ;;  %v2670_v26 = vpack.c.bf16 %v12644_v7, %v12644_v7  ;;  %v12772_v5 = vld [vmem:[#allocation12 + $0xc0] ss:$16 sps:$4 sm:$0xff]  }
 0x415   :  { %v2643_v6 = vadd.f32 1.0, %v10717_v20  ;;  %v10719_v24 = vpop.eup %10718  ;;  %v12774_v20 = vld [vmem:[#allocation12 + $0xc8] ss:$16 sps:$4 sm:$0xff]  }
 0x416   :  { %10722 = vrcp.f32 %v2637_v41  ;;  %2896 = vmatmul.mubr.bf16.vlgmr.msra.gmra.mrb[56].mxu0 %v2670_v26  ;;  %2937 = vmatmul.mubr.bf16.vlgmr.msra.gmra.mrb[56].mxu1 %v2670_v26  ;;  %v12780_v41 = vld [vmem:[#allocation12 + $0xe4] ss:$16 sps:$4 sm:$0xff]   ;;  %v12782_v26 = vld [vmem:[#allocation12 + $0xec] ss:$16 sps:$4 sm:$0xff]  }
 0x417   :  { %10724 = vrcp.f32 %v2643_v6  ;;  %3147 = vmatpush1.bf16.msra.mxu0 %v12475_v45  ;;  %3188 = vmatpush1.bf16.msra.mxu1 %v12477_v39  ;;  %v10721_v45 = vpop.eup %10720  ;;  %v14981_v39 = vld [vmem:[#allocation78_spill] sm:$0xff] }
 0x418   :  { %3148 = vmatprep.subr.bf16.mxu0 %v12485_v48  ;;  %3189 = vmatprep.subr.bf16.mxu1 %v12487_v50  ;;  %v14982_v50 = vld [vmem:[#allocation80_spill] sm:$0xff] }
 0x419   :  { %3178 = vmatprep.mubr.bf16.mxu0 %v14950_v31  ;;  %3219 = vmatprep.mubr.bf16.mxu1 %v14950_v31  ;;  %v12784_v6 = vld [vmem:[#allocation12 + $0xe0] ss:$16 sps:$4 sm:$0xff]  }
 0x41b   :  { %3149 = vmatpush1.bf16.msra.mxu0 %v12491_v37  ;;  %3190 = vmatpush1.bf16.msra.mxu1 %v12493_v27  ;;  %v2650_v37 = vadd.f32 1.0, %v10719_v24  ;;  %v12786_v24 = vld [vmem:[#allocation12 + $0xe8] ss:$16 sps:$4 sm:$0xff]  }
 0x41c   :  { %3150 = vmatprep.subr.bf16.mxu0 %v12497_v38  ;;  %3191 = vmatprep.subr.bf16.mxu1 %v12499_v33 }
 0x41d   :  { %10726 = vrcp.f32 %v2650_v37 }
 0x41f   :  { %3151 = vmatpush1.bf16.msra.mxu0 %v12505_v29  ;;  %3192 = vmatpush1.bf16.msra.mxu1 %v14981_v39  ;;  %v14984_v29 = vld [vmem:[#allocation87_spill] sm:$0xff] }
 0x420   :  { %v10723_v48 = vpop.eup %10722  ;;  %3152 = vmatprep.subr.bf16.mxu0 %v14982_v50  ;;  %3193 = vmatprep.subr.bf16.mxu1 %v14983_v13  ;;  %v12794_v39 = vld [vmem:[#allocation13 + $0xc] ss:$16 sps:$4 sm:$0xff]  }
 0x421   :  { %v10725_v15 = vpop.eup %10724  ;;  %v2654_v16 = vmul.f32 %v10723_v48, %v10721_v45  ;;  %v12792_v45 = vld [vmem:[#allocation13 + $0x4] ss:$16 sps:$4 sm:$0xff]   ;;  %v14994_v13 = vld [vmem:[#allocation33_spill] sm:$0xff] }
 0x422   :  { %v2653_v27 = vmul.f32 %v10725_v15, %v12545_v46 }
 0x423   :  { %3153 = vmatpush1.bf16.msra.mxu0 %v12517_v10  ;;  %3194 = vmatpush1.bf16.msra.mxu1 %v12519_v44  ;;  %v14985_v10 = vld [vmem:[#allocation88_spill] sm:$0xff]  ;;  %v14986_v44 = vld [vmem:[#allocation89_spill] sm:$0xff] }
 0x424   :  { %v2655_v38 = vadd.f32 %v2654_v16, %v2653_v27  ;;  %3154 = vmatprep.subr.bf16.mxu0 %v12523_v43  ;;  %3195 = vmatprep.subr.bf16.mxu1 %v12525_v34  ;;  %v14987_v43 = vld [vmem:[#allocation90_spill] sm:$0xff]  ;;  %v14988_v34 = vld [vmem:[#allocation91_spill] sm:$0xff]  ;;  %v14995_v16 = vld [vmem:[#allocation36_spill] sm:$0xff] }
 0x426   :  { %10728 = vtanh.f32 %v2655_v38  ;;  %v12671_v33 = vsel %vm2659_vm8, %v2655_v38, %v12545_v46  ;;  %v14992_v46 = vld [vmem:[#allocation95_spill] sm:$0xff] }
 0x427   :  { %3155 = vmatpush1.bf16.msra.mxu0 %v12532_v36  ;;  %3196 = vmatpush1.bf16.msra.mxu1 %v14984_v29  ;;  %v10727_v9 = vpop.eup %10726  ;;  %v14996_v29 = vld [vmem:[#allocation35_spill] sm:$0xff] }
 0x428   :  { %3156 = vmatprep.subr.bf16.mxu0 %v14985_v10  ;;  %3197 = vmatprep.subr.bf16.mxu1 %v14986_v44  ;;  %v14997_v44 = vld [vmem:[#allocation37_spill] sm:$0xff] }
 0x42b   :  { %3157 = vmatpush1.bf16.msra.mxu0 %v14987_v43  ;;  %3198 = vmatpush1.bf16.msra.mxu1 %v14988_v34 }
 0x42c   :  { %3158 = vmatprep.subr.bf16.mxu0 %v14989_v30  ;;  %3199 = vmatprep.subr.bf16.mxu1 %v14990_v8 }
 0x42f   :  { %3159 = vmatpush1.bf16.msra.mxu0 %v14991_v32  ;;  %3200 = vmatpush1.bf16.msra.mxu1 %v14992_v46 }
 0x430   :  { %v10729_v36 = vpop.eup %10728  ;;  %3160 = vmatprep.subr.bf16.mxu0 %v12567_v23  ;;  %3201 = vmatprep.subr.bf16.mxu1 %v12569_v40  ;;  %v12696_v40 = vld [vmem:[#allocation12 + $0x4] ss:$16 sps:$4 sm:$0xff]   ;;  %v12698_v23 = vld [vmem:[#allocation12 + $0xc] ss:$16 sps:$4 sm:$0xff]  }
 0x431   :  { %v2657_v35 = vmul.f32 %v10729_v36, %v10727_v9 }
 0x433   :  { %3161 = vmatpush1.bf16.msra.mxu0 %v12573_v19  ;;  %3202 = vmatpush1.bf16.msra.mxu1 %v12575_v0  ;;  %v12690_v11 = vsel %vm2659_vm8, %v2657_v35, %v12586_v25  ;;  %v12700_v19 = vld [vmem:[#allocation12] ss:$16 sps:$4 sm:$0xff]   ;;  %v12702_v0 = vld [vmem:[#allocation12 + $0x8] ss:$16 sps:$4 sm:$0xff]  }
 0x434   :  { %14993 = vst [vmem:[#allocation32_spill] sm:$0xff] %v12690_v11  ;;  %v2953_v4 = vpack.c.bf16 %v12690_v11, %v12690_v11  ;;  %3485 = vmatprep.subr.bf16.mxu0 %v12696_v40  ;;  %3526 = vmatprep.subr.bf16.mxu1 %v12698_v23 }
 0x436   :  { %3179 = vmatmul.mubr.bf16.vlgmr.msra.gmra.mrb[60].mxu0 %v2953_v4  ;;  %3220 = vmatmul.mubr.bf16.vlgmr.msra.gmra.mrb[60].mxu1 %v2953_v4 }
 0x437   :  { %3517 = vmatprep.mubr.bf16.mxu0 %v14950_v31  ;;  %3558 = vmatprep.mubr.bf16.mxu1 %v14950_v31 }
 0x438   :  { %3486 = vmatpush1.bf16.msra.mxu0 %v12700_v19  ;;  %3527 = vmatpush1.bf16.msra.mxu1 %v12702_v0 }
 0x439   :  { %3487 = vmatprep.subr.bf16.mxu0 %v12708_v21  ;;  %3528 = vmatprep.subr.bf16.mxu1 %v12710_v17 }
 0x43c   :  { %3488 = vmatpush1.bf16.msra.mxu0 %v12712_v22  ;;  %3529 = vmatpush1.bf16.msra.mxu1 %v12714_v12 }
 0x43d   :  { %3489 = vmatprep.subr.bf16.mxu0 %v12720_v42  ;;  %3530 = vmatprep.subr.bf16.mxu1 %v12722_v47 }
 0x440   :  { %3490 = vmatpush1.bf16.msra.mxu0 %v12724_v18  ;;  %3531 = vmatpush1.bf16.msra.mxu1 %v12726_v51 }
 0x441   :  { %3491 = vmatprep.subr.bf16.mxu0 %v12732_v52  ;;  %3532 = vmatprep.subr.bf16.mxu1 %v12734_v53 }
 0x444   :  { %3492 = vmatpush1.bf16.msra.mxu0 %v12736_v54  ;;  %3533 = vmatpush1.bf16.msra.mxu1 %v12738_v55 }
 0x445   :  { %3493 = vmatprep.subr.bf16.mxu0 %v12744_v56  ;;  %3534 = vmatprep.subr.bf16.mxu1 %v12746_v57 }
 0x448   :  { %3494 = vmatpush1.bf16.msra.mxu0 %v12748_v59  ;;  %3535 = vmatpush1.bf16.msra.mxu1 %v12750_v60 }
 0x449   :  { %3495 = vmatprep.subr.bf16.mxu0 %v12756_v61  ;;  %3536 = vmatprep.subr.bf16.mxu1 %v12758_v62 }
 0x44c   :  { %3496 = vmatpush1.bf16.msra.mxu0 %v12760_v63  ;;  %3537 = vmatpush1.bf16.msra.mxu1 %v12762_v1 }
 0x44d   :  { %3497 = vmatprep.subr.bf16.mxu0 %v12768_v2  ;;  %3538 = vmatprep.subr.bf16.mxu1 %v12770_v3 }
 0x450   :  { %3498 = vmatpush1.bf16.msra.mxu0 %v12772_v5  ;;  %3539 = vmatpush1.bf16.msra.mxu1 %v12774_v20 }
 0x451   :  { %3499 = vmatprep.subr.bf16.mxu0 %v12780_v41  ;;  %3540 = vmatprep.subr.bf16.mxu1 %v12782_v26 }
 0x454   :  { %3500 = vmatpush1.bf16.msra.mxu0 %v12784_v6  ;;  %3541 = vmatpush1.bf16.msra.mxu1 %v12786_v24 }
 0x455   :  { %3768 = vmatprep.subr.bf16.mxu0 %v12792_v45  ;;  %3809 = vmatprep.subr.bf16.mxu1 %v12794_v39 }
 0x4e9   :  { %v2897_v48 = vpop.f32.mrb[56].mxu0  ;;  %v2938_v50 = vpop.f32.mrb[56].mxu1 }
 0x4ea   :  { %v2945_v15 = vadd.f32 %v2897_v48, %v14994_v13  ;;  %v2947_v37 = vadd.f32 %v2938_v50, %v14995_v16  ;;  %v2899_v27 = vpop.f32.mrb[57].mxu0  ;;  %v2940_v38 = vpop.f32.mrb[57].mxu1 }
 0x4eb   :  { %v2946_v10 = vadd.f32 %v2899_v27, %v14996_v29  ;;  %v2948_v43 = vadd.f32 %v2940_v38, %v14997_v44  ;;  %v2901_v34 = vpop.f32.mrb[58].mxu0  ;;  %v2942_v30 = vpop.f32.mrb[58].mxu1 }
 0x4ec   :  { %v9568_v8 = vmul.f32 -1.442695, %v2945_v15  ;;  %v2902_v9 = vpop.f32.mrb[59].mxu0  ;;  %v2943_v32 = vpop.f32.mrb[59].mxu1 }
 0x4ed   :  { %v9569_v46 = vmul.f32 -1.442695, %v2946_v10  ;;  %v9570_v36 = vmul.f32 -1.442695, %v2948_v43  ;;  %v14998_v43 = vld [vmem:[#allocation70_spill] sm:$0xff] }
 0x4ee   :  { %10730 = vpow2.f32 %v9568_v8 }
 0x4ef   :  { %10732 = vpow2.f32 %v9569_v46 }
 0x4f0   :  { %10734 = vpow2.f32 %v9570_v36  ;;  %v15000_v36 = vld [vmem:[#allocation71_spill] sm:$0xff] }
 0x4f1   :  { %10736 = vtanh.f32 %v2947_v37  ;;  %v14999_v37 = vld [vmem:[#allocation72_spill] sm:$0xff] }
 0x4f8   :  { %v10731_v35 = vpop.eup %10730 }
 0x4f9   :  { %v10733_v4 = vpop.eup %10732  ;;  %v3235_v48 = vadd.f32 1.0, %v10731_v35 }
 0x4fa   :  { %v3241_v50 = vadd.f32 1.0, %v10733_v4  ;;  %v10735_v13 = vpop.eup %10734  ;;  %v15001_v4 = vld [vmem:[#allocation74_spill] sm:$0xff] }
 0x4fb   :  { %10738 = vrcp.f32 %v3235_v48  ;;  %v10737_v16 = vpop.eup %10736  ;;  %v3248_v15 = vadd.f32 1.0, %v10735_v13 }
 0x4fc   :  { %10740 = vrcp.f32 %v3241_v50 }
 0x4fd   :  { %10742 = vrcp.f32 %v3248_v15 }
 0x505   :  { %v10739_v27 = vpop.eup %10738 }
 0x506   :  { %v10741_v38 = vpop.eup %10740  ;;  %v3252_v29 = vmul.f32 %v10739_v27, %v10737_v16 }
 0x507   :  { %v3251_v44 = vmul.f32 %v10741_v38, %v12639_v58 }
 0x509   :  { %v3253_v10 = vadd.f32 %v3252_v29, %v3251_v44  ;;  %v3180_v34 = vpop.f32.mrb[60].mxu0  ;;  %v3221_v30 = vpop.f32.mrb[60].mxu1 }
 0x50a   :  { %v3228_v8 = vadd.f32 %v3180_v34, %v14998_v43  ;;  %v3230_v9 = vadd.f32 %v3221_v30, %v14999_v37  ;;  %v3182_v32 = vpop.f32.mrb[61].mxu0  ;;  %v3223_v46 = vpop.f32.mrb[61].mxu1 }
 0x50b   :  { %10744 = vtanh.f32 %v3253_v10  ;;  %v3229_v35 = vadd.f32 %v3182_v32, %v15000_v36  ;;  %v3231_v48 = vadd.f32 %v3223_v46, %v15001_v4  ;;  %v3184_v50 = vpop.f32.mrb[62].mxu0  ;;  %v3225_v13 = vpop.f32.mrb[62].mxu1  ;;  %v12811_v16 = vsel %vm3280_vm9, %v3253_v10, %v12639_v58  ;;  %v12813_v32 = vld [vmem:[#allocation13] ss:$16 sps:$4 sm:$0xff]   ;;  %v12815_v46 = vld [vmem:[#allocation13 + $0x8] ss:$16 sps:$4 sm:$0xff]  }
 0x50c   :  { %v9571_v27 = vmul.f32 -1.442695, %v3228_v8  ;;  %v3185_v38 = vpop.f32.mrb[63].mxu0  ;;  %v3226_v29 = vpop.f32.mrb[63].mxu1  ;;  %v12826_v4 = vld [vmem:[#allocation13 + $0x2c] ss:$16 sps:$4 sm:$0xff]  }
 0x50d   :  { %v9572_v15 = vmul.f32 -1.442695, %v3229_v35  ;;  %v10743_v44 = vpop.eup %10742  ;;  %v9573_v30 = vmul.f32 -1.442695, %v3231_v48  ;;  %v12824_v35 = vld [vmem:[#allocation13 + $0x24] ss:$16 sps:$4 sm:$0xff]  }
 0x50e   :  { %10746 = vpow2.f32 %v9571_v27  ;;  %v12830_v50 = vld [vmem:[#allocation13 + $0x20] ss:$16 sps:$4 sm:$0xff]   ;;  %v12832_v13 = vld [vmem:[#allocation13 + $0x28] ss:$16 sps:$4 sm:$0xff]   ;;  %v12836_v27 = vld [vmem:[#allocation13 + $0x44] ss:$16 sps:$4 sm:$0xff]  }
 0x50f   :  { %10748 = vpow2.f32 %v9572_v15  ;;  %v12844_v38 = vld [vmem:[#allocation13 + $0x40] ss:$16 sps:$4 sm:$0xff]   ;;  %v12846_v29 = vld [vmem:[#allocation13 + $0x48] ss:$16 sps:$4 sm:$0xff]   ;;  %v12850_v15 = vld [vmem:[#allocation13 + $0x64] ss:$16 sps:$4 sm:$0xff]  }
 0x510   :  { %10750 = vpow2.f32 %v9573_v30  ;;  %15003 = vst [vmem:[#allocation34_spill] sm:$0xff] %v12844_v38  ;;  %15004 = vst [vmem:[#allocation73_spill] sm:$0xff] %v12846_v29 }
 0x511   :  { %10752 = vtanh.f32 %v3230_v9  ;;  %v12838_v9 = vld [vmem:[#allocation13 + $0x4c] ss:$16 sps:$4 sm:$0xff]   ;;  %15005 = vst [vmem:[#allocation76_spill] sm:$0xff] %v12850_v15 }
 0x515   :  { %v10745_v34 = vpop.eup %10744 }
 0x516   :  { %v3255_v43 = vmul.f32 %v10745_v34, %v10743_v44  ;;  %v12852_v44 = vld [vmem:[#allocation13 + $0x6c] ss:$16 sps:$4 sm:$0xff]  }
 0x517   :  { %15006 = vst [vmem:[#allocation75_spill] sm:$0xff] %v12852_v44 }
 0x518   :  { %v10747_v37 = vpop.eup %10746  ;;  %v12820_v58 = vsel %vm3280_vm9, %v3255_v43, %v12644_v7  ;;  %v12856_v43 = vld [vmem:[#allocation13 + $0x60] ss:$16 sps:$4 sm:$0xff]  }
 0x519   :  { %15002 = vst [vmem:[#allocation31_spill] sm:$0xff] %v12820_v58  ;;  %v10749_v10 = vpop.eup %10748  ;;  %v3259_v8 = vadd.f32 1.0, %v10747_v37  ;;  %v3292_v36 = vpack.c.bf16 %v12820_v58, %v12820_v58  ;;  %v12858_v37 = vld [vmem:[#allocation13 + $0x68] ss:$16 sps:$4 sm:$0xff]  }
 0x51a   :  { %v3265_v48 = vadd.f32 1.0, %v10749_v10  ;;  %v10751_v34 = vpop.eup %10750 }
 0x51b   :  { %10754 = vrcp.f32 %v3259_v8  ;;  %3518 = vmatmul.mubr.bf16.vlgmr.msra.gmra.mrb[64].mxu0 %v3292_v36  ;;  %3559 = vmatmul.mubr.bf16.vlgmr.msra.gmra.mrb[64].mxu1 %v3292_v36  ;;  %v10753_v30 = vpop.eup %10752  ;;  %v12862_v8 = vld [vmem:[#allocation13 + $0x84] ss:$16 sps:$4 sm:$0xff]   ;;  %v12864_v36 = vld [vmem:[#allocation13 + $0x8c] ss:$16 sps:$4 sm:$0xff]   ;;  %v3272_v25 = vadd.f32 1.0, %v10751_v34 }
 0x51c   :  { %10756 = vrcp.f32 %v3265_v48  ;;  %3769 = vmatpush1.bf16.msra.mxu0 %v12813_v32  ;;  %3810 = vmatpush1.bf16.msra.mxu1 %v12815_v46 }
 0x51d   :  { %3770 = vmatprep.subr.bf16.mxu0 %v12824_v35  ;;  %3811 = vmatprep.subr.bf16.mxu1 %v12826_v4  ;;  %10758 = vrcp.f32 %v3272_v25  ;;  %v12895_v25 = vld [vmem:[#allocation13 + $0xcc] ss:$16 sps:$4 sm:$0xff]  }
 0x51e   :  { %3800 = vmatprep.mubr.bf16.mxu0 %v14950_v31  ;;  %3841 = vmatprep.mubr.bf16.mxu1 %v14950_v31 }
 0x520   :  { %3771 = vmatpush1.bf16.msra.mxu0 %v12830_v50  ;;  %3812 = vmatpush1.bf16.msra.mxu1 %v12832_v13 }
 0x521   :  { %3772 = vmatprep.subr.bf16.mxu0 %v12836_v27  ;;  %3813 = vmatprep.subr.bf16.mxu1 %v12838_v9 }
 0x524   :  { %3773 = vmatpush1.bf16.msra.mxu0 %v12844_v38  ;;  %3814 = vmatpush1.bf16.msra.mxu1 %v12846_v29  ;;  %v12871_v29 = vld [vmem:[#allocation13 + $0x88] ss:$16 sps:$4 sm:$0xff]   ;;  %v12877_v38 = vld [vmem:[#allocation13 + $0xac] ss:$16 sps:$4 sm:$0xff]  }
 0x525   :  { %v10755_v10 = vpop.eup %10754  ;;  %3774 = vmatprep.subr.bf16.mxu0 %v12850_v15  ;;  %3815 = vmatprep.subr.bf16.mxu1 %v12852_v44  ;;  %v12875_v44 = vld [vmem:[#allocation13 + $0xa4] ss:$16 sps:$4 sm:$0xff]   ;;  %15008 = vst [vmem:[#allocation78_spill] sm:$0xff] %v12877_v38 }
 0x526   :  { %v10757_v48 = vpop.eup %10756  ;;  %v3276_v49 = vmul.f32 %v10755_v10, %v10753_v30  ;;  %15007 = vst [vmem:[#allocation77_spill] sm:$0xff] %v12875_v44  ;;  %v12893_v30 = vld [vmem:[#allocation13 + $0xc4] ss:$16 sps:$4 sm:$0xff]  }
 0x527   :  { %v3275_v7 = vmul.f32 %v10757_v48, %v12671_v33  ;;  %15011 = vst [vmem:[#allocation87_spill] sm:$0xff] %v12893_v30  ;;  %v12905_v10 = vld [vmem:[#allocation13 + $0xe4] ss:$16 sps:$4 sm:$0xff]   ;;  %v12907_v48 = vld [vmem:[#allocation13 + $0xec] ss:$16 sps:$4 sm:$0xff]  }
 0x528   :  { %3775 = vmatpush1.bf16.msra.mxu0 %v12856_v43  ;;  %3816 = vmatpush1.bf16.msra.mxu1 %v12858_v37 }
 0x529   :  { %v3277_v15 = vadd.f32 %v3276_v49, %v3275_v7  ;;  %3776 = vmatprep.subr.bf16.mxu0 %v12862_v8  ;;  %3817 = vmatprep.subr.bf16.mxu1 %v12864_v36  ;;  %v12887_v49 = vld [vmem:[#allocation13 + $0xa0] ss:$16 sps:$4 sm:$0xff]   ;;  %v12889_v7 = vld [vmem:[#allocation13 + $0xa8] ss:$16 sps:$4 sm:$0xff]  }
 0x52a   :  { %15009 = vst [vmem:[#allocation80_spill] sm:$0xff] %v12887_v49  ;;  %15010 = vst [vmem:[#allocation86_spill] sm:$0xff] %v12889_v7 }
 0x52b   :  { %10760 = vtanh.f32 %v3277_v15  ;;  %v12883_v34 = vsel %vm3281_vm10, %v3277_v15, %v12671_v33  ;;  %v12899_v33 = vld [vmem:[#allocation13 + $0xc0] ss:$16 sps:$4 sm:$0xff]   ;;  %v12901_v15 = vld [vmem:[#allocation13 + $0xc8] ss:$16 sps:$4 sm:$0xff]  }
 0x52c   :  { %3777 = vmatpush1.bf16.msra.mxu0 %v12869_v28  ;;  %3818 = vmatpush1.bf16.msra.mxu1 %v12871_v29  ;;  %15012 = vst [vmem:[#allocation88_spill] sm:$0xff] %v12899_v33  ;;  %15013 = vst [vmem:[#allocation89_spill] sm:$0xff] %v12901_v15 }
 0x52d   :  { %3778 = vmatprep.subr.bf16.mxu0 %v12875_v44  ;;  %3819 = vmatprep.subr.bf16.mxu1 %v12877_v38  ;;  %v10759_v38 = vpop.eup %10758 }
 0x530   :  { %3779 = vmatpush1.bf16.msra.mxu0 %v12887_v49  ;;  %3820 = vmatpush1.bf16.msra.mxu1 %v12889_v7  ;;  %v12911_v49 = vld [vmem:[#allocation13 + $0xe0] ss:$16 sps:$4 sm:$0xff]   ;;  %v12913_v7 = vld [vmem:[#allocation13 + $0xe8] ss:$16 sps:$4 sm:$0xff]  }
 0x531   :  { %3780 = vmatprep.subr.bf16.mxu0 %v12893_v30  ;;  %3821 = vmatprep.subr.bf16.mxu1 %v12895_v25 }
 0x534   :  { %3781 = vmatpush1.bf16.msra.mxu0 %v12899_v33  ;;  %3822 = vmatpush1.bf16.msra.mxu1 %v12901_v15 }
 0x535   :  { %v10761_v44 = vpop.eup %10760  ;;  %3782 = vmatprep.subr.bf16.mxu0 %v12905_v10  ;;  %3823 = vmatprep.subr.bf16.mxu1 %v12907_v48 }
 0x536   :  { %v3279_v30 = vmul.f32 %v10761_v44, %v10759_v38  ;;  %v15020_v44 = vld [vmem:[#allocation68_spill] sm:$0xff] }
 0x538   :  { %3783 = vmatpush1.bf16.msra.mxu0 %v12911_v49  ;;  %3824 = vmatpush1.bf16.msra.mxu1 %v12913_v7  ;;  %v12922_v33 = vsel %vm3281_vm10, %v3279_v30, %v12690_v11 }
 0x539   :  { %15014 = vst [vmem:[#allocation90_spill] sm:$0xff] %v12922_v33  ;;  %v3575_v15 = vpack.c.bf16 %v12922_v33, %v12922_v33  ;;  %4105 = vmatprep.subr.bf16.mxu0 %v12696_v40  ;;  %4146 = vmatprep.subr.bf16.mxu1 %v12698_v23 }
 0x53b   :  { %3801 = vmatmul.mubr.bf16.vlgmr.msra.gmra.mrb[68].mxu0 %v3575_v15  ;;  %3842 = vmatmul.mubr.bf16.vlgmr.msra.gmra.mrb[68].mxu1 %v3575_v15 }
 0x53c   :  { %4106 = vmatpush1.bf16.msra.mxu0 %v12700_v19  ;;  %4147 = vmatpush1.bf16.msra.mxu1 %v12702_v0  ;;  %v15015_v19 = vld [vmem:[#allocation38_spill] sm:$0xff] }
 0x53d   :  { %4107 = vmatprep.subr.bf16.mxu0 %v12708_v21  ;;  %4148 = vmatprep.subr.bf16.mxu1 %v12710_v17  ;;  %v15016_v21 = vld [vmem:[#allocation40_spill] sm:$0xff] }
 0x53e   :  { %4137 = vmatprep.mubr.bf16.mxu0 %v14950_v31  ;;  %4178 = vmatprep.mubr.bf16.mxu1 %v14950_v31 }
 0x540   :  { %4108 = vmatpush1.bf16.msra.mxu0 %v12712_v22  ;;  %4149 = vmatpush1.bf16.msra.mxu1 %v12714_v12 }
 0x541   :  { %4109 = vmatprep.subr.bf16.mxu0 %v12720_v42  ;;  %4150 = vmatprep.subr.bf16.mxu1 %v12722_v47  ;;  %v15017_v42 = vld [vmem:[#allocation39_spill] sm:$0xff] }
 0x544   :  { %4110 = vmatpush1.bf16.msra.mxu0 %v12724_v18  ;;  %4151 = vmatpush1.bf16.msra.mxu1 %v12726_v51  ;;  %v15018_v18 = vld [vmem:[#allocation42_spill] sm:$0xff] }
 0x545   :  { %4111 = vmatprep.subr.bf16.mxu0 %v12732_v52  ;;  %4152 = vmatprep.subr.bf16.mxu1 %v12734_v53 }
 0x548   :  { %4112 = vmatpush1.bf16.msra.mxu0 %v12736_v54  ;;  %4153 = vmatpush1.bf16.msra.mxu1 %v12738_v55 }
 0x549   :  { %4113 = vmatprep.subr.bf16.mxu0 %v12744_v56  ;;  %4154 = vmatprep.subr.bf16.mxu1 %v12746_v57 }
 0x54c   :  { %4114 = vmatpush1.bf16.msra.mxu0 %v12748_v59  ;;  %4155 = vmatpush1.bf16.msra.mxu1 %v12750_v60 }
 0x54d   :  { %4115 = vmatprep.subr.bf16.mxu0 %v12756_v61  ;;  %4156 = vmatprep.subr.bf16.mxu1 %v12758_v62 }
 0x550   :  { %4116 = vmatpush1.bf16.msra.mxu0 %v12760_v63  ;;  %4157 = vmatpush1.bf16.msra.mxu1 %v12762_v1 }
 0x551   :  { %4117 = vmatprep.subr.bf16.mxu0 %v12768_v2  ;;  %4158 = vmatprep.subr.bf16.mxu1 %v12770_v3 }
 0x554   :  { %4118 = vmatpush1.bf16.msra.mxu0 %v12772_v5  ;;  %4159 = vmatpush1.bf16.msra.mxu1 %v12774_v20 }
 0x555   :  { %4119 = vmatprep.subr.bf16.mxu0 %v12780_v41  ;;  %4160 = vmatprep.subr.bf16.mxu1 %v12782_v26 }
 0x558   :  { %4120 = vmatpush1.bf16.msra.mxu0 %v12784_v6  ;;  %4161 = vmatpush1.bf16.msra.mxu1 %v12786_v24 }
 0x559   :  { %4388 = vmatprep.subr.bf16.mxu0 %v12792_v45  ;;  %4429 = vmatprep.subr.bf16.mxu1 %v12794_v39  ;;  %v15019_v39 = vld [vmem:[#allocation65_spill] sm:$0xff] }
 0x5ee   :  { %v3519_v40 = vpop.f32.mrb[64].mxu0  ;;  %v3560_v23 = vpop.f32.mrb[64].mxu1 }
 0x5ef   :  { %v3567_v0 = vadd.f32 %v3519_v40, %v15015_v19  ;;  %v3569_v17 = vadd.f32 %v3560_v23, %v15016_v21  ;;  %v3521_v22 = vpop.f32.mrb[65].mxu0  ;;  %v3562_v12 = vpop.f32.mrb[65].mxu1  ;;  %v15021_v23 = vld [vmem:[#allocation67_spill] sm:$0xff] }
 0x5f0   :  { %v3568_v47 = vadd.f32 %v3521_v22, %v15017_v42  ;;  %v3570_v51 = vadd.f32 %v3562_v12, %v15018_v18  ;;  %v3523_v52 = vpop.f32.mrb[66].mxu0  ;;  %v3564_v53 = vpop.f32.mrb[66].mxu1 }
 0x5f1   :  { %v9638_v54 = vmul.f32 -1.442695, %v3567_v0  ;;  %v3524_v55 = vpop.f32.mrb[67].mxu0  ;;  %v3565_v56 = vpop.f32.mrb[67].mxu1  ;;  %v15022_v0 = vld [vmem:[#allocation69_spill] sm:$0xff] }
 0x5f2   :  { %v9639_v57 = vmul.f32 -1.442695, %v3568_v47  ;;  %v9640_v59 = vmul.f32 -1.442695, %v3570_v51 }
 0x5f3   :  { %10762 = vpow2.f32 %v9638_v54 }
 0x5f4   :  { %10764 = vpow2.f32 %v9639_v57 }
 0x5f5   :  { %10766 = vpow2.f32 %v9640_v59 }
 0x5f6   :  { %10768 = vtanh.f32 %v3569_v17 }
 0x5fd   :  { %v10763_v60 = vpop.eup %10762 }
 0x5fe   :  { %v10765_v61 = vpop.eup %10764  ;;  %v3857_v62 = vadd.f32 1.0, %v10763_v60 }
 0x5ff   :  { %v3863_v63 = vadd.f32 1.0, %v10765_v61  ;;  %v10767_v1 = vpop.eup %10766 }
 0x600   :  { %10770 = vrcp.f32 %v3857_v62  ;;  %v10769_v2 = vpop.eup %10768  ;;  %v3870_v41 = vadd.f32 1.0, %v10767_v1  ;;  %v15027_v1 = vld [vmem:[#allocation75_spill] sm:$0xff] }
 0x601   :  { %10772 = vrcp.f32 %v3863_v63  ;;  %v15024_v63 = vld [vmem:[#allocation34_spill] sm:$0xff] }
 0x602   :  { %10774 = vrcp.f32 %v3870_v41  ;;  %v15033_v41 = vld [vmem:[#allocation88_spill] sm:$0xff] }
 0x60a   :  { %v10771_v3 = vpop.eup %10770 }
 0x60b   :  { %v10773_v5 = vpop.eup %10772  ;;  %v3874_v20 = vmul.f32 %v10771_v3, %v10769_v2 }
 0x60c   :  { %v3873_v26 = vmul.f32 %v10773_v5, %v12811_v16  ;;  %v10775_v52 = vpop.eup %10774  ;;  %v15028_v5 = vld [vmem:[#allocation77_spill] sm:$0xff] }
 0x60e   :  { %v3875_v6 = vadd.f32 %v3874_v20, %v3873_v26  ;;  %v3802_v24 = vpop.f32.mrb[68].mxu0  ;;  %v3843_v45 = vpop.f32.mrb[68].mxu1 }
 0x60f   :  { %v3850_v38 = vadd.f32 %v3802_v24, %v15019_v39  ;;  %v3852_v30 = vadd.f32 %v3843_v45, %v15020_v44  ;;  %v3804_v15 = vpop.f32.mrb[69].mxu0  ;;  %v3845_v40 = vpop.f32.mrb[69].mxu1  ;;  %v13044_v24 = vld [vmem:[#allocation12 + $0x2c] ss:$16 sps:$4 sm:$0xff]   ;;  %v13046_v45 = vld [vmem:[#allocation12 + $0x20] ss:$16 sps:$4 sm:$0xff]  }
 0x610   :  { %10776 = vtanh.f32 %v3875_v6  ;;  %v3851_v19 = vadd.f32 %v3804_v15, %v15021_v23  ;;  %v3853_v21 = vadd.f32 %v3845_v40, %v15022_v0  ;;  %v3806_v17 = vpop.f32.mrb[70].mxu0  ;;  %v3847_v22 = vpop.f32.mrb[70].mxu1  ;;  %v12974_v12 = vsel %vm3281_vm10, %v3875_v6, %v12811_v16  ;;  %v13042_v6 = vld [vmem:[#allocation12 + $0x24] ss:$16 sps:$4 sm:$0xff]   ;;  %v13048_v39 = vld [vmem:[#allocation12 + $0x28] ss:$16 sps:$4 sm:$0xff]  }
 0x611   :  { %v9641_v42 = vmul.f32 -1.442695, %v3850_v38  ;;  %v3807_v47 = vpop.f32.mrb[71].mxu0  ;;  %v3848_v18 = vpop.f32.mrb[71].mxu1  ;;  %v13054_v38 = vld [vmem:[#allocation12 + $0x44] ss:$16 sps:$4 sm:$0xff]  }
 0x612   :  { %v9642_v51 = vmul.f32 -1.442695, %v3851_v19  ;;  %v9643_v54 = vmul.f32 -1.442695, %v3853_v21  ;;  %v13056_v44 = vld [vmem:[#allocation12 + $0x4c] ss:$16 sps:$4 sm:$0xff]  }
 0x613   :  { %10778 = vpow2.f32 %v9641_v42  ;;  %v13060_v15 = vld [vmem:[#allocation12 + $0x48] ss:$16 sps:$4 sm:$0xff]   ;;  %v13066_v40 = vld [vmem:[#allocation12 + $0x64] ss:$16 sps:$4 sm:$0xff]   ;;  %v13068_v23 = vld [vmem:[#allocation12 + $0x6c] ss:$16 sps:$4 sm:$0xff]  }
 0x614   :  { %10780 = vpow2.f32 %v9642_v51  ;;  %v13070_v19 = vld [vmem:[#allocation12 + $0x60] ss:$16 sps:$4 sm:$0xff]   ;;  %v13072_v0 = vld [vmem:[#allocation12 + $0x68] ss:$16 sps:$4 sm:$0xff]   ;;  %v13078_v21 = vld [vmem:[#allocation12 + $0x84] ss:$16 sps:$4 sm:$0xff]  }
 0x615   :  { %10782 = vpow2.f32 %v9643_v54  ;;  %v13080_v17 = vld [vmem:[#allocation12 + $0x8c] ss:$16 sps:$4 sm:$0xff]   ;;  %v13082_v22 = vld [vmem:[#allocation12 + $0x80] ss:$16 sps:$4 sm:$0xff]   ;;  %v13084_v42 = vld [vmem:[#allocation12 + $0x88] ss:$16 sps:$4 sm:$0xff]  }
 0x616   :  { %10784 = vtanh.f32 %v3852_v30  ;;  %v13058_v30 = vld [vmem:[#allocation12 + $0x40] ss:$16 sps:$4 sm:$0xff]   ;;  %v13090_v47 = vld [vmem:[#allocation12 + $0xa4] ss:$16 sps:$4 sm:$0xff]   ;;  %v13092_v18 = vld [vmem:[#allocation12 + $0xac] ss:$16 sps:$4 sm:$0xff]  }
 0x617   :  { %v13094_v51 = vld [vmem:[#allocation12 + $0xa0] ss:$16 sps:$4 sm:$0xff]   ;;  %v13104_v54 = vld [vmem:[#allocation12 + $0xcc] ss:$16 sps:$4 sm:$0xff]  }
 0x61a   :  { %v10777_v53 = vpop.eup %10776 }
 0x61b   :  { %v3877_v55 = vmul.f32 %v10777_v53, %v10775_v52  ;;  %v13096_v52 = vld [vmem:[#allocation12 + $0xa8] ss:$16 sps:$4 sm:$0xff]   ;;  %v13102_v53 = vld [vmem:[#allocation12 + $0xc4] ss:$16 sps:$4 sm:$0xff]  }
 0x61d   :  { %v10779_v56 = vpop.eup %10778  ;;  %v12979_v57 = vsel %vm3281_vm10, %v3877_v55, %v12820_v58  ;;  %v13106_v55 = vld [vmem:[#allocation12 + $0xc0] ss:$16 sps:$4 sm:$0xff]  }
 0x61e   :  { %15023 = vst [vmem:[#allocation91_spill] sm:$0xff] %v12979_v57  ;;  %v10781_v59 = vpop.eup %10780  ;;  %v3881_v60 = vadd.f32 1.0, %v10779_v56  ;;  %v3912_v16 = vpack.c.bf16 %v12979_v57, %v12979_v57  ;;  %v13108_v56 = vld [vmem:[#allocation12 + $0xc8] ss:$16 sps:$4 sm:$0xff]   ;;  %v13202_v58 = vld [vmem:[#allocation13 + $0x80] ss:$16 sps:$4 sm:$0xff]  }
 0x61f   :  { %v3887_v61 = vadd.f32 1.0, %v10781_v59  ;;  %v10783_v62 = vpop.eup %10782  ;;  %v13114_v59 = vld [vmem:[#allocation12 + $0xe4] ss:$16 sps:$4 sm:$0xff]  }
 0x620   :  { %10786 = vrcp.f32 %v3881_v60  ;;  %4138 = vmatmul.mubr.bf16.vlgmr.msra.gmra.mrb[72].mxu0 %v3912_v16  ;;  %4179 = vmatmul.mubr.bf16.vlgmr.msra.gmra.mrb[72].mxu1 %v3912_v16  ;;  %v13116_v60 = vld [vmem:[#allocation12 + $0xec] ss:$16 sps:$4 sm:$0xff]   ;;  %v13118_v16 = vld [vmem:[#allocation12 + $0xe0] ss:$16 sps:$4 sm:$0xff]  }
 0x621   :  { %10788 = vrcp.f32 %v3887_v61  ;;  %4389 = vmatpush1.bf16.msra.mxu0 %v12813_v32  ;;  %4430 = vmatpush1.bf16.msra.mxu1 %v12815_v46  ;;  %v10785_v32 = vpop.eup %10784  ;;  %v15025_v46 = vld [vmem:[#allocation73_spill] sm:$0xff] }
 0x622   :  { %4390 = vmatprep.subr.bf16.mxu0 %v12824_v35  ;;  %4431 = vmatprep.subr.bf16.mxu1 %v12826_v4  ;;  %v15026_v4 = vld [vmem:[#allocation76_spill] sm:$0xff]  ;;  %v13120_v61 = vld [vmem:[#allocation12 + $0xe8] ss:$16 sps:$4 sm:$0xff]  }
 0x623   :  { %4420 = vmatprep.mubr.bf16.mxu0 %v14950_v31  ;;  %4461 = vmatprep.mubr.bf16.mxu1 %v14950_v31 }
 0x625   :  { %4391 = vmatpush1.bf16.msra.mxu0 %v12830_v50  ;;  %4432 = vmatpush1.bf16.msra.mxu1 %v12832_v13  ;;  %v3894_v50 = vadd.f32 1.0, %v10783_v62  ;;  %v13126_v62 = vld [vmem:[#allocation13 + $0x4] ss:$16 sps:$4 sm:$0xff]  }
 0x626   :  { %4392 = vmatprep.subr.bf16.mxu0 %v12836_v27  ;;  %4433 = vmatprep.subr.bf16.mxu1 %v12838_v9 }
 0x627   :  { %10790 = vrcp.f32 %v3894_v50 }
 0x629   :  { %4393 = vmatpush1.bf16.msra.mxu0 %v15024_v63  ;;  %4434 = vmatpush1.bf16.msra.mxu1 %v15025_v46 }
 0x62a   :  { %v10787_v35 = vpop.eup %10786  ;;  %4394 = vmatprep.subr.bf16.mxu0 %v15026_v4  ;;  %4435 = vmatprep.subr.bf16.mxu1 %v15027_v1  ;;  %v15036_v1 = vld [vmem:[#allocation44_spill] sm:$0xff] }
 0x62b   :  { %v10789_v2 = vpop.eup %10788  ;;  %v3898_v3 = vmul.f32 %v10787_v35, %v10785_v32  ;;  %v13128_v32 = vld [vmem:[#allocation13 + $0xc] ss:$16 sps:$4 sm:$0xff]  }
 0x62c   :  { %v3897_v13 = vmul.f32 %v10789_v2, %v12883_v34  ;;  %v15035_v35 = vld [vmem:[#allocation41_spill] sm:$0xff] }
 0x62d   :  { %4395 = vmatpush1.bf16.msra.mxu0 %v12856_v43  ;;  %4436 = vmatpush1.bf16.msra.mxu1 %v12858_v37  ;;  %v15029_v43 = vld [vmem:[#allocation78_spill] sm:$0xff]  ;;  %v15030_v37 = vld [vmem:[#allocation80_spill] sm:$0xff] }
 0x62e   :  { %v3899_v27 = vadd.f32 %v3898_v3, %v3897_v13  ;;  %4396 = vmatprep.subr.bf16.mxu0 %v12862_v8  ;;  %4437 = vmatprep.subr.bf16.mxu1 %v12864_v36  ;;  %v15031_v8 = vld [vmem:[#allocation86_spill] sm:$0xff]  ;;  %v15032_v36 = vld [vmem:[#allocation87_spill] sm:$0xff] }
 0x62f   :  { %v15037_v13 = vld [vmem:[#allocation43_spill] sm:$0xff] }
 0x630   :  { %10792 = vtanh.f32 %v3899_v27  ;;  %v13005_v9 = vsel %vm3280_vm9, %v3899_v27, %v12883_v34  ;;  %v15034_v34 = vld [vmem:[#allocation89_spill] sm:$0xff] }
 0x631   :  { %4397 = vmatpush1.bf16.msra.mxu0 %v12869_v28  ;;  %4438 = vmatpush1.bf16.msra.mxu1 %v12871_v29  ;;  %v10791_v20 = vpop.eup %10790 }
 0x632   :  { %4398 = vmatprep.subr.bf16.mxu0 %v15028_v5  ;;  %4439 = vmatprep.subr.bf16.mxu1 %v15029_v43  ;;  %v15038_v5 = vld [vmem:[#allocation45_spill] sm:$0xff] }
 0x635   :  { %4399 = vmatpush1.bf16.msra.mxu0 %v15030_v37  ;;  %4440 = vmatpush1.bf16.msra.mxu1 %v15031_v8 }
 0x636   :  { %4400 = vmatprep.subr.bf16.mxu0 %v15032_v36  ;;  %4441 = vmatprep.subr.bf16.mxu1 %v12895_v25 }
 0x639   :  { %4401 = vmatpush1.bf16.msra.mxu0 %v15033_v41  ;;  %4442 = vmatpush1.bf16.msra.mxu1 %v15034_v34 }
 0x63a   :  { %v10793_v28 = vpop.eup %10792  ;;  %4402 = vmatprep.subr.bf16.mxu0 %v12905_v10  ;;  %4443 = vmatprep.subr.bf16.mxu1 %v12907_v48  ;;  %v13030_v10 = vld [vmem:[#allocation12 + $0x4] ss:$16 sps:$4 sm:$0xff]   ;;  %v13032_v48 = vld [vmem:[#allocation12 + $0xc] ss:$16 sps:$4 sm:$0xff]  }
 0x63b   :  { %v3901_v29 = vmul.f32 %v10793_v28, %v10791_v20 }
 0x63d   :  { %4403 = vmatpush1.bf16.msra.mxu0 %v12911_v49  ;;  %4444 = vmatpush1.bf16.msra.mxu1 %v12913_v7  ;;  %v13024_v26 = vsel %vm3280_vm9, %v3901_v29, %v12922_v33  ;;  %v13034_v49 = vld [vmem:[#allocation12] ss:$16 sps:$4 sm:$0xff]   ;;  %v13036_v7 = vld [vmem:[#allocation12 + $0x8] ss:$16 sps:$4 sm:$0xff]  }
 0x63e   :  { %v4195_v25 = vpack.c.bf16 %v13024_v26, %v13024_v26  ;;  %4725 = vmatprep.subr.bf16.mxu0 %v13030_v10  ;;  %4766 = vmatprep.subr.bf16.mxu1 %v13032_v48 }
 0x640   :  { %4421 = vmatmul.mubr.bf16.vlgmr.msra.gmra.mrb[76].mxu0 %v4195_v25  ;;  %4462 = vmatmul.mubr.bf16.vlgmr.msra.gmra.mrb[76].mxu1 %v4195_v25 }
 0x641   :  { %4757 = vmatprep.mubr.bf16.mxu0 %v14950_v31  ;;  %4798 = vmatprep.mubr.bf16.mxu1 %v14950_v31 }
 0x642   :  { %4726 = vmatpush1.bf16.msra.mxu0 %v13034_v49  ;;  %4767 = vmatpush1.bf16.msra.mxu1 %v13036_v7 }
 0x643   :  { %4727 = vmatprep.subr.bf16.mxu0 %v13042_v6  ;;  %4768 = vmatprep.subr.bf16.mxu1 %v13044_v24 }
 0x646   :  { %4728 = vmatpush1.bf16.msra.mxu0 %v13046_v45  ;;  %4769 = vmatpush1.bf16.msra.mxu1 %v13048_v39 }
 0x647   :  { %4729 = vmatprep.subr.bf16.mxu0 %v13054_v38  ;;  %4770 = vmatprep.subr.bf16.mxu1 %v13056_v44 }
 0x64a   :  { %4730 = vmatpush1.bf16.msra.mxu0 %v13058_v30  ;;  %4771 = vmatpush1.bf16.msra.mxu1 %v13060_v15 }
 0x64b   :  { %4731 = vmatprep.subr.bf16.mxu0 %v13066_v40  ;;  %4772 = vmatprep.subr.bf16.mxu1 %v13068_v23 }
 0x64e   :  { %4732 = vmatpush1.bf16.msra.mxu0 %v13070_v19  ;;  %4773 = vmatpush1.bf16.msra.mxu1 %v13072_v0 }
 0x64f   :  { %4733 = vmatprep.subr.bf16.mxu0 %v13078_v21  ;;  %4774 = vmatprep.subr.bf16.mxu1 %v13080_v17 }
 0x652   :  { %4734 = vmatpush1.bf16.msra.mxu0 %v13082_v22  ;;  %4775 = vmatpush1.bf16.msra.mxu1 %v13084_v42 }
 0x653   :  { %4735 = vmatprep.subr.bf16.mxu0 %v13090_v47  ;;  %4776 = vmatprep.subr.bf16.mxu1 %v13092_v18 }
 0x656   :  { %4736 = vmatpush1.bf16.msra.mxu0 %v13094_v51  ;;  %4777 = vmatpush1.bf16.msra.mxu1 %v13096_v52 }
 0x657   :  { %4737 = vmatprep.subr.bf16.mxu0 %v13102_v53  ;;  %4778 = vmatprep.subr.bf16.mxu1 %v13104_v54 }
 0x65a   :  { %4738 = vmatpush1.bf16.msra.mxu0 %v13106_v55  ;;  %4779 = vmatpush1.bf16.msra.mxu1 %v13108_v56 }
 0x65b   :  { %4739 = vmatprep.subr.bf16.mxu0 %v13114_v59  ;;  %4780 = vmatprep.subr.bf16.mxu1 %v13116_v60 }
 0x65e   :  { %4740 = vmatpush1.bf16.msra.mxu0 %v13118_v16  ;;  %4781 = vmatpush1.bf16.msra.mxu1 %v13120_v61 }
 0x65f   :  { %5008 = vmatprep.subr.bf16.mxu0 %v13126_v62  ;;  %5049 = vmatprep.subr.bf16.mxu1 %v13128_v32 }
 0x6f3   :  { %v4139_v63 = vpop.f32.mrb[72].mxu0  ;;  %v4180_v46 = vpop.f32.mrb[72].mxu1 }
 0x6f4   :  { %v4187_v4 = vadd.f32 %v4139_v63, %v15035_v35  ;;  %v4189_v2 = vadd.f32 %v4180_v46, %v15036_v1  ;;  %v4141_v3 = vpop.f32.mrb[73].mxu0  ;;  %v4182_v50 = vpop.f32.mrb[73].mxu1 }
 0x6f5   :  { %v4188_v27 = vadd.f32 %v4141_v3, %v15037_v13  ;;  %v4190_v43 = vadd.f32 %v4182_v50, %v15038_v5  ;;  %v4143_v37 = vpop.f32.mrb[74].mxu0  ;;  %v4184_v8 = vpop.f32.mrb[74].mxu1 }
 0x6f6   :  { %v9708_v36 = vmul.f32 -1.442695, %v4187_v4  ;;  %v4144_v20 = vpop.f32.mrb[75].mxu0  ;;  %v4185_v41 = vpop.f32.mrb[75].mxu1 }
 0x6f7   :  { %v9709_v34 = vmul.f32 -1.442695, %v4188_v27  ;;  %v9710_v28 = vmul.f32 -1.442695, %v4190_v43  ;;  %v15039_v43 = vld [vmem:[#allocation62_spill] sm:$0xff]  ;;  %v15040_v20 = vld [vmem:[#allocation64_spill] sm:$0xff] }
 0x6f8   :  { %10794 = vpow2.f32 %v9708_v36 }
 0x6f9   :  { %10796 = vpow2.f32 %v9709_v34 }
 0x6fa   :  { %10798 = vpow2.f32 %v9710_v28  ;;  %v15041_v28 = vld [vmem:[#allocation63_spill] sm:$0xff] }
 0x6fb   :  { %10800 = vtanh.f32 %v4189_v2 }
 0x702   :  { %v10795_v29 = vpop.eup %10794 }
 0x703   :  { %v10797_v25 = vpop.eup %10796  ;;  %v4477_v63 = vadd.f32 1.0, %v10795_v29 }
 0x704   :  { %v4483_v46 = vadd.f32 1.0, %v10797_v25  ;;  %v10799_v35 = vpop.eup %10798  ;;  %v15042_v25 = vld [vmem:[#allocation66_spill] sm:$0xff] }
 0x705   :  { %10802 = vrcp.f32 %v4477_v63  ;;  %v10801_v1 = vpop.eup %10800  ;;  %v4490_v4 = vadd.f32 1.0, %v10799_v35 }
 0x706   :  { %10804 = vrcp.f32 %v4483_v46 }
 0x707   :  { %10806 = vrcp.f32 %v4490_v4 }
 0x70f   :  { %v10803_v3 = vpop.eup %10802 }
 0x710   :  { %v10805_v50 = vpop.eup %10804  ;;  %v4494_v13 = vmul.f32 %v10803_v3, %v10801_v1 }
 0x711   :  { %v4493_v5 = vmul.f32 %v10805_v50, %v12974_v12 }
 0x713   :  { %v4495_v27 = vadd.f32 %v4494_v13, %v4493_v5  ;;  %v4422_v37 = vpop.f32.mrb[76].mxu0  ;;  %v4463_v8 = vpop.f32.mrb[76].mxu1 }
 0x714   :  { %v4470_v36 = vadd.f32 %v4422_v37, %v15039_v43  ;;  %v4472_v41 = vadd.f32 %v4463_v8, %v15040_v20  ;;  %v4424_v2 = vpop.f32.mrb[77].mxu0  ;;  %v4465_v34 = vpop.f32.mrb[77].mxu1 }
 0x715   :  { %10808 = vtanh.f32 %v4495_v27  ;;  %v4471_v29 = vadd.f32 %v4424_v2, %v15041_v28  ;;  %v4473_v63 = vadd.f32 %v4465_v34, %v15042_v25  ;;  %v4426_v46 = vpop.f32.mrb[78].mxu0  ;;  %v4467_v1 = vpop.f32.mrb[78].mxu1  ;;  %v13144_v35 = vsel %vm2659_vm8, %v4495_v27, %v12974_v12  ;;  %v13146_v2 = vld [vmem:[#allocation13] ss:$16 sps:$4 sm:$0xff]   ;;  %v13148_v34 = vld [vmem:[#allocation13 + $0x8] ss:$16 sps:$4 sm:$0xff]  }
 0x716   :  { %v9711_v3 = vmul.f32 -1.442695, %v4470_v36  ;;  %v4427_v50 = vpop.f32.mrb[79].mxu0  ;;  %v4468_v13 = vpop.f32.mrb[79].mxu1  ;;  %v13159_v25 = vld [vmem:[#allocation13 + $0x2c] ss:$16 sps:$4 sm:$0xff]  }
 0x717   :  { %v9712_v4 = vmul.f32 -1.442695, %v4471_v29  ;;  %v10807_v5 = vpop.eup %10806  ;;  %v9713_v8 = vmul.f32 -1.442695, %v4473_v63  ;;  %v13157_v29 = vld [vmem:[#allocation13 + $0x24] ss:$16 sps:$4 sm:$0xff]  }
 0x718   :  { %10810 = vpow2.f32 %v9711_v3  ;;  %v13163_v46 = vld [vmem:[#allocation13 + $0x20] ss:$16 sps:$4 sm:$0xff]   ;;  %v13165_v1 = vld [vmem:[#allocation13 + $0x28] ss:$16 sps:$4 sm:$0xff]   ;;  %v13169_v3 = vld [vmem:[#allocation13 + $0x44] ss:$16 sps:$4 sm:$0xff]  }
 0x719   :  { %10812 = vpow2.f32 %v9712_v4  ;;  %v13177_v50 = vld [vmem:[#allocation13 + $0x40] ss:$16 sps:$4 sm:$0xff]   ;;  %v13179_v13 = vld [vmem:[#allocation13 + $0x48] ss:$16 sps:$4 sm:$0xff]   ;;  %v13183_v4 = vld [vmem:[#allocation13 + $0x64] ss:$16 sps:$4 sm:$0xff]  }
 0x71a   :  { %10814 = vpow2.f32 %v9713_v8  ;;  %15043 = vst [vmem:[#allocation92_spill] sm:$0xff] %v13177_v50  ;;  %15044 = vst [vmem:[#allocation93_spill] sm:$0xff] %v13179_v13 }
 0x71b   :  { %10816 = vtanh.f32 %v4472_v41  ;;  %v13171_v41 = vld [vmem:[#allocation13 + $0x4c] ss:$16 sps:$4 sm:$0xff]   ;;  %15045 = vst [vmem:[#allocation94_spill] sm:$0xff] %v13183_v4 }
 0x71f   :  { %v10809_v37 = vpop.eup %10808 }
 0x720   :  { %v4497_v43 = vmul.f32 %v10809_v37, %v10807_v5  ;;  %v13185_v5 = vld [vmem:[#allocation13 + $0x6c] ss:$16 sps:$4 sm:$0xff]  }
 0x721   :  { %15046 = vst [vmem:[#allocation95_spill] sm:$0xff] %v13185_v5 }
 0x722   :  { %v10811_v20 = vpop.eup %10810  ;;  %v13153_v12 = vsel %vm2659_vm8, %v4497_v43, %v12979_v57  ;;  %v13189_v43 = vld [vmem:[#allocation13 + $0x60] ss:$16 sps:$4 sm:$0xff]  }
 0x723   :  { %v10813_v27 = vpop.eup %10812  ;;  %v4501_v36 = vadd.f32 1.0, %v10811_v20  ;;  %v4532_v28 = vpack.c.bf16 %v13153_v12, %v13153_v12  ;;  %v13191_v20 = vld [vmem:[#allocation13 + $0x68] ss:$16 sps:$4 sm:$0xff]  }
 0x724   :  { %v4507_v63 = vadd.f32 1.0, %v10813_v27  ;;  %v10815_v37 = vpop.eup %10814 }
 0x725   :  { %10818 = vrcp.f32 %v4501_v36  ;;  %4758 = vmatmul.mubr.bf16.vlgmr.msra.gmra.mrb[80].mxu0 %v4532_v28  ;;  %4799 = vmatmul.mubr.bf16.vlgmr.msra.gmra.mrb[80].mxu1 %v4532_v28  ;;  %v10817_v8 = vpop.eup %10816  ;;  %v13195_v36 = vld [vmem:[#allocation13 + $0x84] ss:$16 sps:$4 sm:$0xff]   ;;  %v13197_v28 = vld [vmem:[#allocation13 + $0x8c] ss:$16 sps:$4 sm:$0xff]   ;;  %v4514_v11 = vadd.f32 1.0, %v10815_v37 }
 0x726   :  { %10820 = vrcp.f32 %v4507_v63  ;;  %5009 = vmatpush1.bf16.msra.mxu0 %v13146_v2  ;;  %5050 = vmatpush1.bf16.msra.mxu1 %v13148_v34 }
 0x727   :  { %5010 = vmatprep.subr.bf16.mxu0 %v13157_v29  ;;  %5051 = vmatprep.subr.bf16.mxu1 %v13159_v25  ;;  %10822 = vrcp.f32 %v4514_v11  ;;  %v13227_v11 = vld [vmem:[#allocation13 + $0xcc] ss:$16 sps:$4 sm:$0xff]  }
 0x728   :  { %5040 = vmatprep.mubr.bf16.mxu0 %v14950_v31  ;;  %5081 = vmatprep.mubr.bf16.mxu1 %v14950_v31 }
 0x72a   :  { %5011 = vmatpush1.bf16.msra.mxu0 %v13163_v46  ;;  %5052 = vmatpush1.bf16.msra.mxu1 %v13165_v1 }
 0x72b   :  { %5012 = vmatprep.subr.bf16.mxu0 %v13169_v3  ;;  %5053 = vmatprep.subr.bf16.mxu1 %v13171_v41 }
 0x72e   :  { %5013 = vmatpush1.bf16.msra.mxu0 %v13177_v50  ;;  %5054 = vmatpush1.bf16.msra.mxu1 %v13179_v13  ;;  %v13204_v13 = vld [vmem:[#allocation13 + $0x88] ss:$16 sps:$4 sm:$0xff]   ;;  %v13210_v50 = vld [vmem:[#allocation13 + $0xac] ss:$16 sps:$4 sm:$0xff]  }
 0x72f   :  { %v10819_v27 = vpop.eup %10818  ;;  %5014 = vmatprep.subr.bf16.mxu0 %v13183_v4  ;;  %5055 = vmatprep.subr.bf16.mxu1 %v13185_v5  ;;  %v13208_v5 = vld [vmem:[#allocation13 + $0xa4] ss:$16 sps:$4 sm:$0xff]   ;;  %15048 = vst [vmem:[#allocation36_spill] sm:$0xff] %v13210_v50 }
 0x730   :  { %v10821_v63 = vpop.eup %10820  ;;  %v4518_v57 = vmul.f32 %v10819_v27, %v10817_v8  ;;  %15047 = vst [vmem:[#allocation33_spill] sm:$0xff] %v13208_v5  ;;  %v13225_v8 = vld [vmem:[#allocation13 + $0xc4] ss:$16 sps:$4 sm:$0xff]  }
 0x731   :  { %v4517_v33 = vmul.f32 %v10821_v63, %v13005_v9  ;;  %15051 = vst [vmem:[#allocation70_spill] sm:$0xff] %v13225_v8  ;;  %v13237_v27 = vld [vmem:[#allocation13 + $0xe4] ss:$16 sps:$4 sm:$0xff]   ;;  %v13239_v63 = vld [vmem:[#allocation13 + $0xec] ss:$16 sps:$4 sm:$0xff]  }
 0x732   :  { %5015 = vmatpush1.bf16.msra.mxu0 %v13189_v43  ;;  %5056 = vmatpush1.bf16.msra.mxu1 %v13191_v20 }
 0x733   :  { %v4519_v4 = vadd.f32 %v4518_v57, %v4517_v33  ;;  %5016 = vmatprep.subr.bf16.mxu0 %v13195_v36  ;;  %5057 = vmatprep.subr.bf16.mxu1 %v13197_v28  ;;  %v13219_v33 = vld [vmem:[#allocation13 + $0xa0] ss:$16 sps:$4 sm:$0xff]   ;;  %v13221_v57 = vld [vmem:[#allocation13 + $0xa8] ss:$16 sps:$4 sm:$0xff]  }
 0x734   :  { %15049 = vst [vmem:[#allocation35_spill] sm:$0xff] %v13219_v33  ;;  %15050 = vst [vmem:[#allocation37_spill] sm:$0xff] %v13221_v57 }
 0x735   :  { %10824 = vtanh.f32 %v4519_v4  ;;  %v13215_v37 = vsel %vm2658_vm7, %v4519_v4, %v13005_v9  ;;  %v13231_v9 = vld [vmem:[#allocation13 + $0xc0] ss:$16 sps:$4 sm:$0xff]   ;;  %v13233_v4 = vld [vmem:[#allocation13 + $0xc8] ss:$16 sps:$4 sm:$0xff]  }
 0x736   :  { %5017 = vmatpush1.bf16.msra.mxu0 %v13202_v58  ;;  %5058 = vmatpush1.bf16.msra.mxu1 %v13204_v13  ;;  %15052 = vst [vmem:[#allocation72_spill] sm:$0xff] %v13231_v9  ;;  %15053 = vst [vmem:[#allocation71_spill] sm:$0xff] %v13233_v4 }
 0x737   :  { %5018 = vmatprep.subr.bf16.mxu0 %v13208_v5  ;;  %5059 = vmatprep.subr.bf16.mxu1 %v13210_v50  ;;  %v10823_v50 = vpop.eup %10822 }
 0x73a   :  { %5019 = vmatpush1.bf16.msra.mxu0 %v13219_v33  ;;  %5060 = vmatpush1.bf16.msra.mxu1 %v13221_v57  ;;  %v13243_v33 = vld [vmem:[#allocation13 + $0xe0] ss:$16 sps:$4 sm:$0xff]   ;;  %v13245_v57 = vld [vmem:[#allocation13 + $0xe8] ss:$16 sps:$4 sm:$0xff]  }
 0x73b   :  { %5020 = vmatprep.subr.bf16.mxu0 %v13225_v8  ;;  %5061 = vmatprep.subr.bf16.mxu1 %v13227_v11 }
 0x73e   :  { %5021 = vmatpush1.bf16.msra.mxu0 %v13231_v9  ;;  %5062 = vmatpush1.bf16.msra.mxu1 %v13233_v4 }
 0x73f   :  { %v10825_v5 = vpop.eup %10824  ;;  %5022 = vmatprep.subr.bf16.mxu0 %v13237_v27  ;;  %5063 = vmatprep.subr.bf16.mxu1 %v13239_v63 }
 0x740   :  { %v4521_v8 = vmul.f32 %v10825_v5, %v10823_v50  ;;  %v15059_v5 = vld [vmem:[#allocation60_spill] sm:$0xff] }
 0x742   :  { %5023 = vmatpush1.bf16.msra.mxu0 %v13243_v33  ;;  %5064 = vmatpush1.bf16.msra.mxu1 %v13245_v57  ;;  %v13254_v9 = vsel %vm2658_vm7, %v4521_v8, %v13024_v26 }
 0x743   :  { %v4815_v4 = vpack.c.bf16 %v13254_v9, %v13254_v9  ;;  %5345 = vmatprep.subr.bf16.mxu0 %v13030_v10  ;;  %5386 = vmatprep.subr.bf16.mxu1 %v13032_v48 }
 0x745   :  { %5041 = vmatmul.mubr.bf16.vlgmr.msra.gmra.mrb[84].mxu0 %v4815_v4  ;;  %5082 = vmatmul.mubr.bf16.vlgmr.msra.gmra.mrb[84].mxu1 %v4815_v4 }
 0x746   :  { %5346 = vmatpush1.bf16.msra.mxu0 %v13034_v49  ;;  %5387 = vmatpush1.bf16.msra.mxu1 %v13036_v7  ;;  %v15054_v49 = vld [vmem:[#allocation46_spill] sm:$0xff] }
 0x747   :  { %5347 = vmatprep.subr.bf16.mxu0 %v13042_v6  ;;  %5388 = vmatprep.subr.bf16.mxu1 %v13044_v24  ;;  %v15055_v6 = vld [vmem:[#allocation48_spill] sm:$0xff] }
 0x748   :  { %5377 = vmatprep.mubr.bf16.mxu0 %v14950_v31  ;;  %5418 = vmatprep.mubr.bf16.mxu1 %v14950_v31 }
 0x74a   :  { %5348 = vmatpush1.bf16.msra.mxu0 %v13046_v45  ;;  %5389 = vmatpush1.bf16.msra.mxu1 %v13048_v39 }
 0x74b   :  { %5349 = vmatprep.subr.bf16.mxu0 %v13054_v38  ;;  %5390 = vmatprep.subr.bf16.mxu1 %v13056_v44  ;;  %v15056_v38 = vld [vmem:[#allocation47_spill] sm:$0xff] }
 0x74e   :  { %5350 = vmatpush1.bf16.msra.mxu0 %v13058_v30  ;;  %5391 = vmatpush1.bf16.msra.mxu1 %v13060_v15  ;;  %v15057_v30 = vld [vmem:[#allocation50_spill] sm:$0xff] }
 0x74f   :  { %5351 = vmatprep.subr.bf16.mxu0 %v13066_v40  ;;  %5392 = vmatprep.subr.bf16.mxu1 %v13068_v23 }
 0x752   :  { %5352 = vmatpush1.bf16.msra.mxu0 %v13070_v19  ;;  %5393 = vmatpush1.bf16.msra.mxu1 %v13072_v0 }
 0x753   :  { %5353 = vmatprep.subr.bf16.mxu0 %v13078_v21  ;;  %5394 = vmatprep.subr.bf16.mxu1 %v13080_v17 }
 0x756   :  { %5354 = vmatpush1.bf16.msra.mxu0 %v13082_v22  ;;  %5395 = vmatpush1.bf16.msra.mxu1 %v13084_v42 }
 0x757   :  { %5355 = vmatprep.subr.bf16.mxu0 %v13090_v47  ;;  %5396 = vmatprep.subr.bf16.mxu1 %v13092_v18 }
 0x75a   :  { %5356 = vmatpush1.bf16.msra.mxu0 %v13094_v51  ;;  %5397 = vmatpush1.bf16.msra.mxu1 %v13096_v52 }
 0x75b   :  { %5357 = vmatprep.subr.bf16.mxu0 %v13102_v53  ;;  %5398 = vmatprep.subr.bf16.mxu1 %v13104_v54 }
 0x75e   :  { %5358 = vmatpush1.bf16.msra.mxu0 %v13106_v55  ;;  %5399 = vmatpush1.bf16.msra.mxu1 %v13108_v56 }
 0x75f   :  { %5359 = vmatprep.subr.bf16.mxu0 %v13114_v59  ;;  %5400 = vmatprep.subr.bf16.mxu1 %v13116_v60 }
 0x762   :  { %5360 = vmatpush1.bf16.msra.mxu0 %v13118_v16  ;;  %5401 = vmatpush1.bf16.msra.mxu1 %v13120_v61 }
 0x763   :  { %5628 = vmatprep.subr.bf16.mxu0 %v13126_v62  ;;  %5669 = vmatprep.subr.bf16.mxu1 %v13128_v32  ;;  %v15058_v32 = vld [vmem:[#allocation57_spill] sm:$0xff] }
 0x7f8   :  { %v4759_v10 = vpop.f32.mrb[80].mxu0  ;;  %v4800_v48 = vpop.f32.mrb[80].mxu1 }
 0x7f9   :  { %v4807_v7 = vadd.f32 %v4759_v10, %v15054_v49  ;;  %v4809_v24 = vadd.f32 %v4800_v48, %v15055_v6  ;;  %v4761_v45 = vpop.f32.mrb[81].mxu0  ;;  %v4802_v39 = vpop.f32.mrb[81].mxu1  ;;  %v15060_v48 = vld [vmem:[#allocation59_spill] sm:$0xff] }
 0x7fa   :  { %v4808_v44 = vadd.f32 %v4761_v45, %v15056_v38  ;;  %v4810_v15 = vadd.f32 %v4802_v39, %v15057_v30  ;;  %v4763_v40 = vpop.f32.mrb[82].mxu0  ;;  %v4804_v23 = vpop.f32.mrb[82].mxu1 }
 0x7fb   :  { %v9778_v19 = vmul.f32 -1.442695, %v4807_v7  ;;  %v4764_v0 = vpop.f32.mrb[83].mxu0  ;;  %v4805_v21 = vpop.f32.mrb[83].mxu1  ;;  %v15061_v7 = vld [vmem:[#allocation61_spill] sm:$0xff] }
 0x7fc   :  { %v9779_v17 = vmul.f32 -1.442695, %v4808_v44  ;;  %v9780_v22 = vmul.f32 -1.442695, %v4810_v15 }
 0x7fd   :  { %10826 = vpow2.f32 %v9778_v19 }
 0x7fe   :  { %10828 = vpow2.f32 %v9779_v17 }
 0x7ff   :  { %10830 = vpow2.f32 %v9780_v22 }
 0x800   :  { %10832 = vtanh.f32 %v4809_v24 }
 0x807   :  { %v10827_v42 = vpop.eup %10826 }
 0x808   :  { %v10829_v47 = vpop.eup %10828  ;;  %v5097_v18 = vadd.f32 1.0, %v10827_v42 }
 0x809   :  { %v5103_v51 = vadd.f32 1.0, %v10829_v47  ;;  %v10831_v52 = vpop.eup %10830 }
 0x80a   :  { %10834 = vrcp.f32 %v5097_v18  ;;  %v10833_v53 = vpop.eup %10832  ;;  %v5110_v59 = vadd.f32 1.0, %v10831_v52  ;;  %v15065_v52 = vld [vmem:[#allocation95_spill] sm:$0xff] }
 0x80b   :  { %10836 = vrcp.f32 %v5103_v51  ;;  %v15062_v51 = vld [vmem:[#allocation92_spill] sm:$0xff] }
 0x80c   :  { %10838 = vrcp.f32 %v5110_v59  ;;  %v15071_v59 = vld [vmem:[#allocation72_spill] sm:$0xff] }
 0x814   :  { %v10835_v54 = vpop.eup %10834 }
 0x815   :  { %v10837_v55 = vpop.eup %10836  ;;  %v5114_v56 = vmul.f32 %v10835_v54, %v10833_v53 }
 0x816   :  { %v5113_v60 = vmul.f32 %v10837_v55, %v13144_v35  ;;  %v10839_v40 = vpop.eup %10838  ;;  %v15066_v55 = vld [vmem:[#allocation33_spill] sm:$0xff] }
 0x818   :  { %v5115_v16 = vadd.f32 %v5114_v56, %v5113_v60  ;;  %v5042_v61 = vpop.f32.mrb[84].mxu0  ;;  %v5083_v62 = vpop.f32.mrb[84].mxu1 }
 0x819   :  { %v5090_v50 = vadd.f32 %v5042_v61, %v15058_v32  ;;  %v5092_v8 = vadd.f32 %v5083_v62, %v15059_v5  ;;  %v5044_v4 = vpop.f32.mrb[85].mxu0  ;;  %v5085_v10 = vpop.f32.mrb[85].mxu1  ;;  %v5794_v61 = vld [vmem:[#allocation15 + $0x20] sm:$0xff] }
 0x81a   :  { %10840 = vtanh.f32 %v5115_v16  ;;  %v5091_v49 = vadd.f32 %v5044_v4, %v15060_v48  ;;  %v5093_v6 = vadd.f32 %v5085_v10, %v15061_v7  ;;  %v5046_v24 = vpop.f32.mrb[86].mxu0  ;;  %v5087_v45 = vpop.f32.mrb[86].mxu1  ;;  %v13306_v39 = vsel %vm2037_vm6, %v5115_v16, %v13144_v35  ;;  %v5790_v16 = vld [vmem:[#allocation15] sm:$0xff]  ;;  %v5803_v10 = vld [vmem:[#allocation15 + $0x68] sm:$0xff] }
 0x81b   :  { %v9781_v38 = vmul.f32 -1.442695, %v5090_v50  ;;  %v5047_v44 = vpop.f32.mrb[87].mxu0  ;;  %v5088_v30 = vpop.f32.mrb[87].mxu1  ;;  %v9855_v62 = vcombine.high %v5790_v16, %v5794_v61  ;;  %v9854_v32 = vcombine.low %v5790_v16, %v5794_v61  ;;  %v5802_v5 = vld [vmem:[#allocation15 + $0x60] sm:$0xff]  ;;  %v5807_v45 = vld [vmem:[#allocation15 + $0x88] sm:$0xff] }
 0x81c   :  { %v9782_v15 = vmul.f32 -1.442695, %v5091_v49  ;;  %v9783_v19 = vmul.f32 -1.442695, %v5093_v6  ;;  %v5806_v6 = vld [vmem:[#allocation15 + $0x80] sm:$0xff]  ;;  %v5811_v44 = vld [vmem:[#allocation15 + $0xa8] sm:$0xff] }
 0x81d   :  { %10842 = vpow2.f32 %v9781_v38  ;;  %v5810_v24 = vld [vmem:[#allocation15 + $0xa0] sm:$0xff] }
 0x81e   :  { %10844 = vpow2.f32 %v9782_v15  ;;  %v9871_v38 = vcombine.high %v5806_v6, %v5810_v24  ;;  %v9870_v30 = vcombine.low %v5806_v6, %v5810_v24  ;;  %v9872_v15 = vcombine.low %v5807_v45, %v5811_v44  ;;  %v5846_v61 = vld [vmem:[#allocation15 + $0x1c0] sm:$0xff] }
 0x81f   :  { %10846 = vpow2.f32 %v9783_v19  ;;  %v5818_v19 = vld [vmem:[#allocation15 + $0xe0] sm:$0xff] }
 0x820   :  { %10848 = vtanh.f32 %v5092_v8  ;;  %v5799_v8 = vld [vmem:[#allocation15 + $0x48] sm:$0xff]  ;;  %v5862_v24 = vld [vmem:[#allocation15 + $0x240] sm:$0xff] }
 0x821   :  { %v9864_v49 = vcombine.low %v5799_v8, %v5803_v10  ;;  %v9865_v7 = vcombine.high %v5799_v8, %v5803_v10  ;;  %v5858_v8 = vld [vmem:[#allocation15 + $0x220] sm:$0xff] }
 0x824   :  { %v10841_v23 = vpop.eup %10840 }
 0x825   :  { %v5117_v0 = vmul.f32 %v10841_v23, %v10839_v40  ;;  %v9873_v40 = vcombine.high %v5807_v45, %v5811_v44  ;;  %v5814_v23 = vld [vmem:[#allocation15 + $0xc0] sm:$0xff] }
 0x826   :  { %v5866_v45 = vld [vmem:[#allocation15 + $0x260] sm:$0xff] }
 0x827   :  { %v10843_v21 = vpop.eup %10842  ;;  %v13311_v17 = vsel %vm2037_vm6, %v5117_v0, %v13153_v12  ;;  %v5815_v0 = vld [vmem:[#allocation15 + $0xc8] sm:$0xff]  ;;  %v9927_v44 = vcombine.high %v5862_v24, %v5866_v45 }
 0x828   :  { %v10845_v22 = vpop.eup %10844  ;;  %v5121_v42 = vadd.f32 1.0, %v10843_v21  ;;  %v5152_v35 = vpack.c.bf16 %v13311_v17, %v13311_v17  ;;  %v9879_v21 = vcombine.high %v5814_v23, %v5818_v19 }
 0x829   :  { %v5127_v47 = vadd.f32 1.0, %v10845_v22  ;;  %v10847_v18 = vpop.eup %10846  ;;  %v5819_v22 = vld [vmem:[#allocation15 + $0xe8] sm:$0xff] }
 0x82a   :  { %10850 = vrcp.f32 %v5121_v42  ;;  %5378 = vmatmul.mubr.bf16.vlgmr.msra.gmra.mrb[88].mxu0 %v5152_v35  ;;  %5419 = vmatmul.mubr.bf16.vlgmr.msra.gmra.mrb[88].mxu1 %v5152_v35  ;;  %v9878_v42 = vcombine.low %v5814_v23, %v5818_v19  ;;  %v9880_v35 = vcombine.low %v5815_v0, %v5819_v22  ;;  %v5870_v19 = vld [vmem:[#allocation15 + $0x280] sm:$0xff] }
 0x82b   :  { %10852 = vrcp.f32 %v5127_v47  ;;  %5629 = vmatpush1.bf16.msra.mxu0 %v13146_v2  ;;  %5670 = vmatpush1.bf16.msra.mxu1 %v13148_v34  ;;  %v10849_v2 = vpop.eup %10848  ;;  %v15063_v34 = vld [vmem:[#allocation93_spill] sm:$0xff]  ;;  %v9881_v47 = vcombine.high %v5815_v0, %v5819_v22  ;;  %v5874_v0 = vld [vmem:[#allocation15 + $0x2a0] sm:$0xff] }
 0x82c   :  { %5630 = vmatprep.subr.bf16.mxu0 %v13157_v29  ;;  %5671 = vmatprep.subr.bf16.mxu1 %v13159_v25  ;;  %v15064_v25 = vld [vmem:[#allocation94_spill] sm:$0xff]  ;;  %v9935_v22 = vcombine.high %v5870_v19, %v5874_v0 }
 0x82d   :  { %5660 = vmatprep.mubr.bf16.mxu0 %v14950_v31  ;;  %5701 = vmatprep.mubr.bf16.mxu1 %v14950_v31 }
 0x82f   :  { %5631 = vmatpush1.bf16.msra.mxu0 %v13163_v46  ;;  %5672 = vmatpush1.bf16.msra.mxu1 %v13165_v1  ;;  %v5134_v46 = vadd.f32 1.0, %v10847_v18  ;;  %v5822_v18 = vld [vmem:[#allocation15 + $0x100] sm:$0xff] }
 0x830   :  { %5632 = vmatprep.subr.bf16.mxu0 %v13169_v3  ;;  %5673 = vmatprep.subr.bf16.mxu1 %v13171_v41 }
 0x831   :  { %10854 = vrcp.f32 %v5134_v46  ;;  %v5834_v46 = vld [vmem:[#allocation15 + $0x160] sm:$0xff] }
 0x833   :  { %5633 = vmatpush1.bf16.msra.mxu0 %v15062_v51  ;;  %5674 = vmatpush1.bf16.msra.mxu1 %v15063_v34  ;;  %v5823_v51 = vld [vmem:[#allocation15 + $0x108] sm:$0xff] }
 0x834   :  { %v10851_v29 = vpop.eup %10850  ;;  %5634 = vmatprep.subr.bf16.mxu0 %v15064_v25  ;;  %5675 = vmatprep.subr.bf16.mxu1 %v15065_v52 }
 0x835   :  { %v10853_v53 = vpop.eup %10852  ;;  %v5138_v54 = vmul.f32 %v10851_v29, %v10849_v2  ;;  %v5826_v2 = vld [vmem:[#allocation15 + $0x120] sm:$0xff]  ;;  %v5827_v29 = vld [vmem:[#allocation15 + $0x128] sm:$0xff] }
 0x836   :  { %v5137_v1 = vmul.f32 %v10853_v53, %v13215_v37  ;;  %v9887_v34 = vcombine.high %v5822_v18, %v5826_v2  ;;  %v9886_v25 = vcombine.low %v5822_v18, %v5826_v2  ;;  %v9888_v52 = vcombine.low %v5823_v51, %v5827_v29  ;;  %v5878_v2 = vld [vmem:[#allocation15 + $0x2c0] sm:$0xff] }
 0x837   :  { %5635 = vmatpush1.bf16.msra.mxu0 %v13189_v43  ;;  %5676 = vmatpush1.bf16.msra.mxu1 %v13191_v20  ;;  %v15067_v43 = vld [vmem:[#allocation36_spill] sm:$0xff]  ;;  %v15068_v20 = vld [vmem:[#allocation35_spill] sm:$0xff]  ;;  %v9889_v53 = vcombine.high %v5823_v51, %v5827_v29  ;;  %v5882_v51 = vld [vmem:[#allocation15 + $0x2e0] sm:$0xff] }
 0x838   :  { %v5139_v3 = vadd.f32 %v5138_v54, %v5137_v1  ;;  %5636 = vmatprep.subr.bf16.mxu0 %v13195_v36  ;;  %5677 = vmatprep.subr.bf16.mxu1 %v13197_v28  ;;  %v15069_v36 = vld [vmem:[#allocation37_spill] sm:$0xff]  ;;  %v15070_v28 = vld [vmem:[#allocation70_spill] sm:$0xff]  ;;  %v5831_v1 = vld [vmem:[#allocation15 + $0x148] sm:$0xff]  ;;  %v9943_v29 = vcombine.high %v5878_v2, %v5882_v51 }
 0x839   :  { %v5830_v54 = vld [vmem:[#allocation15 + $0x140] sm:$0xff] }
 0x83a   :  { %10856 = vtanh.f32 %v5139_v3  ;;  %v13337_v41 = vsel %vm2036_vm5, %v5139_v3, %v13215_v37  ;;  %v15072_v37 = vld [vmem:[#allocation71_spill] sm:$0xff]  ;;  %v9895_v3 = vcombine.high %v5830_v54, %v5834_v46 }
 0x83b   :  { %5637 = vmatpush1.bf16.msra.mxu0 %v13202_v58  ;;  %5678 = vmatpush1.bf16.msra.mxu1 %v13204_v13  ;;  %v10855_v56 = vpop.eup %10854 }
 0x83c   :  { %5638 = vmatprep.subr.bf16.mxu0 %v15066_v55  ;;  %5679 = vmatprep.subr.bf16.mxu1 %v15067_v43  ;;  %v5835_v55 = vld [vmem:[#allocation15 + $0x168] sm:$0xff]  ;;  %v9894_v43 = vcombine.low %v5830_v54, %v5834_v46  ;;  %v5886_v46 = vld [vmem:[#allocation15 + $0x300] sm:$0xff] }
 0x83f   :  { %5639 = vmatpush1.bf16.msra.mxu0 %v15068_v20  ;;  %5680 = vmatpush1.bf16.msra.mxu1 %v15069_v36  ;;  %v9896_v20 = vcombine.low %v5831_v1, %v5835_v55  ;;  %v9897_v36 = vcombine.high %v5831_v1, %v5835_v55  ;;  %v5890_v1 = vld [vmem:[#allocation15 + $0x320] sm:$0xff] }
 0x840   :  { %5640 = vmatprep.subr.bf16.mxu0 %v15070_v28  ;;  %5681 = vmatprep.subr.bf16.mxu1 %v13227_v11  ;;  %v5838_v28 = vld [vmem:[#allocation15 + $0x180] sm:$0xff]  ;;  %v9951_v55 = vcombine.high %v5886_v46, %v5890_v1 }
 0x843   :  { %5641 = vmatpush1.bf16.msra.mxu0 %v15071_v59  ;;  %5682 = vmatpush1.bf16.msra.mxu1 %v15072_v37  ;;  %v5839_v59 = vld [vmem:[#allocation15 + $0x188] sm:$0xff] }
 0x844   :  { %v10857_v58 = vpop.eup %10856  ;;  %5642 = vmatprep.subr.bf16.mxu0 %v13237_v27  ;;  %5683 = vmatprep.subr.bf16.mxu1 %v13239_v63  ;;  %v5791_v27 = vld [vmem:[#allocation15 + $0x8] sm:$0xff] }
 0x845   :  { %v5141_v13 = vmul.f32 %v10857_v58, %v10855_v56  ;;  %v5795_v63 = vld [vmem:[#allocation15 + $0x28] sm:$0xff]  ;;  %v5842_v56 = vld [vmem:[#allocation15 + $0x1a0] sm:$0xff] }
 0x846   :  { %v9856_v50 = vcombine.low %v5791_v27, %v5795_v63  ;;  %v9903_v37 = vcombine.high %v5838_v28, %v5842_v56  ;;  %v5843_v58 = vld [vmem:[#allocation15 + $0x1a8] sm:$0xff] }
 0x847   :  { %5643 = vmatpush1.bf16.msra.mxu0 %v13243_v33  ;;  %5684 = vmatpush1.bf16.msra.mxu1 %v13245_v57  ;;  %v13356_v60 = vsel %vm2036_vm5, %v5141_v13, %v13254_v9  ;;  %v9857_v33 = vcombine.high %v5791_v27, %v5795_v63  ;;  %v5798_v57 = vld [vmem:[#allocation15 + $0x40] sm:$0xff]  ;;  %v9902_v13 = vcombine.low %v5838_v28, %v5842_v56 }
 0x848   :  { %v5435_v11 = vpack.c.bf16 %v13356_v60, %v13356_v60  ;;  %6600 = vmatprep.subr.bf16.mxu0 %v9855_v62  ;;  %v9863_v4 = vcombine.high %v5798_v57, %v5802_v5  ;;  %v9862_v48 = vcombine.low %v5798_v57, %v5802_v5  ;;  %v9905_v16 = vcombine.high %v5839_v59, %v5843_v58  ;;  %v5850_v27 = vld [vmem:[#allocation15 + $0x1e0] sm:$0xff]  ;;  %v5847_v62 = vld [vmem:[#allocation15 + $0x1c8] sm:$0xff] }
 0x849   :  { %6673 = vmatprep.subr.bf16.mxu1 %v9857_v33  ;;  %v9911_v63 = vcombine.high %v5846_v61, %v5850_v27  ;;  %v5854_v5 = vld [vmem:[#allocation15 + $0x200] sm:$0xff] }
 0x84a   :  { %5661 = vmatmul.mubr.bf16.vlgmr.msra.gmra.mrb[92].mxu0 %v5435_v11  ;;  %5702 = vmatmul.mubr.bf16.vlgmr.msra.gmra.mrb[92].mxu1 %v5435_v11  ;;  %v9904_v11 = vcombine.low %v5839_v59, %v5843_v58  ;;  %v9919_v10 = vcombine.high %v5854_v5, %v5858_v8  ;;  %v5894_v56 = vld [vmem:[#allocation15 + $0x340] sm:$0xff] }
 0x84b   :  { %6601 = vmatpush1.bf16.msra.mxu0 %v9854_v32  ;;  %6674 = vmatpush1.bf16.msra.mxu1 %v9856_v50  ;;  %v5851_v32 = vld [vmem:[#allocation15 + $0x1e8] sm:$0xff]  ;;  %v9910_v50 = vcombine.low %v5846_v61, %v5850_v27  ;;  %v5898_v59 = vld [vmem:[#allocation15 + $0x360] sm:$0xff] }
 0x84c   :  { %6602 = vmatprep.subr.bf16.mxu0 %v9863_v4  ;;  %6675 = vmatprep.subr.bf16.mxu1 %v9865_v7  ;;  %v9912_v33 = vcombine.low %v5847_v62, %v5851_v32  ;;  %v9913_v57 = vcombine.high %v5847_v62, %v5851_v32  ;;  %v5855_v4 = vld [vmem:[#allocation15 + $0x208] sm:$0xff]  ;;  %v9959_v58 = vcombine.high %v5894_v56, %v5898_v59 }
 0x84d   :  { %v9958_v61 = vcombine.low %v5894_v56, %v5898_v59  ;;  %v5903_v62 = vld [vmem:[#allocation15 + $0x388] sm:$0xff] }
 0x84f   :  { %6603 = vmatpush1.bf16.msra.mxu0 %v9862_v48  ;;  %6676 = vmatpush1.bf16.msra.mxu1 %v9864_v49  ;;  %v5859_v48 = vld [vmem:[#allocation15 + $0x228] sm:$0xff]  ;;  %v9918_v49 = vcombine.low %v5854_v5, %v5858_v8  ;;  %v5914_v5 = vld [vmem:[#allocation15 + $0x3e0] sm:$0xff] }
 0x850   :  { %6604 = vmatprep.subr.bf16.mxu0 %v9871_v38  ;;  %6677 = vmatprep.subr.bf16.mxu1 %v9873_v40  ;;  %v9920_v7 = vcombine.low %v5855_v4, %v5859_v48  ;;  %v9921_v6 = vcombine.high %v5855_v4, %v5859_v48  ;;  %v5863_v38 = vld [vmem:[#allocation15 + $0x248] sm:$0xff] }
 0x851   :  { %v5911_v8 = vld [vmem:[#allocation15 + $0x3c8] sm:$0xff] }
 0x852   :  { %v5915_v4 = vld [vmem:[#allocation15 + $0x3e8] sm:$0xff] }
 0x853   :  { %6605 = vmatpush1.bf16.msra.mxu0 %v9870_v30  ;;  %6678 = vmatpush1.bf16.msra.mxu1 %v9872_v15  ;;  %v5867_v30 = vld [vmem:[#allocation15 + $0x268] sm:$0xff]  ;;  %v9926_v15 = vcombine.low %v5862_v24, %v5866_v45  ;;  %v9976_v24 = vcombine.low %v5911_v8, %v5915_v4  ;;  %v13360_v45 = vld [vmem:[#allocation15 + $0x10] sm:$0xff] }
 0x854   :  { %6606 = vmatprep.subr.bf16.mxu0 %v9879_v21  ;;  %6679 = vmatprep.subr.bf16.mxu1 %v9881_v47  ;;  %v9928_v40 = vcombine.low %v5863_v38, %v5867_v30  ;;  %v9929_v23 = vcombine.high %v5863_v38, %v5867_v30  ;;  %v5871_v21 = vld [vmem:[#allocation15 + $0x288] sm:$0xff]  ;;  %v13362_v38 = vld [vmem:[#allocation15 + $0x30] sm:$0xff] }
 0x855   :  { %v9859_v30 = vcombine.high %v13360_v45, %v13362_v38 }
 0x857   :  { %6607 = vmatpush1.bf16.msra.mxu0 %v9878_v42  ;;  %6680 = vmatpush1.bf16.msra.mxu1 %v9880_v35  ;;  %v5875_v42 = vld [vmem:[#allocation15 + $0x2a8] sm:$0xff]  ;;  %v9934_v35 = vcombine.low %v5870_v19, %v5874_v0 }
 0x858   :  { %6608 = vmatprep.subr.bf16.mxu0 %v9887_v34  ;;  %6681 = vmatprep.subr.bf16.mxu1 %v9889_v53  ;;  %v9936_v47 = vcombine.low %v5871_v21, %v5875_v42  ;;  %v9937_v18 = vcombine.high %v5871_v21, %v5875_v42  ;;  %v5879_v34 = vld [vmem:[#allocation15 + $0x2c8] sm:$0xff] }
 0x85b   :  { %6609 = vmatpush1.bf16.msra.mxu0 %v9886_v25  ;;  %6682 = vmatpush1.bf16.msra.mxu1 %v9888_v52  ;;  %v5883_v25 = vld [vmem:[#allocation15 + $0x2e8] sm:$0xff]  ;;  %v9942_v52 = vcombine.low %v5878_v2, %v5882_v51 }
 0x85c   :  { %6610 = vmatprep.subr.bf16.mxu0 %v9895_v3  ;;  %6683 = vmatprep.subr.bf16.mxu1 %v9897_v36  ;;  %v9944_v53 = vcombine.low %v5879_v34, %v5883_v25  ;;  %v9945_v54 = vcombine.high %v5879_v34, %v5883_v25  ;;  %v5887_v3 = vld [vmem:[#allocation15 + $0x308] sm:$0xff] }
 0x85d   :  { %v15075_v51 = vld [vmem:[#allocation51_spill] sm:$0xff] }
 0x85f   :  { %6611 = vmatpush1.bf16.msra.mxu0 %v9894_v43  ;;  %6684 = vmatpush1.bf16.msra.mxu1 %v9896_v20  ;;  %v5891_v43 = vld [vmem:[#allocation15 + $0x328] sm:$0xff]  ;;  %v9950_v20 = vcombine.low %v5886_v46, %v5890_v1 }
 0x860   :  { %6612 = vmatprep.subr.bf16.mxu0 %v9903_v37  ;;  %6685 = vmatprep.subr.bf16.mxu1 %v9905_v16  ;;  %v9952_v36 = vcombine.low %v5887_v3, %v5891_v43  ;;  %v9953_v28 = vcombine.high %v5887_v3, %v5891_v43  ;;  %v5895_v37 = vld [vmem:[#allocation15 + $0x348] sm:$0xff]  ;;  %v5906_v16 = vld [vmem:[#allocation15 + $0x3a0] sm:$0xff] }
 0x863   :  { %6613 = vmatpush1.bf16.msra.mxu0 %v9902_v13  ;;  %6686 = vmatpush1.bf16.msra.mxu1 %v9904_v11  ;;  %v5899_v13 = vld [vmem:[#allocation15 + $0x368] sm:$0xff]  ;;  %v5902_v11 = vld [vmem:[#allocation15 + $0x380] sm:$0xff] }
 0x864   :  { %6614 = vmatprep.subr.bf16.mxu0 %v9911_v63  ;;  %6687 = vmatprep.subr.bf16.mxu1 %v9913_v57  ;;  %v9961_v27 = vcombine.high %v5895_v37, %v5899_v13  ;;  %v5907_v63 = vld [vmem:[#allocation15 + $0x3a8] sm:$0xff]  ;;  %v9960_v32 = vcombine.low %v5895_v37, %v5899_v13  ;;  %v5910_v57 = vld [vmem:[#allocation15 + $0x3c0] sm:$0xff] }
 0x865   :  { %v9968_v48 = vcombine.low %v5903_v62, %v5907_v63 }
 0x867   :  { %6615 = vmatpush1.bf16.msra.mxu0 %v9910_v50  ;;  %6688 = vmatpush1.bf16.msra.mxu1 %v9912_v33  ;;  %v9967_v50 = vcombine.high %v5902_v11, %v5906_v16  ;;  %v9969_v33 = vcombine.high %v5903_v62, %v5907_v63  ;;  %v15077_v63 = vld [vmem:[#allocation54_spill] sm:$0xff] }
 0x868   :  { %6616 = vmatprep.subr.bf16.mxu0 %v9919_v10  ;;  %6689 = vmatprep.subr.bf16.mxu1 %v9921_v6  ;;  %v9966_v10 = vcombine.low %v5902_v11, %v5906_v16  ;;  %v9974_v6 = vcombine.low %v5910_v57, %v5914_v5 }
 0x86b   :  { %6617 = vmatpush1.bf16.msra.mxu0 %v9918_v49  ;;  %6690 = vmatpush1.bf16.msra.mxu1 %v9920_v7  ;;  %v9975_v49 = vcombine.high %v5910_v57, %v5914_v5  ;;  %v9977_v7 = vcombine.high %v5911_v8, %v5915_v4  ;;  %v15079_v8 = vld [vmem:[#allocation55_spill] sm:$0xff] }
 0x86c   :  { %6618 = vmatprep.subr.bf16.mxu0 %v9927_v44  ;;  %6691 = vmatprep.subr.bf16.mxu1 %v9929_v23  ;;  %v13364_v44 = vld [vmem:[#allocation15 + $0x18] sm:$0xff] }
 0x86f   :  { %6619 = vmatpush1.bf16.msra.mxu0 %v9926_v15  ;;  %6692 = vmatpush1.bf16.msra.mxu1 %v9928_v40  ;;  %v13368_v15 = vld [vmem:[#allocation15 + $0x38] sm:$0xff]  ;;  %v9858_v40 = vcombine.low %v13360_v45, %v13362_v38 }
 0x870   :  { %6620 = vmatprep.subr.bf16.mxu0 %v9935_v22  ;;  %6693 = vmatprep.subr.bf16.mxu1 %v9937_v18  ;;  %v9860_v23 = vcombine.low %v13364_v44, %v13368_v15  ;;  %v9861_v19 = vcombine.high %v13364_v44, %v13368_v15  ;;  %v15073_v22 = vld [vmem:[#allocation49_spill] sm:$0xff]  ;;  %v15085_v44 = vld [vmem:[#allocation30_spill] sm:$0xff]  ;;  %v15086_v15 = vld [vmem:[#allocation31_spill] sm:$0xff] }
 0x873   :  { %6621 = vmatpush1.bf16.msra.mxu0 %v9934_v35  ;;  %6694 = vmatpush1.bf16.msra.mxu1 %v9936_v47  ;;  %v15074_v35 = vld [vmem:[#allocation52_spill] sm:$0xff] }
 0x874   :  { %6622 = vmatprep.subr.bf16.mxu0 %v9943_v29  ;;  %6695 = vmatprep.subr.bf16.mxu1 %v9945_v54  ;;  %v15076_v29 = vld [vmem:[#allocation53_spill] sm:$0xff] }
 0x877   :  { %6623 = vmatpush1.bf16.msra.mxu0 %v9942_v52  ;;  %6696 = vmatpush1.bf16.msra.mxu1 %v9944_v53 }
 0x878   :  { %6624 = vmatprep.subr.bf16.mxu0 %v9951_v55  ;;  %6697 = vmatprep.subr.bf16.mxu1 %v9953_v28 }
 0x87b   :  { %6625 = vmatpush1.bf16.msra.mxu0 %v9950_v20  ;;  %6698 = vmatpush1.bf16.msra.mxu1 %v9952_v36 }
 0x87c   :  { %6626 = vmatprep.subr.bf16.mxu0 %v9959_v58  ;;  %6699 = vmatprep.subr.bf16.mxu1 %v9961_v27 }
 0x87f   :  { %6627 = vmatpush1.bf16.msra.mxu0 %v9958_v61  ;;  %6700 = vmatpush1.bf16.msra.mxu1 %v9960_v32 }
 0x880   :  { %6628 = vmatprep.subr.bf16.mxu0 %v9967_v50  ;;  %6701 = vmatprep.subr.bf16.mxu1 %v9969_v33  ;;  %v15078_v50 = vld [vmem:[#allocation56_spill] sm:$0xff] }
 0x883   :  { %6629 = vmatpush1.bf16.msra.mxu0 %v9966_v10  ;;  %6702 = vmatpush1.bf16.msra.mxu1 %v9968_v48  ;;  %v15080_v10 = vld [vmem:[#allocation58_spill] sm:$0xff] }
 0x884   :  { %6630 = vmatprep.subr.bf16.mxu0 %v9975_v49  ;;  %6703 = vmatprep.subr.bf16.mxu1 %v9977_v7 }
 0x887   :  { %6631 = vmatpush1.bf16.msra.mxu0 %v9974_v6  ;;  %6704 = vmatpush1.bf16.msra.mxu1 %v9976_v24 }
 0x888   :  { %6746 = vmatprep.subr.bf16.mxu0 %v9859_v30  ;;  %6819 = vmatprep.subr.bf16.mxu1 %v9861_v19 }
 0x8fd   :  { %v5379_v0 = vpop.f32.mrb[88].mxu0  ;;  %v5420_v21 = vpop.f32.mrb[88].mxu1 }
 0x8fe   :  { %v5427_v42 = vadd.f32 %v5379_v0, %v15073_v22  ;;  %v5429_v47 = vadd.f32 %v5420_v21, %v15074_v35  ;;  %v5381_v18 = vpop.f32.mrb[89].mxu0  ;;  %v5422_v2 = vpop.f32.mrb[89].mxu1 }
 0x8ff   :  { %v5428_v34 = vadd.f32 %v5381_v18, %v15075_v51  ;;  %v5430_v25 = vadd.f32 %v5422_v2, %v15076_v29  ;;  %v5383_v52 = vpop.f32.mrb[90].mxu0  ;;  %v5424_v53 = vpop.f32.mrb[90].mxu1 }
 0x900   :  { %v9848_v54 = vmul.f32 -1.442695, %v5427_v42  ;;  %v5384_v46 = vpop.f32.mrb[91].mxu0  ;;  %v5425_v1 = vpop.f32.mrb[91].mxu1 }
 0x901   :  { %v9849_v3 = vmul.f32 -1.442695, %v5428_v34  ;;  %v9850_v55 = vmul.f32 -1.442695, %v5430_v25 }
 0x902   :  { %10858 = vpow2.f32 %v9848_v54 }
 0x903   :  { %10860 = vpow2.f32 %v9849_v3 }
 0x904   :  { %10862 = vpow2.f32 %v9850_v55  ;;  %v5800_v55 = vld [vmem:[#allocation15 + $0x50] sm:$0xff] }
 0x905   :  { %10864 = vtanh.f32 %v5429_v47 }
 0x90c   :  { %v10859_v43 = vpop.eup %10858 }
 0x90d   :  { %v10861_v20 = vpop.eup %10860  ;;  %v5717_v36 = vadd.f32 1.0, %v10859_v43 }
 0x90e   :  { %v5723_v28 = vadd.f32 1.0, %v10861_v20  ;;  %v10863_v56 = vpop.eup %10862  ;;  %v5804_v20 = vld [vmem:[#allocation15 + $0x70] sm:$0xff] }
 0x90f   :  { %10866 = vrcp.f32 %v5717_v36  ;;  %v10865_v59 = vpop.eup %10864  ;;  %v5730_v11 = vadd.f32 1.0, %v10863_v56  ;;  %v5801_v36 = vld [vmem:[#allocation15 + $0x58] sm:$0xff] }
 0x910   :  { %10868 = vrcp.f32 %v5723_v28  ;;  %v5805_v28 = vld [vmem:[#allocation15 + $0x78] sm:$0xff] }
 0x911   :  { %10870 = vrcp.f32 %v5730_v11  ;;  %v9867_v11 = vcombine.high %v5800_v55, %v5804_v20 }
 0x919   :  { %v10867_v37 = vpop.eup %10866 }
 0x91a   :  { %v10869_v58 = vpop.eup %10868  ;;  %v5734_v13 = vmul.f32 %v10867_v37, %v10865_v59  ;;  %v15083_v59 = vld [vmem:[#allocation82_spill] sm:$0xff]  ;;  %v15084_v37 = vld [vmem:[#allocation79_spill] sm:$0xff] }
 0x91b   :  { %v5733_v16 = vmul.f32 %v10869_v58, %v13306_v39  ;;  %v10871_v19 = vpop.eup %10870  ;;  %v13403_v58 = vpack.c.bf16 %v15084_v37, %v15083_v59  ;;  %v5848_v37 = vld [vmem:[#allocation15 + $0x1d0] sm:$0xff] }
 0x91d   :  { %v5735_v61 = vadd.f32 %v5734_v13, %v5733_v16  ;;  %v5662_v27 = vpop.f32.mrb[92].mxu0  ;;  %v5703_v62 = vpop.f32.mrb[92].mxu1  ;;  %v5808_v13 = vld [vmem:[#allocation15 + $0x90] sm:$0xff] }
 0x91e   :  { %v5710_v32 = vadd.f32 %v5662_v27, %v15077_v63  ;;  %v5712_v33 = vadd.f32 %v5703_v62, %v15078_v50  ;;  %v5664_v57 = vpop.f32.mrb[93].mxu0  ;;  %v5705_v5 = vpop.f32.mrb[93].mxu1  ;;  %v5812_v16 = vld [vmem:[#allocation15 + $0xb0] sm:$0xff]  ;;  %v5813_v27 = vld [vmem:[#allocation15 + $0xb8] sm:$0xff]  ;;  %v13415_v62 = vpack.c.bf16 %v13024_v26, %v13254_v9  ;;  %v9866_v63 = vcombine.low %v5800_v55, %v5804_v20 }
 0x91f   :  { %10872 = vtanh.f32 %v5735_v61  ;;  %v5711_v4 = vadd.f32 %v5664_v57, %v15079_v8  ;;  %v5713_v48 = vadd.f32 %v5705_v5, %v15080_v10  ;;  %v5666_v49 = vpop.f32.mrb[94].mxu0  ;;  %v5707_v7 = vpop.f32.mrb[94].mxu1  ;;  %v5809_v61 = vld [vmem:[#allocation15 + $0x98] sm:$0xff]  ;;  %v9875_v50 = vcombine.high %v5808_v13, %v5812_v16  ;;  %v5816_v26 = vld [vmem:[#allocation15 + $0xd0] sm:$0xff] }
 0x920   :  { %v9851_v6 = vmul.f32 -1.442695, %v5710_v32  ;;  %v5667_v24 = vpop.f32.mrb[95].mxu0  ;;  %v5708_v39 = vpop.f32.mrb[95].mxu1  ;;  %v9868_v32 = vcombine.low %v5801_v36, %v5805_v28  ;;  %v5820_v9 = vld [vmem:[#allocation15 + $0xf0] sm:$0xff]  ;;  %v5817_v57 = vld [vmem:[#allocation15 + $0xd8] sm:$0xff]  ;;  %v9874_v45 = vcombine.low %v5808_v13, %v5812_v16  ;;  %v9876_v38 = vcombine.low %v5809_v61, %v5813_v27 }
 0x921   :  { %v9852_v30 = vmul.f32 -1.442695, %v5711_v4  ;;  %v9853_v21 = vmul.f32 -1.442695, %v5713_v48  ;;  %v5821_v5 = vld [vmem:[#allocation15 + $0xf8] sm:$0xff]  ;;  %v9883_v8 = vcombine.high %v5816_v26, %v5820_v9  ;;  %v5828_v10 = vld [vmem:[#allocation15 + $0x130] sm:$0xff]  ;;  %v9882_v39 = vcombine.low %v5816_v26, %v5820_v9 }
 0x922   :  { %10874 = vpow2.f32 %v9851_v6  ;;  %v9885_v4 = vcombine.high %v5817_v57, %v5821_v5  ;;  %v5825_v48 = vld [vmem:[#allocation15 + $0x118] sm:$0xff]  ;;  %v15087_v7 = vld [vmem:[#allocation90_spill] sm:$0xff]  ;;  %v15088_v6 = vld [vmem:[#allocation32_spill] sm:$0xff] }
 0x923   :  { %10876 = vpow2.f32 %v9852_v30  ;;  %v5829_v49 = vld [vmem:[#allocation15 + $0x138] sm:$0xff]  ;;  %v13433_v24 = vpack.c.bf16 %v15088_v6, %v15087_v7  ;;  %v9884_v30 = vcombine.low %v5817_v57, %v5821_v5  ;;  %v5852_v13 = vld [vmem:[#allocation15 + $0x1f0] sm:$0xff] }
 0x924   :  { %10878 = vpow2.f32 %v9853_v21  ;;  %v5832_v21 = vld [vmem:[#allocation15 + $0x150] sm:$0xff]  ;;  %v5857_v26 = vld [vmem:[#allocation15 + $0x218] sm:$0xff] }
 0x925   :  { %10880 = vtanh.f32 %v5712_v33  ;;  %v9877_v33 = vcombine.high %v5809_v61, %v5813_v27  ;;  %v5861_v9 = vld [vmem:[#allocation15 + $0x238] sm:$0xff] }
 0x926   :  { %v9925_v5 = vcombine.high %v5857_v26, %v5861_v9  ;;  %v5873_v7 = vld [vmem:[#allocation15 + $0x298] sm:$0xff] }
 0x929   :  { %v10873_v0 = vpop.eup %10872 }
 0x92a   :  { %v13385_v22 = vmul.f32 %v10873_v0, %v10871_v19  ;;  %v9893_v0 = vcombine.high %v5825_v48, %v5829_v49 }
 0x92c   :  { %v10875_v42 = vpop.eup %10874  ;;  %v5762_v59 = vsel %vm1415_vm3, %v13385_v22, %v13311_v17  ;;  %v9914_v22 = vcombine.low %v5848_v37, %v5852_v13 }
 0x92d   :  { %v10877_v35 = vpop.eup %10876  ;;  %v5741_v47 = vadd.f32 1.0, %v10875_v42  ;;  %v5836_v42 = vld [vmem:[#allocation15 + $0x170] sm:$0xff]  ;;  %v13465_v27 = vpack.c.bf16 %v5762_v59, %v13311_v17 }
 0x92e   :  { %v5747_v18 = vadd.f32 1.0, %v10877_v35  ;;  %v10879_v2 = vpop.eup %10878  ;;  %v5833_v35 = vld [vmem:[#allocation15 + $0x158] sm:$0xff] }
 0x92f   :  { %10882 = vrcp.f32 %v5741_v47  ;;  %v10881_v51 = vpop.eup %10880  ;;  %v5754_v52 = vadd.f32 1.0, %v10879_v2  ;;  %v5837_v47 = vld [vmem:[#allocation15 + $0x178] sm:$0xff]  ;;  %v9892_v2 = vcombine.low %v5825_v48, %v5829_v49  ;;  %v5872_v48 = vld [vmem:[#allocation15 + $0x290] sm:$0xff] }
 0x930   :  { %10884 = vrcp.f32 %v5747_v18  ;;  %v9900_v20 = vcombine.low %v5833_v35, %v5837_v47  ;;  %v5876_v49 = vld [vmem:[#allocation15 + $0x2b0] sm:$0xff] }
 0x931   :  { %10886 = vrcp.f32 %v5754_v52  ;;  %v9901_v52 = vcombine.high %v5833_v35, %v5837_v47  ;;  %v5885_v35 = vld [vmem:[#allocation15 + $0x2f8] sm:$0xff]  ;;  %v9938_v47 = vcombine.low %v5872_v48, %v5876_v49 }
 0x939   :  { %v10883_v34 = vpop.eup %10882 }
 0x93a   :  { %v10885_v29 = vpop.eup %10884  ;;  %v5758_v25 = vmul.f32 %v10883_v34, %v10881_v51  ;;  %v15089_v51 = vld [vmem:[#allocation91_spill] sm:$0xff] }
 0x93b   :  { %v5757_v53 = vmul.f32 %v10885_v29, %v13337_v41  ;;  %v10887_v46 = vpop.eup %10886  ;;  %v13439_v34 = vpack.c.bf16 %v13153_v12, %v15089_v51  ;;  %v5840_v29 = vld [vmem:[#allocation15 + $0x190] sm:$0xff] }
 0x93c   :  { %v13503_v41 = vld [vmem:[#allocation18 + $0x4c] ss:$16 sps:$4 sm:$0xff]   ;;  %v13569_v12 = vld [vmem:[#allocation18 + $0xc8] ss:$16 sps:$4 sm:$0xff]  }
 0x93d   :  { %v5759_v54 = vadd.f32 %v5758_v25, %v5757_v53  ;;  %v9899_v25 = vcombine.high %v5832_v21, %v5836_v42  ;;  %v5844_v53 = vld [vmem:[#allocation15 + $0x1b0] sm:$0xff]  ;;  %15100 = vst [vmem:[#allocation68_spill] sm:$0xff] %v13503_v41  ;;  %15118 = vst [vmem:[#allocation62_spill] sm:$0xff] %v13569_v12 }
 0x93e   :  { %v9906_v16 = vcombine.low %v5840_v29, %v5844_v53 }
 0x93f   :  { %10888 = vtanh.f32 %v5759_v54  ;;  %v5841_v54 = vld [vmem:[#allocation15 + $0x198] sm:$0xff] }
 0x949   :  { %v10889_v1 = vpop.eup %10888 }
 0x94a   :  { %v5761_v3 = vmul.f32 %v10889_v1, %v10887_v46  ;;  %v5845_v46 = vld [vmem:[#allocation15 + $0x1b8] sm:$0xff]  ;;  %v15090_v1 = vld [vmem:[#allocation96_spill] sm:$0xff] }
 0x94b   :  { %v9908_v61 = vcombine.low %v5841_v54, %v5845_v46 }
 0x94c   :  { %v5763_v43 = vsel %vm1414_vm1, %v5761_v3, %v13356_v60  ;;  %v15091_v3 = vld [vmem:[#allocation84_spill] sm:$0xff] }
 0x94d   :  { %v13392_v56 = vpack.c.bf16 %v13356_v60, %v5763_v43  ;;  %v9869_v60 = vcombine.high %v5801_v36, %v5805_v28  ;;  %v13445_v55 = vpack.c.bf16 %v15091_v3, %v15090_v1  ;;  %v9898_v43 = vcombine.low %v5832_v21, %v5836_v42  ;;  %v5884_v21 = vld [vmem:[#allocation15 + $0x2f0] sm:$0xff]  ;;  %v5881_v42 = vld [vmem:[#allocation15 + $0x2d8] sm:$0xff] }
 0x94e   :  { %v9907_v36 = vcombine.high %v5840_v29, %v5844_v53  ;;  %v9909_v28 = vcombine.high %v5841_v54, %v5845_v46  ;;  %v9949_v51 = vcombine.high %v5881_v42, %v5885_v35  ;;  %v5888_v29 = vld [vmem:[#allocation15 + $0x310] sm:$0xff]  ;;  %v5893_v53 = vld [vmem:[#allocation15 + $0x338] sm:$0xff]  ;;  %v9948_v46 = vcombine.low %v5881_v42, %v5885_v35 }
 0x94f   :  { %6632 = vmatprep.mubr.bf16.mxu0 %v13392_v56  ;;  %6705 = vmatprep.mubr.bf16.mxu1 %v13392_v56  ;;  %v13529_v42 = vld [vmem:[#allocation18 + $0x84] ss:$16 sps:$4 sm:$0xff]   ;;  %v13531_v35 = vld [vmem:[#allocation18 + $0x8c] ss:$16 sps:$4 sm:$0xff]  }
 0x950   :  { %10108 = vmatmul.mubr.msk.bf16.vlgmr.msra.gmra.mrb[96].mxu0 %vm13397_vm12, %v13403_v58  ;;  %10114 = vmatmul.mubr.msk.bf16.vlgmr.msra.gmra.mrb[96].mxu1 %vm13397_vm12, %v13403_v58  ;;  %15107 = vst [vmem:[#allocation77_spill] sm:$0xff] %v13529_v42  ;;  %15108 = vst [vmem:[#allocation78_spill] sm:$0xff] %v13531_v35 }
 0x951   :  { %6747 = vmatpush1.bf16.msra.mxu0 %v9858_v40  ;;  %6820 = vmatpush1.bf16.msra.mxu1 %v9860_v23  ;;  %v13427_v40 = vpack.c.bf16 %v15086_v15, %v15085_v44  ;;  %v5824_v23 = vld [vmem:[#allocation15 + $0x110] sm:$0xff]  ;;  %v5865_v44 = vld [vmem:[#allocation15 + $0x258] sm:$0xff] }
 0x952   :  { %6642 = vmatprep.mubr.bf16.mxu0 %v13415_v62  ;;  %6715 = vmatprep.mubr.bf16.mxu1 %v13415_v62  ;;  %v9891_v19 = vcombine.high %v5824_v23, %v5828_v10  ;;  %v9890_v18 = vcombine.low %v5824_v23, %v5828_v10  ;;  %v5869_v15 = vld [vmem:[#allocation15 + $0x278] sm:$0xff] }
 0x953   :  { %6748 = vmatprep.subr.bf16.mxu0 %v9867_v11  ;;  %6821 = vmatprep.subr.bf16.mxu1 %v9869_v60  ;;  %v5849_v11 = vld [vmem:[#allocation15 + $0x1d8] sm:$0xff]  ;;  %v9933_v10 = vcombine.high %v5865_v44, %v5869_v15 }
 0x954   :  { %v5853_v60 = vld [vmem:[#allocation15 + $0x1f8] sm:$0xff] }
 0x955   :  { %6749 = vmatpush1.bf16.msra.mxu0 %v9866_v63  ;;  %6822 = vmatpush1.bf16.msra.mxu1 %v9868_v32  ;;  %v5856_v63 = vld [vmem:[#allocation15 + $0x210] sm:$0xff]  ;;  %v9915_v32 = vcombine.high %v5848_v37, %v5852_v13  ;;  %v9916_v57 = vcombine.low %v5849_v11, %v5853_v60 }
 0x956   :  { %6750 = vmatprep.subr.bf16.mxu0 %v9875_v50  ;;  %6823 = vmatprep.subr.bf16.mxu1 %v9877_v33  ;;  %v9917_v50 = vcombine.high %v5849_v11, %v5853_v60  ;;  %v5860_v33 = vld [vmem:[#allocation15 + $0x230] sm:$0xff] }
 0x957   :  { %v9923_v17 = vcombine.high %v5856_v63, %v5860_v33  ;;  %v9922_v23 = vcombine.low %v5856_v63, %v5860_v33  ;;  %v5904_v60 = vld [vmem:[#allocation15 + $0x390] sm:$0xff]  ;;  %v5909_v63 = vld [vmem:[#allocation15 + $0x3b8] sm:$0xff] }
 0x958   :  { %6643 = vmatmul.mubr.bf16.gmra.mrb[100].mxu0 %v13427_v40  ;;  %6716 = vmatmul.mubr.bf16.gmra.mrb[100].mxu1 %v13427_v40 }
 0x959   :  { %6751 = vmatpush1.bf16.msra.mxu0 %v9874_v45  ;;  %6824 = vmatpush1.bf16.msra.mxu1 %v9876_v38  ;;  %v5864_v45 = vld [vmem:[#allocation15 + $0x250] sm:$0xff] }
 0x95a   :  { %6652 = vmatprep.mubr.bf16.mxu0 %v13433_v24  ;;  %6725 = vmatprep.mubr.bf16.mxu1 %v13433_v24  ;;  %v5868_v38 = vld [vmem:[#allocation15 + $0x270] sm:$0xff] }
 0x95b   :  { %6752 = vmatprep.subr.bf16.mxu0 %v9883_v8  ;;  %6825 = vmatprep.subr.bf16.mxu1 %v9885_v4  ;;  %v9924_v8 = vcombine.low %v5857_v26, %v5861_v9  ;;  %v9931_v4 = vcombine.high %v5864_v45, %v5868_v38  ;;  %v9930_v6 = vcombine.low %v5864_v45, %v5868_v38  ;;  %v5912_v9 = vld [vmem:[#allocation15 + $0x3d0] sm:$0xff] }
 0x95d   :  { %6753 = vmatpush1.bf16.msra.mxu0 %v9882_v39  ;;  %6826 = vmatpush1.bf16.msra.mxu1 %v9884_v30  ;;  %v9932_v39 = vcombine.low %v5865_v44, %v5869_v15  ;;  %v9939_v30 = vcombine.high %v5872_v48, %v5876_v49  ;;  %v13479_v48 = vld [vmem:[#allocation18 + $0x8] ss:$16 sps:$4 sm:$0xff]   ;;  %v13481_v49 = vld [vmem:[#allocation18 + $0x24] ss:$16 sps:$4 sm:$0xff]  }
 0x95e   :  { %6754 = vmatprep.subr.bf16.mxu0 %v9891_v19  ;;  %6827 = vmatprep.subr.bf16.mxu1 %v9893_v0  ;;  %v5880_v0 = vld [vmem:[#allocation15 + $0x2d0] sm:$0xff]  ;;  %15094 = vst [vmem:[#allocation74_spill] sm:$0xff] %v13479_v48  ;;  %15095 = vst [vmem:[#allocation38_spill] sm:$0xff] %v13481_v49 }
 0x95f   :  { %v9946_v54 = vcombine.low %v5880_v0, %v5884_v21 }
 0x960   :  { %6653 = vmatmul.mubr.bf16.gmra.mrb[104].mxu0 %v13439_v34  ;;  %6726 = vmatmul.mubr.bf16.gmra.mrb[104].mxu1 %v13439_v34 }
 0x961   :  { %6755 = vmatpush1.bf16.msra.mxu0 %v9890_v18  ;;  %6828 = vmatpush1.bf16.msra.mxu1 %v9892_v2  ;;  %v9947_v2 = vcombine.high %v5880_v0, %v5884_v21  ;;  %v13523_v0 = vld [vmem:[#allocation18 + $0x60] ss:$16 sps:$4 sm:$0xff]   ;;  %v13525_v21 = vld [vmem:[#allocation18 + $0x68] ss:$16 sps:$4 sm:$0xff]  }
 0x962   :  { %10111 = vmatprep.mubr.msk.bf16.mxu0 %vm13450_vm13, %v13445_v55  ;;  %10117 = vmatprep.mubr.msk.bf16.mxu1 %vm13450_vm13, %v13445_v55  ;;  %15105 = vst [vmem:[#allocation76_spill] sm:$0xff] %v13523_v0  ;;  %15106 = vst [vmem:[#allocation75_spill] sm:$0xff] %v13525_v21 }
 0x963   :  { %6756 = vmatprep.subr.bf16.mxu0 %v9899_v25  ;;  %6829 = vmatprep.subr.bf16.mxu1 %v9901_v52  ;;  %v5892_v25 = vld [vmem:[#allocation15 + $0x330] sm:$0xff]  ;;  %v5889_v52 = vld [vmem:[#allocation15 + $0x318] sm:$0xff] }
 0x964   :  { %v9955_v1 = vcombine.high %v5888_v29, %v5892_v25  ;;  %v9957_v3 = vcombine.high %v5889_v52, %v5893_v53  ;;  %v9954_v59 = vcombine.low %v5888_v29, %v5892_v25  ;;  %v9956_v37 = vcombine.low %v5889_v52, %v5893_v53  ;;  %v13563_v29 = vld [vmem:[#allocation18 + $0xcc] ss:$16 sps:$4 sm:$0xff]   ;;  %v13573_v25 = vld [vmem:[#allocation18 + $0xe4] ss:$16 sps:$4 sm:$0xff]   ;;  %v13583_v53 = vld [vmem:[#allocation18 + $0xe0] ss:$16 sps:$4 sm:$0xff]  }
 0x965   :  { %6757 = vmatpush1.bf16.msra.mxu0 %v9898_v43  ;;  %6830 = vmatpush1.bf16.msra.mxu1 %v9900_v20  ;;  %v5896_v43 = vld [vmem:[#allocation15 + $0x350] sm:$0xff]  ;;  %15116 = vst [vmem:[#allocation43_spill] sm:$0xff] %v13563_v29  ;;  %15119 = vst [vmem:[#allocation64_spill] sm:$0xff] %v13573_v25 }
 0x966   :  { %6758 = vmatprep.subr.bf16.mxu0 %v9907_v36  ;;  %6831 = vmatprep.subr.bf16.mxu1 %v9909_v28  ;;  %v5900_v20 = vld [vmem:[#allocation15 + $0x370] sm:$0xff]  ;;  %v5897_v36 = vld [vmem:[#allocation15 + $0x358] sm:$0xff]  ;;  %15121 = vst [vmem:[#allocation66_spill] sm:$0xff] %v13583_v53 }
 0x967   :  { %v5901_v28 = vld [vmem:[#allocation15 + $0x378] sm:$0xff]  ;;  %v9963_v13 = vcombine.high %v5896_v43, %v5900_v20  ;;  %v13575_v52 = vld [vmem:[#allocation18 + $0xec] ss:$16 sps:$4 sm:$0xff]  }
 0x968   :  { %6663 = vmatmul.mubr.bf16.gmra.mrb[108].mxu0 %v13465_v27  ;;  %6736 = vmatmul.mubr.bf16.gmra.mrb[108].mxu1 %v13465_v27  ;;  %v9965_v11 = vcombine.high %v5897_v36, %v5901_v28  ;;  %15120 = vst [vmem:[#allocation63_spill] sm:$0xff] %v13575_v52 }
 0x969   :  { %6759 = vmatpush1.bf16.msra.mxu0 %v9906_v16  ;;  %6832 = vmatpush1.bf16.msra.mxu1 %v9908_v61  ;;  %v5908_v16 = vld [vmem:[#allocation15 + $0x3b0] sm:$0xff]  ;;  %v5905_v61 = vld [vmem:[#allocation15 + $0x398] sm:$0xff] }
 0x96a   :  { %6778 = vmatprep.mubr.bf16.mxu0 %v13392_v56  ;;  %6851 = vmatprep.mubr.bf16.mxu1 %v13392_v56  ;;  %v5877_v56 = vld [vmem:[#allocation15 + $0x2b8] sm:$0xff]  ;;  %v9971_v33 = vcombine.high %v5904_v60, %v5908_v16  ;;  %v9973_v26 = vcombine.high %v5905_v61, %v5909_v63  ;;  %v9972_v45 = vcombine.low %v5905_v61, %v5909_v63  ;;  %v13637_v63 = vld [vmem:[#allocation19 + $0x68] ss:$16 sps:$4 sm:$0xff]  }
 0x96b   :  { %6760 = vmatprep.subr.bf16.mxu0 %v9915_v32  ;;  %6833 = vmatprep.subr.bf16.mxu1 %v9917_v50  ;;  %v9941_v19 = vcombine.high %v5873_v7, %v5877_v56  ;;  %v9940_v18 = vcombine.low %v5873_v7, %v5877_v56  ;;  %v9962_v32 = vcombine.low %v5896_v43, %v5900_v20  ;;  %v13483_v7 = vld [vmem:[#allocation18 + $0x2c] ss:$16 sps:$4 sm:$0xff]   ;;  %v13495_v56 = vld [vmem:[#allocation18 + $0x20] ss:$16 sps:$4 sm:$0xff]   ;;  %v13601_v43 = vld [vmem:[#allocation19 + $0x24] ss:$16 sps:$4 sm:$0xff]  }
 0x96c   :  { %v9964_v50 = vcombine.low %v5897_v36, %v5901_v28  ;;  %15096 = vst [vmem:[#allocation40_spill] sm:$0xff] %v13483_v7  ;;  %15097 = vst [vmem:[#allocation39_spill] sm:$0xff] %v13495_v56  ;;  %v13603_v20 = vld [vmem:[#allocation19 + $0x2c] ss:$16 sps:$4 sm:$0xff]   ;;  %v13609_v36 = vld [vmem:[#allocation19 + $0x20] ss:$16 sps:$4 sm:$0xff]  }
 0x96d   :  { %6761 = vmatpush1.bf16.msra.mxu0 %v9914_v22  ;;  %6834 = vmatpush1.bf16.msra.mxu1 %v9916_v57  ;;  %v5916_v22 = vld [vmem:[#allocation15 + $0x3f0] sm:$0xff]  ;;  %v5913_v57 = vld [vmem:[#allocation15 + $0x3d8] sm:$0xff] }
 0x96e   :  { %6762 = vmatprep.subr.bf16.mxu0 %v9923_v17  ;;  %6835 = vmatprep.subr.bf16.mxu1 %v9925_v5  ;;  %v5917_v17 = vld [vmem:[#allocation15 + $0x3f8] sm:$0xff]  ;;  %v9970_v5 = vcombine.low %v5904_v60, %v5908_v16  ;;  %v9979_v38 = vcombine.high %v5912_v9, %v5916_v22  ;;  %v9978_v15 = vcombine.low %v5912_v9, %v5916_v22  ;;  %v13611_v28 = vld [vmem:[#allocation19 + $0x28] ss:$16 sps:$4 sm:$0xff]   ;;  %v13631_v16 = vld [vmem:[#allocation19 + $0x6c] ss:$16 sps:$4 sm:$0xff]  }
 0x96f   :  { %v9981_v44 = vcombine.high %v5913_v57, %v5917_v17  ;;  %v13629_v60 = vld [vmem:[#allocation19 + $0x64] ss:$16 sps:$4 sm:$0xff]   ;;  %v13635_v61 = vld [vmem:[#allocation19 + $0x60] ss:$16 sps:$4 sm:$0xff]   ;;  %v13655_v22 = vld [vmem:[#allocation19 + $0xac] ss:$16 sps:$4 sm:$0xff]  }
 0x970   :  { %v13653_v9 = vld [vmem:[#allocation19 + $0xa4] ss:$16 sps:$4 sm:$0xff]  }
 0x971   :  { %6763 = vmatpush1.bf16.msra.mxu0 %v9922_v23  ;;  %6836 = vmatpush1.bf16.msra.mxu1 %v9924_v8  ;;  %v9980_v23 = vcombine.low %v5913_v57, %v5917_v17  ;;  %v13471_v8 = vld [vmem:[#allocation18 + $0x4] ss:$16 sps:$4 sm:$0xff]   ;;  %v13659_v57 = vld [vmem:[#allocation19 + $0xa0] ss:$16 sps:$4 sm:$0xff]   ;;  %v13661_v17 = vld [vmem:[#allocation19 + $0xa8] ss:$16 sps:$4 sm:$0xff]  }
 0x972   :  { %6764 = vmatprep.subr.bf16.mxu0 %v9931_v4  ;;  %6837 = vmatprep.subr.bf16.mxu1 %v9933_v10  ;;  %v13473_v4 = vld [vmem:[#allocation18 + $0xc] ss:$16 sps:$4 sm:$0xff]   ;;  %v13477_v10 = vld [vmem:[#allocation18] ss:$16 sps:$4 sm:$0xff]   ;;  %15125 = vst [vmem:[#allocation50_spill] sm:$0xff] %v13659_v57 }
 0x975   :  { %6765 = vmatpush1.bf16.msra.mxu0 %v9930_v6  ;;  %6838 = vmatpush1.bf16.msra.mxu1 %v9932_v39  ;;  %v13497_v6 = vld [vmem:[#allocation18 + $0x28] ss:$16 sps:$4 sm:$0xff]   ;;  %v13501_v39 = vld [vmem:[#allocation18 + $0x44] ss:$16 sps:$4 sm:$0xff]  }
 0x976   :  { %6766 = vmatprep.subr.bf16.mxu0 %v9939_v30  ;;  %6839 = vmatprep.subr.bf16.mxu1 %v9941_v19  ;;  %15098 = vst [vmem:[#allocation42_spill] sm:$0xff] %v13497_v6  ;;  %15099 = vst [vmem:[#allocation65_spill] sm:$0xff] %v13501_v39  ;;  %v13513_v30 = vld [vmem:[#allocation18 + $0x64] ss:$16 sps:$4 sm:$0xff]   ;;  %v13515_v19 = vld [vmem:[#allocation18 + $0x6c] ss:$16 sps:$4 sm:$0xff]  }
 0x977   :  { %15103 = vst [vmem:[#allocation34_spill] sm:$0xff] %v13513_v30  ;;  %15104 = vst [vmem:[#allocation73_spill] sm:$0xff] %v13515_v19 }
 0x979   :  { %6767 = vmatpush1.bf16.msra.mxu0 %v9938_v47  ;;  %6840 = vmatpush1.bf16.msra.mxu1 %v9940_v18  ;;  %v13541_v47 = vld [vmem:[#allocation18 + $0xa4] ss:$16 sps:$4 sm:$0xff]   ;;  %v13543_v18 = vld [vmem:[#allocation18 + $0xac] ss:$16 sps:$4 sm:$0xff]  }
 0x97a   :  { %6768 = vmatprep.subr.bf16.mxu0 %v9947_v2  ;;  %6841 = vmatprep.subr.bf16.mxu1 %v9949_v51  ;;  %15111 = vst [vmem:[#allocation87_spill] sm:$0xff] %v13541_v47  ;;  %15112 = vst [vmem:[#allocation88_spill] sm:$0xff] %v13543_v18  ;;  %v13555_v2 = vld [vmem:[#allocation18 + $0xa0] ss:$16 sps:$4 sm:$0xff]   ;;  %v13557_v51 = vld [vmem:[#allocation18 + $0xa8] ss:$16 sps:$4 sm:$0xff]  }
 0x97b   :  { %15113 = vst [vmem:[#allocation89_spill] sm:$0xff] %v13555_v2  ;;  %15114 = vst [vmem:[#allocation41_spill] sm:$0xff] %v13557_v51 }
 0x97d   :  { %6769 = vmatpush1.bf16.msra.mxu0 %v9946_v54  ;;  %6842 = vmatpush1.bf16.msra.mxu1 %v9948_v46  ;;  %v13585_v54 = vld [vmem:[#allocation18 + $0xe8] ss:$16 sps:$4 sm:$0xff]   ;;  %v13589_v46 = vld [vmem:[#allocation19 + $0x4] ss:$16 sps:$4 sm:$0xff]  }
 0x97e   :  { %6770 = vmatprep.subr.bf16.mxu0 %v9955_v1  ;;  %6843 = vmatprep.subr.bf16.mxu1 %v9957_v3  ;;  %15122 = vst [vmem:[#allocation46_spill] sm:$0xff] %v13585_v54  ;;  %15123 = vst [vmem:[#allocation48_spill] sm:$0xff] %v13589_v46  ;;  %v13591_v1 = vld [vmem:[#allocation19 + $0xc] ss:$16 sps:$4 sm:$0xff]   ;;  %v13597_v3 = vld [vmem:[#allocation19 + $0x8] ss:$16 sps:$4 sm:$0xff]  }
 0x97f   :  { %15124 = vst [vmem:[#allocation47_spill] sm:$0xff] %v13591_v1 }
 0x981   :  { %6771 = vmatpush1.bf16.msra.mxu0 %v9954_v59  ;;  %6844 = vmatpush1.bf16.msra.mxu1 %v9956_v37  ;;  %v13615_v59 = vld [vmem:[#allocation19 + $0x44] ss:$16 sps:$4 sm:$0xff]   ;;  %v13617_v37 = vld [vmem:[#allocation19 + $0x4c] ss:$16 sps:$4 sm:$0xff]  }
 0x982   :  { %6772 = vmatprep.subr.bf16.mxu0 %v9963_v13  ;;  %6845 = vmatprep.subr.bf16.mxu1 %v9965_v11  ;;  %v13623_v13 = vld [vmem:[#allocation19 + $0x40] ss:$16 sps:$4 sm:$0xff]   ;;  %v13625_v11 = vld [vmem:[#allocation19 + $0x48] ss:$16 sps:$4 sm:$0xff]  }
 0x985   :  { %6773 = vmatpush1.bf16.msra.mxu0 %v9962_v32  ;;  %6846 = vmatpush1.bf16.msra.mxu1 %v9964_v50  ;;  %v13641_v32 = vld [vmem:[#allocation19 + $0x84] ss:$16 sps:$4 sm:$0xff]   ;;  %v13643_v50 = vld [vmem:[#allocation19 + $0x8c] ss:$16 sps:$4 sm:$0xff]  }
 0x986   :  { %6774 = vmatprep.subr.bf16.mxu0 %v9971_v33  ;;  %6847 = vmatprep.subr.bf16.mxu1 %v9973_v26  ;;  %v13647_v33 = vld [vmem:[#allocation19 + $0x80] ss:$16 sps:$4 sm:$0xff]   ;;  %v13649_v26 = vld [vmem:[#allocation19 + $0x88] ss:$16 sps:$4 sm:$0xff]  }
 0x989   :  { %6775 = vmatpush1.bf16.msra.mxu0 %v9970_v5  ;;  %6848 = vmatpush1.bf16.msra.mxu1 %v9972_v45  ;;  %v13665_v5 = vld [vmem:[#allocation19 + $0xc4] ss:$16 sps:$4 sm:$0xff]   ;;  %v13667_v45 = vld [vmem:[#allocation19 + $0xcc] ss:$16 sps:$4 sm:$0xff]  }
 0x98a   :  { %6776 = vmatprep.subr.bf16.mxu0 %v9979_v38  ;;  %6849 = vmatprep.subr.bf16.mxu1 %v9981_v44  ;;  %v13671_v38 = vld [vmem:[#allocation19 + $0xc0] ss:$16 sps:$4 sm:$0xff]   ;;  %v13673_v44 = vld [vmem:[#allocation19 + $0xc8] ss:$16 sps:$4 sm:$0xff]  }
 0x98d   :  { %6777 = vmatpush1.bf16.msra.mxu0 %v9978_v15  ;;  %6850 = vmatpush1.bf16.msra.mxu1 %v9980_v23  ;;  %v13677_v15 = vld [vmem:[#allocation19 + $0xe4] ss:$16 sps:$4 sm:$0xff]   ;;  %v13679_v23 = vld [vmem:[#allocation19 + $0xec] ss:$16 sps:$4 sm:$0xff]  }
 0x98e   :  { %7152 = vmatprep.subr.bf16.mxu0 %v13471_v8  ;;  %7193 = vmatprep.subr.bf16.mxu1 %v13473_v4 }
 0x990   :  { %10120 = vmatmul.mubr.msk.bf16.vlgmr.msra.gmra.mrb[112].mxu0 %vm13397_vm12, %v13403_v58  ;;  %10126 = vmatmul.mubr.msk.bf16.vlgmr.msra.gmra.mrb[112].mxu1 %vm13397_vm12, %v13403_v58  ;;  %v13507_v58 = vld [vmem:[#allocation18 + $0x40] ss:$16 sps:$4 sm:$0xff]  }
 0x991   :  { %6788 = vmatprep.mubr.bf16.mxu0 %v13415_v62  ;;  %6861 = vmatprep.mubr.bf16.mxu1 %v13415_v62  ;;  %15101 = vst [vmem:[#allocation67_spill] sm:$0xff] %v13507_v58  ;;  %v13509_v62 = vld [vmem:[#allocation18 + $0x48] ss:$16 sps:$4 sm:$0xff]  }
 0x992   :  { %7153 = vmatpush1.bf16.msra.mxu0 %v13477_v10  ;;  %7194 = vmatpush1.bf16.msra.mxu1 %v13479_v48  ;;  %15102 = vst [vmem:[#allocation69_spill] sm:$0xff] %v13509_v62 }
 0x993   :  { %7154 = vmatprep.subr.bf16.mxu0 %v13481_v49  ;;  %7195 = vmatprep.subr.bf16.mxu1 %v13483_v7 }
 0x996   :  { %7155 = vmatpush1.bf16.msra.mxu0 %v13495_v56  ;;  %7196 = vmatpush1.bf16.msra.mxu1 %v13497_v6 }
 0x997   :  { %7156 = vmatprep.subr.bf16.mxu0 %v13501_v39  ;;  %7197 = vmatprep.subr.bf16.mxu1 %v13503_v41 }
 0x998   :  { %6789 = vmatmul.mubr.bf16.gmra.mrb[116].mxu0 %v13427_v40  ;;  %6862 = vmatmul.mubr.bf16.gmra.mrb[116].mxu1 %v13427_v40  ;;  %v13535_v40 = vld [vmem:[#allocation18 + $0x80] ss:$16 sps:$4 sm:$0xff]  }
 0x999   :  { %6798 = vmatprep.mubr.bf16.mxu0 %v13433_v24  ;;  %6871 = vmatprep.mubr.bf16.mxu1 %v13433_v24  ;;  %15109 = vst [vmem:[#allocation80_spill] sm:$0xff] %v13535_v40  ;;  %v13537_v24 = vld [vmem:[#allocation18 + $0x88] ss:$16 sps:$4 sm:$0xff]  }
 0x99a   :  { %7157 = vmatpush1.bf16.msra.mxu0 %v13507_v58  ;;  %7198 = vmatpush1.bf16.msra.mxu1 %v13509_v62  ;;  %15110 = vst [vmem:[#allocation86_spill] sm:$0xff] %v13537_v24 }
 0x99b   :  { %7158 = vmatprep.subr.bf16.mxu0 %v13513_v30  ;;  %7199 = vmatprep.subr.bf16.mxu1 %v13515_v19 }
 0x99e   :  { %7159 = vmatpush1.bf16.msra.mxu0 %v13523_v0  ;;  %7200 = vmatpush1.bf16.msra.mxu1 %v13525_v21 }
 0x99f   :  { %7160 = vmatprep.subr.bf16.mxu0 %v13529_v42  ;;  %7201 = vmatprep.subr.bf16.mxu1 %v13531_v35 }
 0x9a0   :  { %6799 = vmatmul.mubr.bf16.gmra.mrb[120].mxu0 %v13439_v34  ;;  %6872 = vmatmul.mubr.bf16.gmra.mrb[120].mxu1 %v13439_v34  ;;  %v13561_v34 = vld [vmem:[#allocation18 + $0xc4] ss:$16 sps:$4 sm:$0xff]  }
 0x9a1   :  { %10123 = vmatprep.mubr.msk.bf16.mxu0 %vm13450_vm13, %v13445_v55  ;;  %10129 = vmatprep.mubr.msk.bf16.mxu1 %vm13450_vm13, %v13445_v55  ;;  %15115 = vst [vmem:[#allocation44_spill] sm:$0xff] %v13561_v34  ;;  %v13567_v55 = vld [vmem:[#allocation18 + $0xc0] ss:$16 sps:$4 sm:$0xff]  }
 0x9a2   :  { %7161 = vmatpush1.bf16.msra.mxu0 %v13535_v40  ;;  %7202 = vmatpush1.bf16.msra.mxu1 %v13537_v24  ;;  %15117 = vst [vmem:[#allocation45_spill] sm:$0xff] %v13567_v55 }
 0x9a3   :  { %7162 = vmatprep.subr.bf16.mxu0 %v13541_v47  ;;  %7203 = vmatprep.subr.bf16.mxu1 %v13543_v18 }
 0x9a6   :  { %7163 = vmatpush1.bf16.msra.mxu0 %v13555_v2  ;;  %7204 = vmatpush1.bf16.msra.mxu1 %v13557_v51 }
 0x9a7   :  { %7164 = vmatprep.subr.bf16.mxu0 %v13561_v34  ;;  %7205 = vmatprep.subr.bf16.mxu1 %v13563_v29 }
 0x9a8   :  { %6809 = vmatmul.mubr.bf16.gmra.mrb[124].mxu0 %v13465_v27  ;;  %6882 = vmatmul.mubr.bf16.gmra.mrb[124].mxu1 %v13465_v27  ;;  %v13595_v27 = vld [vmem:[#allocation19] ss:$16 sps:$4 sm:$0xff]  }
 0x9a9   :  { %7184 = vmatprep.mubr.bf16.mxu0 %v14950_v31  ;;  %7225 = vmatprep.mubr.bf16.mxu1 %v14950_v31 }
 0x9aa   :  { %7165 = vmatpush1.bf16.msra.mxu0 %v13567_v55  ;;  %7206 = vmatpush1.bf16.msra.mxu1 %v13569_v12 }
 0x9ab   :  { %7166 = vmatprep.subr.bf16.mxu0 %v13573_v25  ;;  %7207 = vmatprep.subr.bf16.mxu1 %v13575_v52 }
 0x9ae   :  { %7167 = vmatpush1.bf16.msra.mxu0 %v13583_v53  ;;  %7208 = vmatpush1.bf16.msra.mxu1 %v13585_v54 }
 0x9af   :  { %7434 = vmatprep.subr.bf16.mxu0 %v13589_v46  ;;  %7475 = vmatprep.subr.bf16.mxu1 %v13591_v1 }
 0x9b1   :  { %7185 = vmatmul.mubr.bf16.vlgmr.msra.gmra.mrb[128].mxu0 %v14950_v31  ;;  %7226 = vmatmul.mubr.bf16.vlgmr.msra.gmra.mrb[128].mxu1 %v14950_v31 }
 0x9b2   :  { %7435 = vmatpush1.bf16.msra.mxu0 %v13595_v27  ;;  %7476 = vmatpush1.bf16.msra.mxu1 %v13597_v3 }
 0x9b3   :  { %7436 = vmatprep.subr.bf16.mxu0 %v13601_v43  ;;  %7477 = vmatprep.subr.bf16.mxu1 %v13603_v20 }
 0x9b4   :  { %7466 = vmatprep.mubr.bf16.mxu0 %v14950_v31  ;;  %7507 = vmatprep.mubr.bf16.mxu1 %v14950_v31 }
 0x9b6   :  { %7437 = vmatpush1.bf16.msra.mxu0 %v13609_v36  ;;  %7478 = vmatpush1.bf16.msra.mxu1 %v13611_v28 }
 0x9b7   :  { %7438 = vmatprep.subr.bf16.mxu0 %v13615_v59  ;;  %7479 = vmatprep.subr.bf16.mxu1 %v13617_v37 }
 0x9ba   :  { %7439 = vmatpush1.bf16.msra.mxu0 %v13623_v13  ;;  %7480 = vmatpush1.bf16.msra.mxu1 %v13625_v11 }
 0x9bb   :  { %7440 = vmatprep.subr.bf16.mxu0 %v13629_v60  ;;  %7481 = vmatprep.subr.bf16.mxu1 %v13631_v16 }
 0x9be   :  { %7441 = vmatpush1.bf16.msra.mxu0 %v13635_v61  ;;  %7482 = vmatpush1.bf16.msra.mxu1 %v13637_v63 }
 0x9bf   :  { %7442 = vmatprep.subr.bf16.mxu0 %v13641_v32  ;;  %7483 = vmatprep.subr.bf16.mxu1 %v13643_v50 }
 0x9c2   :  { %7443 = vmatpush1.bf16.msra.mxu0 %v13647_v33  ;;  %7484 = vmatpush1.bf16.msra.mxu1 %v13649_v26 }
 0x9c3   :  { %7444 = vmatprep.subr.bf16.mxu0 %v13653_v9  ;;  %7485 = vmatprep.subr.bf16.mxu1 %v13655_v22 }
 0x9c6   :  { %7445 = vmatpush1.bf16.msra.mxu0 %v13659_v57  ;;  %7486 = vmatpush1.bf16.msra.mxu1 %v13661_v17  ;;  %v13685_v57 = vld [vmem:[#allocation19 + $0xe8] ss:$16 sps:$4 sm:$0xff]  }
 0x9c7   :  { %7446 = vmatprep.subr.bf16.mxu0 %v13665_v5  ;;  %7487 = vmatprep.subr.bf16.mxu1 %v13667_v45 }
 0x9ca   :  { %7447 = vmatpush1.bf16.msra.mxu0 %v13671_v38  ;;  %7488 = vmatpush1.bf16.msra.mxu1 %v13673_v44 }
 0x9cb   :  { %7448 = vmatprep.subr.bf16.mxu0 %v13677_v15  ;;  %7489 = vmatprep.subr.bf16.mxu1 %v13679_v23 }
 0x9ce   :  { %7449 = vmatpush1.bf16.msra.mxu0 %v13683_v14  ;;  %7490 = vmatpush1.bf16.msra.mxu1 %v13685_v57 }
 0x9cf   :  { %7577 = vmatprep.subr.bf16.mxu0 %v13471_v8  ;;  %7618 = vmatprep.subr.bf16.mxu1 %v13473_v4 }
 0x9d1   :  { %7467 = vmatmul.mubr.bf16.vlgmr.msra.gmra.mrb[132].mxu0 %v14950_v31  ;;  %7508 = vmatmul.mubr.bf16.vlgmr.msra.gmra.mrb[132].mxu1 %v14950_v31 }
 0x9d2   :  { %7578 = vmatpush1.bf16.msra.mxu0 %v13477_v10  ;;  %7619 = vmatpush1.bf16.msra.mxu1 %v13479_v48 }
 0x9d3   :  { %7579 = vmatprep.subr.bf16.mxu0 %v13481_v49  ;;  %7620 = vmatprep.subr.bf16.mxu1 %v13483_v7 }
 0x9d4   :  { %7609 = vmatprep.mubr.bf16.mxu0 %v14950_v31  ;;  %7650 = vmatprep.mubr.bf16.mxu1 %v14950_v31 }
 0x9d6   :  { %7580 = vmatpush1.bf16.msra.mxu0 %v13495_v56  ;;  %7621 = vmatpush1.bf16.msra.mxu1 %v13497_v6 }
 0x9d7   :  { %7581 = vmatprep.subr.bf16.mxu0 %v13501_v39  ;;  %7622 = vmatprep.subr.bf16.mxu1 %v13503_v41 }
 0x9da   :  { %7582 = vmatpush1.bf16.msra.mxu0 %v13507_v58  ;;  %7623 = vmatpush1.bf16.msra.mxu1 %v13509_v62 }
 0x9db   :  { %7583 = vmatprep.subr.bf16.mxu0 %v13513_v30  ;;  %7624 = vmatprep.subr.bf16.mxu1 %v13515_v19 }
 0x9de   :  { %7584 = vmatpush1.bf16.msra.mxu0 %v13523_v0  ;;  %7625 = vmatpush1.bf16.msra.mxu1 %v13525_v21 }
 0x9df   :  { %7585 = vmatprep.subr.bf16.mxu0 %v13529_v42  ;;  %7626 = vmatprep.subr.bf16.mxu1 %v13531_v35 }
 0x9e2   :  { %7586 = vmatpush1.bf16.msra.mxu0 %v13535_v40  ;;  %7627 = vmatpush1.bf16.msra.mxu1 %v13537_v24 }
 0x9e3   :  { %7587 = vmatprep.subr.bf16.mxu0 %v13541_v47  ;;  %7628 = vmatprep.subr.bf16.mxu1 %v13543_v18 }
 0x9e6   :  { %7588 = vmatpush1.bf16.msra.mxu0 %v13555_v2  ;;  %7629 = vmatpush1.bf16.msra.mxu1 %v13557_v51  ;;  %v13729_v51 = vld [vmem:[#allocation16] sm:$0xff] }
 0x9e7   :  { %7589 = vmatprep.subr.bf16.mxu0 %v13561_v34  ;;  %7630 = vmatprep.subr.bf16.mxu1 %v13563_v29 }
 0x9ea   :  { %7590 = vmatpush1.bf16.msra.mxu0 %v13567_v55  ;;  %7631 = vmatpush1.bf16.msra.mxu1 %v13569_v12  ;;  %v15126_v55 = vld [vmem:[#allocation29_spill] sm:$0xff] }
 0x9eb   :  { %7591 = vmatprep.subr.bf16.mxu0 %v13573_v25  ;;  %7632 = vmatprep.subr.bf16.mxu1 %v13575_v52  ;;  %v15127_v12 = vsub.s32 0, %v15126_v55  ;;  %v15128_v52 = vsub.s32 2, %v15126_v55  ;;  %v15130_v18 = vsub.s32 3, %v15126_v55 }
 0x9ed   :  { %v13738_v25 = vrot.slane %v13729_v51, %v15127_v12  ;;  %v13757_v47 = vrot.slane %v13729_v51, %v15130_v18 }
 0x9ee   :  { %7592 = vmatpush1.bf16.msra.mxu0 %v13583_v53  ;;  %7633 = vmatpush1.bf16.msra.mxu1 %v13585_v54  ;;  %v13743_v53 = vrot.slane %v13729_v51, %v15128_v52 }
 0x9ef   :  { %7668 = vmatprep.subr.bf16.mxu0 %v13589_v46  ;;  %7709 = vmatprep.subr.bf16.mxu1 %v13591_v1  ;;  %v15129_v1 = vsub.s32 1, %v15126_v55 }
 0x9f1   :  { %v13752_v2 = vrot.slane %v13729_v51, %v15129_v1 }
 0xa23   :  { %v13731_v34 = vpop.f32.mrb[96].mxu0  ;;  %v13733_v29 = vpop.f32.mrb[96].mxu1 }
 0xa24   :  { %v13745_v54 = vpop.f32.mrb[97].mxu0  ;;  %v13747_v46 = vpop.f32.mrb[97].mxu1  ;;  %v6635_v41 = vadd.f32 %v13731_v34, %v13738_v25 }
 0xa25   :  { %v6638_v12 = vpop.f32.mrb[98].mxu0  ;;  %v6711_v24 = vpop.f32.mrb[98].mxu1 }
 0xa26   :  { %v13760_v40 = vadd.f32 %v6638_v12, %v13738_v25  ;;  %v13763_v52 = vadd.f32 %v6711_v24, %v13743_v53  ;;  %v6640_v35 = vpop.f32.mrb[99].mxu0  ;;  %v6713_v42 = vpop.f32.mrb[99].mxu1 }
 0xa27   :  { %v13766_v21 = vadd.f32 %v6640_v35, %v13752_v2  ;;  %v13769_v1 = vadd.f32 %v6713_v42, %v13757_v47 }
 0xa28   :  { %15131 = vst [vmem:[#allocation57_spill] sm:$0xff] %v13760_v40  ;;  %15132 = vst [vmem:[#allocation60_spill] sm:$0xff] %v13763_v52 }
 0xa29   :  { %15133 = vst [vmem:[#allocation59_spill] sm:$0xff] %v13766_v21  ;;  %15134 = vst [vmem:[#allocation61_spill] sm:$0xff] %v13769_v1 }
 0xa2b   :  { %v6644_v0 = vpop.f32.mrb[100].mxu0  ;;  %v6717_v19 = vpop.f32.mrb[100].mxu1 }
 0xa2c   :  { %v13772_v18 = vadd.f32 %v6644_v0, %v13738_v25  ;;  %v13775_v30 = vadd.f32 %v6717_v19, %v13743_v53  ;;  %v6646_v12 = vpop.f32.mrb[101].mxu0  ;;  %v6719_v40 = vpop.f32.mrb[101].mxu1 }
 0xa2d   :  { %v13778_v24 = vadd.f32 %v6646_v12, %v13752_v2  ;;  %v13781_v52 = vadd.f32 %v6719_v40, %v13757_v47  ;;  %v6648_v35 = vpop.f32.mrb[102].mxu0  ;;  %v6721_v21 = vpop.f32.mrb[102].mxu1 }
 0xa2e   :  { %15135 = vst [vmem:[#allocation92_spill] sm:$0xff] %v13772_v18  ;;  %15136 = vst [vmem:[#allocation93_spill] sm:$0xff] %v13775_v30  ;;  %v13784_v42 = vadd.f32 %v6648_v35, %v13738_v25  ;;  %v13787_v1 = vadd.f32 %v6721_v21, %v13743_v53  ;;  %v6650_v0 = vpop.f32.mrb[103].mxu0  ;;  %v6723_v18 = vpop.f32.mrb[103].mxu1 }
 0xa2f   :  { %15137 = vst [vmem:[#allocation94_spill] sm:$0xff] %v13778_v24  ;;  %15138 = vst [vmem:[#allocation95_spill] sm:$0xff] %v13781_v52  ;;  %v13790_v19 = vadd.f32 %v6650_v0, %v13752_v2  ;;  %v13793_v30 = vadd.f32 %v6723_v18, %v13757_v47 }
 0xa30   :  { %15139 = vst [vmem:[#allocation33_spill] sm:$0xff] %v13784_v42  ;;  %15140 = vst [vmem:[#allocation36_spill] sm:$0xff] %v13787_v1 }
 0xa31   :  { %15141 = vst [vmem:[#allocation35_spill] sm:$0xff] %v13790_v19  ;;  %15142 = vst [vmem:[#allocation37_spill] sm:$0xff] %v13793_v30 }
 0xa33   :  { %v6654_v12 = vpop.f32.mrb[104].mxu0  ;;  %v6727_v24 = vpop.f32.mrb[104].mxu1 }
 0xa34   :  { %v13796_v40 = vadd.f32 %v6654_v12, %v13738_v25  ;;  %v13799_v52 = vadd.f32 %v6727_v24, %v13743_v53  ;;  %v6656_v35 = vpop.f32.mrb[105].mxu0  ;;  %v6729_v42 = vpop.f32.mrb[105].mxu1 }
 0xa35   :  { %v13802_v21 = vadd.f32 %v6656_v35, %v13752_v2  ;;  %v13805_v1 = vadd.f32 %v6729_v42, %v13757_v47  ;;  %v6658_v0 = vpop.f32.mrb[106].mxu0  ;;  %v6731_v19 = vpop.f32.mrb[106].mxu1 }
 0xa36   :  { %15143 = vst [vmem:[#allocation70_spill] sm:$0xff] %v13796_v40  ;;  %15144 = vst [vmem:[#allocation72_spill] sm:$0xff] %v13799_v52  ;;  %v13808_v18 = vadd.f32 %v6658_v0, %v13738_v25  ;;  %v13811_v30 = vadd.f32 %v6731_v19, %v13743_v53  ;;  %v6660_v12 = vpop.f32.mrb[107].mxu0  ;;  %v6733_v40 = vpop.f32.mrb[107].mxu1 }
 0xa37   :  { %15145 = vst [vmem:[#allocation71_spill] sm:$0xff] %v13802_v21  ;;  %15146 = vst [vmem:[#allocation49_spill] sm:$0xff] %v13805_v1  ;;  %v13814_v24 = vadd.f32 %v6660_v12, %v13752_v2  ;;  %v13817_v52 = vadd.f32 %v6733_v40, %v13757_v47 }
 0xa38   :  { %15147 = vst [vmem:[#allocation52_spill] sm:$0xff] %v13808_v18  ;;  %15148 = vst [vmem:[#allocation51_spill] sm:$0xff] %v13811_v30 }
 0xa39   :  { %15149 = vst [vmem:[#allocation53_spill] sm:$0xff] %v13814_v24  ;;  %15150 = vst [vmem:[#allocation54_spill] sm:$0xff] %v13817_v52 }
 0xa3b   :  { %v6664_v35 = vpop.f32.mrb[108].mxu0  ;;  %v6737_v21 = vpop.f32.mrb[108].mxu1 }
 0xa3c   :  { %v13820_v42 = vadd.f32 %v6664_v35, %v13738_v25  ;;  %v13823_v1 = vadd.f32 %v6737_v21, %v13743_v53  ;;  %v6666_v0 = vpop.f32.mrb[109].mxu0  ;;  %v6739_v18 = vpop.f32.mrb[109].mxu1 }
 0xa3d   :  { %v13826_v19 = vadd.f32 %v6666_v0, %v13752_v2  ;;  %v13829_v30 = vadd.f32 %v6739_v18, %v13757_v47  ;;  %v6668_v12 = vpop.f32.mrb[110].mxu0  ;;  %v6741_v24 = vpop.f32.mrb[110].mxu1  ;;  %v15159_v0 = vsub.s32 4, %v15126_v55 }
 0xa3e   :  { %15151 = vst [vmem:[#allocation56_spill] sm:$0xff] %v13820_v42  ;;  %15152 = vst [vmem:[#allocation55_spill] sm:$0xff] %v13823_v1  ;;  %v13832_v40 = vadd.f32 %v6668_v12, %v13738_v25  ;;  %v13835_v52 = vadd.f32 %v6741_v24, %v13743_v53  ;;  %v6670_v35 = vpop.f32.mrb[111].mxu0  ;;  %v6743_v42 = vpop.f32.mrb[111].mxu1  ;;  %v15161_v24 = vsub.s32 5, %v15126_v55 }
 0xa3f   :  { %15153 = vst [vmem:[#allocation58_spill] sm:$0xff] %v13826_v19  ;;  %15154 = vst [vmem:[#allocation82_spill] sm:$0xff] %v13829_v30  ;;  %v13838_v21 = vadd.f32 %v6670_v35, %v13752_v2  ;;  %v13841_v1 = vadd.f32 %v6743_v42, %v13757_v47  ;;  %v13846_v18 = vrot.slane %v13729_v51, %v15159_v0  ;;  %v15160_v30 = vsub.s32 6, %v15126_v55 }
 0xa40   :  { %15155 = vst [vmem:[#allocation79_spill] sm:$0xff] %v13832_v40  ;;  %15156 = vst [vmem:[#allocation30_spill] sm:$0xff] %v13835_v52  ;;  %v13856_v52 = vrot.slane %v13729_v51, %v15161_v24  ;;  %v15162_v35 = vsub.s32 7, %v15126_v55 }
 0xa41   :  { %15157 = vst [vmem:[#allocation31_spill] sm:$0xff] %v13838_v21  ;;  %15158 = vst [vmem:[#allocation90_spill] sm:$0xff] %v13841_v1  ;;  %v13851_v12 = vrot.slane %v13729_v51, %v15160_v30 }
 0xa42   :  { %v13861_v42 = vrot.slane %v13729_v51, %v15162_v35 }
 0xa63   :  { %v6780_v1 = vpop.f32.mrb[112].mxu0  ;;  %v6853_v21 = vpop.f32.mrb[112].mxu1 }
 0xa64   :  { %v13864_v0 = vadd.f32 %v6780_v1, %v13846_v18  ;;  %v13867_v40 = vadd.f32 %v6853_v21, %v13851_v12  ;;  %v6782_v30 = vpop.f32.mrb[113].mxu0  ;;  %v6855_v19 = vpop.f32.mrb[113].mxu1 }
 0xa65   :  { %v13870_v62 = vadd.f32 %v6782_v30, %v13856_v52  ;;  %v13873_v24 = vadd.f32 %v6855_v19, %v13861_v42  ;;  %v6784_v55 = vpop.f32.mrb[114].mxu0  ;;  %v6857_v58 = vpop.f32.mrb[114].mxu1 }
 0xa66   :  { %15163 = vst [vmem:[#allocation32_spill] sm:$0xff] %v13864_v0  ;;  %15164 = vst [vmem:[#allocation91_spill] sm:$0xff] %v13867_v40  ;;  %v13876_v51 = vadd.f32 %v6784_v55, %v13846_v18  ;;  %v13879_v35 = vadd.f32 %v6857_v58, %v13851_v12  ;;  %v6786_v1 = vpop.f32.mrb[115].mxu0  ;;  %v6859_v0 = vpop.f32.mrb[115].mxu1 }
 0xa67   :  { %15165 = vst [vmem:[#allocation96_spill] sm:$0xff] %v13870_v62  ;;  %15166 = vst [vmem:[#allocation84_spill] sm:$0xff] %v13873_v24  ;;  %v13882_v21 = vadd.f32 %v6786_v1, %v13856_v52  ;;  %v13885_v40 = vadd.f32 %v6859_v0, %v13861_v42 }
 0xa68   :  { %15167 = vst [vmem:[#allocation29_spill] sm:$0xff] %v13876_v51  ;;  %15168 = vst [vmem:[#allocation97_spill] sm:$0xff] %v13879_v35 }
 0xa69   :  { %15169 = vst [vmem:[#allocation98_spill] sm:$0xff] %v13882_v21  ;;  %15170 = vst [vmem:[#allocation99_spill] sm:$0xff] %v13885_v40 }
 0xa6b   :  { %v6790_v30 = vpop.f32.mrb[116].mxu0  ;;  %v6863_v62 = vpop.f32.mrb[116].mxu1 }
 0xa6c   :  { %v13888_v19 = vadd.f32 %v6790_v30, %v13846_v18  ;;  %v13891_v24 = vadd.f32 %v6863_v62, %v13851_v12  ;;  %v6792_v55 = vpop.f32.mrb[117].mxu0  ;;  %v6865_v51 = vpop.f32.mrb[117].mxu1 }
 0xa6d   :  { %v13894_v58 = vadd.f32 %v6792_v55, %v13856_v52  ;;  %v13897_v35 = vadd.f32 %v6865_v51, %v13861_v42  ;;  %v6794_v1 = vpop.f32.mrb[118].mxu0  ;;  %v6867_v21 = vpop.f32.mrb[118].mxu1 }
 0xa6e   :  { %15171 = vst [vmem:[#allocation100_spill] sm:$0xff] %v13888_v19  ;;  %15172 = vst [vmem:[#allocation101_spill] sm:$0xff] %v13891_v24  ;;  %v13900_v0 = vadd.f32 %v6794_v1, %v13846_v18  ;;  %v13903_v40 = vadd.f32 %v6867_v21, %v13851_v12  ;;  %v6796_v30 = vpop.f32.mrb[119].mxu0  ;;  %v6869_v19 = vpop.f32.mrb[119].mxu1 }
 0xa6f   :  { %15173 = vst [vmem:[#allocation102_spill] sm:$0xff] %v13894_v58  ;;  %15174 = vst [vmem:[#allocation103_spill] sm:$0xff] %v13897_v35  ;;  %v13906_v62 = vadd.f32 %v6796_v30, %v13856_v52  ;;  %v13909_v24 = vadd.f32 %v6869_v19, %v13861_v42 }
 0xa70   :  { %15175 = vst [vmem:[#allocation104_spill] sm:$0xff] %v13900_v0  ;;  %15176 = vst [vmem:[#allocation105_spill] sm:$0xff] %v13903_v40 }
 0xa71   :  { %15177 = vst [vmem:[#allocation106_spill] sm:$0xff] %v13906_v62  ;;  %15178 = vst [vmem:[#allocation107_spill] sm:$0xff] %v13909_v24 }
 0xa73   :  { %v6800_v55 = vpop.f32.mrb[120].mxu0  ;;  %v6873_v58 = vpop.f32.mrb[120].mxu1 }
 0xa74   :  { %v13912_v51 = vadd.f32 %v6800_v55, %v13846_v18  ;;  %v13915_v35 = vadd.f32 %v6873_v58, %v13851_v12  ;;  %v6802_v1 = vpop.f32.mrb[121].mxu0  ;;  %v6875_v0 = vpop.f32.mrb[121].mxu1 }
 0xa75   :  { %v13918_v21 = vadd.f32 %v6802_v1, %v13856_v52  ;;  %v13921_v40 = vadd.f32 %v6875_v0, %v13861_v42  ;;  %v6804_v30 = vpop.f32.mrb[122].mxu0  ;;  %v6877_v62 = vpop.f32.mrb[122].mxu1 }
 0xa76   :  { %15179 = vst [vmem:[#allocation108_spill] sm:$0xff] %v13912_v51  ;;  %15180 = vst [vmem:[#allocation109_spill] sm:$0xff] %v13915_v35  ;;  %v13924_v19 = vadd.f32 %v6804_v30, %v13846_v18  ;;  %v13927_v24 = vadd.f32 %v6877_v62, %v13851_v12  ;;  %v6806_v55 = vpop.f32.mrb[123].mxu0  ;;  %v6879_v51 = vpop.f32.mrb[123].mxu1 }
 0xa77   :  { %15181 = vst [vmem:[#allocation110_spill] sm:$0xff] %v13918_v21  ;;  %15182 = vst [vmem:[#allocation111_spill] sm:$0xff] %v13921_v40  ;;  %v13930_v58 = vadd.f32 %v6806_v55, %v13856_v52  ;;  %v13933_v35 = vadd.f32 %v6879_v51, %v13861_v42 }
 0xa78   :  { %15183 = vst [vmem:[#allocation112_spill] sm:$0xff] %v13924_v19  ;;  %15184 = vst [vmem:[#allocation113_spill] sm:$0xff] %v13927_v24 }
 0xa79   :  { %15185 = vst [vmem:[#allocation114_spill] sm:$0xff] %v13930_v58  ;;  %15186 = vst [vmem:[#allocation115_spill] sm:$0xff] %v13933_v35 }
 0xa7b   :  { %v6810_v1 = vpop.f32.mrb[124].mxu0  ;;  %v6883_v21 = vpop.f32.mrb[124].mxu1 }
 0xa7c   :  { %v13936_v0 = vadd.f32 %v6810_v1, %v13846_v18  ;;  %v13939_v40 = vadd.f32 %v6883_v21, %v13851_v12  ;;  %v6812_v30 = vpop.f32.mrb[125].mxu0  ;;  %v6885_v19 = vpop.f32.mrb[125].mxu1  ;;  %v6708_v1 = vadd.f32 %v13733_v29, %v13743_v53  ;;  %v6637_v21 = vadd.f32 %v13745_v54, %v13752_v2 }
 0xa7d   :  { %v13942_v62 = vadd.f32 %v6812_v30, %v13856_v52  ;;  %v13945_v24 = vadd.f32 %v6885_v19, %v13861_v42  ;;  %v6814_v55 = vpop.f32.mrb[126].mxu0  ;;  %v6887_v58 = vpop.f32.mrb[126].mxu1  ;;  %v6710_v30 = vadd.f32 %v13747_v46, %v13757_v47 }
 0xa7e   :  { %15187 = vst [vmem:[#allocation116_spill] sm:$0xff] %v13936_v0  ;;  %15188 = vst [vmem:[#allocation117_spill] sm:$0xff] %v13939_v40  ;;  %v6816_v51 = vpop.f32.mrb[127].mxu0  ;;  %v6889_v35 = vpop.f32.mrb[127].mxu1 }
 0xa7f   :  { %15189 = vst [vmem:[#allocation118_spill] sm:$0xff] %v13942_v62  ;;  %15190 = vst [vmem:[#allocation119_spill] sm:$0xff] %v13945_v24 }
 0xa84   :  { %v7186_v62 = vpop.f32.mrb[128].mxu0  ;;  %v7227_v40 = vpop.f32.mrb[128].mxu1 }
 0xa85   :  { %v7234_v19 = vadd.f32 %v7186_v62, %v6635_v41  ;;  %v7236_v24 = vadd.f32 %v7227_v40, %v6708_v1  ;;  %v7188_v0 = vpop.f32.mrb[129].mxu0  ;;  %v7229_v39 = vpop.f32.mrb[129].mxu1  ;;  %v6890_v1 = vadd.f32 %v6889_v35, %v13861_v42 }
 0xa86   :  { %v7235_v6 = vadd.f32 %v7188_v0, %v6637_v21  ;;  %v7237_v56 = vadd.f32 %v7229_v39, %v6710_v30  ;;  %v7190_v7 = vpop.f32.mrb[130].mxu0  ;;  %v7231_v49 = vpop.f32.mrb[130].mxu1 }
 0xa87   :  { %v10046_v34 = vmul.f32 -1.442695, %v7234_v19  ;;  %v7191_v25 = vpop.f32.mrb[131].mxu0  ;;  %v7232_v48 = vpop.f32.mrb[131].mxu1 }
 0xa88   :  { %v10047_v29 = vmul.f32 -1.442695, %v7235_v6  ;;  %v10048_v2 = vmul.f32 -1.442695, %v7237_v56  ;;  %v6815_v48 = vadd.f32 %v6814_v55, %v13846_v18  ;;  %v6888_v6 = vadd.f32 %v6887_v58, %v13851_v12 }
 0xa89   :  { %10890 = vpow2.f32 %v10046_v34  ;;  %v6817_v56 = vadd.f32 %v6816_v51, %v13856_v52 }
 0xa8a   :  { %10892 = vpow2.f32 %v10047_v29 }
 0xa8b   :  { %10894 = vpow2.f32 %v10048_v2 }
 0xa8c   :  { %10896 = vtanh.f32 %v7236_v24 }
 0xa93   :  { %v10891_v53 = vpop.eup %10890 }
 0xa94   :  { %v10893_v54 = vpop.eup %10892  ;;  %v7523_v47 = vadd.f32 1.0, %v10891_v53 }
 0xa95   :  { %v7529_v41 = vadd.f32 1.0, %v10893_v54  ;;  %v10895_v46 = vpop.eup %10894 }
 0xa96   :  { %10898 = vrcp.f32 %v7523_v47  ;;  %v10897_v40 = vpop.eup %10896  ;;  %v7536_v0 = vadd.f32 1.0, %v10895_v46 }
 0xa97   :  { %10900 = vrcp.f32 %v7529_v41 }
 0xa98   :  { %10902 = vrcp.f32 %v7536_v0 }
 0xaa0   :  { %v10899_v39 = vpop.eup %10898 }
 0xaa1   :  { %v10901_v7 = vpop.eup %10900  ;;  %v7540_v49 = vmul.f32 %v10899_v39, %v10897_v40 }
 0xaa2   :  { %v7539_v62 = vmul.f32 0.0, %v10901_v7  ;;  %v10903_v42 = vpop.eup %10902 }
 0xaa4   :  { %v13959_v21 = vadd.f32 %v7540_v49, %v7539_v62  ;;  %v7468_v24 = vpop.f32.mrb[132].mxu0  ;;  %v7509_v30 = vpop.f32.mrb[132].mxu1  ;;  %v15211_v49 = vld [vmem:[#allocation87_spill] sm:$0xff] }
 0xaa5   :  { %v7516_v19 = vadd.f32 %v7468_v24, %v6815_v48  ;;  %v7518_v34 = vadd.f32 %v7509_v30, %v6888_v6  ;;  %v7470_v25 = vpop.f32.mrb[133].mxu0  ;;  %v7511_v29 = vpop.f32.mrb[133].mxu1 }
 0xaa6   :  { %10904 = vtanh.f32 %v13959_v21  ;;  %v7517_v2 = vadd.f32 %v7470_v25, %v6817_v56  ;;  %v7519_v53 = vadd.f32 %v7511_v29, %v6890_v1  ;;  %v7472_v18 = vpop.f32.mrb[134].mxu0  ;;  %v7513_v55 = vpop.f32.mrb[134].mxu1 }
 0xaa7   :  { %v10049_v12 = vmul.f32 -1.442695, %v7516_v19  ;;  %v7473_v58 = vpop.f32.mrb[135].mxu0  ;;  %v7514_v52 = vpop.f32.mrb[135].mxu1  ;;  %v15192_v19 = vld [vmem:[#allocation50_spill] sm:$0xff] }
 0xaa8   :  { %v10050_v51 = vmul.f32 -1.442695, %v7517_v2  ;;  %v10051_v54 = vmul.f32 -1.442695, %v7519_v53  ;;  %v15194_v18 = vld [vmem:[#allocation74_spill] sm:$0xff]  ;;  %v15199_v58 = vld [vmem:[#allocation65_spill] sm:$0xff] }
 0xaa9   :  { %10906 = vpow2.f32 %v10049_v12  ;;  %v15195_v55 = vld [vmem:[#allocation38_spill] sm:$0xff]  ;;  %v15196_v12 = vld [vmem:[#allocation40_spill] sm:$0xff] }
 0xaaa   :  { %10908 = vpow2.f32 %v10050_v51  ;;  %v15200_v52 = vld [vmem:[#allocation68_spill] sm:$0xff]  ;;  %v15201_v51 = vld [vmem:[#allocation67_spill] sm:$0xff]  ;;  %v15222_v53 = vld [vmem:[#allocation46_spill] sm:$0xff] }
 0xaab   :  { %10910 = vpow2.f32 %v10051_v54  ;;  %v15205_v54 = vld [vmem:[#allocation76_spill] sm:$0xff] }
 0xaac   :  { %10912 = vtanh.f32 %v7518_v34 }
 0xab0   :  { %v10905_v35 = vpop.eup %10904 }
 0xab1   :  { %v13962_v47 = vmul.f32 %v10905_v35, %v10903_v42  ;;  %v15203_v42 = vld [vmem:[#allocation34_spill] sm:$0xff]  ;;  %v15204_v35 = vld [vmem:[#allocation73_spill] sm:$0xff] }
 0xab3   :  { %v10907_v41 = vpop.eup %10906  ;;  %v10053_v46 = vpack.c.bf16 %v13962_v47, %v13962_v47 }
 0xab4   :  { %v10909_v40 = vpop.eup %10908  ;;  %v7547_v39 = vadd.f32 1.0, %v10907_v41  ;;  %v15206_v41 = vld [vmem:[#allocation75_spill] sm:$0xff] }
 0xab5   :  { %v7553_v7 = vadd.f32 1.0, %v10909_v40  ;;  %10054 = vmatmul.mubr.msk.bf16.vlgmr.msra.gmra.mrb[136].mxu0 %vm12294_vm2, %v10053_v46  ;;  %10057 = vmatmul.mubr.msk.bf16.vlgmr.msra.gmra.mrb[136].mxu1 %vm12294_vm2, %v10053_v46  ;;  %v10911_v0 = vpop.eup %10910  ;;  %v15207_v46 = vld [vmem:[#allocation77_spill] sm:$0xff]  ;;  %v15208_v40 = vld [vmem:[#allocation78_spill] sm:$0xff] }
 0xab6   :  { %10914 = vrcp.f32 %v7547_v39  ;;  %7669 = vmatpush1.bf16.msra.mxu0 %v13595_v27  ;;  %7710 = vmatpush1.bf16.msra.mxu1 %v13597_v3  ;;  %v10913_v62 = vpop.eup %10912  ;;  %v7560_v1 = vadd.f32 1.0, %v10911_v0  ;;  %v15209_v39 = vld [vmem:[#allocation80_spill] sm:$0xff] }
 0xab7   :  { %10916 = vrcp.f32 %v7553_v7  ;;  %7670 = vmatprep.subr.bf16.mxu0 %v13601_v43  ;;  %7711 = vmatprep.subr.bf16.mxu1 %v13603_v20  ;;  %v15210_v7 = vld [vmem:[#allocation86_spill] sm:$0xff]  ;;  %v15212_v0 = vld [vmem:[#allocation88_spill] sm:$0xff] }
 0xab8   :  { %7700 = vmatprep.mubr.bf16.mxu0 %v14950_v31  ;;  %7741 = vmatprep.mubr.bf16.mxu1 %v14950_v31  ;;  %10918 = vrcp.f32 %v7560_v1  ;;  %v15217_v1 = vld [vmem:[#allocation45_spill] sm:$0xff] }
 0xaba   :  { %7671 = vmatpush1.bf16.msra.mxu0 %v13609_v36  ;;  %7712 = vmatpush1.bf16.msra.mxu1 %v13611_v28 }
 0xabb   :  { %7672 = vmatprep.subr.bf16.mxu0 %v13615_v59  ;;  %7713 = vmatprep.subr.bf16.mxu1 %v13617_v37 }
 0xabe   :  { %7673 = vmatpush1.bf16.msra.mxu0 %v13623_v13  ;;  %7714 = vmatpush1.bf16.msra.mxu1 %v13625_v11 }
 0xabf   :  { %7674 = vmatprep.subr.bf16.mxu0 %v13629_v60  ;;  %7715 = vmatprep.subr.bf16.mxu1 %v13631_v16 }
 0xac0   :  { %v10915_v48 = vpop.eup %10914 }
 0xac1   :  { %v10917_v6 = vpop.eup %10916  ;;  %v7564_v56 = vmul.f32 %v10915_v48, %v10913_v62  ;;  %v15213_v62 = vld [vmem:[#allocation89_spill] sm:$0xff] }
 0xac2   :  { %v7563_v24 = vmul.f32 0.0, %v10917_v6  ;;  %7675 = vmatpush1.bf16.msra.mxu0 %v13635_v61  ;;  %7716 = vmatpush1.bf16.msra.mxu1 %v13637_v63  ;;  %v10919_v34 = vpop.eup %10918  ;;  %v15214_v48 = vld [vmem:[#allocation41_spill] sm:$0xff]  ;;  %v15215_v6 = vld [vmem:[#allocation44_spill] sm:$0xff] }
 0xac3   :  { %7676 = vmatprep.subr.bf16.mxu0 %v13641_v32  ;;  %7717 = vmatprep.subr.bf16.mxu1 %v13643_v50 }
 0xac4   :  { %v13988_v30 = vadd.f32 %v7564_v56, %v7563_v24  ;;  %v15216_v56 = vld [vmem:[#allocation43_spill] sm:$0xff]  ;;  %v15218_v24 = vld [vmem:[#allocation62_spill] sm:$0xff] }
 0xac6   :  { %10920 = vtanh.f32 %v13988_v30  ;;  %7677 = vmatpush1.bf16.msra.mxu0 %v13647_v33  ;;  %7718 = vmatpush1.bf16.msra.mxu1 %v13649_v26 }
 0xac7   :  { %7678 = vmatprep.subr.bf16.mxu0 %v13653_v9  ;;  %7719 = vmatprep.subr.bf16.mxu1 %v13655_v22 }
 0xaca   :  { %7679 = vmatpush1.bf16.msra.mxu0 %v15192_v19  ;;  %7720 = vmatpush1.bf16.msra.mxu1 %v13661_v17 }
 0xacb   :  { %7680 = vmatprep.subr.bf16.mxu0 %v13665_v5  ;;  %7721 = vmatprep.subr.bf16.mxu1 %v13667_v45 }
 0xace   :  { %7681 = vmatpush1.bf16.msra.mxu0 %v13671_v38  ;;  %7722 = vmatpush1.bf16.msra.mxu1 %v13673_v44 }
 0xacf   :  { %7682 = vmatprep.subr.bf16.mxu0 %v13677_v15  ;;  %7723 = vmatprep.subr.bf16.mxu1 %v13679_v23 }
 0xad0   :  { %v10921_v25 = vpop.eup %10920 }
 0xad1   :  { %v14003_v29 = vmul.f32 %v10921_v25, %v10919_v34  ;;  %v15219_v34 = vld [vmem:[#allocation64_spill] sm:$0xff]  ;;  %v15220_v25 = vld [vmem:[#allocation63_spill] sm:$0xff] }
 0xad2   :  { %7683 = vmatpush1.bf16.msra.mxu0 %v13683_v14  ;;  %7724 = vmatpush1.bf16.msra.mxu1 %v13685_v57 }
 0xad3   :  { %v10059_v2 = vpack.c.bf16 %v14003_v29, %v14003_v29  ;;  %7811 = vmatprep.subr.bf16.mxu0 %v13471_v8  ;;  %7852 = vmatprep.subr.bf16.mxu1 %v13473_v4  ;;  %v15197_v8 = vld [vmem:[#allocation39_spill] sm:$0xff]  ;;  %v15198_v4 = vld [vmem:[#allocation42_spill] sm:$0xff] }
 0xad5   :  { %10060 = vmatmul.mubr.msk.bf16.vlgmr.msra.gmra.mrb[140].mxu0 %vm12344_vm4, %v10059_v2  ;;  %10063 = vmatmul.mubr.msk.bf16.vlgmr.msra.gmra.mrb[140].mxu1 %vm12344_vm4, %v10059_v2  ;;  %v15221_v2 = vld [vmem:[#allocation66_spill] sm:$0xff] }
 0xad6   :  { %7812 = vmatpush1.bf16.msra.mxu0 %v13477_v10  ;;  %7853 = vmatpush1.bf16.msra.mxu1 %v15194_v18  ;;  %v15202_v10 = vld [vmem:[#allocation69_spill] sm:$0xff]  ;;  %v15223_v18 = vld [vmem:[#allocation48_spill] sm:$0xff] }
 0xad7   :  { %7813 = vmatprep.subr.bf16.mxu0 %v15195_v55  ;;  %7854 = vmatprep.subr.bf16.mxu1 %v15196_v12  ;;  %v15224_v55 = vld [vmem:[#allocation47_spill] sm:$0xff] }
 0xad8   :  { %7843 = vmatprep.mubr.bf16.mxu0 %v14950_v31  ;;  %7884 = vmatprep.mubr.bf16.mxu1 %v14950_v31 }
 0xada   :  { %7814 = vmatpush1.bf16.msra.mxu0 %v15197_v8  ;;  %7855 = vmatpush1.bf16.msra.mxu1 %v15198_v4  ;;  %v15225_v4 = vld [vmem:[#allocation57_spill] sm:$0xff] }
 0xadb   :  { %7815 = vmatprep.subr.bf16.mxu0 %v15199_v58  ;;  %7856 = vmatprep.subr.bf16.mxu1 %v15200_v52  ;;  %v15226_v52 = vld [vmem:[#allocation60_spill] sm:$0xff] }
 0xade   :  { %7816 = vmatpush1.bf16.msra.mxu0 %v15201_v51  ;;  %7857 = vmatpush1.bf16.msra.mxu1 %v15202_v10 }
 0xadf   :  { %7817 = vmatprep.subr.bf16.mxu0 %v15203_v42  ;;  %7858 = vmatprep.subr.bf16.mxu1 %v15204_v35  ;;  %v15227_v35 = vld [vmem:[#allocation59_spill] sm:$0xff] }
 0xae2   :  { %7818 = vmatpush1.bf16.msra.mxu0 %v15205_v54  ;;  %7859 = vmatpush1.bf16.msra.mxu1 %v15206_v41  ;;  %v15228_v41 = vld [vmem:[#allocation61_spill] sm:$0xff] }
 0xae3   :  { %7819 = vmatprep.subr.bf16.mxu0 %v15207_v46  ;;  %7860 = vmatprep.subr.bf16.mxu1 %v15208_v40 }
 0xae6   :  { %7820 = vmatpush1.bf16.msra.mxu0 %v15209_v39  ;;  %7861 = vmatpush1.bf16.msra.mxu1 %v15210_v7 }
 0xae7   :  { %7821 = vmatprep.subr.bf16.mxu0 %v15211_v49  ;;  %7862 = vmatprep.subr.bf16.mxu1 %v15212_v0 }
 0xaea   :  { %7822 = vmatpush1.bf16.msra.mxu0 %v15213_v62  ;;  %7863 = vmatpush1.bf16.msra.mxu1 %v15214_v48 }
 0xaeb   :  { %7823 = vmatprep.subr.bf16.mxu0 %v15215_v6  ;;  %7864 = vmatprep.subr.bf16.mxu1 %v15216_v56 }
 0xaee   :  { %7824 = vmatpush1.bf16.msra.mxu0 %v15217_v1  ;;  %7865 = vmatpush1.bf16.msra.mxu1 %v15218_v24 }
 0xaef   :  { %7825 = vmatprep.subr.bf16.mxu0 %v15219_v34  ;;  %7866 = vmatprep.subr.bf16.mxu1 %v15220_v25 }
 0xaf2   :  { %7826 = vmatpush1.bf16.msra.mxu0 %v15221_v2  ;;  %7867 = vmatpush1.bf16.msra.mxu1 %v15222_v53 }
 0xaf3   :  { %7902 = vmatprep.subr.bf16.mxu0 %v15223_v18  ;;  %7943 = vmatprep.subr.bf16.mxu1 %v15224_v55  ;;  %v7569_v55 = vsel %vm1414_vm1, %v13959_v21, 0.0 }
 0xb88   :  { %v7611_v12 = vpop.f32.mrb[136].mxu0  ;;  %v7652_v8 = vpop.f32.mrb[136].mxu1 }
 0xb89   :  { %v7659_v58 = vadd.f32 %v7611_v12, %v15225_v4  ;;  %v7661_v51 = vadd.f32 %v7652_v8, %v15226_v52  ;;  %v7613_v10 = vpop.f32.mrb[137].mxu0  ;;  %v7654_v42 = vpop.f32.mrb[137].mxu1 }
 0xb8a   :  { %v7660_v54 = vadd.f32 %v7613_v10, %v15227_v35  ;;  %v7662_v46 = vadd.f32 %v7654_v42, %v15228_v41  ;;  %v7615_v40 = vpop.f32.mrb[138].mxu0  ;;  %v7656_v39 = vpop.f32.mrb[138].mxu1  ;;  %v15230_v42 = vld [vmem:[#allocation116_spill] sm:$0xff]  ;;  %v15231_v35 = vld [vmem:[#allocation117_spill] sm:$0xff] }
 0xb8b   :  { %v10064_v7 = vmul.f32 -1.442695, %v7659_v58  ;;  %v7616_v49 = vpop.f32.mrb[139].mxu0  ;;  %v7657_v0 = vpop.f32.mrb[139].mxu1  ;;  %v15232_v40 = vld [vmem:[#allocation118_spill] sm:$0xff] }
 0xb8c   :  { %v10065_v62 = vmul.f32 -1.442695, %v7660_v54  ;;  %v10066_v48 = vmul.f32 -1.442695, %v7662_v46 }
 0xb8d   :  { %10922 = vpow2.f32 %v10064_v7  ;;  %v15233_v7 = vld [vmem:[#allocation119_spill] sm:$0xff] }
 0xb8e   :  { %10924 = vpow2.f32 %v10065_v62 }
 0xb8f   :  { %10926 = vpow2.f32 %v10066_v48 }
 0xb90   :  { %10928 = vtanh.f32 %v7661_v51 }
 0xb97   :  { %v10923_v6 = vpop.eup %10922 }
 0xb98   :  { %v10925_v56 = vpop.eup %10924  ;;  %v7757_v1 = vadd.f32 1.0, %v10923_v6 }
 0xb99   :  { %v7763_v24 = vadd.f32 1.0, %v10925_v56  ;;  %v10927_v34 = vpop.eup %10926 }
 0xb9a   :  { %10930 = vrcp.f32 %v7757_v1  ;;  %v10929_v25 = vpop.eup %10928  ;;  %v7770_v8 = vadd.f32 1.0, %v10927_v34 }
 0xb9b   :  { %10932 = vrcp.f32 %v7763_v24 }
 0xb9c   :  { %10934 = vrcp.f32 %v7770_v8 }
 0xba4   :  { %v10931_v2 = vpop.eup %10930 }
 0xba5   :  { %v10933_v53 = vpop.eup %10932  ;;  %v7774_v12 = vmul.f32 %v10931_v2, %v10929_v25 }
 0xba6   :  { %v7773_v4 = vmul.f32 %v10933_v53, %v7569_v55  ;;  %v10935_v24 = vpop.eup %10934  ;;  %v7568_v53 = vsel %vm1414_vm1, %v13962_v47, 0.0 }
 0xba8   :  { %v7775_v58 = vadd.f32 %v7774_v12, %v7773_v4  ;;  %v7702_v52 = vpop.f32.mrb[140].mxu0  ;;  %v7743_v10 = vpop.f32.mrb[140].mxu1 }
 0xba9   :  { %v7750_v51 = vadd.f32 %v7702_v52, %v15230_v42  ;;  %v7752_v54 = vadd.f32 %v7743_v10, %v15231_v35  ;;  %v7704_v41 = vpop.f32.mrb[141].mxu0  ;;  %v7745_v46 = vpop.f32.mrb[141].mxu1  ;;  %v14174_v10 = vld [vmem:[#allocation18 + $0x8c] ss:$16 sps:$4 sm:$0xff]   ;;  %v14177_v42 = vld [vmem:[#allocation18 + $0x80] ss:$16 sps:$4 sm:$0xff]  }
 0xbaa   :  { %10936 = vtanh.f32 %v7775_v58  ;;  %v7751_v39 = vadd.f32 %v7704_v41, %v15232_v40  ;;  %v7753_v49 = vadd.f32 %v7745_v46, %v15233_v7  ;;  %v7706_v0 = vpop.f32.mrb[142].mxu0  ;;  %v7747_v21 = vpop.f32.mrb[142].mxu1  ;;  %v14062_v62 = vsel %vm2036_vm5, %v7775_v58, %v7569_v55  ;;  %15244 = vst [vmem:[#allocation67_spill] sm:$0xff] %v14174_v10  ;;  %15245 = vst [vmem:[#allocation69_spill] sm:$0xff] %v14177_v42  ;;  %v14183_v35 = vld [vmem:[#allocation18 + $0xa4] ss:$16 sps:$4 sm:$0xff]  }
 0xbab   :  { %v10067_v48 = vmul.f32 -1.442695, %v7750_v51  ;;  %v7707_v6 = vpop.f32.mrb[143].mxu0  ;;  %v7748_v56 = vpop.f32.mrb[143].mxu1  ;;  %v14180_v51 = vld [vmem:[#allocation18 + $0x88] ss:$16 sps:$4 sm:$0xff]  }
 0xbac   :  { %v10068_v1 = vmul.f32 -1.442695, %v7751_v39  ;;  %v10069_v25 = vmul.f32 -1.442695, %v7753_v49  ;;  %15246 = vst [vmem:[#allocation34_spill] sm:$0xff] %v14180_v51  ;;  %15247 = vst [vmem:[#allocation73_spill] sm:$0xff] %v14183_v35 }
 0xbad   :  { %10938 = vpow2.f32 %v10067_v48  ;;  %v14189_v41 = vld [vmem:[#allocation18 + $0xa0] ss:$16 sps:$4 sm:$0xff]   ;;  %v14192_v46 = vld [vmem:[#allocation18 + $0xa8] ss:$16 sps:$4 sm:$0xff]   ;;  %v14195_v40 = vld [vmem:[#allocation18 + $0xc4] ss:$16 sps:$4 sm:$0xff]  }
 0xbae   :  { %10940 = vpow2.f32 %v10068_v1  ;;  %15249 = vst [vmem:[#allocation75_spill] sm:$0xff] %v14189_v41  ;;  %15250 = vst [vmem:[#allocation77_spill] sm:$0xff] %v14192_v46  ;;  %v14198_v39 = vld [vmem:[#allocation18 + $0xcc] ss:$16 sps:$4 sm:$0xff]   ;;  %v14201_v7 = vld [vmem:[#allocation18 + $0xc0] ss:$16 sps:$4 sm:$0xff]  }
 0xbaf   :  { %10942 = vpow2.f32 %v10069_v25  ;;  %15251 = vst [vmem:[#allocation78_spill] sm:$0xff] %v14195_v40  ;;  %15252 = vst [vmem:[#allocation80_spill] sm:$0xff] %v14198_v39  ;;  %v14204_v49 = vld [vmem:[#allocation18 + $0xc8] ss:$16 sps:$4 sm:$0xff]   ;;  %v14207_v0 = vld [vmem:[#allocation18 + $0xe4] ss:$16 sps:$4 sm:$0xff]  }
 0xbb0   :  { %10944 = vtanh.f32 %v7752_v54  ;;  %v14186_v54 = vld [vmem:[#allocation18 + $0xac] ss:$16 sps:$4 sm:$0xff]   ;;  %15253 = vst [vmem:[#allocation86_spill] sm:$0xff] %v14201_v7  ;;  %15254 = vst [vmem:[#allocation87_spill] sm:$0xff] %v14204_v49  ;;  %v14213_v48 = vld [vmem:[#allocation18 + $0xe0] ss:$16 sps:$4 sm:$0xff]  }
 0xbb1   :  { %15248 = vst [vmem:[#allocation76_spill] sm:$0xff] %v14186_v54  ;;  %15255 = vst [vmem:[#allocation88_spill] sm:$0xff] %v14207_v0  ;;  %v14210_v21 = vld [vmem:[#allocation18 + $0xec] ss:$16 sps:$4 sm:$0xff]   ;;  %v14216_v6 = vld [vmem:[#allocation18 + $0xe8] ss:$16 sps:$4 sm:$0xff]  }
 0xbb2   :  { %15256 = vst [vmem:[#allocation89_spill] sm:$0xff] %v14210_v21  ;;  %15257 = vst [vmem:[#allocation41_spill] sm:$0xff] %v14213_v48  ;;  %v14219_v56 = vld [vmem:[#allocation19 + $0x4] ss:$16 sps:$4 sm:$0xff]   ;;  %v14222_v1 = vld [vmem:[#allocation19 + $0xc] ss:$16 sps:$4 sm:$0xff]  }
 0xbb3   :  { %15258 = vst [vmem:[#allocation44_spill] sm:$0xff] %v14216_v6  ;;  %15259 = vst [vmem:[#allocation43_spill] sm:$0xff] %v14219_v56  ;;  %v15261_v25 = vld [vmem:[#allocation92_spill] sm:$0xff] }
 0xbb4   :  { %v10937_v34 = vpop.eup %10936  ;;  %15260 = vst [vmem:[#allocation45_spill] sm:$0xff] %v14222_v1 }
 0xbb5   :  { %v7777_v2 = vmul.f32 %v10937_v34, %v10935_v24 }
 0xbb7   :  { %v10939_v12 = vpop.eup %10938  ;;  %v14069_v8 = vsel %vm2036_vm5, %v7777_v2, %v7568_v53  ;;  %v15262_v53 = vld [vmem:[#allocation93_spill] sm:$0xff] }
 0xbb8   :  { %v10941_v55 = vpop.eup %10940  ;;  %v7781_v4 = vadd.f32 1.0, %v10939_v12  ;;  %v7810_v58 = vpack.c.bf16 %v14069_v8, %v14069_v8 }
 0xbb9   :  { %v7787_v52 = vadd.f32 1.0, %v10941_v55  ;;  %v10943_v47 = vpop.eup %10942 }
 0xbba   :  { %10946 = vrcp.f32 %v7781_v4  ;;  %7844 = vmatmul.mubr.bf16.vlgmr.msra.gmra.mrb[144].mxu0 %v7810_v58  ;;  %7885 = vmatmul.mubr.bf16.vlgmr.msra.gmra.mrb[144].mxu1 %v7810_v58  ;;  %v15263_v58 = vld [vmem:[#allocation94_spill] sm:$0xff] }
 0xbbb   :  { %10948 = vrcp.f32 %v7787_v52  ;;  %7903 = vmatpush1.bf16.msra.mxu0 %v13595_v27  ;;  %7944 = vmatpush1.bf16.msra.mxu1 %v13597_v3  ;;  %v10945_v27 = vpop.eup %10944 }
 0xbbc   :  { %7904 = vmatprep.subr.bf16.mxu0 %v13601_v43  ;;  %7945 = vmatprep.subr.bf16.mxu1 %v13603_v20  ;;  %v7571_v20 = vsel %vm1415_vm3, %v13988_v30, 0.0  ;;  %v14165_v30 = vld [vmem:[#allocation18 + $0x60] ss:$16 sps:$4 sm:$0xff]  }
 0xbbd   :  { %7934 = vmatprep.mubr.bf16.mxu0 %v14950_v31  ;;  %7975 = vmatprep.mubr.bf16.mxu1 %v14950_v31  ;;  %15241 = vst [vmem:[#allocation42_spill] sm:$0xff] %v14165_v30 }
 0xbbf   :  { %7905 = vmatpush1.bf16.msra.mxu0 %v13609_v36  ;;  %7946 = vmatpush1.bf16.msra.mxu1 %v13611_v28  ;;  %v7794_v28 = vadd.f32 1.0, %v10943_v47  ;;  %v15264_v47 = vld [vmem:[#allocation95_spill] sm:$0xff] }
 0xbc0   :  { %7906 = vmatprep.subr.bf16.mxu0 %v13615_v59  ;;  %7947 = vmatprep.subr.bf16.mxu1 %v13617_v37 }
 0xbc1   :  { %10950 = vrcp.f32 %v7794_v28 }
 0xbc3   :  { %7907 = vmatpush1.bf16.msra.mxu0 %v13623_v13  ;;  %7948 = vmatpush1.bf16.msra.mxu1 %v13625_v11 }
 0xbc4   :  { %v10947_v3 = vpop.eup %10946  ;;  %7908 = vmatprep.subr.bf16.mxu0 %v13629_v60  ;;  %7949 = vmatprep.subr.bf16.mxu1 %v13631_v16 }
 0xbc5   :  { %v10949_v43 = vpop.eup %10948  ;;  %v7798_v36 = vmul.f32 %v10947_v3, %v10945_v27 }
 0xbc6   :  { %v7797_v59 = vmul.f32 %v10949_v43, %v7571_v20 }
 0xbc7   :  { %7909 = vmatpush1.bf16.msra.mxu0 %v13635_v61  ;;  %7950 = vmatpush1.bf16.msra.mxu1 %v13637_v63  ;;  %v7570_v61 = vsel %vm1415_vm3, %v14003_v29, 0.0  ;;  %v14171_v29 = vld [vmem:[#allocation18 + $0x84] ss:$16 sps:$4 sm:$0xff]  }
 0xbc8   :  { %v7799_v37 = vadd.f32 %v7798_v36, %v7797_v59  ;;  %7910 = vmatprep.subr.bf16.mxu0 %v13641_v32  ;;  %7951 = vmatprep.subr.bf16.mxu1 %v13643_v50  ;;  %v14121_v50 = vld [vmem:[#allocation18 + $0x4] ss:$16 sps:$4 sm:$0xff]   ;;  %15243 = vst [vmem:[#allocation68_spill] sm:$0xff] %v14171_v29 }
 0xbca   :  { %10952 = vtanh.f32 %v7799_v37  ;;  %v14096_v13 = vsel %vm2037_vm6, %v7799_v37, %v7571_v20 }
 0xbcb   :  { %7911 = vmatpush1.bf16.msra.mxu0 %v13647_v33  ;;  %7952 = vmatpush1.bf16.msra.mxu1 %v13649_v26  ;;  %v10951_v11 = vpop.eup %10950  ;;  %v14124_v33 = vld [vmem:[#allocation18 + $0xc] ss:$16 sps:$4 sm:$0xff]   ;;  %v14130_v26 = vld [vmem:[#allocation18 + $0x8] ss:$16 sps:$4 sm:$0xff]  }
 0xbcc   :  { %7912 = vmatprep.subr.bf16.mxu0 %v13653_v9  ;;  %7953 = vmatprep.subr.bf16.mxu1 %v13655_v22  ;;  %v14133_v9 = vld [vmem:[#allocation18 + $0x24] ss:$16 sps:$4 sm:$0xff]   ;;  %v14136_v22 = vld [vmem:[#allocation18 + $0x2c] ss:$16 sps:$4 sm:$0xff]  }
 0xbcf   :  { %7913 = vmatpush1.bf16.msra.mxu0 %v15192_v19  ;;  %7954 = vmatpush1.bf16.msra.mxu1 %v13661_v17  ;;  %v14144_v17 = vld [vmem:[#allocation18 + $0x28] ss:$16 sps:$4 sm:$0xff]  }
 0xbd0   :  { %7914 = vmatprep.subr.bf16.mxu0 %v13665_v5  ;;  %7955 = vmatprep.subr.bf16.mxu1 %v13667_v45  ;;  %15234 = vst [vmem:[#allocation83_spill] sm:$0xff] %v14144_v17  ;;  %v14147_v5 = vld [vmem:[#allocation18 + $0x44] ss:$16 sps:$4 sm:$0xff]   ;;  %v14150_v45 = vld [vmem:[#allocation18 + $0x4c] ss:$16 sps:$4 sm:$0xff]  }
 0xbd1   :  { %15235 = vst [vmem:[#allocation50_spill] sm:$0xff] %v14147_v5  ;;  %15236 = vst [vmem:[#allocation85_spill] sm:$0xff] %v14150_v45  ;;  %v14168_v19 = vld [vmem:[#allocation18 + $0x68] ss:$16 sps:$4 sm:$0xff]  }
 0xbd2   :  { %15242 = vst [vmem:[#allocation65_spill] sm:$0xff] %v14168_v19 }
 0xbd3   :  { %7915 = vmatpush1.bf16.msra.mxu0 %v13671_v38  ;;  %7956 = vmatpush1.bf16.msra.mxu1 %v13673_v44  ;;  %v14153_v38 = vld [vmem:[#allocation18 + $0x40] ss:$16 sps:$4 sm:$0xff]   ;;  %v14156_v44 = vld [vmem:[#allocation18 + $0x48] ss:$16 sps:$4 sm:$0xff]  }
 0xbd4   :  { %v10953_v60 = vpop.eup %10952  ;;  %7916 = vmatprep.subr.bf16.mxu0 %v13677_v15  ;;  %7957 = vmatprep.subr.bf16.mxu1 %v13679_v23  ;;  %15237 = vst [vmem:[#allocation74_spill] sm:$0xff] %v14153_v38  ;;  %15238 = vst [vmem:[#allocation38_spill] sm:$0xff] %v14156_v44  ;;  %v14159_v15 = vld [vmem:[#allocation18 + $0x64] ss:$16 sps:$4 sm:$0xff]   ;;  %v14162_v23 = vld [vmem:[#allocation18 + $0x6c] ss:$16 sps:$4 sm:$0xff]  }
 0xbd5   :  { %v7801_v16 = vmul.f32 %v10953_v60, %v10951_v11  ;;  %15239 = vst [vmem:[#allocation40_spill] sm:$0xff] %v14159_v15  ;;  %15240 = vst [vmem:[#allocation39_spill] sm:$0xff] %v14162_v23 }
 0xbd7   :  { %7917 = vmatpush1.bf16.msra.mxu0 %v13683_v14  ;;  %7958 = vmatpush1.bf16.msra.mxu1 %v13685_v57  ;;  %v14117_v63 = vsel %vm2037_vm6, %v7801_v16, %v7570_v61  ;;  %v14127_v14 = vld [vmem:[#allocation18] ss:$16 sps:$4 sm:$0xff]  }
 0xbd8   :  { %v7901_v32 = vpack.c.bf16 %v14117_v63, %v14117_v63  ;;  %8045 = vmatprep.subr.bf16.mxu0 %v14121_v50  ;;  %8086 = vmatprep.subr.bf16.mxu1 %v14124_v33  ;;  %v14141_v57 = vld [vmem:[#allocation18 + $0x20] ss:$16 sps:$4 sm:$0xff]  }
 0xbda   :  { %7935 = vmatmul.mubr.bf16.vlgmr.msra.gmra.mrb[148].mxu0 %v7901_v32  ;;  %7976 = vmatmul.mubr.bf16.vlgmr.msra.gmra.mrb[148].mxu1 %v7901_v32 }
 0xbdb   :  { %8046 = vmatpush1.bf16.msra.mxu0 %v14127_v14  ;;  %8087 = vmatpush1.bf16.msra.mxu1 %v14130_v26 }
 0xbdc   :  { %8047 = vmatprep.subr.bf16.mxu0 %v14133_v9  ;;  %8088 = vmatprep.subr.bf16.mxu1 %v14136_v22 }
 0xbdd   :  { %8077 = vmatprep.mubr.bf16.mxu0 %v14950_v31  ;;  %8118 = vmatprep.mubr.bf16.mxu1 %v14950_v31 }
 0xbdf   :  { %8048 = vmatpush1.bf16.msra.mxu0 %v14141_v57  ;;  %8089 = vmatpush1.bf16.msra.mxu1 %v14144_v17 }
 0xbe0   :  { %8049 = vmatprep.subr.bf16.mxu0 %v14147_v5  ;;  %8090 = vmatprep.subr.bf16.mxu1 %v14150_v45 }
 0xbe3   :  { %8050 = vmatpush1.bf16.msra.mxu0 %v14153_v38  ;;  %8091 = vmatpush1.bf16.msra.mxu1 %v14156_v44 }
 0xbe4   :  { %8051 = vmatprep.subr.bf16.mxu0 %v14159_v15  ;;  %8092 = vmatprep.subr.bf16.mxu1 %v14162_v23 }
 0xbe7   :  { %8052 = vmatpush1.bf16.msra.mxu0 %v14165_v30  ;;  %8093 = vmatpush1.bf16.msra.mxu1 %v14168_v19 }
 0xbe8   :  { %8053 = vmatprep.subr.bf16.mxu0 %v14171_v29  ;;  %8094 = vmatprep.subr.bf16.mxu1 %v14174_v10 }
 0xbeb   :  { %8054 = vmatpush1.bf16.msra.mxu0 %v14177_v42  ;;  %8095 = vmatpush1.bf16.msra.mxu1 %v14180_v51 }
 0xbec   :  { %8055 = vmatprep.subr.bf16.mxu0 %v14183_v35  ;;  %8096 = vmatprep.subr.bf16.mxu1 %v14186_v54 }
 0xbef   :  { %8056 = vmatpush1.bf16.msra.mxu0 %v14189_v41  ;;  %8097 = vmatpush1.bf16.msra.mxu1 %v14192_v46 }
 0xbf0   :  { %8057 = vmatprep.subr.bf16.mxu0 %v14195_v40  ;;  %8098 = vmatprep.subr.bf16.mxu1 %v14198_v39 }
 0xbf3   :  { %8058 = vmatpush1.bf16.msra.mxu0 %v14201_v7  ;;  %8099 = vmatpush1.bf16.msra.mxu1 %v14204_v49 }
 0xbf4   :  { %8059 = vmatprep.subr.bf16.mxu0 %v14207_v0  ;;  %8100 = vmatprep.subr.bf16.mxu1 %v14210_v21 }
 0xbf7   :  { %8060 = vmatpush1.bf16.msra.mxu0 %v14213_v48  ;;  %8101 = vmatpush1.bf16.msra.mxu1 %v14216_v6 }
 0xbf8   :  { %8136 = vmatprep.subr.bf16.mxu0 %v14219_v56  ;;  %8177 = vmatprep.subr.bf16.mxu1 %v14222_v1 }
 0xc8d   :  { %v7845_v24 = vpop.f32.mrb[144].mxu0  ;;  %v7886_v34 = vpop.f32.mrb[144].mxu1 }
 0xc8e   :  { %v7893_v2 = vadd.f32 %v7845_v24, %v15261_v25  ;;  %v7895_v12 = vadd.f32 %v7886_v34, %v15262_v53  ;;  %v7847_v55 = vpop.f32.mrb[145].mxu0  ;;  %v7888_v4 = vpop.f32.mrb[145].mxu1 }
 0xc8f   :  { %v7894_v52 = vadd.f32 %v7847_v55, %v15263_v58  ;;  %v7896_v27 = vadd.f32 %v7888_v4, %v15264_v47  ;;  %v7849_v3 = vpop.f32.mrb[146].mxu0  ;;  %v7890_v43 = vpop.f32.mrb[146].mxu1  ;;  %v15265_v47 = vld [vmem:[#allocation112_spill] sm:$0xff] }
 0xc90   :  { %v10070_v20 = vmul.f32 -1.442695, %v7893_v2  ;;  %v7850_v36 = vpop.f32.mrb[147].mxu0  ;;  %v7891_v28 = vpop.f32.mrb[147].mxu1  ;;  %v15266_v3 = vld [vmem:[#allocation113_spill] sm:$0xff] }
 0xc91   :  { %v10071_v59 = vmul.f32 -1.442695, %v7894_v52  ;;  %v10072_v37 = vmul.f32 -1.442695, %v7896_v27  ;;  %v15267_v36 = vld [vmem:[#allocation114_spill] sm:$0xff] }
 0xc92   :  { %10954 = vpow2.f32 %v10070_v20 }
 0xc93   :  { %10956 = vpow2.f32 %v10071_v59  ;;  %v15268_v59 = vld [vmem:[#allocation115_spill] sm:$0xff] }
 0xc94   :  { %10958 = vpow2.f32 %v10072_v37 }
 0xc95   :  { %10960 = vtanh.f32 %v7895_v12 }
 0xc9c   :  { %v10955_v11 = vpop.eup %10954 }
 0xc9d   :  { %v10957_v60 = vpop.eup %10956  ;;  %v7991_v16 = vadd.f32 1.0, %v10955_v11 }
 0xc9e   :  { %v7997_v61 = vadd.f32 1.0, %v10957_v60  ;;  %v10959_v32 = vpop.eup %10958 }
 0xc9f   :  { %10962 = vrcp.f32 %v7991_v16  ;;  %v10961_v24 = vpop.eup %10960  ;;  %v8004_v2 = vadd.f32 1.0, %v10959_v32 }
 0xca0   :  { %10964 = vrcp.f32 %v7997_v61 }
 0xca1   :  { %10966 = vrcp.f32 %v8004_v2 }
 0xca9   :  { %v10963_v34 = vpop.eup %10962 }
 0xcaa   :  { %v10965_v25 = vpop.eup %10964  ;;  %v8008_v53 = vmul.f32 %v10963_v34, %v10961_v24 }
 0xcab   :  { %v8007_v55 = vmul.f32 %v10965_v25, %v14062_v62  ;;  %v10967_v25 = vpop.eup %10966 }
 0xcad   :  { %v8009_v4 = vadd.f32 %v8008_v53, %v8007_v55  ;;  %v7936_v58 = vpop.f32.mrb[148].mxu0  ;;  %v7977_v52 = vpop.f32.mrb[148].mxu1 }
 0xcae   :  { %v7984_v27 = vadd.f32 %v7936_v58, %v15265_v47  ;;  %v7986_v43 = vadd.f32 %v7977_v52, %v15266_v3  ;;  %v7938_v12 = vpop.f32.mrb[149].mxu0  ;;  %v7979_v20 = vpop.f32.mrb[149].mxu1 }
 0xcaf   :  { %10968 = vtanh.f32 %v8009_v4  ;;  %v7985_v28 = vadd.f32 %v7938_v12, %v15267_v36  ;;  %v7987_v37 = vadd.f32 %v7979_v20, %v15268_v59  ;;  %v7940_v11 = vpop.f32.mrb[150].mxu0  ;;  %v7981_v60 = vpop.f32.mrb[150].mxu1  ;;  %v14237_v16 = vsel %vm2658_vm7, %v8009_v4, %v14062_v62  ;;  %v14249_v12 = vld [vmem:[#allocation19 + $0x8] ss:$16 sps:$4 sm:$0xff]   ;;  %v14255_v20 = vld [vmem:[#allocation19 + $0x2c] ss:$16 sps:$4 sm:$0xff]  }
 0xcb0   :  { %v10073_v61 = vmul.f32 -1.442695, %v7984_v27  ;;  %v7941_v32 = vpop.f32.mrb[151].mxu0  ;;  %v7982_v24 = vpop.f32.mrb[151].mxu1  ;;  %v14246_v27 = vld [vmem:[#allocation19] ss:$16 sps:$4 sm:$0xff]  }
 0xcb1   :  { %v10074_v34 = vmul.f32 -1.442695, %v7985_v28  ;;  %v10075_v2 = vmul.f32 -1.442695, %v7987_v37  ;;  %v14263_v36 = vld [vmem:[#allocation19 + $0x28] ss:$16 sps:$4 sm:$0xff]  }
 0xcb2   :  { %10970 = vpow2.f32 %v10073_v61  ;;  %v14266_v28 = vld [vmem:[#allocation19 + $0x44] ss:$16 sps:$4 sm:$0xff]   ;;  %v14269_v59 = vld [vmem:[#allocation19 + $0x4c] ss:$16 sps:$4 sm:$0xff]   ;;  %v14272_v60 = vld [vmem:[#allocation19 + $0x40] ss:$16 sps:$4 sm:$0xff]  }
 0xcb3   :  { %10972 = vpow2.f32 %v10074_v34  ;;  %v14275_v61 = vld [vmem:[#allocation19 + $0x48] ss:$16 sps:$4 sm:$0xff]   ;;  %v14278_v24 = vld [vmem:[#allocation19 + $0x64] ss:$16 sps:$4 sm:$0xff]   ;;  %v14281_v34 = vld [vmem:[#allocation19 + $0x6c] ss:$16 sps:$4 sm:$0xff]  }
 0xcb4   :  { %10974 = vpow2.f32 %v10075_v2 }
 0xcb5   :  { %10976 = vtanh.f32 %v7986_v43  ;;  %v14260_v43 = vld [vmem:[#allocation19 + $0x20] ss:$16 sps:$4 sm:$0xff]  }
 0xcb9   :  { %v10969_v53 = vpop.eup %10968 }
 0xcba   :  { %v8011_v55 = vmul.f32 %v10969_v53, %v10967_v25 }
 0xcbc   :  { %v10971_v58 = vpop.eup %10970  ;;  %v14242_v52 = vsel %vm2658_vm7, %v8011_v55, %v14069_v8  ;;  %v14252_v8 = vld [vmem:[#allocation19 + $0x24] ss:$16 sps:$4 sm:$0xff]  }
 0xcbd   :  { %v10973_v47 = vpop.eup %10972  ;;  %v8015_v3 = vadd.f32 1.0, %v10971_v58  ;;  %v8044_v62 = vpack.c.bf16 %v14242_v52, %v14242_v52  ;;  %v14285_v58 = vld [vmem:[#allocation19 + $0x60] ss:$16 sps:$4 sm:$0xff]  }
 0xcbe   :  { %v8021_v4 = vadd.f32 1.0, %v10973_v47  ;;  %v10975_v37 = vpop.eup %10974  ;;  %v14288_v47 = vld [vmem:[#allocation19 + $0x68] ss:$16 sps:$4 sm:$0xff]  }
 0xcbf   :  { %10978 = vrcp.f32 %v8015_v3  ;;  %8078 = vmatmul.mubr.bf16.vlgmr.msra.gmra.mrb[152].mxu0 %v8044_v62  ;;  %8119 = vmatmul.mubr.bf16.vlgmr.msra.gmra.mrb[152].mxu1 %v8044_v62  ;;  %v10977_v11 = vpop.eup %10976  ;;  %v8028_v2 = vadd.f32 1.0, %v10975_v37  ;;  %v14291_v62 = vld [vmem:[#allocation19 + $0x84] ss:$16 sps:$4 sm:$0xff]  }
 0xcc0   :  { %10980 = vrcp.f32 %v8021_v4  ;;  %8137 = vmatpush1.bf16.msra.mxu0 %v14246_v27  ;;  %8178 = vmatpush1.bf16.msra.mxu1 %v14249_v12  ;;  %v14294_v4 = vld [vmem:[#allocation19 + $0x8c] ss:$16 sps:$4 sm:$0xff]  }
 0xcc1   :  { %8138 = vmatprep.subr.bf16.mxu0 %v14252_v8  ;;  %8179 = vmatprep.subr.bf16.mxu1 %v14255_v20  ;;  %15269 = vst [vmem:[#allocation62_spill] sm:$0xff] %v14294_v4  ;;  %10982 = vrcp.f32 %v8028_v2  ;;  %v14314_v2 = vld [vmem:[#allocation19 + $0xa0] ss:$16 sps:$4 sm:$0xff]  }
 0xcc2   :  { %8168 = vmatprep.mubr.bf16.mxu0 %v14950_v31  ;;  %8209 = vmatprep.mubr.bf16.mxu1 %v14950_v31  ;;  %15274 = vst [vmem:[#allocation48_spill] sm:$0xff] %v14314_v2 }
 0xcc4   :  { %8139 = vmatpush1.bf16.msra.mxu0 %v14260_v43  ;;  %8180 = vmatpush1.bf16.msra.mxu1 %v14263_v36 }
 0xcc5   :  { %8140 = vmatprep.subr.bf16.mxu0 %v14266_v28  ;;  %8181 = vmatprep.subr.bf16.mxu1 %v14269_v59 }
 0xcc8   :  { %8141 = vmatpush1.bf16.msra.mxu0 %v14272_v60  ;;  %8182 = vmatpush1.bf16.msra.mxu1 %v14275_v61 }
 0xcc9   :  { %v10979_v32 = vpop.eup %10978  ;;  %8142 = vmatprep.subr.bf16.mxu0 %v14278_v24  ;;  %8183 = vmatprep.subr.bf16.mxu1 %v14281_v34 }
 0xcca   :  { %v10981_v25 = vpop.eup %10980  ;;  %v8032_v53 = vmul.f32 %v10979_v32, %v10977_v11  ;;  %v14302_v11 = vld [vmem:[#allocation19 + $0x80] ss:$16 sps:$4 sm:$0xff]   ;;  %v14305_v32 = vld [vmem:[#allocation19 + $0x88] ss:$16 sps:$4 sm:$0xff]  }
 0xccb   :  { %v8031_v55 = vmul.f32 %v10981_v25, %v14096_v13  ;;  %15270 = vst [vmem:[#allocation64_spill] sm:$0xff] %v14302_v11  ;;  %15271 = vst [vmem:[#allocation63_spill] sm:$0xff] %v14305_v32  ;;  %v14308_v25 = vld [vmem:[#allocation19 + $0xa4] ss:$16 sps:$4 sm:$0xff]  }
 0xccc   :  { %8143 = vmatpush1.bf16.msra.mxu0 %v14285_v58  ;;  %8184 = vmatpush1.bf16.msra.mxu1 %v14288_v47  ;;  %15272 = vst [vmem:[#allocation66_spill] sm:$0xff] %v14308_v25 }
 0xccd   :  { %v8033_v3 = vadd.f32 %v8032_v53, %v8031_v55  ;;  %8144 = vmatprep.subr.bf16.mxu0 %v14291_v62  ;;  %8185 = vmatprep.subr.bf16.mxu1 %v14294_v4  ;;  %v14311_v53 = vld [vmem:[#allocation19 + $0xac] ss:$16 sps:$4 sm:$0xff]   ;;  %v14320_v55 = vld [vmem:[#allocation19 + $0xc4] ss:$16 sps:$4 sm:$0xff]   ;;  %v14341_v4 = vld [vmem:[#allocation19 + $0xe8] ss:$16 sps:$4 sm:$0xff]  }
 0xcce   :  { %15273 = vst [vmem:[#allocation46_spill] sm:$0xff] %v14311_v53  ;;  %15276 = vst [vmem:[#allocation57_spill] sm:$0xff] %v14320_v55 }
 0xccf   :  { %10984 = vtanh.f32 %v8033_v3  ;;  %v14300_v37 = vsel %vm2659_vm8, %v8033_v3, %v14096_v13  ;;  %v14317_v13 = vld [vmem:[#allocation19 + $0xa8] ss:$16 sps:$4 sm:$0xff]   ;;  %v14323_v3 = vld [vmem:[#allocation19 + $0xcc] ss:$16 sps:$4 sm:$0xff]  }
 0xcd0   :  { %8145 = vmatpush1.bf16.msra.mxu0 %v14302_v11  ;;  %8186 = vmatpush1.bf16.msra.mxu1 %v14305_v32  ;;  %15275 = vst [vmem:[#allocation47_spill] sm:$0xff] %v14317_v13  ;;  %15277 = vst [vmem:[#allocation60_spill] sm:$0xff] %v14323_v3  ;;  %v14326_v32 = vld [vmem:[#allocation19 + $0xc0] ss:$16 sps:$4 sm:$0xff]   ;;  %v14332_v11 = vld [vmem:[#allocation19 + $0xe4] ss:$16 sps:$4 sm:$0xff]  }
 0xcd1   :  { %8146 = vmatprep.subr.bf16.mxu0 %v14308_v25  ;;  %8187 = vmatprep.subr.bf16.mxu1 %v14311_v53  ;;  %v10983_v25 = vpop.eup %10982  ;;  %v14329_v53 = vld [vmem:[#allocation19 + $0xc8] ss:$16 sps:$4 sm:$0xff]   ;;  %15279 = vst [vmem:[#allocation61_spill] sm:$0xff] %v14332_v11 }
 0xcd2   :  { %15278 = vst [vmem:[#allocation59_spill] sm:$0xff] %v14329_v53 }
 0xcd4   :  { %8147 = vmatpush1.bf16.msra.mxu0 %v14314_v2  ;;  %8188 = vmatpush1.bf16.msra.mxu1 %v14317_v13  ;;  %v14335_v13 = vld [vmem:[#allocation19 + $0xec] ss:$16 sps:$4 sm:$0xff]  }
 0xcd5   :  { %8148 = vmatprep.subr.bf16.mxu0 %v14320_v55  ;;  %8189 = vmatprep.subr.bf16.mxu1 %v14323_v3  ;;  %v14338_v3 = vld [vmem:[#allocation19 + $0xe0] ss:$16 sps:$4 sm:$0xff]  }
 0xcd8   :  { %8149 = vmatpush1.bf16.msra.mxu0 %v14326_v32  ;;  %8190 = vmatpush1.bf16.msra.mxu1 %v14329_v53 }
 0xcd9   :  { %v10985_v2 = vpop.eup %10984  ;;  %8150 = vmatprep.subr.bf16.mxu0 %v14332_v11  ;;  %8191 = vmatprep.subr.bf16.mxu1 %v14335_v13 }
 0xcda   :  { %v8035_v55 = vmul.f32 %v10985_v2, %v10983_v25  ;;  %v15280_v25 = vld [vmem:[#allocation33_spill] sm:$0xff] }
 0xcdc   :  { %8151 = vmatpush1.bf16.msra.mxu0 %v14338_v3  ;;  %8192 = vmatpush1.bf16.msra.mxu1 %v14341_v4  ;;  %v14347_v53 = vsel %vm2659_vm8, %v8035_v55, %v14117_v63  ;;  %v15281_v55 = vld [vmem:[#allocation36_spill] sm:$0xff] }
 0xcdd   :  { %v8135_v11 = vpack.c.bf16 %v14347_v53, %v14347_v53  ;;  %8279 = vmatprep.subr.bf16.mxu0 %v14121_v50  ;;  %8320 = vmatprep.subr.bf16.mxu1 %v14124_v33 }
 0xcdf   :  { %8169 = vmatmul.mubr.bf16.vlgmr.msra.gmra.mrb[156].mxu0 %v8135_v11  ;;  %8210 = vmatmul.mubr.bf16.vlgmr.msra.gmra.mrb[156].mxu1 %v8135_v11 }
 0xce0   :  { %8280 = vmatpush1.bf16.msra.mxu0 %v14127_v14  ;;  %8321 = vmatpush1.bf16.msra.mxu1 %v14130_v26 }
 0xce1   :  { %8281 = vmatprep.subr.bf16.mxu0 %v14133_v9  ;;  %8322 = vmatprep.subr.bf16.mxu1 %v14136_v22 }
 0xce2   :  { %8311 = vmatprep.mubr.bf16.mxu0 %v14950_v31  ;;  %8352 = vmatprep.mubr.bf16.mxu1 %v14950_v31 }
 0xce4   :  { %8282 = vmatpush1.bf16.msra.mxu0 %v14141_v57  ;;  %8323 = vmatpush1.bf16.msra.mxu1 %v14144_v17 }
 0xce5   :  { %8283 = vmatprep.subr.bf16.mxu0 %v14147_v5  ;;  %8324 = vmatprep.subr.bf16.mxu1 %v14150_v45 }
 0xce8   :  { %8284 = vmatpush1.bf16.msra.mxu0 %v14153_v38  ;;  %8325 = vmatpush1.bf16.msra.mxu1 %v14156_v44 }
 0xce9   :  { %8285 = vmatprep.subr.bf16.mxu0 %v14159_v15  ;;  %8326 = vmatprep.subr.bf16.mxu1 %v14162_v23 }
 0xcec   :  { %8286 = vmatpush1.bf16.msra.mxu0 %v14165_v30  ;;  %8327 = vmatpush1.bf16.msra.mxu1 %v14168_v19 }
 0xced   :  { %8287 = vmatprep.subr.bf16.mxu0 %v14171_v29  ;;  %8328 = vmatprep.subr.bf16.mxu1 %v14174_v10 }
 0xcf0   :  { %8288 = vmatpush1.bf16.msra.mxu0 %v14177_v42  ;;  %8329 = vmatpush1.bf16.msra.mxu1 %v14180_v51 }
 0xcf1   :  { %8289 = vmatprep.subr.bf16.mxu0 %v14183_v35  ;;  %8330 = vmatprep.subr.bf16.mxu1 %v14186_v54 }
 0xcf4   :  { %8290 = vmatpush1.bf16.msra.mxu0 %v14189_v41  ;;  %8331 = vmatpush1.bf16.msra.mxu1 %v14192_v46  ;;  %v15283_v46 = vld [vmem:[#allocation37_spill] sm:$0xff] }
 0xcf5   :  { %8291 = vmatprep.subr.bf16.mxu0 %v14195_v40  ;;  %8332 = vmatprep.subr.bf16.mxu1 %v14198_v39  ;;  %v15282_v40 = vld [vmem:[#allocation35_spill] sm:$0xff] }
 0xcf8   :  { %8292 = vmatpush1.bf16.msra.mxu0 %v14201_v7  ;;  %8333 = vmatpush1.bf16.msra.mxu1 %v14204_v49 }
 0xcf9   :  { %8293 = vmatprep.subr.bf16.mxu0 %v14207_v0  ;;  %8334 = vmatprep.subr.bf16.mxu1 %v14210_v21 }
 0xcfc   :  { %8294 = vmatpush1.bf16.msra.mxu0 %v14213_v48  ;;  %8335 = vmatpush1.bf16.msra.mxu1 %v14216_v6 }
 0xcfd   :  { %8370 = vmatprep.subr.bf16.mxu0 %v14219_v56  ;;  %8411 = vmatprep.subr.bf16.mxu1 %v14222_v1 }
 0xd92   :  { %v8079_v63 = vpop.f32.mrb[152].mxu0  ;;  %v8120_v11 = vpop.f32.mrb[152].mxu1 }
 0xd93   :  { %v8127_v2 = vadd.f32 %v8079_v63, %v15280_v25  ;;  %v8129_v7 = vadd.f32 %v8120_v11, %v15281_v55  ;;  %v8081_v39 = vpop.f32.mrb[153].mxu0  ;;  %v8122_v49 = vpop.f32.mrb[153].mxu1  ;;  %v15286_v25 = vld [vmem:[#allocation110_spill] sm:$0xff]  ;;  %v15287_v55 = vld [vmem:[#allocation111_spill] sm:$0xff] }
 0xd94   :  { %v8128_v0 = vadd.f32 %v8081_v39, %v15282_v40  ;;  %v8130_v21 = vadd.f32 %v8122_v49, %v15283_v46  ;;  %v8083_v41 = vpop.f32.mrb[154].mxu0  ;;  %v8124_v48 = vpop.f32.mrb[154].mxu1 }
 0xd95   :  { %v10076_v54 = vmul.f32 -1.442695, %v8127_v2  ;;  %v8084_v6 = vpop.f32.mrb[155].mxu0  ;;  %v8125_v35 = vpop.f32.mrb[155].mxu1 }
 0xd96   :  { %v10077_v56 = vmul.f32 -1.442695, %v8128_v0  ;;  %v10078_v1 = vmul.f32 -1.442695, %v8130_v21  ;;  %v15284_v21 = vld [vmem:[#allocation108_spill] sm:$0xff] }
 0xd97   :  { %10986 = vpow2.f32 %v10076_v54 }
 0xd98   :  { %10988 = vpow2.f32 %v10077_v56 }
 0xd99   :  { %10990 = vpow2.f32 %v10078_v1 }
 0xd9a   :  { %10992 = vtanh.f32 %v8129_v7 }
 0xda1   :  { %v10987_v51 = vpop.eup %10986 }
 0xda2   :  { %v10989_v42 = vpop.eup %10988  ;;  %v8225_v63 = vadd.f32 1.0, %v10987_v51  ;;  %v15285_v51 = vld [vmem:[#allocation109_spill] sm:$0xff] }
 0xda3   :  { %v8231_v11 = vadd.f32 1.0, %v10989_v42  ;;  %v10991_v40 = vpop.eup %10990 }
 0xda4   :  { %10994 = vrcp.f32 %v8225_v63  ;;  %v10993_v39 = vpop.eup %10992  ;;  %v8238_v48 = vadd.f32 1.0, %v10991_v40 }
 0xda5   :  { %10996 = vrcp.f32 %v8231_v11 }
 0xda6   :  { %10998 = vrcp.f32 %v8238_v48 }
 0xdae   :  { %v10995_v46 = vpop.eup %10994 }
 0xdaf   :  { %v10997_v41 = vpop.eup %10996  ;;  %v8242_v49 = vmul.f32 %v10995_v46, %v10993_v39 }
 0xdb0   :  { %v8241_v35 = vmul.f32 %v10997_v41, %v14237_v16 }
 0xdb2   :  { %v8243_v0 = vadd.f32 %v8242_v49, %v8241_v35  ;;  %v8170_v54 = vpop.f32.mrb[156].mxu0  ;;  %v8211_v6 = vpop.f32.mrb[156].mxu1 }
 0xdb3   :  { %v8218_v56 = vadd.f32 %v8170_v54, %v15284_v21  ;;  %v8220_v1 = vadd.f32 %v8211_v6, %v15285_v51  ;;  %v8172_v7 = vpop.f32.mrb[157].mxu0  ;;  %v8213_v42 = vpop.f32.mrb[157].mxu1 }
 0xdb4   :  { %11000 = vtanh.f32 %v8243_v0  ;;  %v8219_v2 = vadd.f32 %v8172_v7, %v15286_v25  ;;  %v8221_v63 = vadd.f32 %v8213_v42, %v15287_v55  ;;  %v8174_v11 = vpop.f32.mrb[158].mxu0  ;;  %v8215_v39 = vpop.f32.mrb[158].mxu1  ;;  %v14399_v40 = vsel %vm3280_vm9, %v8243_v0, %v14237_v16 }
 0xdb5   :  { %v10079_v46 = vmul.f32 -1.442695, %v8218_v56  ;;  %v8175_v41 = vpop.f32.mrb[159].mxu0  ;;  %v8216_v49 = vpop.f32.mrb[159].mxu1 }
 0xdb6   :  { %v10080_v48 = vmul.f32 -1.442695, %v8219_v2  ;;  %v10999_v35 = vpop.eup %10998  ;;  %v10081_v6 = vmul.f32 -1.442695, %v8221_v63  ;;  %v15289_v49 = vld [vmem:[#allocation64_spill] sm:$0xff] }
 0xdb7   :  { %11002 = vpow2.f32 %v10079_v46  ;;  %v15288_v46 = vld [vmem:[#allocation62_spill] sm:$0xff] }
 0xdb8   :  { %11004 = vpow2.f32 %v10080_v48  ;;  %v15290_v48 = vld [vmem:[#allocation63_spill] sm:$0xff] }
 0xdb9   :  { %11006 = vpow2.f32 %v10081_v6  ;;  %v15293_v6 = vld [vmem:[#allocation48_spill] sm:$0xff] }
 0xdba   :  { %11008 = vtanh.f32 %v8220_v1 }
 0xdbe   :  { %v11001_v54 = vpop.eup %11000 }
 0xdbf   :  { %v8245_v21 = vmul.f32 %v11001_v54, %v10999_v35  ;;  %v15291_v35 = vld [vmem:[#allocation66_spill] sm:$0xff] }
 0xdc0   :  { %v15292_v54 = vld [vmem:[#allocation46_spill] sm:$0xff] }
 0xdc1   :  { %v11003_v51 = vpop.eup %11002  ;;  %v14404_v7 = vsel %vm3280_vm9, %v8245_v21, %v14242_v52  ;;  %v15294_v21 = vld [vmem:[#allocation47_spill] sm:$0xff] }
 0xdc2   :  { %v11005_v42 = vpop.eup %11004  ;;  %v8249_v25 = vadd.f32 1.0, %v11003_v51  ;;  %v8278_v16 = vpack.c.bf16 %v14404_v7, %v14404_v7  ;;  %v15295_v51 = vld [vmem:[#allocation57_spill] sm:$0xff] }
 0xdc3   :  { %v8255_v0 = vadd.f32 1.0, %v11005_v42  ;;  %v11007_v52 = vpop.eup %11006  ;;  %v15296_v42 = vld [vmem:[#allocation60_spill] sm:$0xff] }
 0xdc4   :  { %11010 = vrcp.f32 %v8249_v25  ;;  %8312 = vmatmul.mubr.bf16.vlgmr.msra.gmra.mrb[160].mxu0 %v8278_v16  ;;  %8353 = vmatmul.mubr.bf16.vlgmr.msra.gmra.mrb[160].mxu1 %v8278_v16  ;;  %v11009_v56 = vpop.eup %11008  ;;  %v8262_v63 = vadd.f32 1.0, %v11007_v52 }
 0xdc5   :  { %11012 = vrcp.f32 %v8255_v0  ;;  %8371 = vmatpush1.bf16.msra.mxu0 %v14246_v27  ;;  %8412 = vmatpush1.bf16.msra.mxu1 %v14249_v12  ;;  %v15298_v0 = vld [vmem:[#allocation61_spill] sm:$0xff] }
 0xdc6   :  { %8372 = vmatprep.subr.bf16.mxu0 %v14252_v8  ;;  %8413 = vmatprep.subr.bf16.mxu1 %v14255_v20  ;;  %11014 = vrcp.f32 %v8262_v63  ;;  %v15302_v63 = vld [vmem:[#allocation76_spill] sm:$0xff] }
 0xdc7   :  { %8402 = vmatprep.mubr.bf16.mxu0 %v14950_v31  ;;  %8443 = vmatprep.mubr.bf16.mxu1 %v14950_v31 }
 0xdc9   :  { %8373 = vmatpush1.bf16.msra.mxu0 %v14260_v43  ;;  %8414 = vmatpush1.bf16.msra.mxu1 %v14263_v36 }
 0xdca   :  { %8374 = vmatprep.subr.bf16.mxu0 %v14266_v28  ;;  %8415 = vmatprep.subr.bf16.mxu1 %v14269_v59 }
 0xdcd   :  { %8375 = vmatpush1.bf16.msra.mxu0 %v14272_v60  ;;  %8416 = vmatpush1.bf16.msra.mxu1 %v14275_v61 }
 0xdce   :  { %v11011_v1 = vpop.eup %11010  ;;  %8376 = vmatprep.subr.bf16.mxu0 %v14278_v24  ;;  %8417 = vmatprep.subr.bf16.mxu1 %v14281_v34 }
 0xdcf   :  { %v11013_v2 = vpop.eup %11012  ;;  %v8266_v55 = vmul.f32 %v11011_v1, %v11009_v56 }
 0xdd0   :  { %v8265_v11 = vmul.f32 %v11013_v2, %v14300_v37  ;;  %v11015_v25 = vpop.eup %11014  ;;  %v15300_v2 = vld [vmem:[#allocation34_spill] sm:$0xff] }
 0xdd1   :  { %8377 = vmatpush1.bf16.msra.mxu0 %v14285_v58  ;;  %8418 = vmatpush1.bf16.msra.mxu1 %v14288_v47 }
 0xdd2   :  { %v8267_v39 = vadd.f32 %v8266_v55, %v8265_v11  ;;  %8378 = vmatprep.subr.bf16.mxu0 %v14291_v62  ;;  %8419 = vmatprep.subr.bf16.mxu1 %v15288_v46  ;;  %v15301_v55 = vld [vmem:[#allocation73_spill] sm:$0xff]  ;;  %v15303_v11 = vld [vmem:[#allocation75_spill] sm:$0xff] }
 0xdd4   :  { %11016 = vtanh.f32 %v8267_v39  ;;  %v14430_v41 = vsel %vm3281_vm10, %v8267_v39, %v14300_v37  ;;  %v15297_v37 = vld [vmem:[#allocation59_spill] sm:$0xff]  ;;  %v15304_v39 = vld [vmem:[#allocation77_spill] sm:$0xff] }
 0xdd5   :  { %8379 = vmatpush1.bf16.msra.mxu0 %v15289_v49  ;;  %8420 = vmatpush1.bf16.msra.mxu1 %v15290_v48 }
 0xdd6   :  { %8380 = vmatprep.subr.bf16.mxu0 %v15291_v35  ;;  %8421 = vmatprep.subr.bf16.mxu1 %v15292_v54 }
 0xdd9   :  { %8381 = vmatpush1.bf16.msra.mxu0 %v15293_v6  ;;  %8422 = vmatpush1.bf16.msra.mxu1 %v15294_v21 }
 0xdda   :  { %8382 = vmatprep.subr.bf16.mxu0 %v15295_v51  ;;  %8423 = vmatprep.subr.bf16.mxu1 %v15296_v42 }
 0xddd   :  { %8383 = vmatpush1.bf16.msra.mxu0 %v14326_v32  ;;  %8424 = vmatpush1.bf16.msra.mxu1 %v15297_v37 }
 0xdde   :  { %v11017_v16 = vpop.eup %11016  ;;  %8384 = vmatprep.subr.bf16.mxu0 %v15298_v0  ;;  %8425 = vmatprep.subr.bf16.mxu1 %v14335_v13 }
 0xddf   :  { %v8269_v52 = vmul.f32 %v11017_v16, %v11015_v25  ;;  %v15305_v25 = vld [vmem:[#allocation78_spill] sm:$0xff]  ;;  %v15306_v16 = vld [vmem:[#allocation80_spill] sm:$0xff] }
 0xde1   :  { %8385 = vmatpush1.bf16.msra.mxu0 %v14338_v3  ;;  %8426 = vmatpush1.bf16.msra.mxu1 %v14341_v4  ;;  %v14449_v56 = vsel %vm3281_vm10, %v8269_v52, %v14347_v53  ;;  %v15299_v53 = vld [vmem:[#allocation69_spill] sm:$0xff]  ;;  %v15307_v52 = vld [vmem:[#allocation86_spill] sm:$0xff] }
 0xde2   :  { %v8369_v1 = vpack.c.bf16 %v14449_v56, %v14449_v56  ;;  %8513 = vmatprep.subr.bf16.mxu0 %v14121_v50  ;;  %8554 = vmatprep.subr.bf16.mxu1 %v14124_v33 }
 0xde4   :  { %8403 = vmatmul.mubr.bf16.vlgmr.msra.gmra.mrb[164].mxu0 %v8369_v1  ;;  %8444 = vmatmul.mubr.bf16.vlgmr.msra.gmra.mrb[164].mxu1 %v8369_v1  ;;  %v15308_v1 = vld [vmem:[#allocation87_spill] sm:$0xff] }
 0xde5   :  { %8514 = vmatpush1.bf16.msra.mxu0 %v14127_v14  ;;  %8555 = vmatpush1.bf16.msra.mxu1 %v14130_v26 }
 0xde6   :  { %8515 = vmatprep.subr.bf16.mxu0 %v14133_v9  ;;  %8556 = vmatprep.subr.bf16.mxu1 %v14136_v22 }
 0xde7   :  { %8545 = vmatprep.mubr.bf16.mxu0 %v14950_v31  ;;  %8586 = vmatprep.mubr.bf16.mxu1 %v14950_v31 }
 0xde9   :  { %8516 = vmatpush1.bf16.msra.mxu0 %v14141_v57  ;;  %8557 = vmatpush1.bf16.msra.mxu1 %v14144_v17 }
 0xdea   :  { %8517 = vmatprep.subr.bf16.mxu0 %v14147_v5  ;;  %8558 = vmatprep.subr.bf16.mxu1 %v14150_v45 }
 0xded   :  { %8518 = vmatpush1.bf16.msra.mxu0 %v14153_v38  ;;  %8559 = vmatpush1.bf16.msra.mxu1 %v14156_v44 }
 0xdee   :  { %8519 = vmatprep.subr.bf16.mxu0 %v14159_v15  ;;  %8560 = vmatprep.subr.bf16.mxu1 %v14162_v23  ;;  %v15317_v23 = vld [vmem:[#allocation71_spill] sm:$0xff]  ;;  %v15318_v15 = vld [vmem:[#allocation49_spill] sm:$0xff] }
 0xdf1   :  { %8520 = vmatpush1.bf16.msra.mxu0 %v14165_v30  ;;  %8561 = vmatpush1.bf16.msra.mxu1 %v14168_v19  ;;  %v15316_v19 = vld [vmem:[#allocation72_spill] sm:$0xff] }
 0xdf2   :  { %8521 = vmatprep.subr.bf16.mxu0 %v14171_v29  ;;  %8562 = vmatprep.subr.bf16.mxu1 %v14174_v10  ;;  %v15309_v10 = vld [vmem:[#allocation88_spill] sm:$0xff]  ;;  %v15315_v29 = vld [vmem:[#allocation70_spill] sm:$0xff] }
 0xdf5   :  { %8522 = vmatpush1.bf16.msra.mxu0 %v15299_v53  ;;  %8563 = vmatpush1.bf16.msra.mxu1 %v15300_v2  ;;  %v15310_v53 = vld [vmem:[#allocation89_spill] sm:$0xff] }
 0xdf6   :  { %8523 = vmatprep.subr.bf16.mxu0 %v15301_v55  ;;  %8564 = vmatprep.subr.bf16.mxu1 %v15302_v63  ;;  %v15311_v2 = vld [vmem:[#allocation41_spill] sm:$0xff]  ;;  %v15312_v55 = vld [vmem:[#allocation44_spill] sm:$0xff]  ;;  %v15313_v63 = vld [vmem:[#allocation43_spill] sm:$0xff] }
 0xdf9   :  { %8524 = vmatpush1.bf16.msra.mxu0 %v15303_v11  ;;  %8565 = vmatpush1.bf16.msra.mxu1 %v15304_v39  ;;  %v15314_v11 = vld [vmem:[#allocation45_spill] sm:$0xff] }
 0xdfa   :  { %8525 = vmatprep.subr.bf16.mxu0 %v15305_v25  ;;  %8566 = vmatprep.subr.bf16.mxu1 %v15306_v16 }
 0xdfd   :  { %8526 = vmatpush1.bf16.msra.mxu0 %v15307_v52  ;;  %8567 = vmatpush1.bf16.msra.mxu1 %v15308_v1 }
 0xdfe   :  { %8527 = vmatprep.subr.bf16.mxu0 %v15309_v10  ;;  %8568 = vmatprep.subr.bf16.mxu1 %v15310_v53 }
 0xe01   :  { %8528 = vmatpush1.bf16.msra.mxu0 %v15311_v2  ;;  %8569 = vmatpush1.bf16.msra.mxu1 %v15312_v55 }
 0xe02   :  { %8604 = vmatprep.subr.bf16.mxu0 %v15313_v63  ;;  %8645 = vmatprep.subr.bf16.mxu1 %v15314_v11 }
 0xe97   :  { %v8313_v39 = vpop.f32.mrb[160].mxu0  ;;  %v8354_v25 = vpop.f32.mrb[160].mxu1 }
 0xe98   :  { %v8361_v16 = vadd.f32 %v8313_v39, %v15315_v29  ;;  %v8363_v52 = vadd.f32 %v8354_v25, %v15316_v19  ;;  %v8315_v30 = vpop.f32.mrb[161].mxu0  ;;  %v8356_v1 = vpop.f32.mrb[161].mxu1 }
 0xe99   :  { %v8362_v10 = vadd.f32 %v8315_v30, %v15317_v23  ;;  %v8364_v53 = vadd.f32 %v8356_v1, %v15318_v15  ;;  %v8317_v44 = vpop.f32.mrb[162].mxu0  ;;  %v8358_v2 = vpop.f32.mrb[162].mxu1  ;;  %v15322_v1 = vld [vmem:[#allocation107_spill] sm:$0xff] }
 0xe9a   :  { %v10082_v38 = vmul.f32 -1.442695, %v8361_v16  ;;  %v8318_v55 = vpop.f32.mrb[163].mxu0  ;;  %v8359_v45 = vpop.f32.mrb[163].mxu1  ;;  %v15321_v16 = vld [vmem:[#allocation106_spill] sm:$0xff] }
 0xe9b   :  { %v10083_v63 = vmul.f32 -1.442695, %v8362_v10  ;;  %v10084_v11 = vmul.f32 -1.442695, %v8364_v53  ;;  %v15319_v53 = vld [vmem:[#allocation104_spill] sm:$0xff] }
 0xe9c   :  { %11018 = vpow2.f32 %v10082_v38 }
 0xe9d   :  { %11020 = vpow2.f32 %v10083_v63 }
 0xe9e   :  { %11022 = vpow2.f32 %v10084_v11 }
 0xe9f   :  { %11024 = vtanh.f32 %v8363_v52 }
 0xea6   :  { %v11019_v5 = vpop.eup %11018 }
 0xea7   :  { %v11021_v17 = vpop.eup %11020  ;;  %v8459_v29 = vadd.f32 1.0, %v11019_v5  ;;  %v15320_v5 = vld [vmem:[#allocation105_spill] sm:$0xff] }
 0xea8   :  { %v8465_v19 = vadd.f32 1.0, %v11021_v17  ;;  %v11023_v23 = vpop.eup %11022 }
 0xea9   :  { %11026 = vrcp.f32 %v8459_v29  ;;  %v11025_v30 = vpop.eup %11024  ;;  %v8472_v39 = vadd.f32 1.0, %v11023_v23 }
 0xeaa   :  { %11028 = vrcp.f32 %v8465_v19 }
 0xeab   :  { %11030 = vrcp.f32 %v8472_v39 }
 0xeb3   :  { %v11027_v15 = vpop.eup %11026 }
 0xeb4   :  { %v11029_v44 = vpop.eup %11028  ;;  %v8476_v2 = vmul.f32 %v11027_v15, %v11025_v30 }
 0xeb5   :  { %v8475_v45 = vmul.f32 %v11029_v44, %v14399_v40 }
 0xeb7   :  { %v8477_v10 = vadd.f32 %v8476_v2, %v8475_v45  ;;  %v8404_v38 = vpop.f32.mrb[164].mxu0  ;;  %v8445_v55 = vpop.f32.mrb[164].mxu1 }
 0xeb8   :  { %v8452_v63 = vadd.f32 %v8404_v38, %v15319_v53  ;;  %v8454_v11 = vadd.f32 %v8445_v55, %v15320_v5  ;;  %v8406_v25 = vpop.f32.mrb[165].mxu0  ;;  %v8447_v17 = vpop.f32.mrb[165].mxu1 }
 0xeb9   :  { %11032 = vtanh.f32 %v8477_v10  ;;  %v8453_v52 = vadd.f32 %v8406_v25, %v15321_v16  ;;  %v8455_v29 = vadd.f32 %v8447_v17, %v15322_v1  ;;  %v8408_v19 = vpop.f32.mrb[166].mxu0  ;;  %v8449_v30 = vpop.f32.mrb[166].mxu1  ;;  %v14501_v23 = vsel %vm3281_vm10, %v8477_v10, %v14399_v40 }
 0xeba   :  { %v10085_v15 = vmul.f32 -1.442695, %v8452_v63  ;;  %v8409_v44 = vpop.f32.mrb[167].mxu0  ;;  %v8450_v2 = vpop.f32.mrb[167].mxu1 }
 0xebb   :  { %v10086_v39 = vmul.f32 -1.442695, %v8453_v52  ;;  %v11031_v45 = vpop.eup %11030  ;;  %v10087_v55 = vmul.f32 -1.442695, %v8455_v29 }
 0xebc   :  { %11034 = vpow2.f32 %v10085_v15 }
 0xebd   :  { %11036 = vpow2.f32 %v10086_v39 }
 0xebe   :  { %11038 = vpow2.f32 %v10087_v55  ;;  %v15331_v55 = vld [vmem:[#allocation65_spill] sm:$0xff] }
 0xebf   :  { %11040 = vtanh.f32 %v8454_v11 }
 0xec3   :  { %v11033_v38 = vpop.eup %11032 }
 0xec4   :  { %v8479_v53 = vmul.f32 %v11033_v38, %v11031_v45  ;;  %v15326_v38 = vld [vmem:[#allocation74_spill] sm:$0xff] }
 0xec6   :  { %v11035_v5 = vpop.eup %11034  ;;  %v14506_v25 = vsel %vm3281_vm10, %v8479_v53, %v14404_v7  ;;  %v15332_v53 = vld [vmem:[#allocation68_spill] sm:$0xff] }
 0xec7   :  { %v11037_v17 = vpop.eup %11036  ;;  %v8483_v16 = vadd.f32 1.0, %v11035_v5  ;;  %v8512_v40 = vpack.c.bf16 %v14506_v25, %v14506_v25  ;;  %v15334_v5 = vld [vmem:[#allocation69_spill] sm:$0xff] }
 0xec8   :  { %v8489_v10 = vadd.f32 1.0, %v11037_v17  ;;  %v11039_v7 = vpop.eup %11038  ;;  %v15335_v17 = vld [vmem:[#allocation34_spill] sm:$0xff] }
 0xec9   :  { %11042 = vrcp.f32 %v8483_v16  ;;  %8546 = vmatmul.mubr.bf16.vlgmr.msra.gmra.mrb[168].mxu0 %v8512_v40  ;;  %8587 = vmatmul.mubr.bf16.vlgmr.msra.gmra.mrb[168].mxu1 %v8512_v40  ;;  %v11041_v63 = vpop.eup %11040  ;;  %v8496_v29 = vadd.f32 1.0, %v11039_v7  ;;  %v15336_v16 = vld [vmem:[#allocation73_spill] sm:$0xff]  ;;  %v15337_v40 = vld [vmem:[#allocation76_spill] sm:$0xff] }
 0xeca   :  { %11044 = vrcp.f32 %v8489_v10  ;;  %8605 = vmatpush1.bf16.msra.mxu0 %v14246_v27  ;;  %8646 = vmatpush1.bf16.msra.mxu1 %v14249_v12  ;;  %v15338_v10 = vld [vmem:[#allocation75_spill] sm:$0xff]  ;;  %v15339_v7 = vld [vmem:[#allocation77_spill] sm:$0xff] }
 0xecb   :  { %8606 = vmatprep.subr.bf16.mxu0 %v14252_v8  ;;  %8647 = vmatprep.subr.bf16.mxu1 %v14255_v20  ;;  %11046 = vrcp.f32 %v8496_v29  ;;  %v15344_v29 = vld [vmem:[#allocation88_spill] sm:$0xff] }
 0xecc   :  { %8636 = vmatprep.mubr.bf16.mxu0 %v14950_v31  ;;  %8677 = vmatprep.mubr.bf16.mxu1 %v14950_v31 }
 0xece   :  { %8607 = vmatpush1.bf16.msra.mxu0 %v14260_v43  ;;  %8648 = vmatpush1.bf16.msra.mxu1 %v14263_v36 }
 0xecf   :  { %8608 = vmatprep.subr.bf16.mxu0 %v14266_v28  ;;  %8649 = vmatprep.subr.bf16.mxu1 %v14269_v59 }
 0xed2   :  { %8609 = vmatpush1.bf16.msra.mxu0 %v14272_v60  ;;  %8650 = vmatpush1.bf16.msra.mxu1 %v14275_v61 }
 0xed3   :  { %v11043_v11 = vpop.eup %11042  ;;  %8610 = vmatprep.subr.bf16.mxu0 %v14278_v24  ;;  %8651 = vmatprep.subr.bf16.mxu1 %v14281_v34 }
 0xed4   :  { %v11045_v52 = vpop.eup %11044  ;;  %v8500_v1 = vmul.f32 %v11043_v11, %v11041_v63  ;;  %v15340_v63 = vld [vmem:[#allocation78_spill] sm:$0xff]  ;;  %v15341_v11 = vld [vmem:[#allocation80_spill] sm:$0xff] }
 0xed5   :  { %v8499_v19 = vmul.f32 %v11045_v52, %v14430_v41  ;;  %v11047_v44 = vpop.eup %11046  ;;  %v15342_v52 = vld [vmem:[#allocation86_spill] sm:$0xff] }
 0xed6   :  { %8611 = vmatpush1.bf16.msra.mxu0 %v14285_v58  ;;  %8652 = vmatpush1.bf16.msra.mxu1 %v14288_v47 }
 0xed7   :  { %v8501_v30 = vadd.f32 %v8500_v1, %v8499_v19  ;;  %8612 = vmatprep.subr.bf16.mxu0 %v14291_v62  ;;  %8653 = vmatprep.subr.bf16.mxu1 %v15288_v46  ;;  %v15343_v1 = vld [vmem:[#allocation87_spill] sm:$0xff]  ;;  %v15345_v19 = vld [vmem:[#allocation89_spill] sm:$0xff] }
 0xed9   :  { %11048 = vtanh.f32 %v8501_v30  ;;  %v14532_v15 = vsel %vm3280_vm9, %v8501_v30, %v14430_v41  ;;  %v15346_v30 = vld [vmem:[#allocation41_spill] sm:$0xff] }
 0xeda   :  { %8613 = vmatpush1.bf16.msra.mxu0 %v15289_v49  ;;  %8654 = vmatpush1.bf16.msra.mxu1 %v15290_v48 }
 0xedb   :  { %8614 = vmatprep.subr.bf16.mxu0 %v15291_v35  ;;  %8655 = vmatprep.subr.bf16.mxu1 %v15292_v54 }
 0xede   :  { %8615 = vmatpush1.bf16.msra.mxu0 %v15293_v6  ;;  %8656 = vmatpush1.bf16.msra.mxu1 %v15294_v21 }
 0xedf   :  { %8616 = vmatprep.subr.bf16.mxu0 %v15295_v51  ;;  %8657 = vmatprep.subr.bf16.mxu1 %v15296_v42 }
 0xee2   :  { %8617 = vmatpush1.bf16.msra.mxu0 %v14326_v32  ;;  %8658 = vmatpush1.bf16.msra.mxu1 %v15297_v37 }
 0xee3   :  { %v11049_v41 = vpop.eup %11048  ;;  %8618 = vmatprep.subr.bf16.mxu0 %v15298_v0  ;;  %8659 = vmatprep.subr.bf16.mxu1 %v14335_v13 }
 0xee4   :  { %v8503_v2 = vmul.f32 %v11049_v41, %v11047_v44  ;;  %v15347_v44 = vld [vmem:[#allocation44_spill] sm:$0xff]  ;;  %v15348_v41 = vld [vmem:[#allocation43_spill] sm:$0xff] }
 0xee6   :  { %8619 = vmatpush1.bf16.msra.mxu0 %v14338_v3  ;;  %8660 = vmatpush1.bf16.msra.mxu1 %v14341_v4  ;;  %v14551_v39 = vsel %vm3280_vm9, %v8503_v2, %v14449_v56  ;;  %v15323_v56 = vld [vmem:[#allocation83_spill] sm:$0xff]  ;;  %v15349_v2 = vld [vmem:[#allocation45_spill] sm:$0xff] }
 0xee7   :  { %v8603_v45 = vpack.c.bf16 %v14551_v39, %v14551_v39  ;;  %8747 = vmatprep.subr.bf16.mxu0 %v14121_v50  ;;  %8788 = vmatprep.subr.bf16.mxu1 %v14124_v33  ;;  %v15324_v50 = vld [vmem:[#allocation50_spill] sm:$0xff]  ;;  %v15325_v33 = vld [vmem:[#allocation85_spill] sm:$0xff] }
 0xee9   :  { %8637 = vmatmul.mubr.bf16.vlgmr.msra.gmra.mrb[172].mxu0 %v8603_v45  ;;  %8678 = vmatmul.mubr.bf16.vlgmr.msra.gmra.mrb[172].mxu1 %v8603_v45 }
 0xeea   :  { %8748 = vmatpush1.bf16.msra.mxu0 %v14127_v14  ;;  %8789 = vmatpush1.bf16.msra.mxu1 %v14130_v26  ;;  %v15327_v14 = vld [vmem:[#allocation38_spill] sm:$0xff]  ;;  %v15328_v26 = vld [vmem:[#allocation40_spill] sm:$0xff] }
 0xeeb   :  { %8749 = vmatprep.subr.bf16.mxu0 %v14133_v9  ;;  %8790 = vmatprep.subr.bf16.mxu1 %v14136_v22  ;;  %v15329_v9 = vld [vmem:[#allocation39_spill] sm:$0xff]  ;;  %v15330_v22 = vld [vmem:[#allocation42_spill] sm:$0xff] }
 0xeec   :  { %8779 = vmatprep.mubr.bf16.mxu0 %v14950_v31  ;;  %8820 = vmatprep.mubr.bf16.mxu1 %v14950_v31 }
 0xeee   :  { %8750 = vmatpush1.bf16.msra.mxu0 %v14141_v57  ;;  %8791 = vmatpush1.bf16.msra.mxu1 %v15323_v56  ;;  %v15333_v57 = vld [vmem:[#allocation67_spill] sm:$0xff] }
 0xeef   :  { %8751 = vmatprep.subr.bf16.mxu0 %v15324_v50  ;;  %8792 = vmatprep.subr.bf16.mxu1 %v15325_v33  ;;  %v15350_v50 = vld [vmem:[#allocation52_spill] sm:$0xff] }
 0xef2   :  { %8752 = vmatpush1.bf16.msra.mxu0 %v15326_v38  ;;  %8793 = vmatpush1.bf16.msra.mxu1 %v15327_v14  ;;  %v15351_v38 = vld [vmem:[#allocation51_spill] sm:$0xff] }
 0xef3   :  { %8753 = vmatprep.subr.bf16.mxu0 %v15328_v26  ;;  %8794 = vmatprep.subr.bf16.mxu1 %v15329_v9 }
 0xef6   :  { %8754 = vmatpush1.bf16.msra.mxu0 %v15330_v22  ;;  %8795 = vmatpush1.bf16.msra.mxu1 %v15331_v55  ;;  %v15352_v22 = vld [vmem:[#allocation53_spill] sm:$0xff] }
 0xef7   :  { %8755 = vmatprep.subr.bf16.mxu0 %v15332_v53  ;;  %8796 = vmatprep.subr.bf16.mxu1 %v15333_v57  ;;  %v15353_v53 = vld [vmem:[#allocation54_spill] sm:$0xff] }
 0xefa   :  { %8756 = vmatpush1.bf16.msra.mxu0 %v15334_v5  ;;  %8797 = vmatpush1.bf16.msra.mxu1 %v15335_v17 }
 0xefb   :  { %8757 = vmatprep.subr.bf16.mxu0 %v15336_v16  ;;  %8798 = vmatprep.subr.bf16.mxu1 %v15337_v40 }
 0xefe   :  { %8758 = vmatpush1.bf16.msra.mxu0 %v15338_v10  ;;  %8799 = vmatpush1.bf16.msra.mxu1 %v15339_v7 }
 0xeff   :  { %8759 = vmatprep.subr.bf16.mxu0 %v15340_v63  ;;  %8800 = vmatprep.subr.bf16.mxu1 %v15341_v11 }
 0xf02   :  { %8760 = vmatpush1.bf16.msra.mxu0 %v15342_v52  ;;  %8801 = vmatpush1.bf16.msra.mxu1 %v15343_v1 }
 0xf03   :  { %8761 = vmatprep.subr.bf16.mxu0 %v15344_v29  ;;  %8802 = vmatprep.subr.bf16.mxu1 %v15345_v19 }
 0xf06   :  { %8762 = vmatpush1.bf16.msra.mxu0 %v15346_v30  ;;  %8803 = vmatpush1.bf16.msra.mxu1 %v15347_v44 }
 0xf07   :  { %8838 = vmatprep.subr.bf16.mxu0 %v15348_v41  ;;  %8879 = vmatprep.subr.bf16.mxu1 %v15349_v2 }
 0xf9c   :  { %v8547_v45 = vpop.f32.mrb[168].mxu0  ;;  %v8588_v56 = vpop.f32.mrb[168].mxu1 }
 0xf9d   :  { %v8595_v33 = vadd.f32 %v8547_v45, %v15350_v50  ;;  %v8597_v14 = vadd.f32 %v8588_v56, %v15351_v38  ;;  %v8549_v26 = vpop.f32.mrb[169].mxu0  ;;  %v8590_v9 = vpop.f32.mrb[169].mxu1 }
 0xf9e   :  { %v8596_v55 = vadd.f32 %v8549_v26, %v15352_v22  ;;  %v8598_v57 = vadd.f32 %v8590_v9, %v15353_v53  ;;  %v8551_v5 = vpop.f32.mrb[170].mxu0  ;;  %v8592_v17 = vpop.f32.mrb[170].mxu1  ;;  %v15354_v26 = vld [vmem:[#allocation100_spill] sm:$0xff]  ;;  %v15355_v22 = vld [vmem:[#allocation101_spill] sm:$0xff] }
 0xf9f   :  { %v10088_v16 = vmul.f32 -1.442695, %v8595_v33  ;;  %v8552_v40 = vpop.f32.mrb[171].mxu0  ;;  %v8593_v10 = vpop.f32.mrb[171].mxu1  ;;  %v15357_v17 = vld [vmem:[#allocation103_spill] sm:$0xff] }
 0xfa0   :  { %v10089_v7 = vmul.f32 -1.442695, %v8596_v55  ;;  %v10090_v63 = vmul.f32 -1.442695, %v8598_v57  ;;  %v15356_v57 = vld [vmem:[#allocation102_spill] sm:$0xff] }
 0xfa1   :  { %11050 = vpow2.f32 %v10088_v16 }
 0xfa2   :  { %11052 = vpow2.f32 %v10089_v7 }
 0xfa3   :  { %11054 = vpow2.f32 %v10090_v63 }
 0xfa4   :  { %11056 = vtanh.f32 %v8597_v14 }
 0xfab   :  { %v11051_v11 = vpop.eup %11050 }
 0xfac   :  { %v11053_v52 = vpop.eup %11052  ;;  %v8693_v1 = vadd.f32 1.0, %v11051_v11 }
 0xfad   :  { %v8699_v29 = vadd.f32 1.0, %v11053_v52  ;;  %v11055_v19 = vpop.eup %11054 }
 0xfae   :  { %11058 = vrcp.f32 %v8693_v1  ;;  %v11057_v30 = vpop.eup %11056  ;;  %v8706_v45 = vadd.f32 1.0, %v11055_v19 }
 0xfaf   :  { %11060 = vrcp.f32 %v8699_v29 }
 0xfb0   :  { %11062 = vrcp.f32 %v8706_v45 }
 0xfb8   :  { %v11059_v44 = vpop.eup %11058 }
 0xfb9   :  { %v11061_v41 = vpop.eup %11060  ;;  %v8710_v2 = vmul.f32 %v11059_v44, %v11057_v30 }
 0xfba   :  { %v8709_v56 = vmul.f32 %v11061_v41, %v14501_v23  ;;  %v11063_v29 = vpop.eup %11062 }
 0xfbc   :  { %v8711_v50 = vadd.f32 %v8710_v2, %v8709_v56  ;;  %v8638_v33 = vpop.f32.mrb[172].mxu0  ;;  %v8679_v38 = vpop.f32.mrb[172].mxu1 }
 0xfbd   :  { %v8686_v9 = vadd.f32 %v8638_v33, %v15354_v26  ;;  %v8688_v55 = vadd.f32 %v8679_v38, %v15355_v22  ;;  %v8640_v14 = vpop.f32.mrb[173].mxu0  ;;  %v8681_v53 = vpop.f32.mrb[173].mxu1  ;;  %v11232_v33 = vld [vmem:[#allocation18 + $0x88] ss:$16 sps:$4 sm:$0xff]   ;;  %v11233_v38 = vld [vmem:[#allocation18 + $0xa4] ss:$16 sps:$4 sm:$0xff]  }
 0xfbe   :  { %11064 = vtanh.f32 %v8711_v50  ;;  %v8687_v5 = vadd.f32 %v8640_v14, %v15356_v57  ;;  %v8689_v16 = vadd.f32 %v8681_v53, %v15357_v17  ;;  %v8642_v40 = vpop.f32.mrb[174].mxu0  ;;  %v8683_v10 = vpop.f32.mrb[174].mxu1  ;;  %v14603_v7 = vsel %vm2659_vm8, %v8711_v50, %v14501_v23  ;;  %v11234_v26 = vld [vmem:[#allocation18 + $0xac] ss:$16 sps:$4 sm:$0xff]   ;;  %v11236_v22 = vld [vmem:[#allocation18 + $0xa8] ss:$16 sps:$4 sm:$0xff]  }
 0xfbf   :  { %v10091_v63 = vmul.f32 -1.442695, %v8686_v9  ;;  %v8643_v11 = vpop.f32.mrb[175].mxu0  ;;  %v8684_v52 = vpop.f32.mrb[175].mxu1  ;;  %v11235_v9 = vld [vmem:[#allocation18 + $0xa0] ss:$16 sps:$4 sm:$0xff]  }
 0xfc0   :  { %v10092_v1 = vmul.f32 -1.442695, %v8687_v5  ;;  %v10093_v30 = vmul.f32 -1.442695, %v8689_v16  ;;  %v11238_v14 = vld [vmem:[#allocation18 + $0xcc] ss:$16 sps:$4 sm:$0xff]  }
 0xfc1   :  { %11066 = vpow2.f32 %v10091_v63  ;;  %v11239_v53 = vld [vmem:[#allocation18 + $0xc0] ss:$16 sps:$4 sm:$0xff]   ;;  %v11240_v57 = vld [vmem:[#allocation18 + $0xc8] ss:$16 sps:$4 sm:$0xff]   ;;  %v11241_v5 = vld [vmem:[#allocation18 + $0xe4] ss:$16 sps:$4 sm:$0xff]  }
 0xfc2   :  { %11068 = vpow2.f32 %v10092_v1  ;;  %v11242_v17 = vld [vmem:[#allocation18 + $0xec] ss:$16 sps:$4 sm:$0xff]   ;;  %v11243_v16 = vld [vmem:[#allocation18 + $0xe0] ss:$16 sps:$4 sm:$0xff]   ;;  %v11244_v40 = vld [vmem:[#allocation18 + $0xe8] ss:$16 sps:$4 sm:$0xff]  }
 0xfc3   :  { %11070 = vpow2.f32 %v10093_v30  ;;  %v11245_v10 = vld [vmem:[#allocation19 + $0x4] ss:$16 sps:$4 sm:$0xff]   ;;  %v11246_v63 = vld [vmem:[#allocation19 + $0xc] ss:$16 sps:$4 sm:$0xff]  }
 0xfc4   :  { %11072 = vtanh.f32 %v8688_v55  ;;  %v11237_v55 = vld [vmem:[#allocation18 + $0xc4] ss:$16 sps:$4 sm:$0xff]   ;;  %v15358_v1 = vld [vmem:[#allocation56_spill] sm:$0xff] }
 0xfc8   :  { %v11065_v19 = vpop.eup %11064 }
 0xfc9   :  { %v8713_v44 = vmul.f32 %v11065_v19, %v11063_v29  ;;  %v15359_v19 = vld [vmem:[#allocation55_spill] sm:$0xff] }
 0xfcb   :  { %v11067_v41 = vpop.eup %11066  ;;  %v14608_v2 = vsel %vm2659_vm8, %v8713_v44, %v14506_v25 }
 0xfcc   :  { %v11069_v45 = vpop.eup %11068  ;;  %v8717_v56 = vadd.f32 1.0, %v11067_v41  ;;  %v8746_v23 = vpack.c.bf16 %v14608_v2, %v14608_v2 }
 0xfcd   :  { %v8723_v50 = vadd.f32 1.0, %v11069_v45  ;;  %v11071_v25 = vpop.eup %11070  ;;  %v15360_v45 = vld [vmem:[#allocation58_spill] sm:$0xff] }
 0xfce   :  { %11074 = vrcp.f32 %v8717_v56  ;;  %8780 = vmatmul.mubr.bf16.vlgmr.msra.gmra.mrb[176].mxu0 %v8746_v23  ;;  %8821 = vmatmul.mubr.bf16.vlgmr.msra.gmra.mrb[176].mxu1 %v8746_v23  ;;  %v15361_v23 = vld [vmem:[#allocation82_spill] sm:$0xff] }
 0xfcf   :  { %11076 = vrcp.f32 %v8723_v50  ;;  %8839 = vmatpush1.bf16.msra.mxu0 %v14246_v27  ;;  %8880 = vmatpush1.bf16.msra.mxu1 %v14249_v12  ;;  %v11073_v27 = vpop.eup %11072 }
 0xfd0   :  { %8840 = vmatprep.subr.bf16.mxu0 %v14252_v8  ;;  %8881 = vmatprep.subr.bf16.mxu1 %v14255_v20 }
 0xfd1   :  { %8870 = vmatprep.mubr.bf16.mxu0 %v14950_v31  ;;  %8911 = vmatprep.mubr.bf16.mxu1 %v14950_v31 }
 0xfd3   :  { %8841 = vmatpush1.bf16.msra.mxu0 %v14260_v43  ;;  %8882 = vmatpush1.bf16.msra.mxu1 %v14263_v36  ;;  %v8730_v43 = vadd.f32 1.0, %v11071_v25 }
 0xfd4   :  { %8842 = vmatprep.subr.bf16.mxu0 %v14266_v28  ;;  %8883 = vmatprep.subr.bf16.mxu1 %v14269_v59 }
 0xfd5   :  { %11078 = vrcp.f32 %v8730_v43 }
 0xfd7   :  { %8843 = vmatpush1.bf16.msra.mxu0 %v14272_v60  ;;  %8884 = vmatpush1.bf16.msra.mxu1 %v14275_v61 }
 0xfd8   :  { %v11075_v12 = vpop.eup %11074  ;;  %8844 = vmatprep.subr.bf16.mxu0 %v14278_v24  ;;  %8885 = vmatprep.subr.bf16.mxu1 %v14281_v34 }
 0xfd9   :  { %v11077_v8 = vpop.eup %11076  ;;  %v8734_v20 = vmul.f32 %v11075_v12, %v11073_v27 }
 0xfda   :  { %v8733_v36 = vmul.f32 %v11077_v8, %v14532_v15 }
 0xfdb   :  { %8845 = vmatpush1.bf16.msra.mxu0 %v14285_v58  ;;  %8886 = vmatpush1.bf16.msra.mxu1 %v14288_v47  ;;  %v11213_v47 = vld [vmem:[#allocation18 + $0x4] ss:$16 sps:$4 sm:$0xff]  }
 0xfdc   :  { %v8735_v28 = vadd.f32 %v8734_v20, %v8733_v36  ;;  %8846 = vmatprep.subr.bf16.mxu0 %v14291_v62  ;;  %8887 = vmatprep.subr.bf16.mxu1 %v15288_v46  ;;  %v11214_v62 = vld [vmem:[#allocation18 + $0xc] ss:$16 sps:$4 sm:$0xff]   ;;  %v11219_v46 = vld [vmem:[#allocation18 + $0x20] ss:$16 sps:$4 sm:$0xff]  }
 0xfde   :  { %11080 = vtanh.f32 %v8735_v28  ;;  %v14634_v59 = vsel %vm2658_vm7, %v8735_v28, %v14532_v15  ;;  %v11230_v15 = vld [vmem:[#allocation18 + $0x8c] ss:$16 sps:$4 sm:$0xff]  }
 0xfdf   :  { %8847 = vmatpush1.bf16.msra.mxu0 %v15289_v49  ;;  %8888 = vmatpush1.bf16.msra.mxu1 %v15290_v48  ;;  %v11079_v60 = vpop.eup %11078  ;;  %v11220_v49 = vld [vmem:[#allocation18 + $0x28] ss:$16 sps:$4 sm:$0xff]   ;;  %v11221_v48 = vld [vmem:[#allocation18 + $0x44] ss:$16 sps:$4 sm:$0xff]  }
 0xfe0   :  { %8848 = vmatprep.subr.bf16.mxu0 %v15291_v35  ;;  %8889 = vmatprep.subr.bf16.mxu1 %v15292_v54  ;;  %v11222_v35 = vld [vmem:[#allocation18 + $0x4c] ss:$16 sps:$4 sm:$0xff]   ;;  %v11223_v54 = vld [vmem:[#allocation18 + $0x40] ss:$16 sps:$4 sm:$0xff]  }
 0xfe3   :  { %8849 = vmatpush1.bf16.msra.mxu0 %v15293_v6  ;;  %8890 = vmatpush1.bf16.msra.mxu1 %v15294_v21  ;;  %v11224_v6 = vld [vmem:[#allocation18 + $0x48] ss:$16 sps:$4 sm:$0xff]   ;;  %v11225_v21 = vld [vmem:[#allocation18 + $0x64] ss:$16 sps:$4 sm:$0xff]  }
 0xfe4   :  { %8850 = vmatprep.subr.bf16.mxu0 %v15295_v51  ;;  %8891 = vmatprep.subr.bf16.mxu1 %v15296_v42  ;;  %v11226_v51 = vld [vmem:[#allocation18 + $0x6c] ss:$16 sps:$4 sm:$0xff]   ;;  %v11227_v42 = vld [vmem:[#allocation18 + $0x60] ss:$16 sps:$4 sm:$0xff]  }
 0xfe7   :  { %8851 = vmatpush1.bf16.msra.mxu0 %v14326_v32  ;;  %8892 = vmatpush1.bf16.msra.mxu1 %v15297_v37  ;;  %v11215_v32 = vld [vmem:[#allocation18] ss:$16 sps:$4 sm:$0xff]   ;;  %v11228_v37 = vld [vmem:[#allocation18 + $0x68] ss:$16 sps:$4 sm:$0xff]  }
 0xfe8   :  { %v11081_v61 = vpop.eup %11080  ;;  %8852 = vmatprep.subr.bf16.mxu0 %v15298_v0  ;;  %8893 = vmatprep.subr.bf16.mxu1 %v14335_v13  ;;  %v11216_v13 = vld [vmem:[#allocation18 + $0x8] ss:$16 sps:$4 sm:$0xff]   ;;  %v11229_v0 = vld [vmem:[#allocation18 + $0x84] ss:$16 sps:$4 sm:$0xff]  }
 0xfe9   :  { %v8737_v24 = vmul.f32 %v11081_v61, %v11079_v60 }
 0xfeb   :  { %8853 = vmatpush1.bf16.msra.mxu0 %v14338_v3  ;;  %8894 = vmatpush1.bf16.msra.mxu1 %v14341_v4  ;;  %v14653_v34 = vsel %vm2658_vm7, %v8737_v24, %v14551_v39  ;;  %v11217_v3 = vld [vmem:[#allocation18 + $0x24] ss:$16 sps:$4 sm:$0xff]   ;;  %v11218_v4 = vld [vmem:[#allocation18 + $0x2c] ss:$16 sps:$4 sm:$0xff]   ;;  %v11231_v39 = vld [vmem:[#allocation18 + $0x80] ss:$16 sps:$4 sm:$0xff]  }
 0xfec   :  { %v8837_v58 = vpack.c.bf16 %v14653_v34, %v14653_v34  ;;  %8981 = vmatprep.subr.bf16.mxu0 %v11213_v47  ;;  %9022 = vmatprep.subr.bf16.mxu1 %v11214_v62 }
 0xfee   :  { %8871 = vmatmul.mubr.bf16.vlgmr.msra.gmra.mrb[180].mxu0 %v8837_v58  ;;  %8912 = vmatmul.mubr.bf16.vlgmr.msra.gmra.mrb[180].mxu1 %v8837_v58 }
 0xfef   :  { %8982 = vmatpush1.bf16.msra.mxu0 %v11215_v32  ;;  %9023 = vmatpush1.bf16.msra.mxu1 %v11216_v13 }
 0xff0   :  { %8983 = vmatprep.subr.bf16.mxu0 %v11217_v3  ;;  %9024 = vmatprep.subr.bf16.mxu1 %v11218_v4 }
 0xff1   :  { %9013 = vmatprep.mubr.bf16.mxu0 %v14950_v31  ;;  %9054 = vmatprep.mubr.bf16.mxu1 %v14950_v31 }
 0xff3   :  { %8984 = vmatpush1.bf16.msra.mxu0 %v11219_v46  ;;  %9025 = vmatpush1.bf16.msra.mxu1 %v11220_v49 }
 0xff4   :  { %8985 = vmatprep.subr.bf16.mxu0 %v11221_v48  ;;  %9026 = vmatprep.subr.bf16.mxu1 %v11222_v35  ;;  %v15362_v35 = vld [vmem:[#allocation29_spill] sm:$0xff] }
 0xff7   :  { %8986 = vmatpush1.bf16.msra.mxu0 %v11223_v54  ;;  %9027 = vmatpush1.bf16.msra.mxu1 %v11224_v6  ;;  %v15363_v6 = vld [vmem:[#allocation97_spill] sm:$0xff] }
 0xff8   :  { %8987 = vmatprep.subr.bf16.mxu0 %v11225_v21  ;;  %9028 = vmatprep.subr.bf16.mxu1 %v11226_v51 }
 0xffb   :  { %8988 = vmatpush1.bf16.msra.mxu0 %v11227_v42  ;;  %9029 = vmatpush1.bf16.msra.mxu1 %v11228_v37  ;;  %v15364_v37 = vld [vmem:[#allocation98_spill] sm:$0xff] }
 0xffc   :  { %8989 = vmatprep.subr.bf16.mxu0 %v11229_v0  ;;  %9030 = vmatprep.subr.bf16.mxu1 %v11230_v15  ;;  %v15365_v15 = vld [vmem:[#allocation99_spill] sm:$0xff] }
 0xfff   :  { %8990 = vmatpush1.bf16.msra.mxu0 %v11231_v39  ;;  %9031 = vmatpush1.bf16.msra.mxu1 %v11232_v33 }
0x1000   :  { %8991 = vmatprep.subr.bf16.mxu0 %v11233_v38  ;;  %9032 = vmatprep.subr.bf16.mxu1 %v11234_v26 }
0x1003   :  { %8992 = vmatpush1.bf16.msra.mxu0 %v11235_v9  ;;  %9033 = vmatpush1.bf16.msra.mxu1 %v11236_v22 }
0x1004   :  { %8993 = vmatprep.subr.bf16.mxu0 %v11237_v55  ;;  %9034 = vmatprep.subr.bf16.mxu1 %v11238_v14 }
0x1007   :  { %8994 = vmatpush1.bf16.msra.mxu0 %v11239_v53  ;;  %9035 = vmatpush1.bf16.msra.mxu1 %v11240_v57 }
0x1008   :  { %8995 = vmatprep.subr.bf16.mxu0 %v11241_v5  ;;  %9036 = vmatprep.subr.bf16.mxu1 %v11242_v17 }
0x100b   :  { %8996 = vmatpush1.bf16.msra.mxu0 %v11243_v16  ;;  %9037 = vmatpush1.bf16.msra.mxu1 %v11244_v40 }
0x100c   :  { %9072 = vmatprep.subr.bf16.mxu0 %v11245_v10  ;;  %9113 = vmatprep.subr.bf16.mxu1 %v11246_v63 }
0x10a1   :  { %v8781_v11 = vpop.f32.mrb[176].mxu0  ;;  %v8822_v52 = vpop.f32.mrb[176].mxu1 }
0x10a2   :  { %v8829_v29 = vadd.f32 %v8781_v11, %v15358_v1  ;;  %v8831_v30 = vadd.f32 %v8822_v52, %v15359_v19  ;;  %v8783_v44 = vpop.f32.mrb[177].mxu0  ;;  %v8824_v41 = vpop.f32.mrb[177].mxu1  ;;  %v11247_v52 = vld [vmem:[#allocation19] ss:$16 sps:$4 sm:$0xff]   ;;  %v11248_v1 = vld [vmem:[#allocation19 + $0x8] ss:$16 sps:$4 sm:$0xff]  }
0x10a3   :  { %v8830_v56 = vadd.f32 %v8783_v44, %v15360_v45  ;;  %v8832_v50 = vadd.f32 %v8824_v41, %v15361_v23  ;;  %v8785_v25 = vpop.f32.mrb[178].mxu0  ;;  %v8826_v27 = vpop.f32.mrb[178].mxu1  ;;  %v11251_v19 = vld [vmem:[#allocation19 + $0x20] ss:$16 sps:$4 sm:$0xff]   ;;  %v11253_v44 = vld [vmem:[#allocation19 + $0x44] ss:$16 sps:$4 sm:$0xff]  }
0x10a4   :  { %v10094_v12 = vmul.f32 -1.442695, %v8829_v29  ;;  %v8786_v8 = vpop.f32.mrb[179].mxu0  ;;  %v8827_v20 = vpop.f32.mrb[179].mxu1  ;;  %v11249_v29 = vld [vmem:[#allocation19 + $0x24] ss:$16 sps:$4 sm:$0xff]  }
0x10a5   :  { %v10095_v43 = vmul.f32 -1.442695, %v8830_v56  ;;  %v10096_v36 = vmul.f32 -1.442695, %v8832_v50  ;;  %v11254_v41 = vld [vmem:[#allocation19 + $0x4c] ss:$16 sps:$4 sm:$0xff]  }
0x10a6   :  { %11082 = vpow2.f32 %v10094_v12  ;;  %v11255_v23 = vld [vmem:[#allocation19 + $0x40] ss:$16 sps:$4 sm:$0xff]   ;;  %v11256_v50 = vld [vmem:[#allocation19 + $0x48] ss:$16 sps:$4 sm:$0xff]   ;;  %v11257_v27 = vld [vmem:[#allocation19 + $0x64] ss:$16 sps:$4 sm:$0xff]  }
0x10a7   :  { %11084 = vpow2.f32 %v10095_v43  ;;  %v11258_v12 = vld [vmem:[#allocation19 + $0x6c] ss:$16 sps:$4 sm:$0xff]  }
0x10a8   :  { %11086 = vpow2.f32 %v10096_v36  ;;  %v11259_v36 = vld [vmem:[#allocation19 + $0x60] ss:$16 sps:$4 sm:$0xff]  }
0x10a9   :  { %11088 = vtanh.f32 %v8831_v30  ;;  %v11252_v30 = vld [vmem:[#allocation19 + $0x28] ss:$16 sps:$4 sm:$0xff]  }
0x10b0   :  { %v11083_v28 = vpop.eup %11082 }
0x10b1   :  { %v11085_v60 = vpop.eup %11084  ;;  %v8927_v61 = vadd.f32 1.0, %v11083_v28  ;;  %v11260_v28 = vld [vmem:[#allocation19 + $0x68] ss:$16 sps:$4 sm:$0xff]  }
0x10b2   :  { %v8933_v24 = vadd.f32 1.0, %v11085_v60  ;;  %v11087_v58 = vpop.eup %11086 }
0x10b3   :  { %11090 = vrcp.f32 %v8927_v61  ;;  %v11089_v47 = vpop.eup %11088  ;;  %v8940_v3 = vadd.f32 1.0, %v11087_v58  ;;  %v11261_v61 = vld [vmem:[#allocation19 + $0x84] ss:$16 sps:$4 sm:$0xff]  }
0x10b4   :  { %11092 = vrcp.f32 %v8933_v24  ;;  %v11262_v24 = vld [vmem:[#allocation19 + $0x8c] ss:$16 sps:$4 sm:$0xff]  }
0x10b5   :  { %11094 = vrcp.f32 %v8940_v3  ;;  %v11267_v3 = vld [vmem:[#allocation19 + $0xa0] ss:$16 sps:$4 sm:$0xff]  }
0x10bd   :  { %v11091_v62 = vpop.eup %11090 }
0x10be   :  { %v11093_v32 = vpop.eup %11092  ;;  %v8944_v13 = vmul.f32 %v11091_v62, %v11089_v47  ;;  %v11263_v47 = vld [vmem:[#allocation19 + $0x80] ss:$16 sps:$4 sm:$0xff]   ;;  %v11264_v62 = vld [vmem:[#allocation19 + $0x88] ss:$16 sps:$4 sm:$0xff]  }
0x10bf   :  { %v8943_v4 = vmul.f32 %v11093_v32, %v14603_v7  ;;  %v11095_v53 = vpop.eup %11094  ;;  %v11265_v32 = vld [vmem:[#allocation19 + $0xa4] ss:$16 sps:$4 sm:$0xff]  }
0x10c1   :  { %v8945_v46 = vadd.f32 %v8944_v13, %v8943_v4  ;;  %v8872_v49 = vpop.f32.mrb[180].mxu0  ;;  %v8913_v48 = vpop.f32.mrb[180].mxu1  ;;  %v11266_v13 = vld [vmem:[#allocation19 + $0xac] ss:$16 sps:$4 sm:$0xff]   ;;  %v11268_v4 = vld [vmem:[#allocation19 + $0xa8] ss:$16 sps:$4 sm:$0xff]  }
0x10c2   :  { %v8920_v54 = vadd.f32 %v8872_v49, %v15362_v35  ;;  %v8922_v21 = vadd.f32 %v8913_v48, %v15363_v6  ;;  %v8874_v51 = vpop.f32.mrb[181].mxu0  ;;  %v8915_v42 = vpop.f32.mrb[181].mxu1  ;;  %v11270_v49 = vld [vmem:[#allocation19 + $0xcc] ss:$16 sps:$4 sm:$0xff]   ;;  %v11271_v35 = vld [vmem:[#allocation19 + $0xc0] ss:$16 sps:$4 sm:$0xff]  }
0x10c3   :  { %11096 = vtanh.f32 %v8945_v46  ;;  %v8921_v0 = vadd.f32 %v8874_v51, %v15364_v37  ;;  %v8923_v39 = vadd.f32 %v8915_v42, %v15365_v15  ;;  %v8876_v33 = vpop.f32.mrb[182].mxu0  ;;  %v8917_v38 = vpop.f32.mrb[182].mxu1  ;;  %v14671_v26 = vsel %vm2037_vm6, %v8945_v46, %v14603_v7  ;;  %v11269_v46 = vld [vmem:[#allocation19 + $0xc4] ss:$16 sps:$4 sm:$0xff]   ;;  %v11275_v42 = vld [vmem:[#allocation19 + $0xe0] ss:$16 sps:$4 sm:$0xff]  }
0x10c4   :  { %v10097_v9 = vmul.f32 -1.442695, %v8920_v54  ;;  %v8877_v22 = vpop.f32.mrb[183].mxu0  ;;  %v8918_v55 = vpop.f32.mrb[183].mxu1  ;;  %v11273_v6 = vld [vmem:[#allocation19 + $0xe4] ss:$16 sps:$4 sm:$0xff]  }
0x10c5   :  { %v10098_v14 = vmul.f32 -1.442695, %v8921_v0  ;;  %v10099_v5 = vmul.f32 -1.442695, %v8923_v39  ;;  %v11276_v37 = vld [vmem:[#allocation19 + $0xe8] ss:$16 sps:$4 sm:$0xff]  }
0x10c6   :  { %11098 = vpow2.f32 %v10097_v9  ;;  %v15366_v38 = vld [vmem:[#allocation79_spill] sm:$0xff]  ;;  %v15367_v22 = vld [vmem:[#allocation30_spill] sm:$0xff] }
0x10c7   :  { %11100 = vpow2.f32 %v10098_v14 }
0x10c8   :  { %11102 = vpow2.f32 %v10099_v5 }
0x10c9   :  { %11104 = vtanh.f32 %v8922_v21  ;;  %v11274_v21 = vld [vmem:[#allocation19 + $0xec] ss:$16 sps:$4 sm:$0xff]  }
0x10cd   :  { %v11097_v57 = vpop.eup %11096 }
0x10ce   :  { %v8947_v17 = vmul.f32 %v11097_v57, %v11095_v53  ;;  %v15368_v57 = vld [vmem:[#allocation31_spill] sm:$0xff] }
0x10d0   :  { %v11099_v16 = vpop.eup %11098  ;;  %v14676_v40 = vsel %vm2037_vm6, %v8947_v17, %v14608_v2  ;;  %v11250_v2 = vld [vmem:[#allocation19 + $0x2c] ss:$16 sps:$4 sm:$0xff]  }
0x10d1   :  { %v11101_v10 = vpop.eup %11100  ;;  %v8951_v63 = vadd.f32 1.0, %v11099_v16  ;;  %v8980_v7 = vpack.c.bf16 %v14676_v40, %v14676_v40  ;;  %v15369_v17 = vld [vmem:[#allocation90_spill] sm:$0xff] }
0x10d2   :  { %v8957_v11 = vadd.f32 1.0, %v11101_v10  ;;  %v11103_v45 = vpop.eup %11102 }
0x10d3   :  { %11106 = vrcp.f32 %v8951_v63  ;;  %9014 = vmatmul.mubr.bf16.vlgmr.msra.gmra.mrb[184].mxu0 %v8980_v7  ;;  %9055 = vmatmul.mubr.bf16.vlgmr.msra.gmra.mrb[184].mxu1 %v8980_v7  ;;  %v11105_v56 = vpop.eup %11104  ;;  %v8964_v20 = vadd.f32 1.0, %v11103_v45 }
0x10d4   :  { %11108 = vrcp.f32 %v8957_v11  ;;  %9073 = vmatpush1.bf16.msra.mxu0 %v11247_v52  ;;  %9114 = vmatpush1.bf16.msra.mxu1 %v11248_v1 }
0x10d5   :  { %9074 = vmatprep.subr.bf16.mxu0 %v11249_v29  ;;  %9115 = vmatprep.subr.bf16.mxu1 %v11250_v2  ;;  %11110 = vrcp.f32 %v8964_v20 }
0x10d6   :  { %9104 = vmatprep.mubr.bf16.mxu0 %v14950_v31  ;;  %9145 = vmatprep.mubr.bf16.mxu1 %v14950_v31 }
0x10d8   :  { %9075 = vmatpush1.bf16.msra.mxu0 %v11251_v19  ;;  %9116 = vmatpush1.bf16.msra.mxu1 %v11252_v30 }
0x10d9   :  { %9076 = vmatprep.subr.bf16.mxu0 %v11253_v44  ;;  %9117 = vmatprep.subr.bf16.mxu1 %v11254_v41 }
0x10dc   :  { %9077 = vmatpush1.bf16.msra.mxu0 %v11255_v23  ;;  %9118 = vmatpush1.bf16.msra.mxu1 %v11256_v50 }
0x10dd   :  { %v11107_v25 = vpop.eup %11106  ;;  %9078 = vmatprep.subr.bf16.mxu0 %v11257_v27  ;;  %9119 = vmatprep.subr.bf16.mxu1 %v11258_v12 }
0x10de   :  { %v11109_v31 = vpop.eup %11108  ;;  %v8968_v8 = vmul.f32 %v11107_v25, %v11105_v56 }
0x10df   :  { %v8967_v43 = vmul.f32 %v11109_v31, %v14634_v59  ;;  %v11111_v48 = vpop.eup %11110 }
0x10e0   :  { %9079 = vmatpush1.bf16.msra.mxu0 %v11259_v36  ;;  %9120 = vmatpush1.bf16.msra.mxu1 %v11260_v28 }
0x10e1   :  { %v8969_v60 = vadd.f32 %v8968_v8, %v8967_v43  ;;  %9080 = vmatprep.subr.bf16.mxu0 %v11261_v61  ;;  %9121 = vmatprep.subr.bf16.mxu1 %v11262_v24  ;;  %v15370_v8 = vld [vmem:[#allocation32_spill] sm:$0xff]  ;;  %v15371_v43 = vld [vmem:[#allocation91_spill] sm:$0xff] }
0x10e2   :  { %v15372_v61 = vld [vmem:[#allocation96_spill] sm:$0xff] }
0x10e3   :  { %11112 = vtanh.f32 %v8969_v60  ;;  %v14686_v58 = vsel %vm2036_vm5, %v8969_v60, %v14634_v59  ;;  %v11272_v59 = vld [vmem:[#allocation19 + $0xc8] ss:$16 sps:$4 sm:$0xff]  }
0x10e4   :  { %9081 = vmatpush1.bf16.msra.mxu0 %v11263_v47  ;;  %9122 = vmatpush1.bf16.msra.mxu1 %v11264_v62  ;;  %v15373_v47 = vld [vmem:[#allocation84_spill] sm:$0xff] }
0x10e5   :  { %9082 = vmatprep.subr.bf16.mxu0 %v11265_v32  ;;  %9123 = vmatprep.subr.bf16.mxu1 %v11266_v13 }
0x10e8   :  { %9083 = vmatpush1.bf16.msra.mxu0 %v11267_v3  ;;  %9124 = vmatpush1.bf16.msra.mxu1 %v11268_v4 }
0x10e9   :  { %9084 = vmatprep.subr.bf16.mxu0 %v11269_v46  ;;  %9125 = vmatprep.subr.bf16.mxu1 %v11270_v49 }
0x10ec   :  { %9085 = vmatpush1.bf16.msra.mxu0 %v11271_v35  ;;  %9126 = vmatpush1.bf16.msra.mxu1 %v11272_v59 }
0x10ed   :  { %v11113_v54 = vpop.eup %11112  ;;  %9086 = vmatprep.subr.bf16.mxu0 %v11273_v6  ;;  %9127 = vmatprep.subr.bf16.mxu1 %v11274_v21 }
0x10ee   :  { %v8971_v51 = vmul.f32 %v11113_v54, %v11111_v48 }
0x10f0   :  { %9087 = vmatpush1.bf16.msra.mxu0 %v11275_v42  ;;  %9128 = vmatpush1.bf16.msra.mxu1 %v11276_v37  ;;  %v14691_v0 = vsel %vm2036_vm5, %v8971_v51, %v14653_v34 }
0x10f1   :  { %v9071_v15 = vpack.c.bf16 %v14691_v0, %v14691_v0 }
0x10f3   :  { %9105 = vmatmul.mubr.bf16.vlgmr.msra.gmra.mrb[188].mxu0 %v9071_v15  ;;  %9146 = vmatmul.mubr.bf16.vlgmr.msra.gmra.mrb[188].mxu1 %v9071_v15 }
0x11a6   :  { %v9015_v39 = vpop.f32.mrb[184].mxu0  ;;  %v9056_v33 = vpop.f32.mrb[184].mxu1 }
0x11a7   :  { %v9063_v9 = vadd.f32 %v9015_v39, %v15366_v38  ;;  %v9065_v55 = vadd.f32 %v9056_v33, %v15367_v22  ;;  %v9017_v14 = vpop.f32.mrb[185].mxu0  ;;  %v9058_v53 = vpop.f32.mrb[185].mxu1 }
0x11a8   :  { %v9064_v5 = vadd.f32 %v9017_v14, %v15368_v57  ;;  %v9066_v16 = vadd.f32 %v9058_v53, %v15369_v17  ;;  %v9019_v10 = vpop.f32.mrb[186].mxu0  ;;  %v9060_v34 = vpop.f32.mrb[186].mxu1 }
0x11a9   :  { %v10100_v63 = vmul.f32 -1.442695, %v9063_v9  ;;  %v9020_v7 = vpop.f32.mrb[187].mxu0  ;;  %v9061_v11 = vpop.f32.mrb[187].mxu1 }
0x11aa   :  { %v10101_v52 = vmul.f32 -1.442695, %v9064_v5  ;;  %v10102_v1 = vmul.f32 -1.442695, %v9066_v16 }
0x11ab   :  { %11114 = vpow2.f32 %v10100_v63 }
0x11ac   :  { %11116 = vpow2.f32 %v10101_v52 }
0x11ad   :  { %11118 = vpow2.f32 %v10102_v1 }
0x11ae   :  { %11120 = vtanh.f32 %v9065_v55 }
0x11b5   :  { %v11115_v29 = vpop.eup %11114 }
0x11b6   :  { %v11117_v2 = vpop.eup %11116  ;;  %v9161_v19 = vadd.f32 1.0, %v11115_v29 }
0x11b7   :  { %v9167_v30 = vadd.f32 1.0, %v11117_v2  ;;  %v11119_v44 = vpop.eup %11118 }
0x11b8   :  { %11122 = vrcp.f32 %v9161_v19  ;;  %v11121_v41 = vpop.eup %11120  ;;  %v9174_v50 = vadd.f32 1.0, %v11119_v44 }
0x11b9   :  { %11124 = vrcp.f32 %v9167_v30 }
0x11ba   :  { %11126 = vrcp.f32 %v9174_v50 }
0x11c2   :  { %v11123_v45 = vpop.eup %11122 }
0x11c3   :  { %v11125_v56 = vpop.eup %11124  ;;  %v9178_v23 = vmul.f32 %v11123_v45, %v11121_v41 }
0x11c4   :  { %v9177_v25 = vmul.f32 %v11125_v56, %v14671_v26  ;;  %v11127_v49 = vpop.eup %11126 }
0x11c6   :  { %v9179_v27 = vadd.f32 %v9178_v23, %v9177_v25  ;;  %v9106_v12 = vpop.f32.mrb[188].mxu0  ;;  %v9147_v31 = vpop.f32.mrb[188].mxu1 }
0x11c7   :  { %v9154_v20 = vadd.f32 %v9106_v12, %v15370_v8  ;;  %v9156_v36 = vadd.f32 %v9147_v31, %v15371_v43  ;;  %v9108_v28 = vpop.f32.mrb[189].mxu0  ;;  %v9149_v60 = vpop.f32.mrb[189].mxu1 }
0x11c8   :  { %11128 = vtanh.f32 %v9179_v27  ;;  %v9155_v24 = vadd.f32 %v9108_v28, %v15372_v61  ;;  %v9157_v62 = vadd.f32 %v9149_v60, %v15373_v47  ;;  %v9110_v32 = vpop.f32.mrb[190].mxu0  ;;  %v9151_v13 = vpop.f32.mrb[190].mxu1 }
0x11c9   :  { %v10103_v3 = vmul.f32 -1.442695, %v9154_v20  ;;  %v9111_v4 = vpop.f32.mrb[191].mxu0  ;;  %v9152_v26 = vpop.f32.mrb[191].mxu1 }
0x11ca   :  { %v10104_v46 = vmul.f32 -1.442695, %v9155_v24  ;;  %v10105_v35 = vmul.f32 -1.442695, %v9157_v62 }
0x11cb   :  { %11130 = vpow2.f32 %v10103_v3 }
0x11cc   :  { %11132 = vpow2.f32 %v10104_v46 }
0x11cd   :  { %11134 = vpow2.f32 %v10105_v35 }
0x11ce   :  { %11136 = vtanh.f32 %v9156_v36 }
0x11d2   :  { %v11129_v48 = vpop.eup %11128 }
0x11d3   :  { %v9181_v59 = vmul.f32 %v11129_v48, %v11127_v49 }
0x11d5   :  { %v11131_v54 = vpop.eup %11130  ;;  %v9206_v6 = vsel %vm1415_vm3, %v9181_v59, %v14676_v40 }
0x11d6   :  { %v11133_v21 = vpop.eup %11132  ;;  %v9185_v51 = vadd.f32 1.0, %v11131_v54  ;;  %9208 = vst [vmem:[#allocation21] sm:$0xff] %v9206_v6 }
0x11d7   :  { %v9191_v42 = vadd.f32 1.0, %v11133_v21  ;;  %v11135_v37 = vpop.eup %11134 }
0x11d8   :  { %11138 = vrcp.f32 %v9185_v51  ;;  %v11137_v15 = vpop.eup %11136  ;;  %v9198_v9 = vadd.f32 1.0, %v11135_v37 }
0x11d9   :  { %11140 = vrcp.f32 %v9191_v42 }
0x11da   :  { %11142 = vrcp.f32 %v9198_v9 }
0x11e2   :  { %v11139_v39 = vpop.eup %11138 }
0x11e3   :  { %v11141_v33 = vpop.eup %11140  ;;  %v9202_v38 = vmul.f32 %v11139_v39, %v11137_v15 }
0x11e4   :  { %v9201_v22 = vmul.f32 %v11141_v33, %v14686_v58  ;;  %v11143_v40 = vpop.eup %11142 }
0x11e6   :  { %v9203_v55 = vadd.f32 %v9202_v38, %v9201_v22 }
0x11e8   :  { %11144 = vtanh.f32 %v9203_v55 }
0x11f2   :  { %v11145_v14 = vpop.eup %11144 }
0x11f3   :  { %v9205_v53 = vmul.f32 %v11145_v14, %v11143_v40 }
0x11f5   :  { %v9207_v57 = vsel %vm1414_vm1, %v9205_v53, %v14691_v0 }
0x11f6   :  { %9209 = vst [vmem:[#allocation21 + $0x8] sm:$0xff] %v9207_v57 }
0x11f7   :  { %11508 = shalt.err (!%p11505_p0)
}
0x11f8   :  { %s11509_s26 = scalar_lea.hbm %s14733_s10, 256 }
0x11f9   :  { %p11510_p1 = scmp.ne.s32.totalorder %s14733_s10, %s11509_s26  ;;  %p11513_p2 = scmp.lt.u32.totalorder %s11509_s26, %s14733_s10 }
0x11fb   :  { %p11515_p3 = pnand %p11513_p2, %p11510_p1 }
0x11fd   :  { %11518 = shalt.err (!%p11515_p3)
}
0x11fe   :  { %9219 = dma.vmem_to_hbm [thread:$0]  %s9217_s16, 256, %s14733_s10, [#allocation6]  }
0x11ff   :  { %11531 = dma.done.wait [#allocation6], 256  }
0x1200   :  { %11532 = vsyncadd [#allocation6], 4294967040 }
0x1201   :  { %9223 = vsyncpa [#allocation5], 1 }
0x1202   :  { %9224 = vsyncpa [#allocation8], 1 }
0x1203   :  { %9225 = vsyncpa [#allocation11], 1 }
0x1204   :  { %9226 = vsyncpa [#allocation14], 1 }
0x1205   :  { %9227 = vsyncpa [#allocation17], 1 }
0x1206   :  { %9228 = vsyncpa [#allocation20], 1 }
0x1207   :  { %9229 = vsyncpa [#allocation6], 1 }

</bundles_post_ra>
